<compile_context>
chip_gen: v7x
topology: tpu7x:2x2x1
jax: 0.10.0
libtpu: 0.0.40
codegen_flags: <defaults>
</compile_context>

<pallas_src>
import functools

import numpy as np
import jax
import jax.numpy as jnp
from jax.experimental import pallas as pl
from jax.experimental.pallas import tpu as pltpu

LANE = 128           # pad all matmul output dims to a full lane group
N_CLASS = 21         # 20 foreground classes + background (VOC-style)
N_ANCHOR = 9
FEAT_CH = 32
MID_CH = 32
POOL = 7
HEAD_HIDDEN = 64
ROIS_PER_IMAGE = 16
FEAT_STRIDE = 1
EXT_K = 64           # im2col K (3*3*4 = 36) zero-padded for alignment
BBOX_CLIP = float(np.log(1000.0 / 16.0))
VMEM_LIMIT = 48 * 1024 * 1024   # explicit scoped-VMEM cap (< v7x's 64 MiB physical)


def _round_up(x, m):
    return (x + m - 1) // m * m


# -----------------------------------------------------------------------------
# Pallas kernel 1: fused matmul + bias (+ optional ReLU), M-tiled grid.
# x:(M,K) bf16, w:(K,Np) bf16 (Np multiple of 128), b:(1,Np) f32 -> (M,Np)
# -----------------------------------------------------------------------------
def _mm_bias_kernel(x_ref, w_ref, b_ref, o_ref, *, relu):
    acc = jnp.dot(x_ref[...], w_ref[...], preferred_element_type=jnp.float32)
    acc = acc + b_ref[...]
    if relu:
        acc = jnp.maximum(acc, 0.0)
    o_ref[...] = acc.astype(o_ref.dtype)


def matmul_bias(x, w_packed, b_packed, relu=False, out_dtype=jnp.float32, tm=512):
    M, K = x.shape
    Kp, NP = w_packed.shape
    assert K == Kp, (x.shape, w_packed.shape)
    TM = min(tm, _round_up(M, 8))
    Mp = _round_up(M, TM)
    if Mp != M:
        x = jnp.pad(x, ((0, Mp - M), (0, 0)))
    out = pl.pallas_call(
        functools.partial(_mm_bias_kernel, relu=relu),
        out_shape=jax.ShapeDtypeStruct((Mp, NP), out_dtype),
        grid=(Mp // TM,),
        in_specs=[
            pl.BlockSpec((TM, K), lambda i: (i, 0)),
            pl.BlockSpec((K, NP), lambda i: (0, 0)),
            pl.BlockSpec((1, NP), lambda i: (0, 0)),
        ],
        out_specs=pl.BlockSpec((TM, NP), lambda i: (i, 0)),
        compiler_params=pltpu.CompilerParams(
            dimension_semantics=("parallel",),
            vmem_limit_bytes=VMEM_LIMIT),
    )(x.astype(jnp.bfloat16), w_packed, b_packed)
    return out[:M] if Mp != M else out


# -----------------------------------------------------------------------------
# Pallas kernel 2: fused 3x3 conv (+bias+ReLU) + 1x1 loc/score conv, H-tiled.
# The padded feature map is flattened over ((TH+3), W+2); every spatial shift
# (dy,dx) is a contiguous static row slice, accumulated with 9 MXU dots.  The
# ReLU'd accumulator is cast to bf16 in VMEM and pushed through the fused 1x1
# weights, so the `mid` tensor never reaches HBM.  Wrap columns compute finite
# garbage and are dropped only when the tiny loc/score slab is extracted.
# -----------------------------------------------------------------------------
def _rpn_conv_kernel(x_ref, w3_ref, b3_ref, w1_ref, b1_ref, o_ref, *, Wp, M):
    acc = jnp.zeros((M, o_ref.shape[-1]), jnp.float32)
    for dy in range(3):
        for dx in range(3):
            off = dy * Wp + dx
            acc = acc + jnp.dot(x_ref[0, 0, off:off + M, :], w3_ref[dy * 3 + dx],
                                preferred_element_type=jnp.float32)
    mid = jnp.maximum(acc + b3_ref[...], 0.0).astype(jnp.bfloat16)
    out = jnp.dot(mid, w1_ref[...], preferred_element_type=jnp.float32) + b1_ref[...]
    o_ref[0, 0] = out


def rpn_conv(feat, w3, b3, w1, b1, row_target=512):
    """feat:(N,H,W,128) bf16 -> (N,H,W+2,128) f32 (fused 3x3+ReLU+1x1)."""
    N, H, W, C = feat.shape
    Wp = W + 2
    # H tile: largest divisor of H whose output tile is <= ~row_target rows.
    TH = 1
    for d in range(H, 0, -1):
        if H % d == 0 and d * Wp <= row_target:
            TH = d
            break
    nT = H // TH
    Mrow = TH * Wp
    # pad H by (1,2) / W by (1,1) so every shifted flat slice stays in bounds,
    # then replicate the 3-row halo per tile so Blocked BlockSpecs can tile it.
    # TODO(synk): a manual-DMA (pl.ANY + make_async_copy) halo would avoid the
    # small halo duplication in HBM for very large feature maps.
    x_pad = jnp.pad(feat, ((0, 0), (1, 2), (1, 1), (0, 0))).reshape(N, (H + 3) * Wp, C)
    x_tiles = jnp.stack(
        [x_pad[:, t * TH * Wp: t * TH * Wp + (TH + 3) * Wp, :] for t in range(nT)],
        axis=1)                                                   # (N,nT,(TH+3)*Wp,C)

    out = pl.pallas_call(
        functools.partial(_rpn_conv_kernel, Wp=Wp, M=Mrow),
        out_shape=jax.ShapeDtypeStruct((N, nT, Mrow, LANE), jnp.float32),
        grid=(N, nT),
        in_specs=[
            pl.BlockSpec((1, 1, (TH + 3) * Wp, C), lambda n, t: (n, t, 0, 0)),
            pl.BlockSpec((9, C, LANE), lambda n, t: (0, 0, 0)),
            pl.BlockSpec((1, LANE), lambda n, t: (0, 0)),
            pl.BlockSpec((LANE, LANE), lambda n, t: (0, 0)),
            pl.BlockSpec((1, LANE), lambda n, t: (0, 0)),
        ],
        out_specs=pl.BlockSpec((1, 1, Mrow, LANE), lambda n, t: (n, t, 0, 0)),
        # TODO(synk): on v7x use pltpu.CORE_PARALLEL on one axis to shard the
        # grid across the 2 TensorCores; plain "parallel" is kept for
        # portability across v5e/v6e.
        compiler_params=pltpu.CompilerParams(
            dimension_semantics=("parallel", "parallel"),
            vmem_limit_bytes=VMEM_LIMIT),
    )(x_tiles, w3, b3, w1, b1)
    return out.reshape(N, H, Wp, LANE)


# -----------------------------------------------------------------------------
# Pallas kernel 3: fused RoI head  (fc -> ReLU -> [cls_loc | score]).
# The (R,128) hidden activation stays in VMEM between the two MXU dots.
# -----------------------------------------------------------------------------
def _head_kernel(p_ref, fcw_ref, fcb_ref, hw_ref, hb_ref, o_ref):
    h = jnp.dot(p_ref[...], fcw_ref[...], preferred_element_type=jnp.float32)
    h = jnp.maximum(h + fcb_ref[...], 0.0).astype(jnp.bfloat16)
    o_ref[...] = (jnp.dot(h, hw_ref[...], preferred_element_type=jnp.float32)
                  + hb_ref[...])


def head_forward(pooled, fc_w, fc_b, head_w, head_b):
    R, K = pooled.shape
    Rp = _round_up(R, 8)
    if Rp != R:
        pooled = jnp.pad(pooled, ((0, Rp - R), (0, 0)))
    out = pl.pallas_call(
        _head_kernel,
        out_shape=jax.ShapeDtypeStruct((Rp, LANE), jnp.float32),
        grid=(1,),
        in_specs=[
            pl.BlockSpec((Rp, K), lambda i: (0, 0)),
            pl.BlockSpec((K, LANE), lambda i: (0, 0)),
            pl.BlockSpec((1, LANE), lambda i: (0, 0)),
            pl.BlockSpec((LANE, LANE), lambda i: (0, 0)),
            pl.BlockSpec((1, LANE), lambda i: (0, 0)),
        ],
        out_specs=pl.BlockSpec((Rp, LANE), lambda i: (0, 0)),
        compiler_params=pltpu.CompilerParams(
            dimension_semantics=("arbitrary",),
            vmem_limit_bytes=VMEM_LIMIT),
    )(pooled.astype(jnp.bfloat16), fc_w, fc_b, head_w, head_b)
    return out[:R]


# -----------------------------------------------------------------------------
# Anchor / proposal utilities (pure index math, JAX glue)
# -----------------------------------------------------------------------------
def generate_anchor_base(base_size=4.0, ratios=(0.5, 1.0, 2.0), scales=(1.0, 2.0, 4.0)):
    py = px = base_size / 2.0
    rows = []
    for r in ratios:
        for s in scales:
            h = base_size * s * np.sqrt(r)
            w = base_size * s * np.sqrt(1.0 / r)
            rows.append([py - h / 2.0, px - w / 2.0, py + h / 2.0, px + w / 2.0])
    return jnp.asarray(rows, jnp.float32)                         # (A, 4) y1x1y2x2


def enumerate_anchors(anchor_base, feat_stride, H, W):
    sy = jnp.arange(H, dtype=jnp.float32) * feat_stride
    sx = jnp.arange(W, dtype=jnp.float32) * feat_stride
    yy, xx = jnp.meshgrid(sy, sx, indexing="ij")
    shifts = jnp.stack([yy, xx, yy, xx], axis=-1).reshape(-1, 4)  # (H*W, 4)
    anchors = shifts[:, None, :] + anchor_base[None, :, :]        # (H*W, A, 4)
    return anchors.reshape(-1, 4)


def loc2bbox(anchors, locs):
    ah = anchors[:, 2] - anchors[:, 0]
    aw = anchors[:, 3] - anchors[:, 1]
    acy = anchors[:, 0] + 0.5 * ah
    acx = anchors[:, 1] + 0.5 * aw
    dy, dx = locs[:, 0], locs[:, 1]
    dh = jnp.minimum(locs[:, 2], BBOX_CLIP)        # clamp like torchvision
    dw = jnp.minimum(locs[:, 3], BBOX_CLIP)
    cy = dy * ah + acy
    cx = dx * aw + acx
    h = jnp.exp(dh) * ah
    w = jnp.exp(dw) * aw
    return jnp.stack([cy - 0.5 * h, cx - 0.5 * w, cy + 0.5 * h, cx + 0.5 * w], axis=1)


def roi_pool(feat_nhwc, rois, roi_indices, out_size=7):
    """Simplified RoI pooling: nearest-neighbor sampling at bin centers."""
    # TODO(synk): max-pool / RoIAlign and a Pallas scalar-prefetch DMA gather
    # (fused with the fc matmul) would be needed for exact parity; the gather
    # stays in JAX here (R=32 rows, negligible).
    H, W = feat_nhwc.shape[1], feat_nhwc.shape[2]
    R = rois.shape[0]
    y1, x1, y2, x2 = rois[:, 0], rois[:, 1], rois[:, 2], rois[:, 3]
    bins = (jnp.arange(out_size, dtype=jnp.float32) + 0.5) / out_size
    yy = y1[:, None] + bins[None, :] * (y2 - y1)[:, None]
    xx = x1[:, None] + bins[None, :] * (x2 - x1)[:, None]
    yi = jnp.clip(jnp.floor(yy).astype(jnp.int32), 0, H - 1)
    xi = jnp.clip(jnp.floor(xx).astype(jnp.int32), 0, W - 1)
    pooled = feat_nhwc[roi_indices[:, None, None], yi[:, :, None], xi[:, None, :]]
    return pooled.reshape(R, -1)                                   # (R, P*P*128)


# -----------------------------------------------------------------------------
# Parameters (PyTorch-style raw layout) + one-time packing into kernel layout.
# -----------------------------------------------------------------------------
def init_params(key):
    ks = jax.random.split(key, 8)
    s = 0.05
    return {
        "ext_w": jax.random.normal(ks[0], (FEAT_CH, 4, 3, 3), jnp.float32) * s,
        "ext_b": jnp.zeros((FEAT_CH,), jnp.float32),
        "rpn_w": jax.random.normal(ks[1], (MID_CH, FEAT_CH, 3, 3), jnp.float32) * s,
        "rpn_b": jnp.zeros((MID_CH,), jnp.float32),
        "rpn_loc_w": jax.random.normal(ks[2], (N_ANCHOR * 4, MID_CH, 1, 1), jnp.float32) * 0.01,
        "rpn_loc_b": jnp.zeros((N_ANCHOR * 4,), jnp.float32),
        "rpn_score_w": jax.random.normal(ks[3], (N_ANCHOR * 2, MID_CH, 1, 1), jnp.float32) * 0.01,
        "rpn_score_b": jnp.zeros((N_ANCHOR * 2,), jnp.float32),
        "fc_w": jax.random.normal(ks[4], (POOL * POOL * FEAT_CH, HEAD_HIDDEN), jnp.float32) * s,
        "fc_b": jnp.zeros((HEAD_HIDDEN,), jnp.float32),
        "cls_loc_w": jax.random.normal(ks[5], (HEAD_HIDDEN, N_CLASS * 4), jnp.float32) * 0.01,
        "cls_loc_b": jnp.zeros((N_CLASS * 4,), jnp.float32),
        "score_w": jax.random.normal(ks[6], (HEAD_HIDDEN, N_CLASS), jnp.float32) * 0.01,
        "score_b": jnp.zeros((N_CLASS,), jnp.float32),
    }


def pack_params(p):
    """One-time repack: bf16 MXU weights, f32 biases, 128-lane-dense outputs."""
    packed = {}

    def pad_bias(b):
        return jnp.pad(b, (0, LANE - b.shape[0])).reshape(1, LANE).astype(jnp.float32)

    # extractor conv as im2col matmul: rows ordered ((dy*3+dx)*Cin + cin), K->64
    w = jnp.transpose(p["ext_w"], (2, 3, 1, 0)).reshape(9 * 4, FEAT_CH)   # (36, 32)
    w = jnp.pad(w, ((0, EXT_K - 36), (0, LANE - FEAT_CH)))
    packed["ext_w"] = w.astype(jnp.bfloat16)
    packed["ext_b"] = pad_bias(p["ext_b"])

    # rpn 3x3 conv: (9, Cin->128, Cout->128); extra in-channels see zeros in feat
    wm = jnp.transpose(p["rpn_w"], (2, 3, 1, 0)).reshape(9, FEAT_CH, MID_CH)
    wm = jnp.pad(wm, ((0, 0), (0, LANE - FEAT_CH), (0, LANE - MID_CH)))
    packed["rpn_w"] = wm.astype(jnp.bfloat16)
    packed["rpn_b"] = pad_bias(p["rpn_b"])

    # fused RPN 1x1: loc(36) + score(18) -> 54 cols, K padded 32->128, N -> 128
    w_loc = p["rpn_loc_w"].reshape(N_ANCHOR * 4, MID_CH)
    w_sc = p["rpn_score_w"].reshape(N_ANCHOR * 2, MID_CH)
    w = jnp.concatenate([w_loc, w_sc], axis=0).T                   # (32, 54)
    w = jnp.pad(w, ((0, LANE - MID_CH), (0, LANE - w.shape[1])))
    packed["rpn_out_w"] = w.astype(jnp.bfloat16)
    packed["rpn_out_b"] = pad_bias(jnp.concatenate([p["rpn_loc_b"], p["rpn_score_b"]]))

    # fc: scatter (49*32, 64) rows to the 128-wide pooled layout -> (49*128, 128)
    w = p["fc_w"].reshape(POOL * POOL, FEAT_CH, HEAD_HIDDEN)
    w = jnp.pad(w, ((0, 0), (0, LANE - FEAT_CH), (0, 0))).reshape(POOL * POOL * LANE, HEAD_HIDDEN)
    w = jnp.pad(w, ((0, 0), (0, LANE - HEAD_HIDDEN)))
    packed["fc_w"] = w.astype(jnp.bfloat16)
    packed["fc_b"] = pad_bias(p["fc_b"])

    # fused head: cls_loc(84) + score(21) -> 105 cols, K padded 64->128, N -> 128
    w = jnp.concatenate([p["cls_loc_w"], p["score_w"]], axis=1)    # (64, 105)
    w = jnp.pad(w, ((0, LANE - HEAD_HIDDEN), (0, LANE - w.shape[1])))
    packed["head_w"] = w.astype(jnp.bfloat16)
    packed["head_b"] = pad_bias(jnp.concatenate([p["cls_loc_b"], p["score_b"]]))
    return packed


# -----------------------------------------------------------------------------
# FasterRCNN forward
# -----------------------------------------------------------------------------
def faster_rcnn_forward(packed, x_nchw, scale=1.0):
    N, C, H_img, W_img = x_nchw.shape
    x_nhwc = jnp.transpose(x_nchw, (0, 2, 3, 1)).astype(jnp.float32)

    # ---- 1. feature extractor: JAX im2col (K=36, padded 64) + fused matmul ----
    xp = jnp.pad(x_nhwc, ((0, 0), (1, 1), (1, 1), (0, 0)))
    cols = jnp.concatenate(
        [xp[:, dy:dy + H_img, dx:dx + W_img, :] for dy in range(3) for dx in range(3)],
        axis=-1)                                                    # (N,H,W,36)
    cols = jnp.pad(cols, ((0, 0), (0, 0), (0, 0), (0, EXT_K - 36))).astype(jnp.bfloat16)
    feat = matmul_bias(cols.reshape(N * H_img * W_img, EXT_K),
                       packed["ext_w"], packed["ext_b"],
                       relu=True, out_dtype=jnp.bfloat16)           # (N*H*W, 128) bf16
    feat = feat.reshape(N, H_img, W_img, LANE)                      # channels 32..127 are 0
    Hf, Wf = H_img, W_img

    # ---- 2. region proposal network: single fused 3x3+ReLU+1x1 kernel --------
    rpn_out = rpn_conv(feat, packed["rpn_w"], packed["rpn_b"],
                       packed["rpn_out_w"], packed["rpn_out_b"])    # (N,H,W+2,128) f32
    rpn_valid = rpn_out[:, :, :Wf, :N_ANCHOR * 6]                   # drop wrap cols + pad lanes
    rpn_loc = rpn_valid[..., :N_ANCHOR * 4].reshape(N, Hf * Wf * N_ANCHOR, 4)
    rpn_score = rpn_valid[..., N_ANCHOR * 4:].reshape(N, Hf * Wf * N_ANCHOR, 2)
    fg_prob = jax.nn.softmax(rpn_score, axis=-1)[..., 1]            # (N, HWA)

    anchor = enumerate_anchors(generate_anchor_base(), FEAT_STRIDE, Hf, Wf)

    # proposal layer: decode, clip, take top-K by fg score per image.
    # TODO(synk): NMS has no clean Pallas equivalent; top-K selection is used instead.
    def propose_one(locs, fg):
        boxes = loc2bbox(anchor, locs)
        boxes = jnp.stack([
            jnp.clip(boxes[:, 0], 0.0, float(H_img)),
            jnp.clip(boxes[:, 1], 0.0, float(W_img)),
            jnp.clip(boxes[:, 2], 0.0, float(H_img)),
            jnp.clip(boxes[:, 3], 0.0, float(W_img)),
        ], axis=1)
        _, keep = jax.lax.top_k(fg, ROIS_PER_IMAGE)
        return boxes[keep]

    rois = jax.vmap(propose_one)(rpn_loc, fg_prob).reshape(N * ROIS_PER_IMAGE, 4)
    roi_indices = jnp.repeat(jnp.arange(N, dtype=jnp.int32), ROIS_PER_IMAGE)

    # ---- 3. localization & classification head: gather + fused fc/head -------
    pooled = roi_pool(feat, rois * (1.0 / FEAT_STRIDE), roi_indices, POOL)  # (R, 49*128) bf16
    head_out = head_forward(pooled, packed["fc_w"], packed["fc_b"],
                            packed["head_w"], packed["head_b"])             # (R, 128) f32
    roi_cls_locs = head_out[:, :N_CLASS * 4]
    roi_scores = head_out[:, N_CLASS * 4:N_CLASS * 4 + N_CLASS]

    return roi_cls_locs, roi_scores, rois, roi_indices


if __name__ == "__main__":
    key = jax.random.PRNGKey(0)
    x = jax.random.normal(key, (2, 4, 16, 16), jnp.float32)       # (N, C, H, W)
    params = init_params(jax.random.PRNGKey(42))
    packed = pack_params(params)                                   # pre-pack once

    fwd = jax.jit(faster_rcnn_forward)
    roi_cls_locs, roi_scores, rois, roi_indices = fwd(packed, x)
    jax.block_until_ready((roi_cls_locs, roi_scores, rois, roi_indices))

    assert roi_cls_locs.shape == (2 * ROIS_PER_IMAGE, N_CLASS * 4)
    assert roi_scores.shape == (2 * ROIS_PER_IMAGE, N_CLASS)
    assert rois.shape == (2 * ROIS_PER_IMAGE, 4)
    assert roi_indices.shape == (2 * ROIS_PER_IMAGE,)
    assert bool(jnp.all(jnp.isfinite(roi_cls_locs))) and bool(jnp.all(jnp.isfinite(roi_scores)))
    print("KERNEL_OK")
</pallas_src>

<mosaic_0001>
module attributes {stable_mosaic.version = 11 : i64} {
  func.func @_mm_bias_kernel(%arg0: i32, %arg1: memref<512x64xbf16, #tpu.memory_space<vmem>>, %arg2: memref<64x128xbf16, #tpu.memory_space<vmem>>, %arg3: memref<1x128xf32, #tpu.memory_space<vmem>>, %arg4: memref<512x128xbf16, #tpu.memory_space<vmem>>) attributes {dimension_semantics = [#tpu.dimension_semantics<parallel>], iteration_bounds = array<i64: 1>, scalar_prefetch = 0 : i64, scratch_operands = 0 : i64, tpu.core_type = #tpu.core_type<tc>, window_params = [{transform_indices = @transform_0, window_bounds = array<i64: 512, 64>}, {pipeline_mode = #tpu.pipeline_mode<synchronous>, transform_indices = @transform_1, window_bounds = array<i64: 64, 128>}, {pipeline_mode = #tpu.pipeline_mode<synchronous>, transform_indices = @transform_2, window_bounds = array<i64: 1, 128>}, {transform_indices = @transform_3, window_bounds = array<i64: 512, 128>}]} {
    %c0 = arith.constant 0 : index
    %c0_0 = arith.constant 0 : index
    %0 = vector.load %arg1[%c0, %c0_0] : memref<512x64xbf16, #tpu.memory_space<vmem>>, vector<512x64xbf16>
    %c0_1 = arith.constant 0 : index
    %c0_2 = arith.constant 0 : index
    %1 = vector.load %arg2[%c0_1, %c0_2] : memref<64x128xbf16, #tpu.memory_space<vmem>>, vector<64x128xbf16>
    %cst = arith.constant dense<0.000000e+00> : vector<512x128xf32>
    %2 = tpu.matmul %0, %1, %cst {dimension_numbers = #tpu.dot_dimension_numbers<[1], [0], [0], [1], [0, 0, 1, 1], [], []>} : vector<512x64xbf16>, vector<64x128xbf16>, vector<512x128xf32> -> vector<512x128xf32>
    %c0_3 = arith.constant 0 : index
    %c0_4 = arith.constant 0 : index
    %3 = vector.load %arg3[%c0_3, %c0_4] : memref<1x128xf32, #tpu.memory_space<vmem>>, vector<1x128xf32>
    %4 = vector.broadcast %3 : vector<1x128xf32> to vector<512x128xf32>
    %5 = arith.addf %2, %4 : vector<512x128xf32>
    %cst_5 = arith.constant 0.000000e+00 : f32
    %6 = vector.broadcast %cst_5 : f32 to vector<512x128xf32>
    %7 = arith.maximumf %5, %6 : vector<512x128xf32>
    %8 = arith.truncf %7 : vector<512x128xf32> to vector<512x128xbf16>
    %c0_6 = arith.constant 0 : index
    %c0_7 = arith.constant 0 : index
    %9 = vector.load %arg4[%c0_6, %c0_7] : memref<512x128xbf16, #tpu.memory_space<vmem>>, vector<512x128xbf16>
    tpu.vector_store %arg4[%c0_6, %c0_7], %8 {strides = array<i32>} : memref<512x128xbf16, #tpu.memory_space<vmem>>, vector<512x128xbf16>,
    return
  }
  func.func @transform_0(%arg0: i32) -> (i32, i32) {
    %c0_i32 = arith.constant 0 : i32
    %c0_i32_0 = arith.constant 0 : i32
    return %arg0, %c0_i32 : i32, i32
  }
  func.func @transform_1(%arg0: i32) -> (i32, i32) {
    %c0_i32 = arith.constant 0 : i32
    %c0_i32_0 = arith.constant 0 : i32
    %c0_i32_1 = arith.constant 0 : i32
    return %c0_i32, %c0_i32_0 : i32, i32
  }
  func.func @transform_2(%arg0: i32) -> (i32, i32) {
    %c0_i32 = arith.constant 0 : i32
    %c0_i32_0 = arith.constant 0 : i32
    %c0_i32_1 = arith.constant 0 : i32
    return %c0_i32, %c0_i32_0 : i32, i32
  }
  func.func @transform_3(%arg0: i32) -> (i32, i32) {
    %c0_i32 = arith.constant 0 : i32
    %c0_i32_0 = arith.constant 0 : i32
    return %arg0, %c0_i32 : i32, i32
  }
}

module attributes {stable_mosaic.version = 11 : i64} {
  func.func @_rpn_conv_kernel(%arg0: i32, %arg1: i32, %arg2: memref<1x1x342x128xbf16, #tpu.memory_space<vmem>>, %arg3: memref<9x128x128xbf16, #tpu.memory_space<vmem>>, %arg4: memref<1x128xf32, #tpu.memory_space<vmem>>, %arg5: memref<128x128xbf16, #tpu.memory_space<vmem>>, %arg6: memref<1x128xf32, #tpu.memory_space<vmem>>, %arg7: memref<1x1x288x128xf32, #tpu.memory_space<vmem>>) attributes {dimension_semantics = [#tpu.dimension_semantics<parallel>, #tpu.dimension_semantics<parallel>], iteration_bounds = array<i64: 2, 1>, scalar_prefetch = 0 : i64, scratch_operands = 0 : i64, tpu.core_type = #tpu.core_type<tc>, window_params = [{transform_indices = @transform_0, window_bounds = array<i64: 1, 1, 342, 128>}, {pipeline_mode = #tpu.pipeline_mode<synchronous>, transform_indices = @transform_1, window_bounds = array<i64: 9, 128, 128>}, {pipeline_mode = #tpu.pipeline_mode<synchronous>, transform_indices = @transform_2, window_bounds = array<i64: 1, 128>}, {pipeline_mode = #tpu.pipeline_mode<synchronous>, transform_indices = @transform_3, window_bounds = array<i64: 128, 128>}, {pipeline_mode = #tpu.pipeline_mode<synchronous>, transform_indices = @transform_4, window_bounds = array<i64: 1, 128>}, {transform_indices = @transform_5, window_bounds = array<i64: 1, 1, 288, 128>}]} {
    %cst = arith.constant 0.000000e+00 : f32
    %0 = vector.broadcast %cst : f32 to vector<288x128xf32>
    %c0 = arith.constant 0 : index
    %c0_0 = arith.constant 0 : index
    %c0_1 = arith.constant 0 : index
    %c0_2 = arith.constant 0 : index
    %1 = vector.load %arg2[%c0, %c0_0, %c0_1, %c0_2] : memref<1x1x342x128xbf16, #tpu.memory_space<vmem>>, vector<1x1x288x128xbf16>
    %2 = vector.shape_cast %1 : vector<1x1x288x128xbf16> to vector<288x128xbf16>
    %c0_3 = arith.constant 0 : index
    %c0_4 = arith.constant 0 : index
    %c0_5 = arith.constant 0 : index
    %3 = vector.load %arg3[%c0_3, %c0_4, %c0_5] : memref<9x128x128xbf16, #tpu.memory_space<vmem>>, vector<1x128x128xbf16>
    %4 = vector.shape_cast %3 : vector<1x128x128xbf16> to vector<128x128xbf16>
    %cst_6 = arith.constant dense<0.000000e+00> : vector<288x128xf32>
    %5 = tpu.matmul %2, %4, %cst_6 {dimension_numbers = #tpu.dot_dimension_numbers<[1], [0], [0], [1], [0, 0, 1, 1], [], []>} : vector<288x128xbf16>, vector<128x128xbf16>, vector<288x128xf32> -> vector<288x128xf32>
    %6 = arith.addf %0, %5 : vector<288x128xf32>
    %c0_7 = arith.constant 0 : index
    %c0_8 = arith.constant 0 : index
    %c1 = arith.constant 1 : index
    %c0_9 = arith.constant 0 : index
    %7 = vector.load %arg2[%c0_7, %c0_8, %c1, %c0_9] : memref<1x1x342x128xbf16, #tpu.memory_space<vmem>>, vector<1x1x288x128xbf16>
    %8 = vector.shape_cast %7 : vector<1x1x288x128xbf16> to vector<288x128xbf16>
    %c1_10 = arith.constant 1 : index
    %c0_11 = arith.constant 0 : index
    %c0_12 = arith.constant 0 : index
    %9 = vector.load %arg3[%c1_10, %c0_11, %c0_12] : memref<9x128x128xbf16, #tpu.memory_space<vmem>>, vector<1x128x128xbf16>
    %10 = vector.shape_cast %9 : vector<1x128x128xbf16> to vector<128x128xbf16>
    %cst_13 = arith.constant dense<0.000000e+00> : vector<288x128xf32>
    %11 = tpu.matmul %8, %10, %cst_13 {dimension_numbers = #tpu.dot_dimension_numbers<[1], [0], [0], [1], [0, 0, 1, 1], [], []>} : vector<288x128xbf16>, vector<128x128xbf16>, vector<288x128xf32> -> vector<288x128xf32>
    %12 = arith.addf %6, %11 : vector<288x128xf32>
    %c0_14 = arith.constant 0 : index
    %c0_15 = arith.constant 0 : index
    %c2 = arith.constant 2 : index
    %c0_16 = arith.constant 0 : index
    %13 = vector.load %arg2[%c0_14, %c0_15, %c2, %c0_16] : memref<1x1x342x128xbf16, #tpu.memory_space<vmem>>, vector<1x1x288x128xbf16>
    %14 = vector.shape_cast %13 : vector<1x1x288x128xbf16> to vector<288x128xbf16>
    %c2_17 = arith.constant 2 : index
    %c0_18 = arith.constant 0 : index
    %c0_19 = arith.constant 0 : index
    %15 = vector.load %arg3[%c2_17, %c0_18, %c0_19] : memref<9x128x128xbf16, #tpu.memory_space<vmem>>, vector<1x128x128xbf16>
    %16 = vector.shape_cast %15 : vector<1x128x128xbf16> to vector<128x128xbf16>
    %cst_20 = arith.constant dense<0.000000e+00> : vector<288x128xf32>
    %17 = tpu.matmul %14, %16, %cst_20 {dimension_numbers = #tpu.dot_dimension_numbers<[1], [0], [0], [1], [0, 0, 1, 1], [], []>} : vector<288x128xbf16>, vector<128x128xbf16>, vector<288x128xf32> -> vector<288x128xf32>
    %18 = arith.addf %12, %17 : vector<288x128xf32>
    %c0_21 = arith.constant 0 : index
    %c0_22 = arith.constant 0 : index
    %c18 = arith.constant 18 : index
    %c0_23 = arith.constant 0 : index
    %19 = vector.load %arg2[%c0_21, %c0_22, %c18, %c0_23] : memref<1x1x342x128xbf16, #tpu.memory_space<vmem>>, vector<1x1x288x128xbf16>
    %20 = vector.shape_cast %19 : vector<1x1x288x128xbf16> to vector<288x128xbf16>
    %c3 = arith.constant 3 : index
    %c0_24 = arith.constant 0 : index
    %c0_25 = arith.constant 0 : index
    %21 = vector.load %arg3[%c3, %c0_24, %c0_25] : memref<9x128x128xbf16, #tpu.memory_space<vmem>>, vector<1x128x128xbf16>
    %22 = vector.shape_cast %21 : vector<1x128x128xbf16> to vector<128x128xbf16>
    %cst_26 = arith.constant dense<0.000000e+00> : vector<288x128xf32>
    %23 = tpu.matmul %20, %22, %cst_26 {dimension_numbers = #tpu.dot_dimension_numbers<[1], [0], [0], [1], [0, 0, 1, 1], [], []>} : vector<288x128xbf16>, vector<128x128xbf16>, vector<288x128xf32> -> vector<288x128xf32>
    %24 = arith.addf %18, %23 : vector<288x128xf32>
    %c0_27 = arith.constant 0 : index
    %c0_28 = arith.constant 0 : index
    %c19 = arith.constant 19 : index
    %c0_29 = arith.constant 0 : index
    %25 = vector.load %arg2[%c0_27, %c0_28, %c19, %c0_29] : memref<1x1x342x128xbf16, #tpu.memory_space<vmem>>, vector<1x1x288x128xbf16>
    %26 = vector.shape_cast %25 : vector<1x1x288x128xbf16> to vector<288x128xbf16>
    %c4 = arith.constant 4 : index
    %c0_30 = arith.constant 0 : index
    %c0_31 = arith.constant 0 : index
    %27 = vector.load %arg3[%c4, %c0_30, %c0_31] : memref<9x128x128xbf16, #tpu.memory_space<vmem>>, vector<1x128x128xbf16>
    %28 = vector.shape_cast %27 : vector<1x128x128xbf16> to vector<128x128xbf16>
    %cst_32 = arith.constant dense<0.000000e+00> : vector<288x128xf32>
    %29 = tpu.matmul %26, %28, %cst_32 {dimension_numbers = #tpu.dot_dimension_numbers<[1], [0], [0], [1], [0, 0, 1, 1], [], []>} : vector<288x128xbf16>, vector<128x128xbf16>, vector<288x128xf32> -> vector<288x128xf32>
    %30 = arith.addf %24, %29 : vector<288x128xf32>
    %c0_33 = arith.constant 0 : index
    %c0_34 = arith.constant 0 : index
    %c20 = arith.constant 20 : index
    %c0_35 = arith.constant 0 : index
    %31 = vector.load %arg2[%c0_33, %c0_34, %c20, %c0_35] : memref<1x1x342x128xbf16, #tpu.memory_space<vmem>>, vector<1x1x288x128xbf16>
    %32 = vector.shape_cast %31 : vector<1x1x288x128xbf16> to vector<288x128xbf16>
    %c5 = arith.constant 5 : index
    %c0_36 = arith.constant 0 : index
    %c0_37 = arith.constant 0 : index
    %33 = vector.load %arg3[%c5, %c0_36, %c0_37] : memref<9x128x128xbf16, #tpu.memory_space<vmem>>, vector<1x128x128xbf16>
    %34 = vector.shape_cast %33 : vector<1x128x128xbf16> to vector<128x128xbf16>
    %cst_38 = arith.constant dense<0.000000e+00> : vector<288x128xf32>
    %35 = tpu.matmul %32, %34, %cst_38 {dimension_numbers = #tpu.dot_dimension_numbers<[1], [0], [0], [1], [0, 0, 1, 1], [], []>} : vector<288x128xbf16>, vector<128x128xbf16>, vector<288x128xf32> -> vector<288x128xf32>
    %36 = arith.addf %30, %35 : vector<288x128xf32>
    %c0_39 = arith.constant 0 : index
    %c0_40 = arith.constant 0 : index
    %c36 = arith.constant 36 : index
    %c0_41 = arith.constant 0 : index
    %37 = vector.load %arg2[%c0_39, %c0_40, %c36, %c0_41] : memref<1x1x342x128xbf16, #tpu.memory_space<vmem>>, vector<1x1x288x128xbf16>
    %38 = vector.shape_cast %37 : vector<1x1x288x128xbf16> to vector<288x128xbf16>
    %c6 = arith.constant 6 : index
    %c0_42 = arith.constant 0 : index
    %c0_43 = arith.constant 0 : index
    %39 = vector.load %arg3[%c6, %c0_42, %c0_43] : memref<9x128x128xbf16, #tpu.memory_space<vmem>>, vector<1x128x128xbf16>
    %40 = vector.shape_cast %39 : vector<1x128x128xbf16> to vector<128x128xbf16>
    %cst_44 = arith.constant dense<0.000000e+00> : vector<288x128xf32>
    %41 = tpu.matmul %38, %40, %cst_44 {dimension_numbers = #tpu.dot_dimension_numbers<[1], [0], [0], [1], [0, 0, 1, 1], [], []>} : vector<288x128xbf16>, vector<128x128xbf16>, vector<288x128xf32> -> vector<288x128xf32>
    %42 = arith.addf %36, %41 : vector<288x128xf32>
    %c0_45 = arith.constant 0 : index
    %c0_46 = arith.constant 0 : index
    %c37 = arith.constant 37 : index
    %c0_47 = arith.constant 0 : index
    %43 = vector.load %arg2[%c0_45, %c0_46, %c37, %c0_47] : memref<1x1x342x128xbf16, #tpu.memory_space<vmem>>, vector<1x1x288x128xbf16>
    %44 = vector.shape_cast %43 : vector<1x1x288x128xbf16> to vector<288x128xbf16>
    %c7 = arith.constant 7 : index
    %c0_48 = arith.constant 0 : index
    %c0_49 = arith.constant 0 : index
    %45 = vector.load %arg3[%c7, %c0_48, %c0_49] : memref<9x128x128xbf16, #tpu.memory_space<vmem>>, vector<1x128x128xbf16>
    %46 = vector.shape_cast %45 : vector<1x128x128xbf16> to vector<128x128xbf16>
    %cst_50 = arith.constant dense<0.000000e+00> : vector<288x128xf32>
    %47 = tpu.matmul %44, %46, %cst_50 {dimension_numbers = #tpu.dot_dimension_numbers<[1], [0], [0], [1], [0, 0, 1, 1], [], []>} : vector<288x128xbf16>, vector<128x128xbf16>, vector<288x128xf32> -> vector<288x128xf32>
    %48 = arith.addf %42, %47 : vector<288x128xf32>
    %c0_51 = arith.constant 0 : index
    %c0_52 = arith.constant 0 : index
    %c38 = arith.constant 38 : index
    %c0_53 = arith.constant 0 : index
    %49 = vector.load %arg2[%c0_51, %c0_52, %c38, %c0_53] : memref<1x1x342x128xbf16, #tpu.memory_space<vmem>>, vector<1x1x288x128xbf16>
    %50 = vector.shape_cast %49 : vector<1x1x288x128xbf16> to vector<288x128xbf16>
    %c8 = arith.constant 8 : index
    %c0_54 = arith.constant 0 : index
    %c0_55 = arith.constant 0 : index
    %51 = vector.load %arg3[%c8, %c0_54, %c0_55] : memref<9x128x128xbf16, #tpu.memory_space<vmem>>, vector<1x128x128xbf16>
    %52 = vector.shape_cast %51 : vector<1x128x128xbf16> to vector<128x128xbf16>
    %cst_56 = arith.constant dense<0.000000e+00> : vector<288x128xf32>
    %53 = tpu.matmul %50, %52, %cst_56 {dimension_numbers = #tpu.dot_dimension_numbers<[1], [0], [0], [1], [0, 0, 1, 1], [], []>} : vector<288x128xbf16>, vector<128x128xbf16>, vector<288x128xf32> -> vector<288x128xf32>
    %54 = arith.addf %48, %53 : vector<288x128xf32>
    %c0_57 = arith.constant 0 : index
    %c0_58 = arith.constant 0 : index
    %55 = vector.load %arg4[%c0_57, %c0_58] : memref<1x128xf32, #tpu.memory_space<vmem>>, vector<1x128xf32>
    %56 = vector.broadcast %55 : vector<1x128xf32> to vector<288x128xf32>
    %57 = arith.addf %54, %56 : vector<288x128xf32>
    %cst_59 = arith.constant 0.000000e+00 : f32
    %58 = vector.broadcast %cst_59 : f32 to vector<288x128xf32>
    %59 = arith.maximumf %57, %58 : vector<288x128xf32>
    %60 = arith.truncf %59 : vector<288x128xf32> to vector<288x128xbf16>
    %c0_60 = arith.constant 0 : index
    %c0_61 = arith.constant 0 : index
    %61 = vector.load %arg5[%c0_60, %c0_61] : memref<128x128xbf16, #tpu.memory_space<vmem>>, vector<128x128xbf16>
    %cst_62 = arith.constant dense<0.000000e+00> : vector<288x128xf32>
    %62 = tpu.matmul %60, %61, %cst_62 {dimension_numbers = #tpu.dot_dimension_numbers<[1], [0], [0], [1], [0, 0, 1, 1], [], []>} : vector<288x128xbf16>, vector<128x128xbf16>, vector<288x128xf32> -> vector<288x128xf32>
    %c0_63 = arith.constant 0 : index
    %c0_64 = arith.constant 0 : index
    %63 = vector.load %arg6[%c0_63, %c0_64] : memref<1x128xf32, #tpu.memory_space<vmem>>, vector<1x128xf32>
    %64 = vector.broadcast %63 : vector<1x128xf32> to vector<288x128xf32>
    %65 = arith.addf %62, %64 : vector<288x128xf32>
    %c0_65 = arith.constant 0 : index
    %c0_66 = arith.constant 0 : index
    %c0_67 = arith.constant 0 : index
    %c0_68 = arith.constant 0 : index
    %66 = vector.load %arg7[%c0_65, %c0_66, %c0_67, %c0_68] : memref<1x1x288x128xf32, #tpu.memory_space<vmem>>, vector<1x1x288x128xf32>
    %67 = vector.shape_cast %66 : vector<1x1x288x128xf32> to vector<288x128xf32>
    %68 = vector.shape_cast %65 : vector<288x128xf32> to vector<1x1x288x128xf32>
    tpu.vector_store %arg7[%c0_65, %c0_66, %c0_67, %c0_68], %68 {strides = array<i32>} : memref<1x1x288x128xf32, #tpu.memory_space<vmem>>, vector<1x1x288x128xf32>,
    return
  }
  func.func @transform_0(%arg0: i32, %arg1: i32) -> (i32, i32, i32, i32) {
    %c0_i32 = arith.constant 0 : i32
    %c0_i32_0 = arith.constant 0 : i32
    %c0_i32_1 = arith.constant 0 : i32
    return %arg0, %arg1, %c0_i32, %c0_i32_0 : i32, i32, i32, i32
  }
  func.func @transform_1(%arg0: i32, %arg1: i32) -> (i32, i32, i32) {
    %c0_i32 = arith.constant 0 : i32
    %c0_i32_0 = arith.constant 0 : i32
    %c0_i32_1 = arith.constant 0 : i32
    %c0_i32_2 = arith.constant 0 : i32
    return %c0_i32, %c0_i32_0, %c0_i32_1 : i32, i32, i32
  }
  func.func @transform_2(%arg0: i32, %arg1: i32) -> (i32, i32) {
    %c0_i32 = arith.constant 0 : i32
    %c0_i32_0 = arith.constant 0 : i32
    %c0_i32_1 = arith.constant 0 : i32
    return %c0_i32, %c0_i32_0 : i32, i32
  }
  func.func @transform_3(%arg0: i32, %arg1: i32) -> (i32, i32) {
    %c0_i32 = arith.constant 0 : i32
    %c0_i32_0 = arith.constant 0 : i32
    %c0_i32_1 = arith.constant 0 : i32
    return %c0_i32, %c0_i32_0 : i32, i32
  }
  func.func @transform_4(%arg0: i32, %arg1: i32) -> (i32, i32) {
    %c0_i32 = arith.constant 0 : i32
    %c0_i32_0 = arith.constant 0 : i32
    %c0_i32_1 = arith.constant 0 : i32
    return %c0_i32, %c0_i32_0 : i32, i32
  }
  func.func @transform_5(%arg0: i32, %arg1: i32) -> (i32, i32, i32, i32) {
    %c0_i32 = arith.constant 0 : i32
    %c0_i32_0 = arith.constant 0 : i32
    %c0_i32_1 = arith.constant 0 : i32
    return %arg0, %arg1, %c0_i32, %c0_i32_0 : i32, i32, i32, i32
  }
}

module attributes {stable_mosaic.version = 11 : i64} {
  func.func @_head_kernel(%arg0: i32, %arg1: memref<32x6272xbf16, #tpu.memory_space<vmem>>, %arg2: memref<6272x128xbf16, #tpu.memory_space<vmem>>, %arg3: memref<1x128xf32, #tpu.memory_space<vmem>>, %arg4: memref<128x128xbf16, #tpu.memory_space<vmem>>, %arg5: memref<1x128xf32, #tpu.memory_space<vmem>>, %arg6: memref<32x128xf32, #tpu.memory_space<vmem>>) attributes {dimension_semantics = [#tpu.dimension_semantics<arbitrary>], iteration_bounds = array<i64: 1>, scalar_prefetch = 0 : i64, scratch_operands = 0 : i64, tpu.core_type = #tpu.core_type<tc>, window_params = [{pipeline_mode = #tpu.pipeline_mode<synchronous>, transform_indices = @transform_0, window_bounds = array<i64: 32, 6272>}, {pipeline_mode = #tpu.pipeline_mode<synchronous>, transform_indices = @transform_1, window_bounds = array<i64: 6272, 128>}, {pipeline_mode = #tpu.pipeline_mode<synchronous>, transform_indices = @transform_2, window_bounds = array<i64: 1, 128>}, {pipeline_mode = #tpu.pipeline_mode<synchronous>, transform_indices = @transform_3, window_bounds = array<i64: 128, 128>}, {pipeline_mode = #tpu.pipeline_mode<synchronous>, transform_indices = @transform_4, window_bounds = array<i64: 1, 128>}, {pipeline_mode = #tpu.pipeline_mode<synchronous>, transform_indices = @transform_5, window_bounds = array<i64: 32, 128>}]} {
    %c0 = arith.constant 0 : index
    %c0_0 = arith.constant 0 : index
    %0 = vector.load %arg1[%c0, %c0_0] : memref<32x6272xbf16, #tpu.memory_space<vmem>>, vector<32x6272xbf16>
    %c0_1 = arith.constant 0 : index
    %c0_2 = arith.constant 0 : index
    %1 = vector.load %arg2[%c0_1, %c0_2] : memref<6272x128xbf16, #tpu.memory_space<vmem>>, vector<6272x128xbf16>
    %cst = arith.constant dense<0.000000e+00> : vector<32x128xf32>
    %2 = tpu.matmul %0, %1, %cst {dimension_numbers = #tpu.dot_dimension_numbers<[1], [0], [0], [1], [0, 0, 1, 1], [], []>} : vector<32x6272xbf16>, vector<6272x128xbf16>, vector<32x128xf32> -> vector<32x128xf32>
    %c0_3 = arith.constant 0 : index
    %c0_4 = arith.constant 0 : index
    %3 = vector.load %arg3[%c0_3, %c0_4] : memref<1x128xf32, #tpu.memory_space<vmem>>, vector<1x128xf32>
    %4 = vector.broadcast %3 : vector<1x128xf32> to vector<32x128xf32>
    %5 = arith.addf %2, %4 : vector<32x128xf32>
    %cst_5 = arith.constant 0.000000e+00 : f32
    %6 = vector.broadcast %cst_5 : f32 to vector<32x128xf32>
    %7 = arith.maximumf %5, %6 : vector<32x128xf32>
    %8 = arith.truncf %7 : vector<32x128xf32> to vector<32x128xbf16>
    %c0_6 = arith.constant 0 : index
    %c0_7 = arith.constant 0 : index
    %9 = vector.load %arg4[%c0_6, %c0_7] : memref<128x128xbf16, #tpu.memory_space<vmem>>, vector<128x128xbf16>
    %cst_8 = arith.constant dense<0.000000e+00> : vector<32x128xf32>
    %10 = tpu.matmul %8, %9, %cst_8 {dimension_numbers = #tpu.dot_dimension_numbers<[1], [0], [0], [1], [0, 0, 1, 1], [], []>} : vector<32x128xbf16>, vector<128x128xbf16>, vector<32x128xf32> -> vector<32x128xf32>
    %c0_9 = arith.constant 0 : index
    %c0_10 = arith.constant 0 : index
    %11 = vector.load %arg5[%c0_9, %c0_10] : memref<1x128xf32, #tpu.memory_space<vmem>>, vector<1x128xf32>
    %12 = vector.broadcast %11 : vector<1x128xf32> to vector<32x128xf32>
    %13 = arith.addf %10, %12 : vector<32x128xf32>
    %c0_11 = arith.constant 0 : index
    %c0_12 = arith.constant 0 : index
    %14 = vector.load %arg6[%c0_11, %c0_12] : memref<32x128xf32, #tpu.memory_space<vmem>>, vector<32x128xf32>
    tpu.vector_store %arg6[%c0_11, %c0_12], %13 {strides = array<i32>} : memref<32x128xf32, #tpu.memory_space<vmem>>, vector<32x128xf32>,
    return
  }
  func.func @transform_0(%arg0: i32) -> (i32, i32) {
    %c0_i32 = arith.constant 0 : i32
    %c0_i32_0 = arith.constant 0 : i32
    %c0_i32_1 = arith.constant 0 : i32
    return %c0_i32, %c0_i32_0 : i32, i32
  }
  func.func @transform_1(%arg0: i32) -> (i32, i32) {
    %c0_i32 = arith.constant 0 : i32
    %c0_i32_0 = arith.constant 0 : i32
    %c0_i32_1 = arith.constant 0 : i32
    return %c0_i32, %c0_i32_0 : i32, i32
  }
  func.func @transform_2(%arg0: i32) -> (i32, i32) {
    %c0_i32 = arith.constant 0 : i32
    %c0_i32_0 = arith.constant 0 : i32
    %c0_i32_1 = arith.constant 0 : i32
    return %c0_i32, %c0_i32_0 : i32, i32
  }
  func.func @transform_3(%arg0: i32) -> (i32, i32) {
    %c0_i32 = arith.constant 0 : i32
    %c0_i32_0 = arith.constant 0 : i32
    %c0_i32_1 = arith.constant 0 : i32
    return %c0_i32, %c0_i32_0 : i32, i32
  }
  func.func @transform_4(%arg0: i32) -> (i32, i32) {
    %c0_i32 = arith.constant 0 : i32
    %c0_i32_0 = arith.constant 0 : i32
    %c0_i32_1 = arith.constant 0 : i32
    return %c0_i32, %c0_i32_0 : i32, i32
  }
  func.func @transform_5(%arg0: i32) -> (i32, i32) {
    %c0_i32 = arith.constant 0 : i32
    %c0_i32_0 = arith.constant 0 : i32
    %c0_i32_1 = arith.constant 0 : i32
    return %c0_i32, %c0_i32_0 : i32, i32
  }
}

</mosaic_0001>

<bundles_post_ra>
// kernel: faster_rcnn_forward.3
= control target key start
LH: loop header
LB: loop body
LE: loop exit
PB: predicated region body
PF: predicated region fallthrough
CT: control target
= control target key end

     0   :  { %vm278_vm0 = vcmask 523264   ;;  %s1917_s1 = inlined_call_operand.vmem [shape: bf16[64,128], index: 1, kind: input, shape index: {}]   ;;  %s1918_s0 = inlined_call_operand.vmem [shape: bf16[512,64], index: 0, kind: input, shape index: {}]   ;;  %s1919_s2 = inlined_call_operand.vmem [shape: f32[1,128], index: 2, kind: input, shape index: {}]   ;;  %s1920_s3 = inlined_call_operand.vmem [shape: bf16[512,128], index: 3, kind: output, shape index: {}]  }
   0x1   :  { %v1556_v0 = vld [vmem:[%s1917_s1] sm:$0xff]   ;;  %v1557_v1 = vld [vmem:[%s1917_s1 + $0x8] sm:$0xff]   ;;  %v1558_v2 = vld [vmem:[%s1917_s1 + $0x10] sm:$0xff]  }
   0x2   :  { %1476 = vmatprep.subr.bf16.mxu0 %v1556_v0  ;;  %1548 = vmatprep.subr.bf16.mxu1 %v1556_v0  ;;  %v1560_v3 = vld [vmem:[%s1918_s0] sm:$0xff]   ;;  %v1559_v5 = vld [vmem:[%s1917_s1 + $0x18] sm:$0xff]   ;;  %v1562_v6 = vld [vmem:[%s1918_s0 + $0x8] sm:$0xff]  }
   0x3   :  { %1477 = vmatpush3.bf16.msra.mxu0 %v1556_v0  ;;  %1552 = vmatpush3.bf16.msra.mxu1 %v1556_v0  ;;  %v1561_v4 = vld [vmem:[%s1918_s0 + $0x80] sm:$0xff]   ;;  %v1563_v7 = vld [vmem:[%s1918_s0 + $0x88] sm:$0xff]   ;;  %v1564_v8 = vld [vmem:[%s1918_s0 + $0x10] sm:$0xff]  }
   0x4   :  { %1478 = vmatprep.subr.bf16.mxu0 %v1557_v1  ;;  %1549 = vmatprep.subr.bf16.mxu1 %v1557_v1  ;;  %v1565_v9 = vld [vmem:[%s1918_s0 + $0x90] sm:$0xff]   ;;  %v1566_v10 = vld [vmem:[%s1918_s0 + $0x18] sm:$0xff]   ;;  %v1568_v12 = vld [vmem:[%s1918_s0 + $0x20] sm:$0xff]  }
   0x5   :  { %1484 = vmatprep.mubr.msk.bf16.mxu0 %vm278_vm0, %v1560_v3  ;;  %1516 = vmatprep.mubr.msk.bf16.mxu1 %vm278_vm0, %v1561_v4  ;;  %v1567_v11 = vld [vmem:[%s1918_s0 + $0x98] sm:$0xff]   ;;  %v1569_v13 = vld [vmem:[%s1918_s0 + $0xa0] sm:$0xff]   ;;  %v1570_v14 = vld [vmem:[%s1918_s0 + $0x28] sm:$0xff]  }
   0x6   :  { %v1571_v15 = vld [vmem:[%s1918_s0 + $0xa8] sm:$0xff]   ;;  %v1572_v16 = vld [vmem:[%s1918_s0 + $0x30] sm:$0xff]   ;;  %v1574_v18 = vld [vmem:[%s1918_s0 + $0x38] sm:$0xff]  }
   0x7   :  { %1479 = vmatpush3.bf16.msra.mxu0 %v1557_v1  ;;  %1553 = vmatpush3.bf16.msra.mxu1 %v1557_v1  ;;  %v1573_v17 = vld [vmem:[%s1918_s0 + $0xb0] sm:$0xff]   ;;  %v1575_v19 = vld [vmem:[%s1918_s0 + $0xb8] sm:$0xff]   ;;  %v1576_v20 = vld [vmem:[%s1918_s0 + $0x40] sm:$0xff]  }
   0x8   :  { %1480 = vmatprep.subr.bf16.mxu0 %v1558_v2  ;;  %1550 = vmatprep.subr.bf16.mxu1 %v1558_v2  ;;  %v1577_v21 = vld [vmem:[%s1918_s0 + $0xc0] sm:$0xff]   ;;  %v1578_v22 = vld [vmem:[%s1918_s0 + $0x48] sm:$0xff]   ;;  %v1580_v24 = vld [vmem:[%s1918_s0 + $0x50] sm:$0xff]  }
   0x9   :  { %v1579_v23 = vld [vmem:[%s1918_s0 + $0xc8] sm:$0xff]   ;;  %v1581_v25 = vld [vmem:[%s1918_s0 + $0xd0] sm:$0xff]   ;;  %v1582_v26 = vld [vmem:[%s1918_s0 + $0x58] sm:$0xff]  }
   0xa   :  { %v1583_v27 = vld [vmem:[%s1918_s0 + $0xd8] sm:$0xff]   ;;  %v1584_v28 = vld [vmem:[%s1918_s0 + $0x60] sm:$0xff]   ;;  %v1586_v30 = vld [vmem:[%s1918_s0 + $0x68] sm:$0xff]  }
   0xb   :  { %1481 = vmatpush3.bf16.msra.mxu0 %v1558_v2  ;;  %1554 = vmatpush3.bf16.msra.mxu1 %v1558_v2  ;;  %v1585_v29 = vld [vmem:[%s1918_s0 + $0xe0] sm:$0xff]   ;;  %v1587_v31 = vld [vmem:[%s1918_s0 + $0xe8] sm:$0xff]   ;;  %v1588_v32 = vld [vmem:[%s1918_s0 + $0x70] sm:$0xff]  }
   0xc   :  { %1482 = vmatprep.subr.bf16.mxu0 %v1559_v5  ;;  %1551 = vmatprep.subr.bf16.mxu1 %v1559_v5  ;;  %v1589_v33 = vld [vmem:[%s1918_s0 + $0xf0] sm:$0xff]   ;;  %v1590_v34 = vld [vmem:[%s1918_s0 + $0x78] sm:$0xff]   ;;  %v1755_v36 = vld [vmem:[%s1919_s2] ss:$0 sm:$0xff] }
   0xd   :  { %v1591_v35 = vld [vmem:[%s1918_s0 + $0xf8] sm:$0xff]  }
   0xf   :  { %1483 = vmatpush3.bf16.msra.mxu0 %v1559_v5  ;;  %1555 = vmatpush3.bf16.msra.mxu1 %v1559_v5 }
  0x12   :  { %1485 = vmatmul.mubr.msk.bf16.vlgmr.msra.gmra.mrb[0].mxu0 %vm278_vm0, %v1562_v6  ;;  %1517 = vmatmul.mubr.msk.bf16.vlgmr.msra.gmra.mrb[0].mxu1 %vm278_vm0, %v1563_v7 }
  0x13   :  { %1488 = vmatprep.mubr.msk.bf16.mxu0 %vm278_vm0, %v1564_v8  ;;  %1520 = vmatprep.mubr.msk.bf16.mxu1 %vm278_vm0, %v1565_v9 }
  0x1a   :  { %1489 = vmatmul.mubr.msk.bf16.gmra.mrb[4].mxu0 %vm278_vm0, %v1566_v10  ;;  %1521 = vmatmul.mubr.msk.bf16.gmra.mrb[4].mxu1 %vm278_vm0, %v1567_v11 }
  0x1b   :  { %1492 = vmatprep.mubr.msk.bf16.mxu0 %vm278_vm0, %v1568_v12  ;;  %1524 = vmatprep.mubr.msk.bf16.mxu1 %vm278_vm0, %v1569_v13 }
  0x22   :  { %1493 = vmatmul.mubr.msk.bf16.gmra.mrb[8].mxu0 %vm278_vm0, %v1570_v14  ;;  %1525 = vmatmul.mubr.msk.bf16.gmra.mrb[8].mxu1 %vm278_vm0, %v1571_v15 }
  0x23   :  { %1496 = vmatprep.mubr.msk.bf16.mxu0 %vm278_vm0, %v1572_v16  ;;  %1528 = vmatprep.mubr.msk.bf16.mxu1 %vm278_vm0, %v1573_v17 }
  0x2a   :  { %1497 = vmatmul.mubr.msk.bf16.gmra.mrb[12].mxu0 %vm278_vm0, %v1574_v18  ;;  %1529 = vmatmul.mubr.msk.bf16.gmra.mrb[12].mxu1 %vm278_vm0, %v1575_v19 }
  0x2b   :  { %1500 = vmatprep.mubr.msk.bf16.mxu0 %vm278_vm0, %v1576_v20  ;;  %1532 = vmatprep.mubr.msk.bf16.mxu1 %vm278_vm0, %v1577_v21 }
  0x32   :  { %1501 = vmatmul.mubr.msk.bf16.gmra.mrb[16].mxu0 %vm278_vm0, %v1578_v22  ;;  %1533 = vmatmul.mubr.msk.bf16.gmra.mrb[16].mxu1 %vm278_vm0, %v1579_v23 }
  0x33   :  { %1504 = vmatprep.mubr.msk.bf16.mxu0 %vm278_vm0, %v1580_v24  ;;  %1536 = vmatprep.mubr.msk.bf16.mxu1 %vm278_vm0, %v1581_v25 }
  0x3a   :  { %1505 = vmatmul.mubr.msk.bf16.gmra.mrb[20].mxu0 %vm278_vm0, %v1582_v26  ;;  %1537 = vmatmul.mubr.msk.bf16.gmra.mrb[20].mxu1 %vm278_vm0, %v1583_v27 }
  0x3b   :  { %1508 = vmatprep.mubr.msk.bf16.mxu0 %vm278_vm0, %v1584_v28  ;;  %1540 = vmatprep.mubr.msk.bf16.mxu1 %vm278_vm0, %v1585_v29 }
  0x42   :  { %1509 = vmatmul.mubr.msk.bf16.gmra.mrb[24].mxu0 %vm278_vm0, %v1586_v30  ;;  %1541 = vmatmul.mubr.msk.bf16.gmra.mrb[24].mxu1 %vm278_vm0, %v1587_v31 }
  0x43   :  { %1512 = vmatprep.mubr.msk.bf16.mxu0 %vm278_vm0, %v1588_v32  ;;  %1544 = vmatprep.mubr.msk.bf16.mxu1 %vm278_vm0, %v1589_v33 }
  0x4a   :  { %1513 = vmatmul.mubr.msk.bf16.gmra.mrb[28].mxu0 %vm278_vm0, %v1590_v34  ;;  %1545 = vmatmul.mubr.msk.bf16.gmra.mrb[28].mxu1 %vm278_vm0, %v1591_v35 }
  0xe5   :  { %v1486_v37 = vpop.f32.mrb[0].mxu0  ;;  %v1518_v38 = vpop.f32.mrb[0].mxu1 }
  0xe6   :  { %v418_v39 = vadd.f32 %v1486_v37, %v1755_v36  ;;  %v546_v40 = vadd.f32 %v1518_v38, %v1755_v36  ;;  %v409_v41 = vpop.f32.mrb[1].mxu0  ;;  %v537_v42 = vpop.f32.mrb[1].mxu1 }
  0xe7   :  { %v410_v43 = vadd.f32 %v1755_v36, %v409_v41  ;;  %v538_v44 = vadd.f32 %v1755_v36, %v537_v42  ;;  %v1487_v45 = vpop.f32.mrb[2].mxu0  ;;  %v1519_v46 = vpop.f32.mrb[2].mxu1 }
  0xe8   :  { %v421_v47 = vadd.f32 %v1487_v45, %v1755_v36  ;;  %v549_v48 = vadd.f32 %v1519_v46, %v1755_v36  ;;  %v412_v49 = vpop.f32.mrb[3].mxu0  ;;  %v540_v50 = vpop.f32.mrb[3].mxu1  ;;  %v666_v53 = vmax.f32 %v418_v39, 0.0  ;;  %v698_v54 = vmax.f32 %v546_v40, 0.0 }
  0xe9   :  { %v413_v51 = vadd.f32 %v1755_v36, %v412_v49  ;;  %v541_v52 = vadd.f32 %v1755_v36, %v540_v50  ;;  %v664_v57 = vmax.f32 %v410_v43, 0.0  ;;  %v696_v58 = vmax.f32 %v538_v44, 0.0 }
  0xea   :  { %v667_v55 = vmax.f32 %v421_v47, 0.0  ;;  %v699_v56 = vmax.f32 %v549_v48, 0.0 }
  0xeb   :  { %v665_v59 = vmax.f32 %v413_v51, 0.0  ;;  %v697_v60 = vmax.f32 %v541_v52, 0.0 }
  0xec   :  { %v1257_v61 = vpack.c.bf16 %v667_v55, %v666_v53  ;;  %v1337_v62 = vpack.c.bf16 %v699_v56, %v698_v54 }
  0xed   :  { %v1252_v63 = vpack.c.bf16 %v665_v59, %v664_v57  ;;  %v1332_v0 = vpack.c.bf16 %v697_v60, %v696_v58  ;;  %v1490_v1 = vpop.f32.mrb[4].mxu0  ;;  %v1522_v2 = vpop.f32.mrb[4].mxu1 }
  0xee   :  { %1409 = vst [vmem:[%s1920_s3 + $0x8] sm:$0xff] %v1257_v61   ;;  %1425 = vst [vmem:[%s1920_s3 + $0x88] sm:$0xff] %v1337_v62   ;;  %v434_v3 = vadd.f32 %v1490_v1, %v1755_v36  ;;  %v562_v4 = vadd.f32 %v1522_v2, %v1755_v36  ;;  %v425_v5 = vpop.f32.mrb[5].mxu0  ;;  %v553_v6 = vpop.f32.mrb[5].mxu1 }
  0xef   :  { %1253 = vst [vmem:[%s1920_s3] sm:$0xff] %v1252_v63   ;;  %1424 = vst [vmem:[%s1920_s3 + $0x80] sm:$0xff] %v1332_v0   ;;  %v426_v7 = vadd.f32 %v1755_v36, %v425_v5  ;;  %v554_v8 = vadd.f32 %v1755_v36, %v553_v6  ;;  %v1491_v9 = vpop.f32.mrb[6].mxu0  ;;  %v1523_v10 = vpop.f32.mrb[6].mxu1 }
  0xf0   :  { %v437_v11 = vadd.f32 %v1491_v9, %v1755_v36  ;;  %v565_v12 = vadd.f32 %v1523_v10, %v1755_v36  ;;  %v428_v13 = vpop.f32.mrb[7].mxu0  ;;  %v556_v14 = vpop.f32.mrb[7].mxu1  ;;  %v670_v17 = vmax.f32 %v434_v3, 0.0  ;;  %v702_v18 = vmax.f32 %v562_v4, 0.0 }
  0xf1   :  { %v429_v15 = vadd.f32 %v1755_v36, %v428_v13  ;;  %v557_v16 = vadd.f32 %v1755_v36, %v556_v14  ;;  %v668_v21 = vmax.f32 %v426_v7, 0.0  ;;  %v700_v22 = vmax.f32 %v554_v8, 0.0 }
  0xf2   :  { %v671_v19 = vmax.f32 %v437_v11, 0.0  ;;  %v703_v20 = vmax.f32 %v565_v12, 0.0 }
  0xf3   :  { %v669_v23 = vmax.f32 %v429_v15, 0.0  ;;  %v701_v24 = vmax.f32 %v557_v16, 0.0 }
  0xf4   :  { %v1267_v25 = vpack.c.bf16 %v671_v19, %v670_v17  ;;  %v1347_v26 = vpack.c.bf16 %v703_v20, %v702_v18 }
  0xf5   :  { %v1262_v27 = vpack.c.bf16 %v669_v23, %v668_v21  ;;  %v1342_v28 = vpack.c.bf16 %v701_v24, %v700_v22  ;;  %v1494_v29 = vpop.f32.mrb[8].mxu0  ;;  %v1526_v30 = vpop.f32.mrb[8].mxu1 }
  0xf6   :  { %1411 = vst [vmem:[%s1920_s3 + $0x18] sm:$0xff] %v1267_v25   ;;  %1427 = vst [vmem:[%s1920_s3 + $0x98] sm:$0xff] %v1347_v26   ;;  %v450_v31 = vadd.f32 %v1494_v29, %v1755_v36  ;;  %v578_v32 = vadd.f32 %v1526_v30, %v1755_v36  ;;  %v441_v33 = vpop.f32.mrb[9].mxu0  ;;  %v569_v34 = vpop.f32.mrb[9].mxu1 }
  0xf7   :  { %1410 = vst [vmem:[%s1920_s3 + $0x10] sm:$0xff] %v1262_v27   ;;  %1426 = vst [vmem:[%s1920_s3 + $0x90] sm:$0xff] %v1342_v28   ;;  %v442_v35 = vadd.f32 %v1755_v36, %v441_v33  ;;  %v570_v37 = vadd.f32 %v1755_v36, %v569_v34  ;;  %v1495_v38 = vpop.f32.mrb[10].mxu0  ;;  %v1527_v39 = vpop.f32.mrb[10].mxu1 }
  0xf8   :  { %v453_v40 = vadd.f32 %v1495_v38, %v1755_v36  ;;  %v581_v41 = vadd.f32 %v1527_v39, %v1755_v36  ;;  %v444_v42 = vpop.f32.mrb[11].mxu0  ;;  %v572_v43 = vpop.f32.mrb[11].mxu1  ;;  %v674_v46 = vmax.f32 %v450_v31, 0.0  ;;  %v706_v47 = vmax.f32 %v578_v32, 0.0 }
  0xf9   :  { %v445_v44 = vadd.f32 %v1755_v36, %v444_v42  ;;  %v573_v45 = vadd.f32 %v1755_v36, %v572_v43  ;;  %v672_v50 = vmax.f32 %v442_v35, 0.0  ;;  %v704_v51 = vmax.f32 %v570_v37, 0.0 }
  0xfa   :  { %v675_v48 = vmax.f32 %v453_v40, 0.0  ;;  %v707_v49 = vmax.f32 %v581_v41, 0.0 }
  0xfb   :  { %v673_v52 = vmax.f32 %v445_v44, 0.0  ;;  %v705_v53 = vmax.f32 %v573_v45, 0.0 }
  0xfc   :  { %v1277_v54 = vpack.c.bf16 %v675_v48, %v674_v46  ;;  %v1357_v55 = vpack.c.bf16 %v707_v49, %v706_v47 }
  0xfd   :  { %v1272_v56 = vpack.c.bf16 %v673_v52, %v672_v50  ;;  %v1352_v57 = vpack.c.bf16 %v705_v53, %v704_v51  ;;  %v1498_v58 = vpop.f32.mrb[12].mxu0  ;;  %v1530_v59 = vpop.f32.mrb[12].mxu1 }
  0xfe   :  { %1413 = vst [vmem:[%s1920_s3 + $0x28] sm:$0xff] %v1277_v54   ;;  %1429 = vst [vmem:[%s1920_s3 + $0xa8] sm:$0xff] %v1357_v55   ;;  %v466_v60 = vadd.f32 %v1498_v58, %v1755_v36  ;;  %v594_v61 = vadd.f32 %v1530_v59, %v1755_v36  ;;  %v457_v62 = vpop.f32.mrb[13].mxu0  ;;  %v585_v63 = vpop.f32.mrb[13].mxu1 }
  0xff   :  { %1412 = vst [vmem:[%s1920_s3 + $0x20] sm:$0xff] %v1272_v56   ;;  %1428 = vst [vmem:[%s1920_s3 + $0xa0] sm:$0xff] %v1352_v57   ;;  %v458_v0 = vadd.f32 %v1755_v36, %v457_v62  ;;  %v586_v1 = vadd.f32 %v1755_v36, %v585_v63  ;;  %v1499_v2 = vpop.f32.mrb[14].mxu0  ;;  %v1531_v3 = vpop.f32.mrb[14].mxu1 }
 0x100   :  { %v469_v4 = vadd.f32 %v1499_v2, %v1755_v36  ;;  %v597_v5 = vadd.f32 %v1531_v3, %v1755_v36  ;;  %v460_v6 = vpop.f32.mrb[15].mxu0  ;;  %v588_v7 = vpop.f32.mrb[15].mxu1  ;;  %v678_v10 = vmax.f32 %v466_v60, 0.0  ;;  %v710_v11 = vmax.f32 %v594_v61, 0.0 }
 0x101   :  { %v461_v8 = vadd.f32 %v1755_v36, %v460_v6  ;;  %v589_v9 = vadd.f32 %v1755_v36, %v588_v7  ;;  %v676_v14 = vmax.f32 %v458_v0, 0.0  ;;  %v708_v15 = vmax.f32 %v586_v1, 0.0 }
 0x102   :  { %v679_v12 = vmax.f32 %v469_v4, 0.0  ;;  %v711_v13 = vmax.f32 %v597_v5, 0.0 }
 0x103   :  { %v677_v16 = vmax.f32 %v461_v8, 0.0  ;;  %v709_v17 = vmax.f32 %v589_v9, 0.0 }
 0x104   :  { %v1287_v18 = vpack.c.bf16 %v679_v12, %v678_v10  ;;  %v1367_v19 = vpack.c.bf16 %v711_v13, %v710_v11 }
 0x105   :  { %v1282_v20 = vpack.c.bf16 %v677_v16, %v676_v14  ;;  %v1362_v21 = vpack.c.bf16 %v709_v17, %v708_v15  ;;  %v1502_v22 = vpop.f32.mrb[16].mxu0  ;;  %v1534_v23 = vpop.f32.mrb[16].mxu1 }
 0x106   :  { %1415 = vst [vmem:[%s1920_s3 + $0x38] sm:$0xff] %v1287_v18   ;;  %1431 = vst [vmem:[%s1920_s3 + $0xb8] sm:$0xff] %v1367_v19   ;;  %v482_v24 = vadd.f32 %v1502_v22, %v1755_v36  ;;  %v610_v25 = vadd.f32 %v1534_v23, %v1755_v36  ;;  %v473_v26 = vpop.f32.mrb[17].mxu0  ;;  %v601_v27 = vpop.f32.mrb[17].mxu1 }
 0x107   :  { %1414 = vst [vmem:[%s1920_s3 + $0x30] sm:$0xff] %v1282_v20   ;;  %1430 = vst [vmem:[%s1920_s3 + $0xb0] sm:$0xff] %v1362_v21   ;;  %v474_v28 = vadd.f32 %v1755_v36, %v473_v26  ;;  %v602_v29 = vadd.f32 %v1755_v36, %v601_v27  ;;  %v1503_v30 = vpop.f32.mrb[18].mxu0  ;;  %v1535_v31 = vpop.f32.mrb[18].mxu1 }
 0x108   :  { %v485_v32 = vadd.f32 %v1503_v30, %v1755_v36  ;;  %v613_v33 = vadd.f32 %v1535_v31, %v1755_v36  ;;  %v476_v34 = vpop.f32.mrb[19].mxu0  ;;  %v604_v35 = vpop.f32.mrb[19].mxu1  ;;  %v682_v39 = vmax.f32 %v482_v24, 0.0  ;;  %v714_v40 = vmax.f32 %v610_v25, 0.0 }
 0x109   :  { %v477_v37 = vadd.f32 %v1755_v36, %v476_v34  ;;  %v605_v38 = vadd.f32 %v1755_v36, %v604_v35  ;;  %v680_v43 = vmax.f32 %v474_v28, 0.0  ;;  %v712_v44 = vmax.f32 %v602_v29, 0.0 }
 0x10a   :  { %v683_v41 = vmax.f32 %v485_v32, 0.0  ;;  %v715_v42 = vmax.f32 %v613_v33, 0.0 }
 0x10b   :  { %v681_v45 = vmax.f32 %v477_v37, 0.0  ;;  %v713_v46 = vmax.f32 %v605_v38, 0.0 }
 0x10c   :  { %v1297_v47 = vpack.c.bf16 %v683_v41, %v682_v39  ;;  %v1377_v48 = vpack.c.bf16 %v715_v42, %v714_v40 }
 0x10d   :  { %v1292_v49 = vpack.c.bf16 %v681_v45, %v680_v43  ;;  %v1372_v50 = vpack.c.bf16 %v713_v46, %v712_v44  ;;  %v1506_v51 = vpop.f32.mrb[20].mxu0  ;;  %v1538_v52 = vpop.f32.mrb[20].mxu1 }
 0x10e   :  { %1417 = vst [vmem:[%s1920_s3 + $0x48] sm:$0xff] %v1297_v47   ;;  %1433 = vst [vmem:[%s1920_s3 + $0xc8] sm:$0xff] %v1377_v48   ;;  %v498_v53 = vadd.f32 %v1506_v51, %v1755_v36  ;;  %v626_v54 = vadd.f32 %v1538_v52, %v1755_v36  ;;  %v489_v55 = vpop.f32.mrb[21].mxu0  ;;  %v617_v56 = vpop.f32.mrb[21].mxu1 }
 0x10f   :  { %1416 = vst [vmem:[%s1920_s3 + $0x40] sm:$0xff] %v1292_v49   ;;  %1432 = vst [vmem:[%s1920_s3 + $0xc0] sm:$0xff] %v1372_v50   ;;  %v490_v57 = vadd.f32 %v1755_v36, %v489_v55  ;;  %v618_v58 = vadd.f32 %v1755_v36, %v617_v56  ;;  %v1507_v59 = vpop.f32.mrb[22].mxu0  ;;  %v1539_v60 = vpop.f32.mrb[22].mxu1 }
 0x110   :  { %v501_v61 = vadd.f32 %v1507_v59, %v1755_v36  ;;  %v629_v62 = vadd.f32 %v1539_v60, %v1755_v36  ;;  %v492_v63 = vpop.f32.mrb[23].mxu0  ;;  %v620_v0 = vpop.f32.mrb[23].mxu1  ;;  %v686_v3 = vmax.f32 %v498_v53, 0.0  ;;  %v718_v4 = vmax.f32 %v626_v54, 0.0 }
 0x111   :  { %v493_v1 = vadd.f32 %v1755_v36, %v492_v63  ;;  %v621_v2 = vadd.f32 %v1755_v36, %v620_v0  ;;  %v684_v7 = vmax.f32 %v490_v57, 0.0  ;;  %v716_v8 = vmax.f32 %v618_v58, 0.0 }
 0x112   :  { %v687_v5 = vmax.f32 %v501_v61, 0.0  ;;  %v719_v6 = vmax.f32 %v629_v62, 0.0 }
 0x113   :  { %v685_v9 = vmax.f32 %v493_v1, 0.0  ;;  %v717_v10 = vmax.f32 %v621_v2, 0.0 }
 0x114   :  { %v1307_v11 = vpack.c.bf16 %v687_v5, %v686_v3  ;;  %v1387_v12 = vpack.c.bf16 %v719_v6, %v718_v4 }
 0x115   :  { %v1302_v13 = vpack.c.bf16 %v685_v9, %v684_v7  ;;  %v1382_v14 = vpack.c.bf16 %v717_v10, %v716_v8  ;;  %v1510_v15 = vpop.f32.mrb[24].mxu0  ;;  %v1542_v16 = vpop.f32.mrb[24].mxu1 }
 0x116   :  { %1419 = vst [vmem:[%s1920_s3 + $0x58] sm:$0xff] %v1307_v11   ;;  %1435 = vst [vmem:[%s1920_s3 + $0xd8] sm:$0xff] %v1387_v12   ;;  %v514_v17 = vadd.f32 %v1510_v15, %v1755_v36  ;;  %v642_v18 = vadd.f32 %v1542_v16, %v1755_v36  ;;  %v505_v19 = vpop.f32.mrb[25].mxu0  ;;  %v633_v20 = vpop.f32.mrb[25].mxu1 }
 0x117   :  { %1418 = vst [vmem:[%s1920_s3 + $0x50] sm:$0xff] %v1302_v13   ;;  %1434 = vst [vmem:[%s1920_s3 + $0xd0] sm:$0xff] %v1382_v14   ;;  %v506_v21 = vadd.f32 %v1755_v36, %v505_v19  ;;  %v634_v22 = vadd.f32 %v1755_v36, %v633_v20  ;;  %v1511_v23 = vpop.f32.mrb[26].mxu0  ;;  %v1543_v24 = vpop.f32.mrb[26].mxu1 }
 0x118   :  { %v517_v25 = vadd.f32 %v1511_v23, %v1755_v36  ;;  %v645_v26 = vadd.f32 %v1543_v24, %v1755_v36  ;;  %v508_v27 = vpop.f32.mrb[27].mxu0  ;;  %v636_v28 = vpop.f32.mrb[27].mxu1  ;;  %v690_v31 = vmax.f32 %v514_v17, 0.0  ;;  %v722_v32 = vmax.f32 %v642_v18, 0.0 }
 0x119   :  { %v509_v29 = vadd.f32 %v1755_v36, %v508_v27  ;;  %v637_v30 = vadd.f32 %v1755_v36, %v636_v28  ;;  %v688_v35 = vmax.f32 %v506_v21, 0.0  ;;  %v720_v37 = vmax.f32 %v634_v22, 0.0 }
 0x11a   :  { %v691_v33 = vmax.f32 %v517_v25, 0.0  ;;  %v723_v34 = vmax.f32 %v645_v26, 0.0 }
 0x11b   :  { %v689_v38 = vmax.f32 %v509_v29, 0.0  ;;  %v721_v39 = vmax.f32 %v637_v30, 0.0 }
 0x11c   :  { %v1317_v40 = vpack.c.bf16 %v691_v33, %v690_v31  ;;  %v1397_v41 = vpack.c.bf16 %v723_v34, %v722_v32 }
 0x11d   :  { %v1312_v42 = vpack.c.bf16 %v689_v38, %v688_v35  ;;  %v1392_v43 = vpack.c.bf16 %v721_v39, %v720_v37  ;;  %v1514_v44 = vpop.f32.mrb[28].mxu0  ;;  %v1546_v45 = vpop.f32.mrb[28].mxu1 }
 0x11e   :  { %1421 = vst [vmem:[%s1920_s3 + $0x68] sm:$0xff] %v1317_v40   ;;  %1437 = vst [vmem:[%s1920_s3 + $0xe8] sm:$0xff] %v1397_v41   ;;  %v530_v46 = vadd.f32 %v1514_v44, %v1755_v36  ;;  %v658_v47 = vadd.f32 %v1546_v45, %v1755_v36  ;;  %v521_v48 = vpop.f32.mrb[29].mxu0  ;;  %v649_v49 = vpop.f32.mrb[29].mxu1 }
 0x11f   :  { %1420 = vst [vmem:[%s1920_s3 + $0x60] sm:$0xff] %v1312_v42   ;;  %1436 = vst [vmem:[%s1920_s3 + $0xe0] sm:$0xff] %v1392_v43   ;;  %v522_v50 = vadd.f32 %v1755_v36, %v521_v48  ;;  %v650_v51 = vadd.f32 %v1755_v36, %v649_v49  ;;  %v1515_v52 = vpop.f32.mrb[30].mxu0  ;;  %v1547_v53 = vpop.f32.mrb[30].mxu1 }
 0x120   :  { %v533_v54 = vadd.f32 %v1515_v52, %v1755_v36  ;;  %v661_v55 = vadd.f32 %v1547_v53, %v1755_v36  ;;  %v524_v56 = vpop.f32.mrb[31].mxu0  ;;  %v652_v57 = vpop.f32.mrb[31].mxu1  ;;  %v694_v60 = vmax.f32 %v530_v46, 0.0  ;;  %v726_v61 = vmax.f32 %v658_v47, 0.0 }
 0x121   :  { %v525_v58 = vadd.f32 %v1755_v36, %v524_v56  ;;  %v653_v59 = vadd.f32 %v1755_v36, %v652_v57  ;;  %v692_v0 = vmax.f32 %v522_v50, 0.0  ;;  %v724_v1 = vmax.f32 %v650_v51, 0.0 }
 0x122   :  { %v695_v62 = vmax.f32 %v533_v54, 0.0  ;;  %v727_v63 = vmax.f32 %v661_v55, 0.0 }
 0x123   :  { %v693_v2 = vmax.f32 %v525_v58, 0.0  ;;  %v725_v3 = vmax.f32 %v653_v59, 0.0 }
 0x124   :  { %v1327_v4 = vpack.c.bf16 %v695_v62, %v694_v60  ;;  %v1407_v5 = vpack.c.bf16 %v727_v63, %v726_v61 }
 0x125   :  { %v1322_v6 = vpack.c.bf16 %v693_v2, %v692_v0  ;;  %v1402_v7 = vpack.c.bf16 %v725_v3, %v724_v1 }
 0x126   :  { %1423 = vst [vmem:[%s1920_s3 + $0x78] sm:$0xff] %v1327_v4   ;;  %1439 = vst [vmem:[%s1920_s3 + $0xf8] sm:$0xff] %v1407_v5  }
 0x127   :  { %1422 = vst [vmem:[%s1920_s3 + $0x70] sm:$0xff] %v1322_v6   ;;  %1438 = vst [vmem:[%s1920_s3 + $0xf0] sm:$0xff] %v1402_v7  }

// kernel: faster_rcnn_forward.4
= control target key start
LH: loop header
LB: loop body
LE: loop exit
PB: predicated region body
PF: predicated region fallthrough
CT: control target
= control target key end

     0   :  { %s6019_s18 = smov 0   ;;  %s6021_s19 = smov 0   ;;  %s7069_s0 = inlined_call_operand.vmem [shape: bf16[2,1,342,128], index: 0, kind: input, shape index: {}]   ;;  %s7070_s1 = inlined_call_operand.vmem [shape: bf16[9,128,128], index: 1, kind: input, shape index: {}]   ;;  %s7071_s2 = inlined_call_operand.vmem [shape: f32[1,128], index: 2, kind: input, shape index: {}]   ;;  %s7072_s3 = inlined_call_operand.vmem [shape: bf16[128,128], index: 3, kind: input, shape index: {}]   ;;  %s7073_s4 = inlined_call_operand.vmem [shape: f32[1,128], index: 4, kind: input, shape index: {}]   ;;  %s7074_s5 = inlined_call_operand.vmem [shape: f32[2,1,288,128], index: 5, kind: output, shape index: {}]  }
   0x1   :  { %s6023_s20 = smov 0  }
   0x2 LB: > { %s27_s21 = sadd.s32 1, %s5983_s19  ;;  %p4419_p0 = scmp.ge.s32.totalorder %s5987_s20, 1  ;;  %s5987_s20 = sphi %s6023_s20, %s15_s20   ;;  %s5983_s19 = sphi %s6021_s19, %s7076_s19   ;;  %s5979_s18 = sphi %s6019_s18, %s7075_s18  }
   0x3   : > { %p29_p1 = scmp.ge.s32.totalorder %s27_s21, 2  ;;  %p207_p2 = scmp.lt.s32.totalorder %s5987_s20, 3 }
   0x5   : > { %s7078_s21 = smov (%p29_p1, %s27_s21), 0  ;;  %p208_p3 = pnand %p4419_p0, %p207_p2 }
   0x6   : > { %v5790_v0 = vld [vmem:[%s7070_s1 + $0x40] sm:$0xff] (!%p208_p3)   ;;  %p243_p4 = scmp.lt.s32.totalorder (!%p208_p3), %s5979_s18, 1  ;;  %v5792_v2 = vld [vmem:[%s7070_s1 + $0x48] sm:$0xff] (!%p208_p3)   ;;  %v5794_v4 = vld [vmem:[%s7070_s1 + $0x50] sm:$0xff] (!%p208_p3)   ;;  %vm425_vm0 = vsmask.f32 (!%p208_p3), 7424 }
   0x7   : > { %211 = sbr.rel (%p208_p3) target bundleno = 834 (0x342), region = 40  ;;  %v5791_v1 = vld [vmem:[%s7070_s1 + $0x100] sm:$0xff] (!%p208_p3)   ;;  %4956 = vmatprep.subr.bf16.mxu1 (!%p208_p3), %v5790_v0  ;;  %v5793_v3 = vld [vmem:[%s7070_s1 + $0x108] sm:$0xff] (!%p208_p3)   ;;  %v5795_v5 = vld [vmem:[%s7070_s1 + $0x110] sm:$0xff] (!%p208_p3)   ;;  %vm1882_vm1 = vsmask.f32 (!%p208_p3), 6400 }
   0x8   : > { %5164 = vmatprep.subr.bf16.mxu0 (!%p208_p3), %v5791_v1  ;;  %4957 = vmatpush3.bf16.msra.mxu1 (!%p208_p3), %v5790_v0  ;;  %v5796_v6 = vld [vmem:[%s7070_s1 + $0x58] sm:$0xff] (!%p208_p3)   ;;  %v5798_v8 = vld [vmem:[%s7070_s1 + $0x60] sm:$0xff] (!%p208_p3)   ;;  %v5800_v10 = vld [vmem:[%s7070_s1 + $0x68] sm:$0xff] (!%p208_p3)   ;;  %vm2353_vm2 = vcmask (!%p208_p3), 1045504   ;;  %vm1081_vm3 = vcmask (!%p208_p3), 1046528   ;;  %vm3625_vm5 = vcmask (!%p208_p3), 1044480  }
   0x9   : > { %5165 = vmatpush3.bf16.msra.mxu0 (!%p208_p3), %v5791_v1  ;;  %4958 = vmatprep.subr.bf16.mxu1 (!%p208_p3), %v5792_v2  ;;  %v5797_v7 = vld [vmem:[%s7070_s1 + $0x118] sm:$0xff] (!%p208_p3)   ;;  %v5799_v9 = vld [vmem:[%s7070_s1 + $0x120] sm:$0xff] (!%p208_p3)   ;;  %v5801_v11 = vld [vmem:[%s7070_s1 + $0x128] sm:$0xff] (!%p208_p3)   ;;  %vm3154_vm4 = vsmask.f32 (!%p208_p3), 5376 }
   0xa   : > { %5166 = vmatprep.subr.bf16.mxu0 (!%p208_p3), %v5793_v3  ;;  %v5802_v17 = vld [vmem:[%s7070_s1 + $0x70] sm:$0xff] (!%p208_p3)   ;;  %v5804_v32 = vld [vmem:[%s7070_s1 + $0x78] sm:$0xff] (!%p208_p3)   ;;  %v5812_v55 = vld [vmem:[%s7070_s1 + $0x140] sm:$0xff] (!%p208_p3)  }
   0xb   : > { %v5803_v20 = vld [vmem:[%s7070_s1 + $0x130] sm:$0xff] (!%p208_p3)   ;;  %v5805_v36 = vld [vmem:[%s7070_s1 + $0x138] sm:$0xff] (!%p208_p3)  }
   0xc   : > { %4959 = vmatpush3.bf16.msra.mxu1 (!%p208_p3), %v5792_v2 }
   0xd   : > { %5167 = vmatpush3.bf16.msra.mxu0 (!%p208_p3), %v5793_v3  ;;  %4960 = vmatprep.subr.bf16.mxu1 (!%p208_p3), %v5794_v4 }
   0xe   : > { %s7080_s18 = smov (!%p243_p4, %s5979_s18), 1  ;;  %5168 = vmatprep.subr.bf16.mxu0 %v5795_v5 }
   0xf   : > { %s5764_s13 = smul.u32 172, %s7080_s18 }
  0x10   : > { %4961 = vmatpush3.bf16.msra.mxu1 %v5794_v4  ;;  %s5765_s26 = smul.u32 288, %s7080_s18 }
  0x11   : > { %5169 = vmatpush3.bf16.msra.mxu0 %v5795_v5  ;;  %4962 = vmatprep.subr.bf16.mxu1 %v5796_v6  ;;  %s6073_s24 = scalar_lea.vmem %s7069_s0, %s5764_s13 }
  0x12   : > { %5170 = vmatprep.subr.bf16.mxu0 %v5797_v7  ;;  %v262_v12 = vld [vmem:[%s6073_s24] sm:$0xf]  ;;  %v263_v13 = vld [vmem:[%s6073_s24 + $0x4] sm:$0xf]  ;;  %v6086_v15 = vld [vmem:[%s6073_s24 + $0x8] sm:$0xff]   ;;  %s6986_s30 = scalar_lea.vmem %s7074_s5, %s5765_s26 }
  0x13   : > { %v6083_v14 = vcombine.low %v262_v12, %v263_v13  ;;  %v6089_v16 = vld [vmem:[%s6073_s24 + $0x10] sm:$0xff]   ;;  %v1398_v18 = vld [vmem:[%s6073_s24 + $0x8] sm:$0xe]  ;;  %v6096_v19 = vld [vmem:[%s6073_s24 + $0xc] sm:$0xf]  ;;  %v434_v23 = vshll.u32 %v6086_v15, 16 }
  0x14   : > { %4963 = vmatpush3.bf16.msra.mxu1 %v5796_v6  ;;  %v6105_v24 = vcombine.low %v1398_v18, %v6096_v19  ;;  %v6108_v25 = vld [vmem:[%s6073_s24 + $0x10] sm:$0xff]   ;;  %v1892_v26 = vshrl.u32 %v6089_v16, 16  ;;  %v1895_v27 = vshll.u32 %v6089_v16, 16  ;;  %v438_v40 = vshrl.u32 %v6086_v15, 16  ;;  %v6123_v41 = vld [vmem:[%s6073_s24 + $0x18] sm:$0xff]   ;;  %v6138_v56 = vld [vmem:[%s6073_s24 + $0x20] sm:$0xff]  }
  0x15   : > { %5171 = vmatpush3.bf16.msra.mxu0 %v5797_v7  ;;  %4964 = vmatprep.subr.bf16.mxu1 %v5798_v8  ;;  %v427_v21 = vshrl.u32 %v6083_v14, 16  ;;  %v429_v22 = vshll.u32 %v6083_v14, 16  ;;  %v436_v29 = vrot.slane %v434_v23, 1  ;;  %v442_v35 = vshll.u32 %v6108_v25, 16  ;;  %v6126_v44 = vld [vmem:[%s6073_s24 + $0x18] sm:$0xff]   ;;  %v6141_v57 = vld [vmem:[%s6073_s24 + $0x20] sm:$0xff]  }
  0x16   : > { %5172 = vmatprep.subr.bf16.mxu0 %v5799_v9  ;;  %v1884_v30 = vshrl.u32 %v6105_v24, 16  ;;  %v1887_v31 = vshll.u32 %v6105_v24, 16  ;;  %v1894_v33 = vrot.slane %v1892_v26, 1  ;;  %v1897_v34 = vrot.slane %v1895_v27, 2  ;;  %v6148_v1 = vld [vmem:[%s6073_s24 + $0x28] sm:$0xff]   ;;  %v6167_v26 = vld [vmem:[%s6073_s24 + $0x30] sm:$0xff]  }
  0x17   : > { %v431_v28 = vrot.slane %v429_v22, 1  ;;  %v444_v43 = vrot.slane %v442_v35, 1  ;;  %v1901_v47 = vshrl.u32 %v6123_v41, 16  ;;  %v1904_v48 = vshll.u32 %v6123_v41, 16  ;;  %v5817_v7 = vld [vmem:[%s7070_s1 + $0x148] sm:$0xff]   ;;  %v5822_v35 = vld [vmem:[%s7070_s1 + $0x150] sm:$0xff]  }
  0x18   : > { %4965 = vmatpush3.bf16.msra.mxu1 %v5798_v8  ;;  %v1886_v38 = vrot.slane %v1884_v30, 1  ;;  %v1889_v39 = vrot.slane %v1887_v31, 2  ;;  %v1898_v42 = vor.u32 %v1897_v34, %v1894_v33  ;;  %v446_v49 = vshrl.u32 %v6108_v25, 16  ;;  %v6156_v8 = vld [vmem:[%s6073_s24 + $0x28] sm:$0xff]  }
  0x19   : > { %5173 = vmatpush3.bf16.msra.mxu0 %v5799_v9  ;;  %4966 = vmatprep.subr.bf16.mxu1 %v5800_v10  ;;  %v432_v37 = vor.u32 %v431_v28, %v427_v21  ;;  %v450_v50 = vshll.u32 %v6126_v44, 16  ;;  %v440_v52 = vor.u32 %v438_v40, %v436_v29  ;;  %v1903_v53 = vrot.slane %v1901_v47, 1 }
  0x1a   : > { %5174 = vmatprep.subr.bf16.mxu0 %v5801_v11  ;;  %v1890_v46 = vor.u32 %v1889_v39, %v1886_v38  ;;  %v1906_v54 = vrot.slane %v1904_v48, 2  ;;  %v448_v58 = vor.u32 %v446_v49, %v444_v43  ;;  %v454_v60 = vshrl.u32 %v6126_v44, 16  ;;  %v6189_v48 = vld [vmem:[%s6073_s24 + $0x40] sm:$0xff]  }
  0x1b   : > { %v437_v45 = vsel %vm425_vm0, %v432_v37, %v436_v29  ;;  %v452_v59 = vrot.slane %v450_v50, 1  ;;  %v1910_v62 = vshrl.u32 %v6138_v56, 16  ;;  %v1913_v63 = vshll.u32 %v6138_v56, 16 }
  0x1c   : > { %4967 = vmatpush3.bf16.msra.mxu1 %v5800_v10  ;;  %4972 = vmatprep.mubr.bf16.mxu1 %v437_v45  ;;  %v1899_v51 = vsel %vm1882_vm1, %v1890_v46, %v1898_v42  ;;  %v1907_v61 = vor.u32 %v1906_v54, %v1903_v53  ;;  %v458_v0 = vshll.u32 %v6141_v57, 16  ;;  %v462_v2 = vshrl.u32 %v6141_v57, 16  ;;  %v6194_v53 = vld [vmem:[%s6073_s24 + $0x40] sm:$0xff]  }
  0x1d   : > { %5175 = vmatpush3.bf16.msra.mxu0 %v5801_v11  ;;  %4968 = vmatprep.subr.bf16.mxu1 %v5802_v17  ;;  %v445_v3 = vsel %vm425_vm0, %v440_v52, %v444_v43  ;;  %v1912_v4 = vrot.slane %v1910_v62, 1  ;;  %v1915_v5 = vrot.slane %v1913_v63, 2  ;;  %v453_v10 = vsel %vm425_vm0, %v448_v58, %v452_v59 }
  0x1e   : > { %5176 = vmatprep.subr.bf16.mxu0 %v5803_v20  ;;  %5180 = vmatprep.mubr.bf16.mxu0 %v1899_v51  ;;  %v460_v6 = vrot.slane %v458_v0, 1  ;;  %v1908_v9 = vsel %vm1882_vm1, %v1898_v42, %v1907_v61  ;;  %v1919_v11 = vshrl.u32 %v6148_v1, 16  ;;  %v1922_v12 = vshll.u32 %v6148_v1, 16  ;;  %v6183_v42 = vld [vmem:[%s6073_s24 + $0x38] sm:$0xff]  }
  0x1f   : > { %v1916_v13 = vor.u32 %v1915_v5, %v1912_v4  ;;  %v466_v18 = vshll.u32 %v6156_v8, 16  ;;  %v470_v27 = vshrl.u32 %v6156_v8, 16  ;;  %v474_v34 = vshll.u32 %v6167_v26, 16 }
  0x20   : > { %4969 = vmatpush3.bf16.msra.mxu1 %v5802_v17  ;;  %v456_v17 = vor.u32 %v454_v60, %v452_v59  ;;  %v1921_v21 = vrot.slane %v1919_v11, 1  ;;  %v1924_v22 = vrot.slane %v1922_v12, 2  ;;  %v464_v23 = vor.u32 %v462_v2, %v460_v6  ;;  %v6214_v12 = vld [vmem:[%s6073_s24 + $0x50] sm:$0xff]  }
  0x21   : > { %5177 = vmatpush3.bf16.msra.mxu0 %v5803_v20  ;;  %4970 = vmatprep.subr.bf16.mxu1 %v5804_v32  ;;  %v6164_v20 = vld [vmem:[%s6073_s24 + $0x30] sm:$0xff]   ;;  %v1917_v28 = vsel %vm1882_vm1, %v1907_v61, %v1916_v13  ;;  %v468_v29 = vrot.slane %v466_v18, 1  ;;  %v476_v38 = vrot.slane %v474_v34, 1  ;;  %v478_v47 = vshrl.u32 %v6167_v26, 16  ;;  %v6200_v61 = vld [vmem:[%s6073_s24 + $0x48] sm:$0xff]   ;;  %v5832_v34 = vld [vmem:[%s7070_s1 + $0x160] sm:$0xff]  }
  0x22   : > { %5178 = vmatprep.subr.bf16.mxu0 %v5805_v36  ;;  %v1928_v30 = vshrl.u32 %v6164_v20, 16  ;;  %v1931_v31 = vshll.u32 %v6164_v20, 16  ;;  %v1925_v33 = vor.u32 %v1924_v22, %v1921_v21  ;;  %v461_v43 = vsel %vm425_vm0, %v456_v17, %v460_v6  ;;  %v6220_v22 = vld [vmem:[%s6073_s24 + $0x50] sm:$0xff]  }
  0x23   : > { %v469_v45 = vsel %vm425_vm0, %v464_v23, %v468_v29  ;;  %v482_v52 = vshll.u32 %v6183_v42, 16  ;;  %v1949_v58 = vshll.u32 %v6189_v48, 16  ;;  %v472_v59 = vor.u32 %v470_v27, %v468_v29  ;;  %v6223_v23 = vld [vmem:[%s6073_s24 + $0x58] sm:$0xff]  }
  0x24   : > { %4971 = vmatpush3.bf16.msra.mxu1 %v5804_v32  ;;  %v6174_v32 = vld [vmem:[%s6073_s24 + $0x38] sm:$0xff]   ;;  %v1933_v37 = vrot.slane %v1931_v31, 2  ;;  %v1926_v49 = vsel %vm1882_vm1, %v1916_v13, %v1925_v33  ;;  %v480_v63 = vor.u32 %v478_v47, %v476_v38  ;;  %v490_v5 = vshll.u32 %v6194_v53, 16 }
  0x25   : > { %5179 = vmatpush3.bf16.msra.mxu0 %v5805_v36  ;;  %v1930_v36 = vrot.slane %v1928_v30, 1  ;;  %v1937_v39 = vshrl.u32 %v6174_v32, 16  ;;  %v1940_v40 = vshll.u32 %v6174_v32, 16  ;;  %v484_v60 = vrot.slane %v482_v52, 1 }
  0x26   : > { %5216 = vmatprep.subr.bf16.mxu0 %v5812_v55  ;;  %v1951_v2 = vrot.slane %v1949_v58, 2  ;;  %v1955_v6 = vshrl.u32 %v6200_v61, 16  ;;  %v486_v11 = vshrl.u32 %v6183_v42, 16  ;;  %v494_v21 = vshrl.u32 %v6194_v53, 16 }
  0x27   : > { %4973 = vmatmul.mubr.bf16.vlgmr.msra.gmra.mrb[0].mxu1 %v445_v3  ;;  %v1934_v46 = vor.u32 %v1933_v37, %v1930_v36  ;;  %v1939_v50 = vrot.slane %v1937_v39, 1  ;;  %v1942_v51 = vrot.slane %v1940_v40, 2  ;;  %v5827_v3 = vld [vmem:[%s7070_s1 + $0x158] sm:$0xff]   ;;  %v485_v17 = vsel %vm425_vm0, %v480_v63, %v484_v60 }
  0x28   : > { %5181 = vmatmul.mubr.bf16.vlgmr.msra.gmra.mrb[0].mxu0 %v1908_v9  ;;  %4976 = vmatprep.mubr.bf16.mxu1 %v453_v10  ;;  %v6209_v9 = vld [vmem:[%s6073_s24 + $0x48] sm:$0xff]   ;;  %v477_v10 = vsel %vm425_vm0, %v472_v59, %v476_v38  ;;  %v1957_v18 = vrot.slane %v1955_v6, 1  ;;  %v1964_v29 = vshrl.u32 %v6214_v12, 16  ;;  %v1967_v30 = vshll.u32 %v6214_v12, 16  ;;  %v6234_v38 = vld [vmem:[%s6073_s24 + $0x58] sm:$0xff]   ;;  %v5836_v59 = vld [vmem:[%s7070_s1] sm:$0xff]  }
  0x29   : > { %5217 = vmatpush3.bf16.msra.mxu0 %v5812_v55  ;;  %5184 = vmatprep.mubr.bf16.mxu0 %v1917_v28  ;;  %v1935_v54 = vsel %vm1882_vm1, %v1925_v33, %v1934_v46  ;;  %v1946_v55 = vshrl.u32 %v6189_v48, 16  ;;  %v1943_v62 = vor.u32 %v1942_v51, %v1939_v50  ;;  %v498_v28 = vshll.u32 %v6209_v9, 16  ;;  %v6243_v51 = vld [vmem:[%s6073_s24 + $0x60] sm:$0xff]  }
  0x2a   : > { %5218 = vmatprep.subr.bf16.mxu0 %v5817_v7  ;;  %v492_v33 = vrot.slane %v490_v5, 1  ;;  %v1969_v36 = vrot.slane %v1967_v30, 2  ;;  %v502_v37 = vshrl.u32 %v6209_v9, 16  ;;  %v488_v39 = vor.u32 %v486_v11, %v484_v60  ;;  %5008 = vmatprep.subr.bf16.mxu1 %v5836_v59 }
  0x2b   : > { %v1948_v0 = vrot.slane %v1946_v55, 1  ;;  %v1944_v13 = vsel %vm1882_vm1, %v1934_v46, %v1943_v62  ;;  %v506_v40 = vshll.u32 %v6220_v22, 16  ;;  %v6240_v46 = vld [vmem:[%s6073_s24 + $0x60] sm:$0xff]   ;;  %v500_v50 = vrot.slane %v498_v28, 1  ;;  %5009 = vmatpush3.bf16.msra.mxu1 %v5836_v59  ;;  %v5839_v28 = vld [vmem:[%s7070_s1 + $0x168] sm:$0xff]   ;;  %v6286_v59 = vld [vmem:[%s6073_s24 + $0x70] sm:$0xff]  }
  0x2c   : > { %v1982_v55 = vshrl.u32 %v6240_v46, 16  ;;  %v1985_v58 = vshll.u32 %v6240_v46, 16  ;;  %v493_v60 = vsel %vm425_vm0, %v488_v39, %v492_v33  ;;  %v510_v6 = vshrl.u32 %v6220_v22, 16 }
  0x2d   : > { %5219 = vmatpush3.bf16.msra.mxu0 %v5817_v7  ;;  %v1952_v4 = vor.u32 %v1951_v2, %v1948_v0  ;;  %v1958_v7 = vshll.u32 %v6200_v61, 16  ;;  %v6253_v2 = vld [vmem:[%s6073_s24 + $0x68] sm:$0xff]  }
  0x2e   : > { %5220 = vmatprep.subr.bf16.mxu0 %v5822_v35  ;;  %v1987_v11 = vrot.slane %v1985_v58, 2 }
  0x2f   : > { %4977 = vmatmul.mubr.bf16.gmra.mrb[4].mxu1 %v461_v43  ;;  %v1960_v27 = vrot.slane %v1958_v7, 2  ;;  %v1953_v31 = vsel %vm1882_vm1, %v1943_v62, %v1952_v4  ;;  %v1973_v43 = vshrl.u32 %v6223_v23, 16  ;;  %v508_v62 = vrot.slane %v506_v40, 1 }
  0x30   : > { %5185 = vmatmul.mubr.bf16.gmra.mrb[4].mxu0 %v1926_v49  ;;  %4980 = vmatprep.mubr.bf16.mxu1 %v469_v45  ;;  %v1976_v45 = vshll.u32 %v6223_v23, 16  ;;  %v496_v49 = vor.u32 %v494_v21, %v492_v33  ;;  %v1984_v7 = vrot.slane %v1982_v55, 1  ;;  %v1991_v21 = vshrl.u32 %v6253_v2, 16 }
  0x31   : > { %5188 = vmatprep.mubr.bf16.mxu0 %v1935_v54  ;;  %5221 = vmatpush3.bf16.msra.mxu0 %v5822_v35  ;;  %v1966_v35 = vrot.slane %v1964_v29, 1  ;;  %v1961_v47 = vor.u32 %v1960_v27, %v1957_v18  ;;  %v514_v54 = vshll.u32 %v6234_v38, 16  ;;  %v1975_v63 = vrot.slane %v1973_v43, 1  ;;  %v6269_v29 = vld [vmem:[%s6073_s24 + $0x68] sm:$0xff]  }
  0x32   : > { %5222 = vmatprep.subr.bf16.mxu0 %v5827_v3  ;;  %v1978_v0 = vrot.slane %v1976_v45, 2  ;;  %v501_v5 = vsel %vm425_vm0, %v496_v49, %v500_v50  ;;  %v504_v18 = vor.u32 %v502_v37, %v500_v50  ;;  %v1994_v27 = vshll.u32 %v6253_v2, 16  ;;  %v5843_v50 = vld [vmem:[%s7070_s1 + $0x10] sm:$0xff]  }
  0x33   : > { %v1970_v52 = vor.u32 %v1969_v36, %v1966_v35  ;;  %v518_v33 = vshrl.u32 %v6234_v38, 16  ;;  %v1988_v35 = vor.u32 %v1987_v11, %v1984_v7  ;;  %v530_v37 = vshll.u32 %v6269_v29, 16  ;;  %v5846_v7 = vld [vmem:[%s7070_s1 + $0x170] sm:$0xff]  }
  0x34   : > { %v1979_v30 = vor.u32 %v1978_v0, %v1975_v63  ;;  %v509_v43 = vsel %vm425_vm0, %v504_v18, %v508_v62  ;;  %v1993_v45 = vrot.slane %v1991_v21, 1  ;;  %v526_v49 = vshrl.u32 %v6243_v51, 16 }
  0x35   : > { %5223 = vmatpush3.bf16.msra.mxu0 %v5827_v3  ;;  %v1962_v3 = vsel %vm1882_vm1, %v1952_v4, %v1961_v47  ;;  %v5838_v4 = vld [vmem:[%s7070_s1 + $0x8] sm:$0xff]   ;;  %v532_v0 = vrot.slane %v530_v37, 1  ;;  %v534_v18 = vshrl.u32 %v6269_v29, 16  ;;  %v538_v21 = vshll.u32 %v6286_v59, 16 }
  0x36   : > { %5224 = vmatprep.subr.bf16.mxu0 %v5832_v34  ;;  %5010 = vmatprep.subr.bf16.mxu1 %v5838_v4 }
  0x37   : > { %4981 = vmatmul.mubr.bf16.gmra.mrb[8].mxu1 %v477_v10  ;;  %v1971_v10 = vsel %vm1882_vm1, %v1961_v47, %v1970_v52  ;;  %v1996_v47 = vrot.slane %v1994_v27, 2 }
  0x38   : > { %5189 = vmatmul.mubr.bf16.gmra.mrb[8].mxu0 %v1944_v13  ;;  %4984 = vmatprep.mubr.bf16.mxu1 %v485_v17  ;;  %v522_v13 = vshll.u32 %v6243_v51, 16  ;;  %v516_v17 = vrot.slane %v514_v54, 1  ;;  %v1980_v54 = vsel %vm1882_vm1, %v1970_v52, %v1979_v30 }
  0x39   : > { %5192 = vmatprep.mubr.bf16.mxu0 %v1953_v31  ;;  %5225 = vmatpush3.bf16.msra.mxu0 %v5832_v34  ;;  %v512_v31 = vor.u32 %v510_v6, %v508_v62  ;;  %v6273_v34 = vld [vmem:[%s6073_s24 + $0x70] sm:$0xff]   ;;  %v6290_v62 = vld [vmem:[%s6073_s24 + $0x78] sm:$0xff]   ;;  %v1997_v11 = vor.u32 %v1996_v47, %v1993_v45  ;;  %v6319_v47 = vld [vmem:[%s6073_s24 + $0x88] sm:$0xff]  }
  0x3a   : > { %v524_v36 = vrot.slane %v522_v13, 1  ;;  %5011 = vmatpush3.bf16.msra.mxu1 %v5838_v4  ;;  %5226 = vmatprep.subr.bf16.mxu0 %v5839_v28  ;;  %v2000_v39 = vshrl.u32 %v6273_v34, 16  ;;  %v2003_v40 = vshll.u32 %v6273_v34, 16  ;;  %v520_v52 = vor.u32 %v518_v33, %v516_v17 }
  0x3b   : > { %v517_v55 = vsel %vm425_vm0, %v512_v31, %v516_v17  ;;  %5012 = vmatprep.subr.bf16.mxu1 %v5843_v50  ;;  %v2012_v6 = vshll.u32 %v6290_v62, 16  ;;  %v6306_v17 = vld [vmem:[%s6073_s24 + $0x80] sm:$0xff]  }
  0x3c   : > { %v2002_v58 = vrot.slane %v2000_v39, 1  ;;  %v2005_v63 = vrot.slane %v2003_v40, 2  ;;  %v528_v13 = vor.u32 %v526_v49, %v524_v36  ;;  %v2018_v33 = vshrl.u32 %v6306_v17, 16  ;;  %v5850_v39 = vld [vmem:[%s7070_s1 + $0x20] sm:$0xff]  }
  0x3d   : > { %5227 = vmatpush3.bf16.msra.mxu0 %v5839_v28  ;;  %v542_v28 = vshrl.u32 %v6286_v59, 16  ;;  %v2014_v31 = vrot.slane %v2012_v6, 2  ;;  %v2021_v37 = vshll.u32 %v6306_v17, 16  ;;  %v1998_v40 = vsel %vm1882_vm1, %v1988_v35, %v1997_v11 }
  0x3e   : > { %5013 = vmatpush3.bf16.msra.mxu1 %v5843_v50  ;;  %v2006_v4 = vor.u32 %v2005_v63, %v2002_v58  ;;  %5228 = vmatprep.subr.bf16.mxu0 %v5846_v7  ;;  %v2020_v49 = vrot.slane %v2018_v33, 1  ;;  %v6323_v58 = vld [vmem:[%s6073_s24 + $0x80] sm:$0xff]   ;;  %v6330_v63 = vld [vmem:[%s6073_s24 + $0x88] sm:$0xff]  }
  0x3f   : > { %4985 = vmatmul.mubr.bf16.gmra.mrb[12].mxu1 %v493_v60  ;;  %v1989_v60 = vsel %vm1882_vm1, %v1979_v30, %v1988_v35  ;;  %v525_v30 = vsel %vm425_vm0, %v520_v52, %v524_v36  ;;  %v2023_v50 = vrot.slane %v2021_v37, 2  ;;  %v5852_v35 = vld [vmem:[%s7070_s1 + $0x28] sm:$0xff]  }
  0x40   : > { %5193 = vmatmul.mubr.bf16.gmra.mrb[12].mxu0 %v1962_v3  ;;  %4988 = vmatprep.mubr.bf16.mxu1 %v501_v5  ;;  %v5845_v3 = vld [vmem:[%s7070_s1 + $0x18] sm:$0xff]   ;;  %v2009_v5 = vshrl.u32 %v6290_v62, 16  ;;  %v2007_v36 = vsel %vm1882_vm1, %v1997_v11, %v2006_v4 }
  0x41   : > { %5196 = vmatprep.mubr.bf16.mxu0 %v1971_v10  ;;  %v6301_v10 = vld [vmem:[%s6073_s24 + $0x78] sm:$0xff]   ;;  %5014 = vmatprep.subr.bf16.mxu1 %v5845_v3  ;;  %v2024_v6 = vor.u32 %v2023_v50, %v2020_v49 }
  0x42   : > { %v2011_v27 = vrot.slane %v2009_v5, 1  ;;  %5229 = vmatpush3.bf16.msra.mxu0 %v5846_v7  ;;  %5015 = vmatpush3.bf16.msra.mxu1 %v5845_v3  ;;  %v546_v45 = vshll.u32 %v6301_v10, 16  ;;  %v6334_v7 = vld [vmem:[%s6073_s24 + $0x90] sm:$0xff]  }
  0x43   : > { %5016 = vmatprep.subr.bf16.mxu1 %v5850_v39  ;;  %v2039_v33 = vshll.u32 %v6334_v7, 16 }
  0x44   : > { %v2015_v3 = vor.u32 %v2014_v31, %v2011_v27  ;;  %v548_v5 = vrot.slane %v546_v45, 1  ;;  %v5855_v27 = vld [vmem:[%s7070_s1 + $0x178] sm:$0xff]   ;;  %v2036_v31 = vshrl.u32 %v6334_v7, 16  ;;  %v5857_v45 = vld [vmem:[%s7070_s1 + $0x30] sm:$0xff]  }
  0x45   : > { %5230 = vmatprep.subr.bf16.mxu0 %v5855_v27  ;;  %v2041_v50 = vrot.slane %v2039_v33, 2 }
  0x46   : > { %5017 = vmatpush3.bf16.msra.mxu1 %v5850_v39  ;;  %v2016_v37 = vsel %vm1882_vm1, %v2006_v4, %v2015_v3  ;;  %v2038_v49 = vrot.slane %v2036_v31, 1  ;;  %5231 = vmatpush3.bf16.msra.mxu0 %v5855_v27  ;;  %v5859_v4 = vld [vmem:[%s7070_s1 + $0x38] sm:$0xff]   ;;  %v5861_v27 = vld [vmem:[%s7070_s1 + $0x180] sm:$0xff]  }
  0x47   : > { %4989 = vmatmul.mubr.bf16.gmra.mrb[16].mxu1 %v509_v43  ;;  %v533_v43 = vsel %vm425_vm0, %v528_v13, %v532_v0  ;;  %5018 = vmatprep.subr.bf16.mxu1 %v5852_v35  ;;  %v550_v13 = vshrl.u32 %v6301_v10, 16 }
  0x48   : > { %5197 = vmatmul.mubr.bf16.gmra.mrb[16].mxu0 %v1980_v54  ;;  %4992 = vmatprep.mubr.bf16.mxu1 %v517_v55  ;;  %v536_v54 = vor.u32 %v534_v18, %v532_v0  ;;  %v540_v55 = vrot.slane %v538_v21, 1  ;;  %v2030_v0 = vshll.u32 %v6319_v47, 16  ;;  %v554_v18 = vshll.u32 %v6323_v58, 16 }
  0x49   : > { %5200 = vmatprep.mubr.bf16.mxu0 %v1989_v60  ;;  %v2027_v60 = vshrl.u32 %v6319_v47, 16  ;;  %v558_v21 = vshrl.u32 %v6323_v58, 16  ;;  %v2042_v33 = vor.u32 %v2041_v50, %v2038_v49  ;;  %5268 = vmatprep.subr.bf16.mxu0 %v5861_v27 }
  0x4a   : > { %v544_v52 = vor.u32 %v542_v28, %v540_v55  ;;  %v541_v11 = vsel %vm425_vm0, %v536_v54, %v540_v55  ;;  %5019 = vmatpush3.bf16.msra.mxu1 %v5852_v35  ;;  %v5858_v54 = vld [vmem:[%s6073_s24 + $0x98] ss:$0 sps:$4 sm:$0x33]   ;;  %v556_v55 = vrot.slane %v554_v18, 1  ;;  %v552_v35 = vor.u32 %v550_v13, %v548_v5  ;;  %v2332_v18 = vld [vmem:[%s6073_s24 + $0x8] sm:$0xc] }
  0x4b   : > { %v2029_v28 = vrot.slane %v2027_v60, 1  ;;  %5020 = vmatprep.subr.bf16.mxu1 %v5857_v45  ;;  %v2048_v31 = vshll.u32 %v5858_v54, 16 }
  0x4c   : > { %v549_v39 = vsel %vm425_vm0, %v544_v52, %v548_v5  ;;  %v2045_v52 = vshrl.u32 %v5858_v54, 16  ;;  %v566_v5 = vshrl.u32 %v6330_v63, 16 }
  0x4e   : > { %5021 = vmatpush3.bf16.msra.mxu1 %v5857_v45 }
  0x4f   : > { %4993 = vmatmul.mubr.bf16.gmra.mrb[20].mxu1 %v525_v30  ;;  %v562_v30 = vshll.u32 %v6330_v63, 16  ;;  %5022 = vmatprep.subr.bf16.mxu1 %v5859_v4 }
  0x50   : > { %5201 = vmatmul.mubr.bf16.gmra.mrb[20].mxu0 %v1998_v40  ;;  %4996 = vmatprep.mubr.bf16.mxu1 %v533_v43  ;;  %v2032_v40 = vrot.slane %v2030_v0, 2  ;;  %v6349_v43 = vld [vmem:[%s6073_s24 + $0x90] ss:$0 sps:$4 sm:$0x11]  }
  0x51   : > { %5204 = vmatprep.mubr.bf16.mxu0 %v2007_v36  ;;  %v2025_v36 = vsel %vm1882_vm1, %v2015_v3, %v2024_v6  ;;  %v564_v60 = vrot.slane %v562_v30, 1  ;;  %v560_v3 = vor.u32 %v558_v21, %v556_v55  ;;  %v2050_v30 = vrot.slane %v2048_v31, 2 }
  0x52   : > { %v2033_v0 = vor.u32 %v2032_v40, %v2029_v28  ;;  %v2047_v28 = vrot.slane %v2045_v52, 1  ;;  %5023 = vmatpush3.bf16.msra.mxu1 %v5859_v4  ;;  %v4582_v40 = vcombine.low %v2332_v18, %v6096_v19 }
  0x53   : > { %v565_v21 = vsel %vm425_vm0, %v560_v3, %v564_v60  ;;  %v568_v49 = vor.u32 %v566_v5, %v564_v60  ;;  %v2359_v3 = vrot.slane %v6138_v56, 2  ;;  %v2363_v56 = vrot.slane %v6164_v20, 2  ;;  %v5870_v20 = vld [vmem:[%s7070_s1 + $0x98] sm:$0xff]   ;;  %v5865_v5 = vld [vmem:[%s7070_s1 + $0x1a0] sm:$0xff]  }
  0x54   : > { %v2034_v13 = vsel %vm1882_vm1, %v2024_v6, %v2033_v0  ;;  %v2051_v6 = vor.u32 %v2050_v30, %v2047_v28  ;;  %v2354_v50 = vrot.slane %v4582_v40, 2  ;;  %v2371_v28 = vrot.slane %v6214_v12, 2  ;;  %v5871_v30 = vld [vmem:[%s7070_s1 + $0x1b0] sm:$0xff]   ;;  %v5876_v12 = vld [vmem:[%s7070_s1 + $0xb8] sm:$0xff]  }
  0x55   : > { %v2373_v40 = vrot.slane %v6223_v23, 2 }
  0x56   : > { %v2052_v19 = vsel %vm1882_vm1, %v2042_v33, %v2051_v6 }
  0x57   : > { %4997 = vmatmul.mubr.bf16.gmra.mrb[24].mxu1 %v541_v11  ;;  %v570_v11 = vshll.u32 %v6349_v43, 16 }
  0x58   : > { %5205 = vmatmul.mubr.bf16.gmra.mrb[24].mxu0 %v2016_v37  ;;  %5000 = vmatprep.mubr.bf16.mxu1 %v549_v39  ;;  %v557_v37 = vsel %vm425_vm0, %v552_v35, %v556_v55  ;;  %v2043_v39 = vsel %vm1882_vm1, %v2033_v0, %v2042_v33  ;;  %v2355_v55 = vrot.slane %v6089_v16, 2  ;;  %v2387_v35 = vrot.slane %v6334_v7, 2 }
  0x59   : > { %5208 = vmatprep.mubr.bf16.mxu0 %v2025_v36  ;;  %v572_v45 = vrot.slane %v570_v11, 1  ;;  %v5866_v36 = vld [vmem:[%s7070_s1 + $0x80] sm:$0xff]   ;;  %v2389_v0 = vrot.slane %v5858_v54, 2  ;;  %v2357_v16 = vrot.slane %v6123_v41, 2  ;;  %v5862_v54 = vld [vmem:[%s7070_s1 + $0x188] sm:$0xff]   ;;  %v2361_v41 = vrot.slane %v6148_v1, 2 }
  0x5a   : > { %5060 = vmatprep.subr.bf16.mxu1 %v5866_v36  ;;  %v2356_v52 = vsel %vm2353_vm2, %v2354_v50, %v2355_v55  ;;  %v5863_v11 = vld [vmem:[%s7070_s1 + $0x190] sm:$0xff]   ;;  %v5864_v1 = vld [vmem:[%s7070_s1 + $0x198] sm:$0xff]  }
  0x5b   : > { %v573_v4 = vsel %vm425_vm0, %v568_v49, %v572_v45  ;;  %v6382_v60 = vsel %vm2353_vm2, %v2387_v35, %v2389_v0  ;;  %v2358_v31 = vsel %vm2353_vm2, %v2355_v55, %v2357_v16  ;;  %v2360_v33 = vsel %vm2353_vm2, %v2357_v16, %v2359_v3  ;;  %v2670_v55 = vld [vmem:[%s6073_s24 + $0x10] sm:$0xc]  ;;  %v5933_v0 = vld [vmem:[%s6073_s24 + $0x8] sm:$0xff]  }
  0x5c   : > { %v2362_v18 = vsel %vm2353_vm2, %v2359_v3, %v2361_v41  ;;  %v2375_v45 = vrot.slane %v6240_v46, 2  ;;  %v2377_v46 = vrot.slane %v6253_v2, 2  ;;  %v2379_v49 = vrot.slane %v6273_v34, 2 }
  0x5d   : > { %v1083_v16 = vrot.slane %v5933_v0, 1  ;;  %v5941_v0 = vld [vmem:[%s6073_s24 + $0x48] sm:$0xff]  }
  0x5e   : > { %v2376_v23 = vsel %vm2353_vm2, %v2373_v40, %v2375_v45  ;;  %v2378_v6 = vsel %vm2353_vm2, %v2375_v45, %v2377_v46  ;;  %v2380_v50 = vsel %vm2353_vm2, %v2377_v46, %v2379_v49  ;;  %v5890_v45 = vld [vmem:[%s7070_s1 + $0x1d8] sm:$0xff]  }
  0x5f   : > { %5001 = vmatmul.mubr.bf16.gmra.mrb[28].mxu1 %v557_v37  ;;  %v2367_v37 = vrot.slane %v6189_v48, 2  ;;  %v5873_v48 = vld [vmem:[%s7070_s1 + $0xa8] sm:$0xff]   ;;  %v5939_v46 = vld [vmem:[%s6073_s24 + $0x38] sm:$0xff]  }
  0x60   : > { %5209 = vmatmul.mubr.bf16.gmra.mrb[28].mxu0 %v2034_v13  ;;  %5004 = vmatprep.mubr.bf16.mxu1 %v565_v21  ;;  %v2369_v21 = vrot.slane %v6200_v61, 2  ;;  %v5874_v61 = vld [vmem:[%s7070_s1 + $0x1b8] sm:$0xff]  }
  0x61   : > { %5212 = vmatprep.mubr.bf16.mxu0 %v2043_v39 }
  0x62   : > { %v2370_v39 = vsel %vm2353_vm2, %v2367_v37, %v2369_v21 }
  0x67   : > { %5005 = vmatmul.mubr.bf16.gmra.mrb[32].mxu1 %v573_v4  ;;  %v6484_v4 = vld [vmem:[%s6073_s24 + $0x14] sm:$0xf] }
  0x68   : > { %5213 = vmatmul.mubr.bf16.gmra.mrb[32].mxu0 %v2052_v19  ;;  %5024 = vmatprep.mubr.bf16.mxu1 %v6083_v14  ;;  %v5867_v14 = vld [vmem:[%s7070_s1 + $0x88] sm:$0xff]  }
  0x69   : > { %5232 = vmatprep.mubr.bf16.mxu0 %v2356_v52  ;;  %v6495_v52 = vld [vmem:[%s6073_s24 + $0x18] sm:$0xff]  }
  0x6f   : > { %5025 = vmatmul.mubr.bf16.vlgmr.msra.gmra.mrb[0].mxu1 %v6086_v15  ;;  %v5869_v15 = vld [vmem:[%s7070_s1 + $0x90] sm:$0xff]  }
  0x70   : > { %5233 = vmatmul.mubr.bf16.vlgmr.msra.gmra.mrb[0].mxu0 %v2358_v31  ;;  %5028 = vmatprep.mubr.bf16.mxu1 %v6108_v25  ;;  %v2364_v25 = vsel %vm2353_vm2, %v2361_v41, %v2363_v56  ;;  %v6504_v31 = vld [vmem:[%s6073_s24 + $0x20] sm:$0xff]  }
  0x71   : > { %5269 = vmatpush3.bf16.msra.mxu0 %v5861_v27  ;;  %5236 = vmatprep.mubr.bf16.mxu0 %v2360_v33  ;;  %v2365_v27 = vrot.slane %v6174_v32, 2  ;;  %v5868_v32 = vld [vmem:[%s7070_s1 + $0x1a8] sm:$0xff]   ;;  %v2820_v41 = vrot.slane %v6504_v31, 2 }
  0x72   : > { %5270 = vmatprep.subr.bf16.mxu0 %v5862_v54  ;;  %5061 = vmatpush3.bf16.msra.mxu1 %v5866_v36  ;;  %v6460_v36 = vld [vmem:[%s7070_s1 + $0xc0] sm:$0xff]   ;;  %v6508_v33 = vld [vmem:[%s6073_s24 + $0x28] sm:$0xff]  }
  0x73   : > { %5062 = vmatprep.subr.bf16.mxu1 %v5867_v14  ;;  %v2366_v13 = vsel %vm2353_vm2, %v2363_v56, %v2365_v27  ;;  %v5935_v56 = vld [vmem:[%s6073_s24 + $0x18] sm:$0xff]  }
  0x75   : > { %5271 = vmatpush3.bf16.msra.mxu0 %v5862_v54  ;;  %v5934_v54 = vld [vmem:[%s6073_s24 + $0x10] sm:$0xff]  }
  0x76   : > { %5272 = vmatprep.subr.bf16.mxu0 %v5863_v11  ;;  %5063 = vmatpush3.bf16.msra.mxu1 %v5867_v14  ;;  %v1085_v14 = vrot.slane %v5934_v54, 1 }
  0x77   : > { %5029 = vmatmul.mubr.bf16.gmra.mrb[4].mxu1 %v6126_v44  ;;  %5064 = vmatprep.subr.bf16.mxu1 %v5869_v15  ;;  %v5872_v44 = vld [vmem:[%s7070_s1 + $0xa0] sm:$0xff]  }
  0x78   : > { %5237 = vmatmul.mubr.bf16.gmra.mrb[4].mxu0 %v2362_v18  ;;  %5032 = vmatprep.mubr.bf16.mxu1 %v6141_v57  ;;  %v2368_v57 = vsel %vm2353_vm2, %v2365_v27, %v2367_v37  ;;  %v1086_v18 = vsel %vm1081_vm3, %v1083_v16, %v1085_v14  ;;  %v5884_v27 = vld [vmem:[%s7070_s1 + $0x1c8] sm:$0xff]   ;;  %v6527_v37 = vld [vmem:[%s6073_s24 + $0x38] sm:$0xff]  }
  0x79   : > { %5240 = vmatprep.mubr.bf16.mxu0 %v2364_v25  ;;  %5273 = vmatpush3.bf16.msra.mxu0 %v5863_v11  ;;  %v1087_v11 = vrot.slane %v5935_v56, 1 }
  0x7a   : > { %5274 = vmatprep.subr.bf16.mxu0 %v5864_v1  ;;  %5065 = vmatpush3.bf16.msra.mxu1 %v5869_v15  ;;  %v2822_v15 = vrot.slane %v6508_v33, 2 }
  0x7b   : > { %5066 = vmatprep.subr.bf16.mxu1 %v5870_v20 }
  0x7d   : > { %5275 = vmatpush3.bf16.msra.mxu0 %v5864_v1  ;;  %v1088_v1 = vsel %vm1081_vm3, %v1085_v14, %v1087_v11 }
  0x7e   : > { %5276 = vmatprep.subr.bf16.mxu0 %v5865_v5  ;;  %5067 = vmatpush3.bf16.msra.mxu1 %v5870_v20  ;;  %v6520_v20 = vld [vmem:[%s6073_s24 + $0x30] sm:$0xff]  }
  0x7f   : > { %5033 = vmatmul.mubr.bf16.gmra.mrb[8].mxu1 %v6156_v8  ;;  %5068 = vmatprep.subr.bf16.mxu1 %v5872_v44  ;;  %v5875_v8 = vld [vmem:[%s7070_s1 + $0xb0] sm:$0xff]  }
  0x80   : > { %5241 = vmatmul.mubr.bf16.gmra.mrb[8].mxu0 %v2366_v13  ;;  %5036 = vmatprep.mubr.bf16.mxu1 %v6167_v26  ;;  %v2372_v26 = vsel %vm2353_vm2, %v2369_v21, %v2371_v28  ;;  %v2826_v21 = vrot.slane %v6527_v37, 2 }
  0x81   : > { %5244 = vmatprep.mubr.bf16.mxu0 %v2368_v57  ;;  %5277 = vmatpush3.bf16.msra.mxu0 %v5865_v5  ;;  %v5897_v5 = vld [vmem:[%s7070_s1 + $0xc8] sm:$0xff]   ;;  %v2824_v57 = vrot.slane %v6520_v20, 2 }
  0x82   : > { %5278 = vmatprep.subr.bf16.mxu0 %v5868_v32  ;;  %5069 = vmatpush3.bf16.msra.mxu1 %v5872_v44  ;;  %v5936_v44 = vld [vmem:[%s6073_s24 + $0x20] sm:$0xff]  }
  0x83   : > { %5070 = vmatprep.subr.bf16.mxu1 %v5873_v48  ;;  %v1089_v13 = vrot.slane %v5936_v44, 1 }
  0x85   : > { %5279 = vmatpush3.bf16.msra.mxu0 %v5868_v32  ;;  %v5937_v32 = vld [vmem:[%s6073_s24 + $0x28] sm:$0xff]  }
  0x86   : > { %5280 = vmatprep.subr.bf16.mxu0 %v5871_v30  ;;  %5071 = vmatpush3.bf16.msra.mxu1 %v5873_v48  ;;  %v1091_v48 = vrot.slane %v5937_v32, 1 }
  0x87   : > { %5037 = vmatmul.mubr.bf16.gmra.mrb[12].mxu1 %v6183_v42  ;;  %5072 = vmatprep.subr.bf16.mxu1 %v5875_v8  ;;  %v6455_v42 = vld [vmem:[%s7070_s1 + $0x1c0] sm:$0xff]  }
  0x88   : > { %5245 = vmatmul.mubr.bf16.gmra.mrb[12].mxu0 %v2370_v39  ;;  %5040 = vmatprep.mubr.bf16.mxu1 %v6194_v53  ;;  %v2374_v53 = vsel %vm2353_vm2, %v2371_v28, %v2373_v40  ;;  %v5887_v28 = vld [vmem:[%s7070_s1 + $0x1d0] sm:$0xff]   ;;  %v2825_v39 = vsel %vm2353_vm2, %v2822_v15, %v2824_v57  ;;  %v6552_v40 = vld [vmem:[%s6073_s24 + $0x48] sm:$0xff]  }
  0x89   : > { %5248 = vmatprep.mubr.bf16.mxu0 %v2372_v26  ;;  %5281 = vmatpush3.bf16.msra.mxu0 %v5871_v30  ;;  %v5900_v30 = vld [vmem:[%s7070_s1 + $0xd0] sm:$0xff]   ;;  %v1092_v26 = vsel %vm1081_vm3, %v1089_v13, %v1091_v48 }
  0x8a   : > { %5282 = vmatprep.subr.bf16.mxu0 %v5874_v61  ;;  %5073 = vmatpush3.bf16.msra.mxu1 %v5875_v8  ;;  %v1090_v8 = vsel %vm1081_vm3, %v1087_v11, %v1089_v13  ;;  %v6604_v11 = vld [vmem:[%s6073_s24 + $0x68] sm:$0xff]   ;;  %v6619_v13 = vld [vmem:[%s7070_s1 + $0x200] sm:$0xff]  }
  0x8b   : > { %5074 = vmatprep.subr.bf16.mxu1 %v5876_v12  ;;  %v2838_v44 = vrot.slane %v6604_v11, 2 }
  0x8d   : > { %5283 = vmatpush3.bf16.msra.mxu0 %v5874_v61  ;;  %v6548_v61 = vld [vmem:[%s6073_s24 + $0x40] sm:$0xff]  }
  0x8e   : > { %5075 = vmatpush3.bf16.msra.mxu1 %v5876_v12  ;;  %5320 = vmatprep.subr.bf16.mxu0 %v6455_v42  ;;  %v2827_v12 = vsel %vm2353_vm2, %v2824_v57, %v2826_v21 }
  0x8f   : > { %5041 = vmatmul.mubr.bf16.gmra.mrb[16].mxu1 %v6209_v9  ;;  %5112 = vmatprep.subr.bf16.mxu1 %v6460_v36  ;;  %v2381_v9 = vrot.slane %v6290_v62, 2 }
  0x90   : > { %5249 = vmatmul.mubr.bf16.gmra.mrb[16].mxu0 %v2374_v53  ;;  %5044 = vmatprep.mubr.bf16.mxu1 %v6220_v22  ;;  %v2383_v22 = vrot.slane %v6306_v17, 2  ;;  %v5932_v17 = vld [vmem:[%s6073_s24 + $0x4] sm:$0xf] }
  0x91   : > { %5252 = vmatprep.mubr.bf16.mxu0 %v2376_v23  ;;  %v2382_v2 = vsel %vm2353_vm2, %v2379_v49, %v2381_v9  ;;  %v2828_v23 = vrot.slane %v6548_v61, 2  ;;  %v1095_v49 = vrot.slane %v5939_v46, 1  ;;  %v6640_v46 = vld [vmem:[%s6073_s24 + $0x80] sm:$0xff]  }
  0x92   : > { %v2384_v34 = vsel %vm2353_vm2, %v2381_v9, %v2383_v22  ;;  %v5905_v9 = vld [vmem:[%s7070_s1 + $0xe0] sm:$0xff]  }
  0x97   : > { %5045 = vmatmul.mubr.bf16.gmra.mrb[20].mxu1 %v6234_v38  ;;  %v2385_v38 = vrot.slane %v6319_v47, 2 }
  0x98   : > { %5253 = vmatmul.mubr.bf16.gmra.mrb[20].mxu0 %v2378_v6  ;;  %5048 = vmatprep.mubr.bf16.mxu1 %v6243_v51  ;;  %v1060_v51 = vld [vmem:[%s6073_s24] sm:$0xe]  ;;  %v2830_v6 = vrot.slane %v6552_v40, 2 }
  0x99   : > { %5256 = vmatprep.mubr.bf16.mxu0 %v2380_v50  ;;  %v2386_v62 = vsel %vm2353_vm2, %v2383_v22, %v2385_v38  ;;  %v4489_v19 = vcombine.low %v1060_v51, %v5932_v17  ;;  %v5893_v50 = vld [vmem:[%s7070_s1 + $0x1e0] sm:$0xff]   ;;  %v5907_v17 = vld [vmem:[%s7070_s1 + $0xe8] sm:$0xff]  }
  0x9a   : > { %v2831_v51 = vsel %vm2353_vm2, %v2828_v23, %v2830_v6 }
  0x9b   : > { %v1082_v47 = vrot.slane %v4489_v19, 1  ;;  %v5940_v19 = vld [vmem:[%s6073_s24 + $0x40] sm:$0xff]  }
  0x9d   : > { %v1084_v3 = vsel %vm1081_vm3, %v1082_v47, %v1083_v16  ;;  %v1099_v16 = vrot.slane %v5941_v0, 1 }
  0x9f   : > { %5049 = vmatmul.mubr.bf16.gmra.mrb[24].mxu1 %v6269_v29  ;;  %v2388_v29 = vsel %vm2353_vm2, %v2385_v38, %v2387_v35  ;;  %v2818_v35 = vrot.slane %v6495_v52, 2  ;;  %v6574_v38 = vld [vmem:[%s6073_s24 + $0x50] sm:$0xff]  }
  0xa0   : > { %5257 = vmatmul.mubr.bf16.gmra.mrb[24].mxu0 %v2382_v2  ;;  %5052 = vmatprep.mubr.bf16.mxu1 %v6286_v59  ;;  %v6492_v59 = vcombine.low %v2670_v55, %v6484_v4  ;;  %v2829_v2 = vsel %vm2353_vm2, %v2826_v21, %v2828_v23  ;;  %v6578_v55 = vld [vmem:[%s6073_s24 + $0x58] sm:$0xff]   ;;  %v2832_v47 = vrot.slane %v6574_v38, 2  ;;  %v6625_v21 = vld [vmem:[%s6073_s24 + $0x70] sm:$0xff]  }
  0xa1   : > { %5260 = vmatprep.mubr.bf16.mxu0 %v2384_v34  ;;  %v2821_v25 = vsel %vm2353_vm2, %v2818_v35, %v2820_v41 }
  0xa2   : > { %v2817_v7 = vrot.slane %v6492_v59, 2  ;;  %v2833_v54 = vsel %vm2353_vm2, %v2830_v6, %v2832_v47  ;;  %v6644_v6 = vld [vmem:[%s6073_s24 + $0x88] sm:$0xff]  }
  0xa7   : > { %5053 = vmatmul.mubr.bf16.gmra.mrb[28].mxu1 %v6301_v10  ;;  %v2819_v10 = vsel %vm2353_vm2, %v2817_v7, %v2818_v35  ;;  %v2834_v7 = vrot.slane %v6578_v55, 2  ;;  %v5903_v35 = vld [vmem:[%s7070_s1 + $0x1f0] sm:$0xff]  }
  0xa8   : > { %5261 = vmatmul.mubr.bf16.gmra.mrb[28].mxu0 %v2386_v62  ;;  %5056 = vmatprep.mubr.bf16.mxu1 %v6323_v58  ;;  %v5898_v62 = vld [vmem:[%s7070_s1 + $0x1e8] sm:$0xff]  }
  0xa9   : > { %5264 = vmatprep.mubr.bf16.mxu0 %v2388_v29  ;;  %v1097_v29 = vrot.slane %v5940_v19, 1  ;;  %v2835_v56 = vsel %vm2353_vm2, %v2832_v47, %v2834_v7  ;;  %v6657_v47 = vld [vmem:[%s6073_s24 + $0x98] sm:$0xff]  }
  0xab   : > { %v1100_v14 = vsel %vm1081_vm3, %v1097_v29, %v1099_v16 }
  0xaf   : > { %5057 = vmatmul.mubr.bf16.gmra.mrb[32].mxu1 %v6330_v63 }
  0xb0   : > { %5265 = vmatmul.mubr.bf16.gmra.mrb[32].mxu0 %v6382_v60  ;;  %5076 = vmatprep.mubr.bf16.mxu1 %v1084_v3  ;;  %v2823_v60 = vsel %vm2353_vm2, %v2820_v41, %v2822_v15  ;;  %v5910_v3 = vld [vmem:[%s7070_s1 + $0xf0] sm:$0xff]   ;;  %v6600_v41 = vld [vmem:[%s6073_s24 + $0x60] sm:$0xff]   ;;  %v5909_v15 = vld [vmem:[%s7070_s1 + $0x1f8] sm:$0xff]  }
  0xb1   : > { %5284 = vmatprep.mubr.bf16.mxu0 %v2819_v10  ;;  %v1098_v10 = vsel %vm1081_vm3, %v1095_v49, %v1097_v29  ;;  %v6654_v29 = vld [vmem:[%s6073_s24 + $0x90] sm:$0xff]  }
  0xb7   : > { %5077 = vmatmul.mubr.bf16.vlgmr.msra.gmra.mrb[0].mxu1 %v1086_v18  ;;  %v5912_v18 = vld [vmem:[%s7070_s1 + $0xf8] sm:$0xff]  }
  0xb8   : > { %5285 = vmatmul.mubr.bf16.vlgmr.msra.gmra.mrb[0].mxu0 %v2821_v25  ;;  %5080 = vmatprep.mubr.bf16.mxu1 %v1088_v1  ;;  %v5942_v25 = vld [vmem:[%s6073_s24 + $0x50] sm:$0xff]  }
  0xb9   : > { %5321 = vmatpush3.bf16.msra.mxu0 %v6455_v42  ;;  %5288 = vmatprep.mubr.bf16.mxu0 %v2823_v60  ;;  %v5902_v42 = vld [vmem:[%s7070_s1 + $0xd8] sm:$0xff]   ;;  %v1101_v1 = vrot.slane %v5942_v25, 1  ;;  %v2836_v60 = vrot.slane %v6600_v41, 2 }
  0xba   : > { %5322 = vmatprep.subr.bf16.mxu0 %v5884_v27  ;;  %5113 = vmatpush3.bf16.msra.mxu1 %v6460_v36  ;;  %v5938_v36 = vld [vmem:[%s6073_s24 + $0x30] sm:$0xff]  }
  0xbb   : > { %5114 = vmatprep.subr.bf16.mxu1 %v5897_v5  ;;  %v1093_v53 = vrot.slane %v5938_v36, 1  ;;  %v1102_v57 = vsel %vm1081_vm3, %v1099_v16, %v1101_v1  ;;  %v2837_v32 = vsel %vm2353_vm2, %v2834_v7, %v2836_v60  ;;  %v1113_v16 = vrot.slane %v6323_v58, 1 }
  0xbc   : > { %v2848_v7 = vrot.slane %v6654_v29, 2 }
  0xbd   : > { %5323 = vmatpush3.bf16.msra.mxu0 %v5884_v27  ;;  %v1094_v22 = vsel %vm1081_vm3, %v1091_v48, %v1093_v53  ;;  %v1096_v34 = vsel %vm1081_vm3, %v1093_v53, %v1095_v49  ;;  %v5943_v27 = vld [vmem:[%s6073_s24 + $0x58] sm:$0xff]  }
  0xbe   : > { %5324 = vmatprep.subr.bf16.mxu0 %v5887_v28  ;;  %5115 = vmatpush3.bf16.msra.mxu1 %v5897_v5  ;;  %v1103_v5 = vrot.slane %v5943_v27, 1 }
  0xbf   : > { %5081 = vmatmul.mubr.bf16.gmra.mrb[4].mxu1 %v1090_v8  ;;  %5116 = vmatprep.subr.bf16.mxu1 %v5900_v30  ;;  %v5944_v8 = vld [vmem:[%s6073_s24 + $0x60] sm:$0xff]  }
  0xc0   : > { %5289 = vmatmul.mubr.bf16.gmra.mrb[4].mxu0 %v2825_v39  ;;  %5084 = vmatprep.mubr.bf16.mxu1 %v1092_v26  ;;  %v1104_v48 = vsel %vm1081_vm3, %v1101_v1, %v1103_v5  ;;  %v1105_v39 = vrot.slane %v5944_v8, 1  ;;  %v2840_v26 = vrot.slane %v6625_v21, 2  ;;  %v3176_v8 = vshll.u32 %v6504_v31, 16 }
  0xc1   : > { %5292 = vmatprep.mubr.bf16.mxu0 %v2827_v12  ;;  %5325 = vmatpush3.bf16.msra.mxu0 %v5887_v28  ;;  %v2839_v28 = vsel %vm2353_vm2, %v2836_v60, %v2838_v44  ;;  %v5945_v12 = vld [vmem:[%s6073_s24 + $0x68] sm:$0xff]  }
  0xc2   : > { %5326 = vmatprep.subr.bf16.mxu0 %v5890_v45  ;;  %5117 = vmatpush3.bf16.msra.mxu1 %v5900_v30  ;;  %v6629_v30 = vld [vmem:[%s6073_s24 + $0x78] sm:$0xff]   ;;  %v1106_v36 = vsel %vm1081_vm3, %v1103_v5, %v1105_v39  ;;  %v2841_v53 = vsel %vm2353_vm2, %v2838_v44, %v2840_v26  ;;  %v1545_v44 = vrot.slane %v6105_v24, 1 }
  0xc3   : > { %5118 = vmatprep.subr.bf16.mxu1 %v5902_v42 }
  0xc5   : > { %5327 = vmatpush3.bf16.msra.mxu0 %v5890_v45  ;;  %v1107_v45 = vrot.slane %v5945_v12, 1  ;;  %v3182_v12 = vshrl.u32 %v6508_v33, 16 }
  0xc6   : > { %5328 = vmatprep.subr.bf16.mxu0 %v5893_v50  ;;  %5119 = vmatpush3.bf16.msra.mxu1 %v5902_v42  ;;  %v2842_v42 = vrot.slane %v6629_v30, 2 }
  0xc7   : > { %5085 = vmatmul.mubr.bf16.gmra.mrb[8].mxu1 %v1094_v22  ;;  %5120 = vmatprep.subr.bf16.mxu1 %v5905_v9  ;;  %v1108_v23 = vsel %vm1081_vm3, %v1105_v39, %v1107_v45  ;;  %v2844_v22 = vrot.slane %v6640_v46, 2 }
  0xc8   : > { %5293 = vmatmul.mubr.bf16.gmra.mrb[8].mxu0 %v2829_v2  ;;  %5088 = vmatprep.mubr.bf16.mxu1 %v1096_v34  ;;  %v2843_v49 = vsel %vm2353_vm2, %v2840_v26, %v2842_v42  ;;  %v5947_v2 = vld [vmem:[%s6073_s24 + $0x78] sm:$0xff]  }
  0xc9   : > { %5296 = vmatprep.mubr.bf16.mxu0 %v2831_v51  ;;  %5329 = vmatpush3.bf16.msra.mxu0 %v5893_v50  ;;  %v5946_v50 = vld [vmem:[%s6073_s24 + $0x70] sm:$0xff]   ;;  %v1111_v34 = vrot.slane %v5947_v2, 1  ;;  %v2846_v51 = vrot.slane %v6644_v6, 2 }
  0xca   : > { %5330 = vmatprep.subr.bf16.mxu0 %v5898_v62  ;;  %5121 = vmatpush3.bf16.msra.mxu1 %v5905_v9  ;;  %v1109_v9 = vrot.slane %v5946_v50, 1 }
  0xcb   : > { %5122 = vmatprep.subr.bf16.mxu1 %v5907_v17  ;;  %v2847_v0 = vsel %vm2353_vm2, %v2844_v22, %v2846_v51  ;;  %v2849_v58 = vsel %vm2353_vm2, %v2846_v51, %v2848_v7 }
  0xcc   : > { %v1112_v19 = vsel %vm1081_vm3, %v1109_v9, %v1111_v34 }
  0xcd   : > { %5331 = vmatpush3.bf16.msra.mxu0 %v5898_v62  ;;  %v1110_v62 = vsel %vm1081_vm3, %v1107_v45, %v1109_v9  ;;  %v3185_v45 = vshll.u32 %v6508_v33, 16  ;;  %v5949_v9 = vld [vmem:[%s6073_s24 + $0x18] sm:$0xff]  }
  0xce   : > { %5332 = vmatprep.subr.bf16.mxu0 %v5903_v35  ;;  %5123 = vmatpush3.bf16.msra.mxu1 %v5907_v17  ;;  %v2845_v17 = vsel %vm2353_vm2, %v2842_v42, %v2844_v22  ;;  %v1548_v22 = vrot.slane %v5949_v9, 1 }
  0xcf   : > { %5089 = vmatmul.mubr.bf16.gmra.mrb[12].mxu1 %v1098_v10  ;;  %5124 = vmatprep.subr.bf16.mxu1 %v5910_v3  ;;  %v3156_v10 = vshrl.u32 %v6492_v59, 16  ;;  %v3187_v50 = vrot.slane %v3185_v45, 3 }
  0xd0   : > { %5297 = vmatmul.mubr.bf16.gmra.mrb[12].mxu0 %v2833_v54  ;;  %5092 = vmatprep.mubr.bf16.mxu1 %v1100_v14  ;;  %v3159_v54 = vshll.u32 %v6492_v59, 16  ;;  %v3164_v14 = vshrl.u32 %v6495_v52, 16  ;;  %v1117_v59 = vrot.slane %v6349_v43, 1 }
  0xd1   : > { %5300 = vmatprep.mubr.bf16.mxu0 %v2835_v56  ;;  %5333 = vmatpush3.bf16.msra.mxu0 %v5903_v35  ;;  %v1115_v35 = vrot.slane %v6330_v63, 1  ;;  %v3167_v56 = vshll.u32 %v6495_v52, 16  ;;  %v5911_v63 = vld [vmem:[%s6073_s24 + $0xa0] ss:$0 sps:$4 sm:$0x33]   ;;  %v3158_v1 = vrot.slane %v3156_v10, 2 }
  0xd2   : > { %5334 = vmatprep.subr.bf16.mxu0 %v5909_v15  ;;  %5125 = vmatpush3.bf16.msra.mxu1 %v5910_v3  ;;  %v2850_v3 = vrot.slane %v6657_v47, 2  ;;  %v3161_v60 = vrot.slane %v3159_v54, 3  ;;  %v3166_v27 = vrot.slane %v3164_v14, 2 }
  0xd3   : > { %5126 = vmatprep.subr.bf16.mxu1 %v5912_v18  ;;  %v3169_v5 = vrot.slane %v3167_v56, 3  ;;  %v1118_v43 = vsel %vm1081_vm3, %v1115_v35, %v1117_v59  ;;  %v5914_v56 = vld [vmem:[%s7070_s1 + $0x208] sm:$0xff]  }
  0xd4   : > { %v2851_v25 = vsel %vm2353_vm2, %v2848_v7, %v2850_v3  ;;  %v3162_v39 = vor.u32 %v3161_v60, %v3158_v1  ;;  %v5952_v1 = vld [vmem:[%s6073_s24 + $0x30] sm:$0xff]  }
  0xd5   : > { %5335 = vmatpush3.bf16.msra.mxu0 %v5909_v15  ;;  %v1114_v15 = vsel %vm1081_vm3, %v1111_v34, %v1113_v16  ;;  %v3170_v26 = vor.u32 %v3169_v5, %v3166_v27  ;;  %v5950_v34 = vld [vmem:[%s6073_s24 + $0x20] sm:$0xff]   ;;  %v1554_v60 = vrot.slane %v5952_v1, 1  ;;  %v3209_v27 = vshrl.u32 %v6548_v61, 16 }
  0xd6   : > { %5127 = vmatpush3.bf16.msra.mxu1 %v5912_v18  ;;  %5372 = vmatprep.subr.bf16.mxu0 %v6619_v13  ;;  %v1116_v18 = vsel %vm1081_vm3, %v1113_v16, %v1115_v35  ;;  %v1550_v51 = vrot.slane %v5950_v34, 1  ;;  %v3203_v16 = vshll.u32 %v6527_v37, 16  ;;  %v3212_v5 = vshll.u32 %v6548_v61, 16  ;;  %v5917_v34 = vld [vmem:[%s7070_s1 + $0x220] sm:$0xff]  }
  0xd7   : > { %5093 = vmatmul.mubr.bf16.gmra.mrb[16].mxu1 %v1102_v57  ;;  %v2852_v57 = vrot.slane %v5911_v63, 2  ;;  %v3257_v1 = vshll.u32 %v6604_v11, 16 }
  0xd8   : > { %5301 = vmatmul.mubr.bf16.gmra.mrb[16].mxu0 %v2837_v32  ;;  %5096 = vmatprep.mubr.bf16.mxu1 %v1104_v48  ;;  %v5948_v32 = vld [vmem:[%s6073_s24 + $0x10] sm:$0xff]  }
  0xd9   : > { %5304 = vmatprep.mubr.bf16.mxu0 %v2839_v28  ;;  %v1546_v48 = vrot.slane %v5948_v32, 1  ;;  %v3173_v28 = vshrl.u32 %v6504_v31, 16  ;;  %v2853_v24 = vsel %vm2353_vm2, %v2850_v3, %v2852_v57  ;;  %v1551_v3 = vsel %vm1081_vm3, %v1548_v22, %v1550_v51 }
  0xda   : > { %v3218_v57 = vshrl.u32 %v6552_v40, 16  ;;  %v3221_v32 = vshll.u32 %v6552_v40, 16 }
  0xdb   : > { %v1547_v42 = vsel %vm1081_vm3, %v1545_v44, %v1546_v48  ;;  %v1549_v7 = vsel %vm1081_vm3, %v1546_v48, %v1548_v22  ;;  %v5915_v44 = vld [vmem:[%s7070_s1 + $0x210] sm:$0xff]   ;;  %v3236_v22 = vshrl.u32 %v6578_v55, 16 }
  0xdc   : > { %v3223_v45 = vrot.slane %v3221_v32, 3 }
  0xdf   : > { %5097 = vmatmul.mubr.bf16.gmra.mrb[20].mxu1 %v1106_v36  ;;  %v3175_v36 = vrot.slane %v3173_v28, 2 }
  0xe0   : > { %5305 = vmatmul.mubr.bf16.gmra.mrb[20].mxu0 %v2841_v53  ;;  %5100 = vmatprep.mubr.bf16.mxu1 %v1108_v23  ;;  %v3178_v53 = vrot.slane %v3176_v8, 3  ;;  %v3171_v23 = vsel %vm3154_vm4, %v3162_v39, %v3170_v26  ;;  %v3211_v8 = vrot.slane %v3209_v27, 2  ;;  %v3214_v39 = vrot.slane %v3212_v5, 3 }
  0xe1   : > { %5308 = vmatprep.mubr.bf16.mxu0 %v2843_v49  ;;  %v3184_v49 = vrot.slane %v3182_v12, 2  ;;  %v3220_v12 = vrot.slane %v3218_v57, 2 }
  0xe2   : > { %v3179_v2 = vor.u32 %v3178_v53, %v3175_v36  ;;  %v3215_v36 = vor.u32 %v3214_v39, %v3211_v8  ;;  %v5954_v53 = vld [vmem:[%s6073_s24 + $0x40] sm:$0xff]   ;;  %v5957_v8 = vld [vmem:[%s6073_s24 + $0x58] sm:$0xff]  }
  0xe3   : > { %v3224_v9 = vor.u32 %v3223_v45, %v3220_v12  ;;  %v1564_v39 = vrot.slane %v5957_v8, 1  ;;  %v5958_v12 = vld [vmem:[%s6073_s24 + $0x60] sm:$0xff]  }
  0xe4   : > { %v3180_v35 = vsel %vm3154_vm4, %v3170_v26, %v3179_v2  ;;  %v1566_v45 = vrot.slane %v5958_v12, 1 }
  0xe7   : > { %5101 = vmatmul.mubr.bf16.gmra.mrb[24].mxu1 %v1110_v62  ;;  %v3191_v62 = vshrl.u32 %v6520_v20, 16 }
  0xe8   : > { %5309 = vmatmul.mubr.bf16.gmra.mrb[24].mxu0 %v2845_v17  ;;  %5104 = vmatprep.mubr.bf16.mxu1 %v1112_v19  ;;  %v3194_v17 = vshll.u32 %v6520_v20, 16  ;;  %v3188_v19 = vor.u32 %v3187_v50, %v3184_v49  ;;  %v3227_v49 = vshrl.u32 %v6574_v38, 16  ;;  %v3230_v50 = vshll.u32 %v6574_v38, 16 }
  0xe9   : > { %5312 = vmatprep.mubr.bf16.mxu0 %v2847_v0  ;;  %v3200_v0 = vshrl.u32 %v6527_v37, 16  ;;  %v3193_v10 = vrot.slane %v3191_v62, 2 }
  0xea   : > { %v3196_v54 = vrot.slane %v3194_v17, 3  ;;  %v3189_v14 = vsel %vm3154_vm4, %v3179_v2, %v3188_v19  ;;  %v3239_v2 = vshll.u32 %v6578_v55, 16 }
  0xec   : > { %v3197_v63 = vor.u32 %v3196_v54, %v3193_v10  ;;  %v5955_v10 = vld [vmem:[%s6073_s24 + $0x48] sm:$0xff]  }
  0xed   : > { %v1560_v54 = vrot.slane %v5955_v10, 1  ;;  %v3290_v10 = vshrl.u32 %v6644_v6, 16 }
  0xee   : > { %v3198_v48 = vsel %vm3154_vm4, %v3188_v19, %v3197_v63  ;;  %v3229_v19 = vrot.slane %v3227_v49, 2 }
  0xef   : > { %5105 = vmatmul.mubr.bf16.gmra.mrb[28].mxu1 %v1114_v15  ;;  %v3202_v15 = vrot.slane %v3200_v0, 2  ;;  %v3232_v0 = vrot.slane %v3230_v50, 3  ;;  %v1567_v50 = vsel %vm1081_vm3, %v1564_v39, %v1566_v45 }
  0xf0   : > { %5313 = vmatmul.mubr.bf16.gmra.mrb[28].mxu0 %v2849_v58  ;;  %5108 = vmatprep.mubr.bf16.mxu1 %v1116_v18  ;;  %v3205_v58 = vrot.slane %v3203_v16, 3  ;;  %v5951_v18 = vld [vmem:[%s6073_s24 + $0x28] sm:$0xff]   ;;  %v3225_v16 = vsel %vm3154_vm4, %v3215_v36, %v3224_v9 }
  0xf1   : > { %5316 = vmatprep.mubr.bf16.mxu0 %v2851_v25  ;;  %v1552_v25 = vrot.slane %v5951_v18, 1  ;;  %v3248_v18 = vshll.u32 %v6600_v41, 16 }
  0xf2   : > { %v3206_v59 = vor.u32 %v3205_v58, %v3202_v15  ;;  %v3245_v58 = vshrl.u32 %v6600_v41, 16 }
  0xf3   : > { %v1555_v28 = vsel %vm1081_vm3, %v1552_v25, %v1554_v60  ;;  %v3250_v57 = vrot.slane %v3248_v18, 3 }
  0xf4   : > { %v3207_v26 = vsel %vm3154_vm4, %v3197_v63, %v3206_v59  ;;  %v3216_v62 = vsel %vm3154_vm4, %v3206_v59, %v3215_v36  ;;  %v3254_v63 = vshrl.u32 %v6604_v11, 16  ;;  %v3272_v36 = vshrl.u32 %v6629_v30, 16 }
  0xf7   : > { %5109 = vmatmul.mubr.bf16.gmra.mrb[32].mxu1 %v1118_v43  ;;  %v5916_v43 = vld [vmem:[%s7070_s1 + $0x218] sm:$0xff]  }
  0xf8   : > { %5317 = vmatmul.mubr.bf16.gmra.mrb[32].mxu0 %v2853_v24  ;;  %5128 = vmatprep.mubr.bf16.mxu1 %v1547_v42  ;;  %v5953_v24 = vld [vmem:[%s6073_s24 + $0x38] sm:$0xff]  }
  0xf9   : > { %5336 = vmatprep.mubr.bf16.mxu0 %v3171_v23  ;;  %v1556_v42 = vrot.slane %v5953_v24, 1  ;;  %v1558_v23 = vrot.slane %v5954_v53, 1  ;;  %v3266_v24 = vshll.u32 %v6625_v21, 16  ;;  %v3275_v53 = vshll.u32 %v6629_v30, 16 }
  0xfb   : > { %v1559_v17 = vsel %vm1081_vm3, %v1556_v42, %v1558_v23  ;;  %v1561_v27 = vsel %vm1081_vm3, %v1558_v23, %v1560_v54 }
  0xff   : > { %5129 = vmatmul.mubr.bf16.vlgmr.msra.gmra.mrb[0].mxu1 %v1549_v7  ;;  %v3238_v7 = vrot.slane %v3236_v22, 2  ;;  %v3268_v22 = vrot.slane %v3266_v24, 3 }
 0x100   : > { %5337 = vmatmul.mubr.bf16.vlgmr.msra.gmra.mrb[0].mxu0 %v3180_v35  ;;  %5132 = vmatprep.mubr.bf16.mxu1 %v1551_v3  ;;  %v3241_v35 = vrot.slane %v3239_v2, 3  ;;  %v5918_v3 = vld [vmem:[%s7070_s1 + $0x228] sm:$0xff]  }
 0x101   : > { %5373 = vmatpush3.bf16.msra.mxu0 %v6619_v13  ;;  %5340 = vmatprep.mubr.bf16.mxu0 %v3189_v14  ;;  %v1553_v13 = vsel %vm1081_vm3, %v1550_v51, %v1552_v25  ;;  %v1557_v51 = vsel %vm1081_vm3, %v1554_v60, %v1556_v42  ;;  %v3233_v14 = vor.u32 %v3232_v0, %v3229_v19  ;;  %v5919_v60 = vld [vmem:[%s7070_s1 + $0x230] sm:$0xff]  }
 0x102   : > { %5374 = vmatprep.subr.bf16.mxu0 %v5914_v56  ;;  %v3242_v25 = vor.u32 %v3241_v35, %v3238_v7  ;;  %v5960_v0 = vld [vmem:[%s6073_s24 + $0x70] sm:$0xff]   ;;  %v3281_v7 = vshrl.u32 %v6640_v46, 16  ;;  %v3284_v35 = vshll.u32 %v6640_v46, 16 }
 0x103   : > { %v3234_v5 = vsel %vm3154_vm4, %v3224_v9, %v3233_v14 }
 0x104   : > { %v3243_v32 = vsel %vm3154_vm4, %v3233_v14, %v3242_v25  ;;  %v3286_v18 = vrot.slane %v3284_v35, 3 }
 0x105   : > { %5375 = vmatpush3.bf16.msra.mxu0 %v5914_v56  ;;  %v5956_v56 = vld [vmem:[%s6073_s24 + $0x50] sm:$0xff]  }
 0x106   : > { %5376 = vmatprep.subr.bf16.mxu0 %v5915_v44  ;;  %v1562_v15 = vrot.slane %v5956_v56, 1 }
 0x107   : > { %5133 = vmatmul.mubr.bf16.gmra.mrb[4].mxu1 %v1553_v13  ;;  %v3256_v13 = vrot.slane %v3254_v63, 2  ;;  %v3292_v63 = vrot.slane %v3290_v10, 2 }
 0x108   : > { %5341 = vmatmul.mubr.bf16.gmra.mrb[4].mxu0 %v3198_v48  ;;  %5136 = vmatprep.mubr.bf16.mxu1 %v1555_v28  ;;  %v1563_v59 = vsel %vm1081_vm3, %v1560_v54, %v1562_v15  ;;  %v3259_v48 = vrot.slane %v3257_v1, 3  ;;  %v5920_v28 = vld [vmem:[%s7070_s1 + $0x238] sm:$0xff]   ;;  %v1565_v23 = vsel %vm1081_vm3, %v1562_v15, %v1564_v39  ;;  %v3293_v54 = vshll.u32 %v6644_v6, 16 }
 0x109   : > { %5344 = vmatprep.mubr.bf16.mxu0 %v3207_v26  ;;  %5377 = vmatpush3.bf16.msra.mxu0 %v5915_v44  ;;  %v3247_v44 = vrot.slane %v3245_v58, 2  ;;  %v3283_v58 = vrot.slane %v3281_v7, 2 }
 0x10a   : > { %5378 = vmatprep.subr.bf16.mxu0 %v5916_v43  ;;  %v3260_v42 = vor.u32 %v3259_v48, %v3256_v13  ;;  %v3295_v1 = vrot.slane %v3293_v54, 3  ;;  %v3308_v48 = vshrl.u32 %v6657_v47, 16 }
 0x10b   : > { %v3251_v26 = vor.u32 %v3250_v57, %v3247_v44  ;;  %v3299_v57 = vshrl.u32 %v6654_v29, 16 }
 0x10c   : > { %v3296_v13 = vor.u32 %v3295_v1, %v3292_v63 }
 0x10d   : > { %5379 = vmatpush3.bf16.msra.mxu0 %v5916_v43  ;;  %v3263_v43 = vshrl.u32 %v6625_v21, 16  ;;  %v3252_v49 = vsel %vm3154_vm4, %v3242_v25, %v3251_v26  ;;  %v3261_v2 = vsel %vm3154_vm4, %v3251_v26, %v3260_v42  ;;  %v3301_v12 = vrot.slane %v3299_v57, 2 }
 0x10e   : > { %5380 = vmatprep.subr.bf16.mxu0 %v5917_v34 }
 0x10f   : > { %5137 = vmatmul.mubr.bf16.gmra.mrb[8].mxu1 %v1557_v51  ;;  %v3265_v9 = vrot.slane %v3263_v43, 2  ;;  %v3277_v51 = vrot.slane %v3275_v53, 3  ;;  %v6776_v43 = vld [vmem:[%s6073_s24 + $0xa0] ss:$0 sps:$4 sm:$0x77]   ;;  %v5963_v53 = vld [vmem:[%s6073_s24 + $0x88] sm:$0xff]  }
 0x110   : > { %5345 = vmatmul.mubr.bf16.gmra.mrb[8].mxu0 %v3216_v62  ;;  %5140 = vmatprep.mubr.bf16.mxu1 %v1559_v17  ;;  %v5959_v62 = vld [vmem:[%s6073_s24 + $0x68] sm:$0xff]  }
 0x111   : > { %5348 = vmatprep.mubr.bf16.mxu0 %v3225_v16  ;;  %5381 = vmatpush3.bf16.msra.mxu0 %v5917_v34  ;;  %v3274_v34 = vrot.slane %v3272_v36, 2  ;;  %v1568_v17 = vrot.slane %v5959_v62, 1  ;;  %v3269_v19 = vor.u32 %v3268_v22, %v3265_v9  ;;  %v1570_v16 = vrot.slane %v5960_v0, 1 }
 0x112   : > { %5382 = vmatprep.subr.bf16.mxu0 %v5918_v3  ;;  %v3317_v22 = vshrl.u32 %v6776_v43, 16 }
 0x113   : > { %v1569_v14 = vsel %vm1081_vm3, %v1566_v45, %v1568_v17  ;;  %v3270_v56 = vsel %vm3154_vm4, %v3260_v42, %v3269_v19  ;;  %v1571_v15 = vsel %vm1081_vm3, %v1568_v17, %v1570_v16  ;;  %v3310_v42 = vrot.slane %v3308_v48, 2  ;;  %v5921_v17 = vld [vmem:[%s6073_s24 + $0x98] ss:$0 sps:$4 sm:$0x11]  }
 0x114   : > { %v1580_v10 = vrot.slane %v5921_v17, 1 }
 0x115   : > { %5383 = vmatpush3.bf16.msra.mxu0 %v5918_v3  ;;  %v3278_v3 = vor.u32 %v3277_v51, %v3274_v34  ;;  %v3604_v51 = vld [vmem:[%s6073_s24 + $0x10] sm:$0x8] }
 0x116   : > { %5384 = vmatprep.subr.bf16.mxu0 %v5919_v60 }
 0x117   : > { %5141 = vmatmul.mubr.bf16.gmra.mrb[12].mxu1 %v1561_v27  ;;  %v3279_v25 = vsel %vm3154_vm4, %v3269_v19, %v3278_v3 }
 0x118   : > { %5349 = vmatmul.mubr.bf16.gmra.mrb[12].mxu0 %v3234_v5  ;;  %5144 = vmatprep.mubr.bf16.mxu1 %v1563_v59  ;;  %v3287_v5 = vor.u32 %v3286_v18, %v3283_v58  ;;  %v5962_v59 = vld [vmem:[%s6073_s24 + $0x80] sm:$0xff]  }
 0x119   : > { %5352 = vmatprep.mubr.bf16.mxu0 %v3243_v32  ;;  %5385 = vmatpush3.bf16.msra.mxu0 %v5919_v60  ;;  %v5961_v60 = vld [vmem:[%s6073_s24 + $0x78] sm:$0xff]   ;;  %v1574_v44 = vrot.slane %v5962_v59, 1  ;;  %v3302_v32 = vshll.u32 %v6654_v29, 16 }
 0x11a   : > { %5386 = vmatprep.subr.bf16.mxu0 %v5920_v28  ;;  %v1572_v27 = vrot.slane %v5961_v60, 1  ;;  %v3288_v39 = vsel %vm3154_vm4, %v3278_v3, %v3287_v5  ;;  %v3297_v24 = vsel %vm3154_vm4, %v3287_v5, %v3296_v13  ;;  %v4675_v3 = vcombine.low %v3604_v51, %v6484_v4 }
 0x11b   : > { %v3304_v45 = vrot.slane %v3302_v32, 3  ;;  %v3629_v4 = vrot.slane %v6504_v31, 3  ;;  %v3635_v60 = vrot.slane %v6527_v37, 3  ;;  %v3637_v31 = vrot.slane %v6548_v61, 3  ;;  %v5924_v32 = vld [vmem:[%s7072_s3] sm:$0xff]  }
 0x11c   : > { %v1573_v8 = vsel %vm1081_vm3, %v1570_v16, %v1572_v27  ;;  %v1575_v26 = vsel %vm1081_vm3, %v1572_v27, %v1574_v44  ;;  %v3319_v16 = vrot.slane %v3317_v22, 2  ;;  %v3643_v37 = vrot.slane %v6578_v55, 3  ;;  %5424 = vmatprep.subr.bf16.mxu1 %v5924_v32  ;;  %v5925_v55 = vld [vmem:[%s7072_s3 + $0x8] sm:$0xff]  }
 0x11d   : > { %5387 = vmatpush3.bf16.msra.mxu0 %v5920_v28  ;;  %v3311_v28 = vshll.u32 %v6657_v47, 16  ;;  %v3638_v59 = vsel %vm3625_vm5, %v3635_v60, %v3637_v31  ;;  %5425 = vmatpush3.bf16.msra.mxu1 %v5924_v32  ;;  %v6911_v32 = vld [vmem:[%s7071_s2] ss:$0 sm:$0xff] }
 0x11e   : > { %5426 = vmatprep.subr.bf16.mxu1 %v5925_v55 }
 0x11f   : > { %5145 = vmatmul.mubr.bf16.gmra.mrb[16].mxu1 %v1565_v23  ;;  %v3313_v36 = vrot.slane %v3311_v28, 3  ;;  %v1576_v23 = vrot.slane %v5963_v53, 1  ;;  %v3649_v28 = vrot.slane %v6625_v21, 3  ;;  %v5929_v53 = vld [vmem:[%s7072_s3 + $0x28] sm:$0xff]  }
 0x120   : > { %5353 = vmatmul.mubr.bf16.gmra.mrb[16].mxu0 %v3252_v49  ;;  %5148 = vmatprep.mubr.bf16.mxu1 %v1567_v50  ;;  %v3305_v49 = vor.u32 %v3304_v45, %v3301_v12  ;;  %v5964_v50 = vld [vmem:[%s6073_s24 + $0x90] sm:$0xff]   ;;  %v3655_v12 = vrot.slane %v6644_v6, 3  ;;  %v3657_v45 = vrot.slane %v6654_v29, 3  ;;  %v3661_v6 = vrot.slane %v6776_v43, 3  ;;  %v5928_v29 = vld [vmem:[%s7072_s3 + $0x20] sm:$0xff]  }
 0x121   : > { %5356 = vmatprep.mubr.bf16.mxu0 %v3261_v2  ;;  %v1578_v9 = vrot.slane %v5964_v50, 1  ;;  %v3320_v2 = vshll.u32 %v6776_v43, 16  ;;  %v3314_v34 = vor.u32 %v3313_v36, %v3310_v42  ;;  %v1577_v62 = vsel %vm1081_vm3, %v1574_v44, %v1576_v23  ;;  %5427 = vmatpush3.bf16.msra.mxu1 %v5925_v55  ;;  %v5927_v42 = vld [vmem:[%s7072_s3 + $0x18] sm:$0xff]  }
 0x122   : > { %v3306_v19 = vsel %vm3154_vm4, %v3296_v13, %v3305_v49  ;;  %v3647_v13 = vrot.slane %v6604_v11, 3  ;;  %v5926_v11 = vld [vmem:[%s7072_s3 + $0x10] sm:$0xff]   ;;  %v3658_v36 = vsel %vm3625_vm5, %v3655_v12, %v3657_v45  ;;  %v5931_v43 = vld [vmem:[%s7072_s3 + $0x38] sm:$0xff]  }
 0x123   : > { %v1579_v0 = vsel %vm1081_vm3, %v1576_v23, %v1578_v9  ;;  %v3322_v7 = vrot.slane %v3320_v2, 3  ;;  %v3315_v35 = vsel %vm3154_vm4, %v3305_v49, %v3314_v34  ;;  %5428 = vmatprep.subr.bf16.mxu1 %v5926_v11  ;;  %v5930_v23 = vld [vmem:[%s7072_s3 + $0x30] sm:$0xff]  }
 0x125   : > { %v3323_v54 = vor.u32 %v3322_v7, %v3319_v16  ;;  %5429 = vmatpush3.bf16.msra.mxu1 %v5926_v11 }
 0x126   : > { %5430 = vmatprep.subr.bf16.mxu1 %v5927_v42 }
 0x127   : > { %5149 = vmatmul.mubr.bf16.gmra.mrb[20].mxu1 %v1569_v14  ;;  %v3626_v14 = vrot.slane %v4675_v3, 3  ;;  %v3324_v58 = vsel %vm3154_vm4, %v3314_v34, %v3323_v54 }
 0x128   : > { %5357 = vmatmul.mubr.bf16.gmra.mrb[20].mxu0 %v3270_v56  ;;  %5152 = vmatprep.mubr.bf16.mxu1 %v1571_v15  ;;  %v3627_v56 = vrot.slane %v6495_v52, 3  ;;  %v1581_v15 = vsel %vm1081_vm3, %v1578_v9, %v1580_v10  ;;  %v3633_v52 = vrot.slane %v6520_v20, 3  ;;  %v3641_v20 = vrot.slane %v6574_v38, 3 }
 0x129   : > { %5360 = vmatprep.mubr.bf16.mxu0 %v3279_v25  ;;  %v3631_v25 = vrot.slane %v6508_v33, 3  ;;  %v3639_v33 = vrot.slane %v6552_v40, 3  ;;  %v3645_v40 = vrot.slane %v6600_v41, 3  ;;  %v3650_v41 = vsel %vm3625_vm5, %v3647_v13, %v3649_v28  ;;  %5431 = vmatpush3.bf16.msra.mxu1 %v5927_v42 }
 0x12a   : > { %v3628_v18 = vsel %vm3625_vm5, %v3626_v14, %v3627_v56  ;;  %v3630_v63 = vsel %vm3625_vm5, %v3627_v56, %v3629_v4  ;;  %v3636_v5 = vsel %vm3625_vm5, %v3633_v52, %v3635_v60  ;;  %v3644_v61 = vsel %vm3625_vm5, %v3641_v20, %v3643_v37  ;;  %5432 = vmatprep.subr.bf16.mxu1 %v5928_v29 }
 0x12b   : > { %v3632_v1 = vsel %vm3625_vm5, %v3629_v4, %v3631_v25  ;;  %v3634_v27 = vsel %vm3625_vm5, %v3631_v25, %v3633_v52  ;;  %v3640_v44 = vsel %vm3625_vm5, %v3637_v31, %v3639_v33  ;;  %v3642_v57 = vsel %vm3625_vm5, %v3639_v33, %v3641_v20 }
 0x12c   : > { %v3646_v38 = vsel %vm3625_vm5, %v3643_v37, %v3645_v40  ;;  %v3648_v48 = vsel %vm3625_vm5, %v3645_v40, %v3647_v13 }
 0x12d   : > { %5433 = vmatpush3.bf16.msra.mxu1 %v5928_v29 }
 0x12e   : > { %5434 = vmatprep.subr.bf16.mxu1 %v5929_v53 }
 0x12f   : > { %5153 = vmatmul.mubr.bf16.gmra.mrb[24].mxu1 %v1573_v8  ;;  %v3651_v8 = vrot.slane %v6629_v30, 3 }
 0x130   : > { %5361 = vmatmul.mubr.bf16.gmra.mrb[24].mxu0 %v3288_v39  ;;  %5156 = vmatprep.mubr.bf16.mxu1 %v1575_v26  ;;  %v3653_v26 = vrot.slane %v6640_v46, 3 }
 0x131   : > { %5364 = vmatprep.mubr.bf16.mxu0 %v3297_v24  ;;  %v3652_v39 = vsel %vm3625_vm5, %v3649_v28, %v3651_v8  ;;  %v3659_v24 = vrot.slane %v6657_v47, 3  ;;  %5435 = vmatpush3.bf16.msra.mxu1 %v5929_v53 }
 0x132   : > { %v3654_v21 = vsel %vm3625_vm5, %v3651_v8, %v3653_v26  ;;  %v3656_v30 = vsel %vm3625_vm5, %v3653_v26, %v3655_v12  ;;  %5436 = vmatprep.subr.bf16.mxu1 %v5930_v23 }
 0x133   : > { %v3660_v46 = vsel %vm3625_vm5, %v3657_v45, %v3659_v24  ;;  %v3662_v47 = vsel %vm3625_vm5, %v3659_v24, %v3661_v6 }
 0x135   : > { %5437 = vmatpush3.bf16.msra.mxu1 %v5930_v23 }
 0x136   : > { %5438 = vmatprep.subr.bf16.mxu1 %v5931_v43 }
 0x137   : > { %5157 = vmatmul.mubr.bf16.gmra.mrb[28].mxu1 %v1577_v62 }
 0x138   : > { %5365 = vmatmul.mubr.bf16.gmra.mrb[28].mxu0 %v3306_v19  ;;  %5160 = vmatprep.mubr.bf16.mxu1 %v1579_v0 }
 0x139   : > { %5368 = vmatprep.mubr.bf16.mxu0 %v3315_v35  ;;  %5439 = vmatpush3.bf16.msra.mxu1 %v5931_v43 }
 0x13f   : > { %5161 = vmatmul.mubr.bf16.gmra.mrb[32].mxu1 %v1581_v15 }
 0x140   : > { %5369 = vmatmul.mubr.bf16.gmra.mrb[32].mxu0 %v3324_v58 }
 0x141   : > { %5388 = vmatprep.mubr.bf16.mxu0 %v3628_v18 }
 0x148   : > { %5389 = vmatmul.mubr.bf16.vlgmr.msra.gmra.mrb[0].mxu0 %v3630_v63 }
 0x149   : > { %5392 = vmatprep.mubr.bf16.mxu0 %v3632_v1 }
 0x150   : > { %5393 = vmatmul.mubr.bf16.gmra.mrb[4].mxu0 %v3634_v27 }
 0x151   : > { %5396 = vmatprep.mubr.bf16.mxu0 %v3636_v5 }
 0x158   : > { %5397 = vmatmul.mubr.bf16.gmra.mrb[8].mxu0 %v3638_v59 }
 0x159   : > { %5400 = vmatprep.mubr.bf16.mxu0 %v3640_v44 }
 0x160   : > { %5401 = vmatmul.mubr.bf16.gmra.mrb[12].mxu0 %v3642_v57 }
 0x161   : > { %5404 = vmatprep.mubr.bf16.mxu0 %v3644_v61 }
 0x168   : > { %5405 = vmatmul.mubr.bf16.gmra.mrb[16].mxu0 %v3646_v38 }
 0x169   : > { %5408 = vmatprep.mubr.bf16.mxu0 %v3648_v48 }
 0x170   : > { %5409 = vmatmul.mubr.bf16.gmra.mrb[20].mxu0 %v3650_v41 }
 0x171   : > { %5412 = vmatprep.mubr.bf16.mxu0 %v3652_v39 }
 0x178   : > { %5413 = vmatmul.mubr.bf16.gmra.mrb[24].mxu0 %v3654_v21 }
 0x179   : > { %5416 = vmatprep.mubr.bf16.mxu0 %v3656_v30 }
 0x180   : > { %5417 = vmatmul.mubr.bf16.gmra.mrb[28].mxu0 %v3658_v36 }
 0x181   : > { %5420 = vmatprep.mubr.bf16.mxu0 %v3660_v46 }
 0x188   : > { %5421 = vmatmul.mubr.bf16.gmra.mrb[32].mxu0 %v3662_v47 }
 0x1d2   : > { %v5130_v49 = vpop.f32.mrb[0].mxu1 }
 0x1d3   : > { %v1682_v50 = vpop.f32.mrb[1].mxu1 }
 0x1d4   : > { %v5131_v9 = vpop.f32.mrb[2].mxu1 }
 0x1d5   : > { %v1685_v22 = vpop.f32.mrb[3].mxu1 }
 0x1da   : > { %v5134_v2 = vpop.f32.mrb[4].mxu1 }
 0x1db   : > { %v1698_v34 = vpop.f32.mrb[5].mxu1 }
 0x1dc   : > { %v5135_v51 = vpop.f32.mrb[6].mxu1 }
 0x1dd   : > { %v1701_v62 = vpop.f32.mrb[7].mxu1 }
 0x1e2   : > { %v6852_v17 = vpop.f32.mrb[8].mxu1 }
 0x1e3   : > { %v6854_v19 = vpop.f32.mrb[9].mxu1 }
 0x1e4   : > { %v6856_v0 = vpop.f32.mrb[10].mxu1 }
 0x1e5   : > { %v6858_v16 = vpop.f32.mrb[11].mxu1 }
 0x1ea   : > { %v6860_v7 = vpop.f32.mrb[12].mxu1 }
 0x1eb   : > { %v6862_v35 = vpop.f32.mrb[13].mxu1 }
 0x1ec   : > { %v6864_v3 = vpop.f32.mrb[14].mxu1 }
 0x1ed   : > { %v6866_v10 = vpop.f32.mrb[15].mxu1 }
 0x1f2   : > { %v6868_v54 = vpop.f32.mrb[16].mxu1 }
 0x1f3   : > { %v6870_v14 = vpop.f32.mrb[17].mxu1 }
 0x1f4   : > { %v6872_v56 = vpop.f32.mrb[18].mxu1 }
 0x1f5   : > { %v6874_v15 = vpop.f32.mrb[19].mxu1 }
 0x1fa   : > { %v6876_v58 = vpop.f32.mrb[20].mxu1 }
 0x1fb   : > { %v6878_v18 = vpop.f32.mrb[21].mxu1 }
 0x1fc   : > { %v6880_v4 = vpop.f32.mrb[22].mxu1 }
 0x1fd   : > { %v6882_v25 = vpop.f32.mrb[23].mxu1 }
 0x202   : > { %v6884_v63 = vpop.f32.mrb[24].mxu1 }
 0x203   : > { %v6886_v1 = vpop.f32.mrb[25].mxu1 }
 0x204   : > { %v6888_v52 = vpop.f32.mrb[26].mxu1 }
 0x205   : > { %v6890_v60 = vpop.f32.mrb[27].mxu1 }
 0x20a   : > { %v6892_v27 = vpop.f32.mrb[28].mxu1 }
 0x20b   : > { %v6894_v5 = vpop.f32.mrb[29].mxu1 }
 0x20c   : > { %v6896_v31 = vpop.f32.mrb[30].mxu1 }
 0x20d   : > { %v6898_v33 = vpop.f32.mrb[31].mxu1 }
 0x212   : > { %v6900_v59 = vpop.f32.mrb[32].mxu1 }
 0x213   : > { %v6902_v44 = vpop.f32.mrb[33].mxu1 }
 0x214   : > { %v6904_v20 = vpop.f32.mrb[34].mxu1 }
 0x215   : > { %v6906_v37 = vpop.f32.mrb[35].mxu1 }
 0x21b   : > { %v5390_v57 = vpop.f32.mrb[0].mxu0 }
 0x21c   : > { %v5476_v61 = vadd.f32 %v5390_v57, %v5130_v49  ;;  %v3763_v40 = vpop.f32.mrb[1].mxu0 }
 0x21d   : > { %v5477_v13 = vadd.f32 %v3763_v40, %v1682_v50  ;;  %v5391_v38 = vpop.f32.mrb[2].mxu0 }
 0x21e   : > { %v3951_v55 = vadd.f32 %v5476_v61, %v6911_v32  ;;  %v5478_v48 = vadd.f32 %v5391_v38, %v5131_v9  ;;  %v3766_v28 = vpop.f32.mrb[3].mxu0 }
 0x21f   : > { %v3949_v8 = vadd.f32 %v5477_v13, %v6911_v32  ;;  %v5479_v41 = vadd.f32 %v3766_v28, %v1685_v22 }
 0x220   : > { %v3952_v11 = vadd.f32 %v5478_v48, %v6911_v32  ;;  %v3987_v26 = vmax.f32 %v3951_v55, 0.0 }
 0x221   : > { %v3950_v39 = vadd.f32 %v5479_v41, %v6911_v32  ;;  %v3985_v21 = vmax.f32 %v3949_v8, 0.0 }
 0x222   : > { %v3988_v12 = vmax.f32 %v3952_v11, 0.0 }
 0x223   : > { %v3986_v30 = vmax.f32 %v3950_v39, 0.0  ;;  %v5394_v45 = vpop.f32.mrb[4].mxu0 }
 0x224   : > { %v4022_v24 = vpack.c.bf16 %v3988_v12, %v3987_v26  ;;  %v5480_v42 = vadd.f32 %v5394_v45, %v5134_v2  ;;  %v3779_v36 = vpop.f32.mrb[5].mxu0 }
 0x225   : > { %v5481_v46 = vadd.f32 %v3779_v36, %v1698_v34  ;;  %v5395_v6 = vpop.f32.mrb[6].mxu0  ;;  %v4021_v29 = vpack.c.bf16 %v3986_v30, %v3985_v21 }
 0x226   : > { %v3955_v47 = vadd.f32 %v5480_v42, %v6911_v32  ;;  %v5482_v53 = vadd.f32 %v5395_v6, %v5135_v51  ;;  %v3782_v23 = vpop.f32.mrb[7].mxu0 }
 0x227   : > { %v3953_v43 = vadd.f32 %v5481_v46, %v6911_v32  ;;  %v5483_v49 = vadd.f32 %v3782_v23, %v1701_v62  ;;  %5440 = vmatprep.mubr.bf16.mxu1 %v4021_v29 }
 0x228   : > { %v3956_v50 = vadd.f32 %v5482_v53, %v6911_v32  ;;  %5441 = vmatmul.mubr.bf16.vlgmr.msra.gmra.mrb[36].mxu1 %v4022_v24  ;;  %v3991_v22 = vmax.f32 %v3955_v47, 0.0 }
 0x229   : > { %v3954_v9 = vadd.f32 %v5483_v49, %v6911_v32  ;;  %v3989_v2 = vmax.f32 %v3953_v43, 0.0 }
 0x22a   : > { %v3992_v57 = vmax.f32 %v3956_v50, 0.0 }
 0x22b   : > { %v3990_v61 = vmax.f32 %v3954_v9, 0.0  ;;  %v5398_v34 = vpop.f32.mrb[8].mxu0 }
 0x22c   : > { %v5484_v40 = vadd.f32 %v5398_v34, %v6852_v17  ;;  %v3795_v13 = vpop.f32.mrb[9].mxu0  ;;  %v4024_v38 = vpack.c.bf16 %v3992_v57, %v3991_v22 }
 0x22d   : > { %v5485_v51 = vadd.f32 %v3795_v13, %v6854_v19  ;;  %v5399_v55 = vpop.f32.mrb[10].mxu0  ;;  %v4023_v48 = vpack.c.bf16 %v3990_v61, %v3989_v2 }
 0x22e   : > { %v3959_v62 = vadd.f32 %v5484_v40, %v6911_v32  ;;  %v5486_v28 = vadd.f32 %v5399_v55, %v6856_v0  ;;  %v3798_v8 = vpop.f32.mrb[11].mxu0 }
 0x22f   : > { %v3957_v41 = vadd.f32 %v5485_v51, %v6911_v32  ;;  %v5487_v11 = vadd.f32 %v3798_v8, %v6858_v16  ;;  %5444 = vmatprep.mubr.bf16.mxu1 %v4023_v48 }
 0x230   : > { %v3960_v39 = vadd.f32 %v5486_v28, %v6911_v32  ;;  %5445 = vmatmul.mubr.bf16.gmra.mrb[40].mxu1 %v4024_v38  ;;  %v3995_v26 = vmax.f32 %v3959_v62, 0.0 }
 0x231   : > { %v3958_v17 = vadd.f32 %v5487_v11, %v6911_v32  ;;  %v3993_v19 = vmax.f32 %v3957_v41, 0.0 }
 0x232   : > { %v3996_v12 = vmax.f32 %v3960_v39, 0.0 }
 0x233   : > { %v3994_v21 = vmax.f32 %v3958_v17, 0.0  ;;  %v5402_v30 = vpop.f32.mrb[12].mxu0 }
 0x234   : > { %v5488_v45 = vadd.f32 %v5402_v30, %v6860_v7  ;;  %v3811_v24 = vpop.f32.mrb[13].mxu0  ;;  %v4026_v0 = vpack.c.bf16 %v3996_v12, %v3995_v26 }
 0x235   : > { %v5489_v42 = vadd.f32 %v3811_v24, %v6862_v35  ;;  %v5403_v36 = vpop.f32.mrb[14].mxu0  ;;  %v4025_v46 = vpack.c.bf16 %v3994_v21, %v3993_v19 }
 0x236   : > { %v3963_v16 = vadd.f32 %v5488_v45, %v6911_v32  ;;  %v5490_v6 = vadd.f32 %v5403_v36, %v6864_v3  ;;  %v3814_v29 = vpop.f32.mrb[15].mxu0 }
 0x237   : > { %v3961_v47 = vadd.f32 %v5489_v42, %v6911_v32  ;;  %v5491_v53 = vadd.f32 %v3814_v29, %v6866_v10  ;;  %5448 = vmatprep.mubr.bf16.mxu1 %v4025_v46 }
 0x238   : > { %v3964_v23 = vadd.f32 %v5490_v6, %v6911_v32  ;;  %5449 = vmatmul.mubr.bf16.gmra.mrb[44].mxu1 %v4026_v0  ;;  %v3999_v43 = vmax.f32 %v3963_v16, 0.0 }
 0x239   : > { %v3962_v7 = vadd.f32 %v5491_v53, %v6911_v32  ;;  %v3997_v35 = vmax.f32 %v3961_v47, 0.0 }
 0x23a   : > { %v4000_v49 = vmax.f32 %v3964_v23, 0.0 }
 0x23b   : > { %v3998_v50 = vmax.f32 %v3962_v7, 0.0  ;;  %v5406_v9 = vpop.f32.mrb[16].mxu0 }
 0x23c   : > { %v5492_v22 = vadd.f32 %v5406_v9, %v6868_v54  ;;  %v3827_v57 = vpop.f32.mrb[17].mxu0  ;;  %v4028_v3 = vpack.c.bf16 %v4000_v49, %v3999_v43 }
 0x23d   : > { %v5493_v2 = vadd.f32 %v3827_v57, %v6870_v14  ;;  %v5407_v61 = vpop.f32.mrb[18].mxu0  ;;  %v4027_v34 = vpack.c.bf16 %v3998_v50, %v3997_v35 }
 0x23e   : > { %v3967_v10 = vadd.f32 %v5492_v22, %v6911_v32  ;;  %v5494_v40 = vadd.f32 %v5407_v61, %v6872_v56  ;;  %v3830_v13 = vpop.f32.mrb[19].mxu0 }
 0x23f   : > { %v3965_v38 = vadd.f32 %v5493_v2, %v6911_v32  ;;  %v5495_v51 = vadd.f32 %v3830_v13, %v6874_v15  ;;  %5452 = vmatprep.mubr.bf16.mxu1 %v4027_v34 }
 0x240   : > { %v3968_v55 = vadd.f32 %v5494_v40, %v6911_v32  ;;  %5453 = vmatmul.mubr.bf16.gmra.mrb[48].mxu1 %v4028_v3  ;;  %v4003_v48 = vmax.f32 %v3967_v10, 0.0 }
 0x241   : > { %v3966_v54 = vadd.f32 %v5495_v51, %v6911_v32  ;;  %v4001_v14 = vmax.f32 %v3965_v38, 0.0 }
 0x242   : > { %v4004_v62 = vmax.f32 %v3968_v55, 0.0 }
 0x243   : > { %v4002_v28 = vmax.f32 %v3966_v54, 0.0  ;;  %v5410_v8 = vpop.f32.mrb[20].mxu0 }
 0x244   : > { %v5496_v41 = vadd.f32 %v5410_v8, %v6876_v58  ;;  %v3843_v11 = vpop.f32.mrb[21].mxu0  ;;  %v4030_v56 = vpack.c.bf16 %v4004_v62, %v4003_v48 }
 0x245   : > { %v5497_v39 = vadd.f32 %v3843_v11, %v6878_v18  ;;  %v5411_v17 = vpop.f32.mrb[22].mxu0  ;;  %v4029_v26 = vpack.c.bf16 %v4002_v28, %v4001_v14 }
 0x246   : > { %v3971_v15 = vadd.f32 %v5496_v41, %v6911_v32  ;;  %v5498_v12 = vadd.f32 %v5411_v17, %v6880_v4  ;;  %v3846_v19 = vpop.f32.mrb[23].mxu0 }
 0x247   : > { %v3969_v21 = vadd.f32 %v5497_v39, %v6911_v32  ;;  %v5499_v30 = vadd.f32 %v3846_v19, %v6882_v25  ;;  %5456 = vmatprep.mubr.bf16.mxu1 %v4029_v26 }
 0x248   : > { %v3972_v45 = vadd.f32 %v5498_v12, %v6911_v32  ;;  %5457 = vmatmul.mubr.bf16.gmra.mrb[52].mxu1 %v4030_v56  ;;  %v4007_v24 = vmax.f32 %v3971_v15, 0.0 }
 0x249   : > { %v3970_v58 = vadd.f32 %v5499_v30, %v6911_v32  ;;  %v4005_v18 = vmax.f32 %v3969_v21, 0.0 }
 0x24a   : > { %v4008_v0 = vmax.f32 %v3972_v45, 0.0 }
 0x24b   : > { %v4006_v42 = vmax.f32 %v3970_v58, 0.0  ;;  %v5414_v36 = vpop.f32.mrb[24].mxu0 }
 0x24c   : > { %v5500_v46 = vadd.f32 %v5414_v36, %v6884_v63  ;;  %v3859_v16 = vpop.f32.mrb[25].mxu0  ;;  %v4032_v4 = vpack.c.bf16 %v4008_v0, %v4007_v24 }
 0x24d   : > { %v5501_v6 = vadd.f32 %v3859_v16, %v6886_v1  ;;  %v5415_v29 = vpop.f32.mrb[26].mxu0  ;;  %v4031_v47 = vpack.c.bf16 %v4006_v42, %v4005_v18 }
 0x24e   : > { %v3975_v25 = vadd.f32 %v5500_v46, %v6911_v32  ;;  %v5502_v53 = vadd.f32 %v5415_v29, %v6888_v52  ;;  %v3862_v23 = vpop.f32.mrb[27].mxu0 }
 0x24f   : > { %v3973_v7 = vadd.f32 %v5501_v6, %v6911_v32  ;;  %v5503_v43 = vadd.f32 %v3862_v23, %v6890_v60  ;;  %5460 = vmatprep.mubr.bf16.mxu1 %v4031_v47 }
 0x250   : > { %v3976_v49 = vadd.f32 %v5502_v53, %v6911_v32  ;;  %5461 = vmatmul.mubr.bf16.gmra.mrb[56].mxu1 %v4032_v4  ;;  %v4011_v35 = vmax.f32 %v3975_v25, 0.0 }
 0x251   : > { %v3974_v63 = vadd.f32 %v5503_v43, %v6911_v32  ;;  %v4009_v1 = vmax.f32 %v3973_v7, 0.0 }
 0x252   : > { %v4012_v50 = vmax.f32 %v3976_v49, 0.0 }
 0x253   : > { %v4010_v9 = vmax.f32 %v3974_v63, 0.0  ;;  %v5418_v22 = vpop.f32.mrb[28].mxu0 }
 0x254   : > { %v5504_v57 = vadd.f32 %v5418_v22, %v6892_v27  ;;  %v3875_v3 = vpop.f32.mrb[29].mxu0  ;;  %v4034_v52 = vpack.c.bf16 %v4012_v50, %v4011_v35 }
 0x255   : > { %v5505_v2 = vadd.f32 %v3875_v3, %v6894_v5  ;;  %v5419_v61 = vpop.f32.mrb[30].mxu0  ;;  %v4033_v34 = vpack.c.bf16 %v4010_v9, %v4009_v1 }
 0x256   : > { %v3979_v60 = vadd.f32 %v5504_v57, %v6911_v32  ;;  %v5506_v10 = vadd.f32 %v5419_v61, %v6896_v31  ;;  %v3878_v40 = vpop.f32.mrb[31].mxu0 }
 0x257   : > { %v3977_v13 = vadd.f32 %v5505_v2, %v6911_v32  ;;  %v5507_v38 = vadd.f32 %v3878_v40, %v6898_v33  ;;  %5464 = vmatprep.mubr.bf16.mxu1 %v4033_v34 }
 0x258   : > { %v3980_v51 = vadd.f32 %v5506_v10, %v6911_v32  ;;  %5465 = vmatmul.mubr.bf16.gmra.mrb[60].mxu1 %v4034_v52  ;;  %v4015_v55 = vmax.f32 %v3979_v60, 0.0 }
 0x259   : > { %v3978_v27 = vadd.f32 %v5507_v38, %v6911_v32  ;;  %v4013_v5 = vmax.f32 %v3977_v13, 0.0 }
 0x25a   : > { %v4016_v54 = vmax.f32 %v3980_v51, 0.0 }
 0x25b   : > { %v4014_v48 = vmax.f32 %v3978_v27, 0.0  ;;  %v5422_v62 = vpop.f32.mrb[32].mxu0 }
 0x25c   : > { %v5508_v14 = vadd.f32 %v5422_v62, %v6900_v59  ;;  %v3891_v28 = vpop.f32.mrb[33].mxu0  ;;  %v4036_v31 = vpack.c.bf16 %v4016_v54, %v4015_v55 }
 0x25d   : > { %v5509_v8 = vadd.f32 %v3891_v28, %v6902_v44  ;;  %v5423_v41 = vpop.f32.mrb[34].mxu0  ;;  %v4035_v11 = vpack.c.bf16 %v4014_v48, %v4013_v5 }
 0x25e   : > { %v3983_v33 = vadd.f32 %v5508_v14, %v6911_v32  ;;  %v5510_v56 = vadd.f32 %v5423_v41, %v6904_v20  ;;  %v3894_v39 = vpop.f32.mrb[35].mxu0  ;;  %v6981_v20 = vld [vmem:[%s7073_s4] ss:$0 sm:$0xff] }
 0x25f   : > { %v3981_v17 = vadd.f32 %v5509_v8, %v6911_v32  ;;  %v5511_v26 = vadd.f32 %v3894_v39, %v6906_v37  ;;  %5468 = vmatprep.mubr.bf16.mxu1 %v4035_v11 }
 0x260   : > { %v3984_v15 = vadd.f32 %v5510_v56, %v6911_v32  ;;  %5469 = vmatmul.mubr.bf16.gmra.mrb[64].mxu1 %v4036_v31  ;;  %v4019_v12 = vmax.f32 %v3983_v33, 0.0 }
 0x261   : > { %v3982_v59 = vadd.f32 %v5511_v26, %v6911_v32  ;;  %v4017_v19 = vmax.f32 %v3981_v17, 0.0 }
 0x262   : > { %v4020_v44 = vmax.f32 %v3984_v15, 0.0 }
 0x263   : > { %v4018_v21 = vmax.f32 %v3982_v59, 0.0 }
 0x264   : > { %v4038_v30 = vpack.c.bf16 %v4020_v44, %v4019_v12 }
 0x265   : > { %v4037_v45 = vpack.c.bf16 %v4018_v21, %v4017_v19 }
 0x267   : > { %5472 = vmatprep.mubr.bf16.mxu1 %v4037_v45 }
 0x268   : > { %5473 = vmatmul.mubr.bf16.gmra.mrb[68].mxu1 %v4038_v30 }
 0x2fb   : > { %v5442_v37 = vpop.f32.mrb[36].mxu1 }
 0x2fc   : > { %v4153_v32 = vadd.f32 %v5442_v37, %v6981_v20  ;;  %v4144_v58 = vpop.f32.mrb[37].mxu1 }
 0x2fd   : > { %v4145_v24 = vadd.f32 %v6981_v20, %v4144_v58  ;;  %v5443_v0 = vpop.f32.mrb[38].mxu1 }
 0x2fe   : > { %4289 = vst [vmem:[%s6986_s30 + $0x10] sm:$0xff] %v4153_v32  ;;  %v4156_v18 = vadd.f32 %v5443_v0, %v6981_v20  ;;  %v4147_v42 = vpop.f32.mrb[39].mxu1 }
 0x2ff   : > { %4287 = vst [vmem:[%s6986_s30] sm:$0xff] %v4145_v24  ;;  %v4148_v36 = vadd.f32 %v6981_v20, %v4147_v42 }
 0x300   : > { %4290 = vst [vmem:[%s6986_s30 + $0x18] sm:$0xff] %v4156_v18 }
 0x301   : > { %4288 = vst [vmem:[%s6986_s30 + $0x8] sm:$0xff] %v4148_v36 }
 0x303   : > { %v5446_v46 = vpop.f32.mrb[40].mxu1 }
 0x304   : > { %v4169_v16 = vadd.f32 %v5446_v46, %v6981_v20  ;;  %v4160_v4 = vpop.f32.mrb[41].mxu1 }
 0x305   : > { %v4161_v6 = vadd.f32 %v6981_v20, %v4160_v4  ;;  %v5447_v29 = vpop.f32.mrb[42].mxu1 }
 0x306   : > { %4293 = vst [vmem:[%s6986_s30 + $0x30] sm:$0xff] %v4169_v16  ;;  %v4172_v47 = vadd.f32 %v5447_v29, %v6981_v20  ;;  %v4163_v25 = vpop.f32.mrb[43].mxu1 }
 0x307   : > { %4291 = vst [vmem:[%s6986_s30 + $0x20] sm:$0xff] %v4161_v6  ;;  %v4164_v53 = vadd.f32 %v6981_v20, %v4163_v25 }
 0x308   : > { %4294 = vst [vmem:[%s6986_s30 + $0x38] sm:$0xff] %v4172_v47 }
 0x309   : > { %4292 = vst [vmem:[%s6986_s30 + $0x28] sm:$0xff] %v4164_v53 }
 0x30b   : > { %v5450_v23 = vpop.f32.mrb[44].mxu1 }
 0x30c   : > { %v4185_v7 = vadd.f32 %v5450_v23, %v6981_v20  ;;  %v4176_v43 = vpop.f32.mrb[45].mxu1 }
 0x30d   : > { %v4177_v49 = vadd.f32 %v6981_v20, %v4176_v43  ;;  %v5451_v63 = vpop.f32.mrb[46].mxu1 }
 0x30e   : > { %4297 = vst [vmem:[%s6986_s30 + $0x50] sm:$0xff] %v4185_v7  ;;  %v4188_v35 = vadd.f32 %v5451_v63, %v6981_v20  ;;  %v4179_v50 = vpop.f32.mrb[47].mxu1 }
 0x30f   : > { %4295 = vst [vmem:[%s6986_s30 + $0x40] sm:$0xff] %v4177_v49  ;;  %v4180_v1 = vadd.f32 %v6981_v20, %v4179_v50 }
 0x310   : > { %4298 = vst [vmem:[%s6986_s30 + $0x58] sm:$0xff] %v4188_v35 }
 0x311   : > { %4296 = vst [vmem:[%s6986_s30 + $0x48] sm:$0xff] %v4180_v1 }
 0x313   : > { %v5454_v9 = vpop.f32.mrb[48].mxu1 }
 0x314   : > { %v4201_v22 = vadd.f32 %v5454_v9, %v6981_v20  ;;  %v4192_v57 = vpop.f32.mrb[49].mxu1 }
 0x315   : > { %v4193_v3 = vadd.f32 %v6981_v20, %v4192_v57  ;;  %v5455_v52 = vpop.f32.mrb[50].mxu1 }
 0x316   : > { %4301 = vst [vmem:[%s6986_s30 + $0x70] sm:$0xff] %v4201_v22  ;;  %v4204_v2 = vadd.f32 %v5455_v52, %v6981_v20  ;;  %v4195_v61 = vpop.f32.mrb[51].mxu1 }
 0x317   : > { %4299 = vst [vmem:[%s6986_s30 + $0x60] sm:$0xff] %v4193_v3  ;;  %v4196_v34 = vadd.f32 %v6981_v20, %v4195_v61 }
 0x318   : > { %4302 = vst [vmem:[%s6986_s30 + $0x78] sm:$0xff] %v4204_v2 }
 0x319   : > { %4300 = vst [vmem:[%s6986_s30 + $0x68] sm:$0xff] %v4196_v34 }
 0x31b   : > { %v5458_v60 = vpop.f32.mrb[52].mxu1 }
 0x31c   : > { %v4217_v10 = vadd.f32 %v5458_v60, %v6981_v20  ;;  %v4208_v40 = vpop.f32.mrb[53].mxu1 }
 0x31d   : > { %v4209_v13 = vadd.f32 %v6981_v20, %v4208_v40  ;;  %v5459_v38 = vpop.f32.mrb[54].mxu1 }
 0x31e   : > { %4305 = vst [vmem:[%s6986_s30 + $0x90] sm:$0xff] %v4217_v10  ;;  %v4220_v51 = vadd.f32 %v5459_v38, %v6981_v20  ;;  %v4211_v27 = vpop.f32.mrb[55].mxu1 }
 0x31f   : > { %4303 = vst [vmem:[%s6986_s30 + $0x80] sm:$0xff] %v4209_v13  ;;  %v4212_v55 = vadd.f32 %v6981_v20, %v4211_v27 }
 0x320   : > { %4306 = vst [vmem:[%s6986_s30 + $0x98] sm:$0xff] %v4220_v51 }
 0x321   : > { %4304 = vst [vmem:[%s6986_s30 + $0x88] sm:$0xff] %v4212_v55 }
 0x323   : > { %v5462_v54 = vpop.f32.mrb[56].mxu1 }
 0x324   : > { %v4233_v5 = vadd.f32 %v5462_v54, %v6981_v20  ;;  %v4224_v48 = vpop.f32.mrb[57].mxu1 }
 0x325   : > { %v4225_v62 = vadd.f32 %v6981_v20, %v4224_v48  ;;  %v5463_v14 = vpop.f32.mrb[58].mxu1 }
 0x326   : > { %4309 = vst [vmem:[%s6986_s30 + $0xb0] sm:$0xff] %v4233_v5  ;;  %v4236_v28 = vadd.f32 %v5463_v14, %v6981_v20  ;;  %v4227_v31 = vpop.f32.mrb[59].mxu1 }
 0x327   : > { %4307 = vst [vmem:[%s6986_s30 + $0xa0] sm:$0xff] %v4225_v62  ;;  %v4228_v8 = vadd.f32 %v6981_v20, %v4227_v31 }
 0x328   : > { %4310 = vst [vmem:[%s6986_s30 + $0xb8] sm:$0xff] %v4236_v28 }
 0x329   : > { %4308 = vst [vmem:[%s6986_s30 + $0xa8] sm:$0xff] %v4228_v8 }
 0x32b   : > { %v5466_v41 = vpop.f32.mrb[60].mxu1 }
 0x32c   : > { %v4249_v11 = vadd.f32 %v5466_v41, %v6981_v20  ;;  %v4240_v33 = vpop.f32.mrb[61].mxu1 }
 0x32d   : > { %v4241_v56 = vadd.f32 %v6981_v20, %v4240_v33  ;;  %v5467_v39 = vpop.f32.mrb[62].mxu1 }
 0x32e   : > { %4313 = vst [vmem:[%s6986_s30 + $0xd0] sm:$0xff] %v4249_v11  ;;  %v4252_v17 = vadd.f32 %v5467_v39, %v6981_v20  ;;  %v4243_v26 = vpop.f32.mrb[63].mxu1 }
 0x32f   : > { %4311 = vst [vmem:[%s6986_s30 + $0xc0] sm:$0xff] %v4241_v56  ;;  %v4244_v15 = vadd.f32 %v6981_v20, %v4243_v26 }
 0x330   : > { %4314 = vst [vmem:[%s6986_s30 + $0xd8] sm:$0xff] %v4252_v17 }
 0x331   : > { %4312 = vst [vmem:[%s6986_s30 + $0xc8] sm:$0xff] %v4244_v15 }
 0x333   : > { %v5470_v59 = vpop.f32.mrb[64].mxu1 }
 0x334   : > { %v4265_v12 = vadd.f32 %v5470_v59, %v6981_v20  ;;  %v4256_v44 = vpop.f32.mrb[65].mxu1 }
 0x335   : > { %v4257_v19 = vadd.f32 %v6981_v20, %v4256_v44  ;;  %v5471_v21 = vpop.f32.mrb[66].mxu1 }
 0x336   : > { %4317 = vst [vmem:[%s6986_s30 + $0xf0] sm:$0xff] %v4265_v12  ;;  %v4268_v30 = vadd.f32 %v5471_v21, %v6981_v20  ;;  %v4259_v45 = vpop.f32.mrb[67].mxu1 }
 0x337   : > { %4315 = vst [vmem:[%s6986_s30 + $0xe0] sm:$0xff] %v4257_v19  ;;  %v4260_v37 = vadd.f32 %v6981_v20, %v4259_v45 }
 0x338   : > { %4318 = vst [vmem:[%s6986_s30 + $0xf8] sm:$0xff] %v4268_v30 }
 0x339   : > { %4316 = vst [vmem:[%s6986_s30 + $0xe8] sm:$0xff] %v4260_v37 }
 0x33b   : > { %v5474_v32 = vpop.f32.mrb[68].mxu1 }
 0x33c   : > { %v4281_v58 = vadd.f32 %v5474_v32, %v6981_v20  ;;  %v4272_v24 = vpop.f32.mrb[69].mxu1 }
 0x33d   : > { %v4273_v0 = vadd.f32 %v6981_v20, %v4272_v24  ;;  %v5475_v18 = vpop.f32.mrb[70].mxu1 }
 0x33e   : > { %4321 = vst [vmem:[%s6986_s30 + $0x110] sm:$0xff] %v4281_v58  ;;  %v4284_v42 = vadd.f32 %v5475_v18, %v6981_v20  ;;  %v4275_v36 = vpop.f32.mrb[71].mxu1 }
 0x33f   : > { %4319 = vst [vmem:[%s6986_s30 + $0x100] sm:$0xff] %v4273_v0  ;;  %v4276_v46 = vadd.f32 %v6981_v20, %v4275_v36 }
 0x340   : > { %4322 = vst [vmem:[%s6986_s30 + $0x118] sm:$0xff] %v4284_v42 }
 0x341   : > { %4320 = vst [vmem:[%s6986_s30 + $0x108] sm:$0xff] %v4276_v46 }
 0x342 PF: > { %s15_s20 = sadd.s32 1, %s5987_s20   ;;  %s7075_s18 = smov %s5983_s19 }
 0x343   : > { %p12_p5 = scmp.ge.s32.totalorder %s15_s20, 4   ;;  %s7076_s19 = smov %s7078_s21 }
 0x345   :  { %14 = sbr.rel (!%p12_p5) target bundleno = 2 (0x2), region = 78 }

// kernel: custom-call
= control target key start
LH: loop header
LB: loop body
LE: loop exit
PB: predicated region body
PF: predicated region fallthrough
CT: control target
= control target key end

     0   :  { %5 = vsyncpa [#allocation9], 0  ;;  %v1627_v0 = vmov 2147483648   ;;  %v1628_v1 = vmov 2147483647   ;;  %s1911_s0 = inlined_call_operand.vmem [shape: f32[2,2304], index: 0, kind: input, shape index: {}]   ;;  %s1912_s1 = inlined_call_operand.hbm [shape: f32[2,16], index: 1, kind: output, shape index: {0}]   ;;  %s1913_s2 = inlined_call_operand.vmem [shape: s32[2,16], index: 2, kind: output, shape index: {1}]  }
   0x1   :  { %7 = vst [vmem:[#allocation12] sm:$0xff] %v1627_v0  ;;  %9 = vst [vmem:[#allocation12 + $0x8] sm:$0xff] %v1627_v0 }
   0x2   :  { %10 = vst [vmem:[#allocation14] sm:$0xff] %v1628_v1  ;;  %12 = vst [vmem:[#allocation14 + $0x8] sm:$0xff] %v1628_v1 }
   0x3   :  { %v53_v2 = vlaneseq  ;;  %v31_v3 = vld [vmem:[%s1911_s0] sm:$0xff]  ;;  %v1629_v5 = vmov 2147483648   ;;  %v1630_v6 = vmov 2147483647   ;;  %v33_v7 = vld [vmem:[%s1911_s0 + $0x8] sm:$0xff]  ;;  %v35_v8 = vld [vmem:[%s1911_s0 + $0x10] sm:$0xff] }
   0x4   :  { %v1563_v4 = vld [vmem:[%s1911_s0 + $0x20] sm:$0xf]  ;;  %130 = vst [vmem:[#allocation13] sm:$0xff] %v1629_v5  ;;  %132 = vst [vmem:[#allocation13 + $0x8] sm:$0xff] %v1629_v5  ;;  %v37_v9 = vld [vmem:[%s1911_s0 + $0x18] sm:$0xff]  ;;  %vm63_vm0 = vcmp.lt.s32.totalorder %v31_v3, 0 }
   0x5   :  { %133 = vst [vmem:[#allocation15] sm:$0xff] %v1630_v6  ;;  %135 = vst [vmem:[#allocation15 + $0x8] sm:$0xff] %v1630_v6  ;;  %v1668_v10 = vshrl.u32 %v53_v2, 7  ;;  %v54_v11 = vand.u32 127, %v53_v2  ;;  %v64_v13 = vsub.s32 2147483647, %v31_v3 }
   0x6   :  { %49 = vst [vmem:[#allocation16 + $0x20] sm:$0xf] %v1563_v4  ;;  %v73_v14 = vsub.s32 2147483647, %v33_v7  ;;  %v82_v15 = vsub.s32 2147483647, %v35_v8 }
   0x7   :  { %v57_v12 = vshrl.u32 %v1668_v10, 1  ;;  %v91_v16 = vsub.s32 2147483647, %v37_v9  ;;  %vm72_vm1 = vcmp.lt.s32.totalorder %v33_v7, 0  ;;  %vm81_vm2 = vcmp.lt.s32.totalorder %v35_v8, 0  ;;  %s1672_s0 = smov 0  }
   0x8   :  { %vm90_vm3 = vcmp.lt.s32.totalorder %v37_v9, 0  ;;  %v65_v19 = vsel %vm63_vm0, %v64_v13, %v31_v3  ;;  %v74_v20 = vsel %vm72_vm1, %v73_v14, %v33_v7  ;;  %v83_v21 = vsel %vm81_vm2, %v82_v15, %v35_v8 }
   0x9   :  { %v59_v17 = vmul.u32 128, %v57_v12  ;;  %v92_v22 = vsel %vm90_vm3, %v91_v16, %v37_v9 }
   0xb   :  { %v60_v18 = vadd.s32 %v59_v17, %v54_v11 }
   0xd   :  { %v98_v23 = vld [vmem:[#allocation16 + $0x20] sm:$0xff]  ;;  %vm67_vm4 = vcmp.lt.s32.totalorder %v60_v18, 2304  ;;  %v75_v24 = vadd.s32 512, %v60_v18  ;;  %v84_v25 = vadd.s32 1024, %v60_v18  ;;  %v93_v26 = vadd.s32 1536, %v60_v18  ;;  %116 = vst [vmem:[#allocation17] sm:$0xff] %v60_v18 }
   0xe   :  { %v68_v27 = vsel %vm67_vm4, %v65_v19, 2147483648  ;;  %vm99_vm5 = vcmp.lt.s32.totalorder %v98_v23, 0  ;;  %v100_v28 = vsub.s32 2147483647, %v98_v23  ;;  %v102_v29 = vadd.s32 2048, %v60_v18 }
   0xf   :  { %69 = vst [vmem:[#allocation16] sm:$0xff] %v68_v27  ;;  %vm76_vm6 = vcmp.lt.s32.totalorder %v75_v24, 2304  ;;  %vm85_vm7 = vcmp.lt.s32.totalorder %v84_v25, 2304  ;;  %vm94_vm8 = vcmp.lt.s32.totalorder %v93_v26, 2304  ;;  %119 = vst [vmem:[#allocation17 + $0x8] sm:$0xff] %v75_v24 }
  0x10   :  { %122 = vst [vmem:[#allocation17 + $0x10] sm:$0xff] %v84_v25  ;;  %125 = vst [vmem:[#allocation17 + $0x18] sm:$0xff] %v93_v26  ;;  %v77_v30 = vsel %vm76_vm6, %v74_v20, 2147483648  ;;  %v86_v31 = vsel %vm85_vm7, %v83_v21, 2147483648  ;;  %v95_v32 = vsel %vm94_vm8, %v92_v22, 2147483648  ;;  %v101_v33 = vsel %vm99_vm5, %v100_v28, %v98_v23 }
  0x11   :  { %128 = vst [vmem:[#allocation17 + $0x20] sm:$0xff] %v102_v29  ;;  %78 = vst [vmem:[#allocation16 + $0x8] sm:$0xff] %v77_v30  ;;  %vm103_vm9 = vcmp.lt.s32.totalorder %v102_v29, 2304 }
  0x12   :  { %87 = vst [vmem:[#allocation16 + $0x10] sm:$0xff] %v86_v31  ;;  %96 = vst [vmem:[#allocation16 + $0x18] sm:$0xff] %v95_v32  ;;  %v104_v34 = vsel %vm103_vm9, %v101_v33, 2147483648 }
  0x13   :  { %105 = vst [vmem:[#allocation16 + $0x20] sm:$0xff] %v104_v34 }
  0x14 LB: > { %v144_v36 = vld [vmem:[#allocation17] sm:$0xff]  ;;  %s508_s19 = scalar_lea.vmem [#allocation13], %s1625_s0  ;;  %s510_s20 = scalar_lea.vmem [#allocation15], %s1625_s0  ;;  %s1625_s0 = sphi %s1672_s0, %s142_s0  }
  0x15   : > { %s142_s0 = sadd.s32 1, %s1625_s0  }
  0x16   : > { %v143_v35 = vld [vmem:[#allocation16] sm:$0xff]  ;;  %v149_v38 = vld [vmem:[#allocation17 + $0x8] sm:$0xff]  ;;  %p139_p2 = scmp.ge.s32.totalorder %s142_s0, 16  }
  0x17   : > { %vm153_vm12 = vcmp.lt.s32.totalorder %v149_v38, %v144_v36  ;;  %v162_v40 = vld [vmem:[#allocation17 + $0x10] sm:$0xff]  ;;  %v175_v44 = vld [vmem:[#allocation17 + $0x18] sm:$0xff]  ;;  %s1636_s0 = smov (%p139_p2), [#allocation8]  }
  0x18   : > { %v147_v37 = vld [vmem:[#allocation16 + $0x8] sm:$0xff] }
  0x19   : > { %vm151_vm10 = vcmp.gt.s32.totalorder %v147_v37, %v143_v35  ;;  %vm152_vm11 = vcmp.eq.s32.totalorder %v147_v37, %v143_v35  ;;  %v160_v39 = vld [vmem:[#allocation16 + $0x10] sm:$0xff]  ;;  %v173_v43 = vld [vmem:[#allocation16 + $0x18] sm:$0xff]  ;;  %v188_v48 = vld [vmem:[#allocation17 + $0x20] sm:$0xff] }
  0x1a   : > { %vm154_vm13 = vmand %vm152_vm11, %vm153_vm12  ;;  %v186_v47 = vld [vmem:[#allocation16 + $0x20] sm:$0xff] }
  0x1b   : > { %vm155_vm14 = vmor %vm151_vm10, %vm154_vm13 }
  0x1c   : > { %v156_v41 = vsel %vm155_vm14, %v147_v37, %v143_v35  ;;  %v157_v42 = vsel %vm155_vm14, %v149_v38, %v144_v36 }
  0x1d   : > { %vm164_vm15 = vcmp.gt.s32.totalorder %v160_v39, %v156_v41  ;;  %vm165_vm0 = vcmp.eq.s32.totalorder %v160_v39, %v156_v41  ;;  %vm166_vm1 = vcmp.lt.s32.totalorder %v162_v40, %v157_v42 }
  0x1e   : > { %vm167_vm2 = vmand %vm165_vm0, %vm166_vm1 }
  0x1f   : > { %vm168_vm3 = vmor %vm164_vm15, %vm167_vm2 }
  0x20   : > { %v169_v45 = vsel %vm168_vm3, %v160_v39, %v156_v41  ;;  %v170_v46 = vsel %vm168_vm3, %v162_v40, %v157_v42 }
  0x21   : > { %vm177_vm4 = vcmp.gt.s32.totalorder %v173_v43, %v169_v45  ;;  %vm178_vm5 = vcmp.eq.s32.totalorder %v173_v43, %v169_v45  ;;  %vm179_vm6 = vcmp.lt.s32.totalorder %v175_v44, %v170_v46 }
  0x22   : > { %vm180_vm7 = vmand %vm178_vm5, %vm179_vm6 }
  0x23   : > { %vm181_vm8 = vmor %vm177_vm4, %vm180_vm7 }
  0x24   : > { %v182_v49 = vsel %vm181_vm8, %v173_v43, %v169_v45  ;;  %v183_v50 = vsel %vm181_vm8, %v175_v44, %v170_v46 }
  0x25   : > { %vm190_vm9 = vcmp.gt.s32.totalorder %v186_v47, %v182_v49  ;;  %vm191_vm10 = vcmp.eq.s32.totalorder %v186_v47, %v182_v49  ;;  %vm192_vm11 = vcmp.lt.s32.totalorder %v188_v48, %v183_v50 }
  0x26   : > { %vm193_vm12 = vmand %vm191_vm10, %vm192_vm11 }
  0x27   : > { %vm194_vm13 = vmor %vm190_vm9, %vm193_vm12 }
  0x28   : > { %v195_v51 = vsel %vm194_vm13, %v186_v47, %v182_v49  ;;  %v196_v52 = vsel %vm194_vm13, %v188_v48, %v183_v50 }
  0x29   : > { %v198_v53 = vrot.slane %v195_v51, 2  ;;  %v199_v54 = vrot.slane %v196_v52, 2 }
  0x2b   : > { %vm201_vm14 = vcmp.gt.s32.totalorder %v198_v53, %v195_v51  ;;  %vm202_vm15 = vcmp.eq.s32.totalorder %v198_v53, %v195_v51  ;;  %vm203_vm0 = vcmp.lt.s32.totalorder %v199_v54, %v196_v52 }
  0x2c   : > { %vm204_vm1 = vmand %vm202_vm15, %vm203_vm0 }
  0x2d   : > { %vm205_vm2 = vmor %vm201_vm14, %vm204_vm1 }
  0x2e   : > { %v206_v55 = vsel %vm205_vm2, %v198_v53, %v195_v51  ;;  %v207_v56 = vsel %vm205_vm2, %v199_v54, %v196_v52 }
  0x2f   : > { %v209_v57 = vrot.slane %v206_v55, 2  ;;  %v210_v58 = vrot.slane %v207_v56, 2 }
  0x31   : > { %vm212_vm3 = vcmp.gt.s32.totalorder %v209_v57, %v206_v55  ;;  %vm213_vm4 = vcmp.eq.s32.totalorder %v209_v57, %v206_v55  ;;  %vm214_vm5 = vcmp.lt.s32.totalorder %v210_v58, %v207_v56 }
  0x32   : > { %vm215_vm6 = vmand %vm213_vm4, %vm214_vm5 }
  0x33   : > { %vm216_vm7 = vmor %vm212_vm3, %vm215_vm6 }
  0x34   : > { %v217_v59 = vsel %vm216_vm7, %v209_v57, %v206_v55  ;;  %v218_v60 = vsel %vm216_vm7, %v210_v58, %v207_v56 }
  0x35   : > { %v220_v61 = vrot.slane %v217_v59, 2  ;;  %v221_v62 = vrot.slane %v218_v60, 2 }
  0x37   : > { %vm223_vm8 = vcmp.gt.s32.totalorder %v220_v61, %v217_v59  ;;  %vm224_vm9 = vcmp.eq.s32.totalorder %v220_v61, %v217_v59  ;;  %vm225_vm10 = vcmp.lt.s32.totalorder %v221_v62, %v218_v60 }
  0x38   : > { %vm226_vm11 = vmand %vm224_vm9, %vm225_vm10 }
  0x39   : > { %vm227_vm12 = vmor %vm223_vm8, %vm226_vm11 }
  0x3a   : > { %v229_v63 = vsel %vm227_vm12, %v221_v62, %v218_v60  ;;  %v228_v0 = vsel %vm227_vm12, %v220_v61, %v217_v59 }
  0x3b   : > { %263 = vxpose.xlu1.b32.start [1/16] %v229_v63, 128  ;;  %231 = vxpose.xlu0.b32.start [1/16] %v228_v0, 128 }
  0x3f   : > { %264 = vxpose.xlu1.b32.cont [2/16] %v229_v63, 128  ;;  %232 = vxpose.xlu0.b32.cont [2/16] %v228_v0, 128 }
  0x43   : > { %265 = vxpose.xlu1.b32.cont [3/16] %v229_v63, 128  ;;  %233 = vxpose.xlu0.b32.cont [3/16] %v228_v0, 128 }
  0x47   : > { %266 = vxpose.xlu1.b32.cont [4/16] %v229_v63, 128  ;;  %234 = vxpose.xlu0.b32.cont [4/16] %v228_v0, 128 }
  0x4b   : > { %267 = vxpose.xlu1.b32.cont [5/16] %v229_v63, 128  ;;  %235 = vxpose.xlu0.b32.cont [5/16] %v228_v0, 128 }
  0x4f   : > { %268 = vxpose.xlu1.b32.cont [6/16] %v229_v63, 128  ;;  %236 = vxpose.xlu0.b32.cont [6/16] %v228_v0, 128 }
  0x53   : > { %269 = vxpose.xlu1.b32.cont [7/16] %v229_v63, 128  ;;  %237 = vxpose.xlu0.b32.cont [7/16] %v228_v0, 128 }
  0x57   : > { %270 = vxpose.xlu1.b32.cont [8/16] %v229_v63, 128  ;;  %238 = vxpose.xlu0.b32.cont [8/16] %v228_v0, 128 }
  0x5b   : > { %271 = vxpose.xlu1.b32.cont [9/16] %v229_v63, 128  ;;  %239 = vxpose.xlu0.b32.cont [9/16] %v228_v0, 128 }
  0x5f   : > { %272 = vxpose.xlu1.b32.cont [10/16] %v229_v63, 128  ;;  %240 = vxpose.xlu0.b32.cont [10/16] %v228_v0, 128 }
  0x63   : > { %273 = vxpose.xlu1.b32.cont [11/16] %v229_v63, 128  ;;  %241 = vxpose.xlu0.b32.cont [11/16] %v228_v0, 128 }
  0x67   : > { %274 = vxpose.xlu1.b32.cont [12/16] %v229_v63, 128  ;;  %242 = vxpose.xlu0.b32.cont [12/16] %v228_v0, 128 }
  0x6b   : > { %275 = vxpose.xlu1.b32.cont [13/16] %v229_v63, 128  ;;  %243 = vxpose.xlu0.b32.cont [13/16] %v228_v0, 128 }
  0x6f   : > { %276 = vxpose.xlu1.b32.cont [14/16] %v229_v63, 128  ;;  %244 = vxpose.xlu0.b32.cont [14/16] %v228_v0, 128 }
  0x73   : > { %277 = vxpose.xlu1.b32.cont [15/16] %v229_v63, 128  ;;  %245 = vxpose.xlu0.b32.cont [15/16] %v228_v0, 128 }
  0x77   : > { %278 = vxpose.xlu1.b32.end [16/16] %v229_v63, 128  ;;  %246 = vxpose.xlu0.b32.end [16/16] %v228_v0, 128 }
  0xbb   : > { %v279_v1 = vpop.trf.xlu1  ;;  %v247_v3 = vpop.trf.xlu0 }
  0xbf   : > { %v280_v4 = vpop.trf.xlu1  ;;  %v248_v5 = vpop.trf.xlu0 }
  0xc0   : > { %vm299_vm13 = vcmp.lt.s32.totalorder %v280_v4, %v279_v1  ;;  %vm297_vm14 = vcmp.gt.s32.totalorder %v248_v5, %v247_v3  ;;  %vm298_vm15 = vcmp.eq.s32.totalorder %v248_v5, %v247_v3 }
  0xc1   : > { %vm300_vm0 = vmand %vm298_vm15, %vm299_vm13 }
  0xc2   : > { %vm301_vm1 = vmor %vm297_vm14, %vm300_vm0 }
  0xc3   : > { %v302_v6 = vsel %vm301_vm1, %v248_v5, %v247_v3  ;;  %v281_v7 = vpop.trf.xlu1  ;;  %v303_v8 = vsel %vm301_vm1, %v280_v4, %v279_v1  ;;  %v249_v9 = vpop.trf.xlu0 }
  0xc4   : > { %vm308_vm2 = vcmp.lt.s32.totalorder %v281_v7, %v303_v8  ;;  %vm306_vm3 = vcmp.gt.s32.totalorder %v249_v9, %v302_v6  ;;  %vm307_vm4 = vcmp.eq.s32.totalorder %v249_v9, %v302_v6 }
  0xc5   : > { %vm309_vm5 = vmand %vm307_vm4, %vm308_vm2 }
  0xc6   : > { %vm310_vm6 = vmor %vm306_vm3, %vm309_vm5 }
  0xc7   : > { %v311_v11 = vsel %vm310_vm6, %v249_v9, %v302_v6  ;;  %v282_v12 = vpop.trf.xlu1  ;;  %v312_v13 = vsel %vm310_vm6, %v281_v7, %v303_v8  ;;  %v250_v14 = vpop.trf.xlu0 }
  0xc8   : > { %vm317_vm7 = vcmp.lt.s32.totalorder %v282_v12, %v312_v13  ;;  %vm315_vm8 = vcmp.gt.s32.totalorder %v250_v14, %v311_v11  ;;  %vm316_vm9 = vcmp.eq.s32.totalorder %v250_v14, %v311_v11 }
  0xc9   : > { %vm318_vm10 = vmand %vm316_vm9, %vm317_vm7 }
  0xca   : > { %vm319_vm11 = vmor %vm315_vm8, %vm318_vm10 }
  0xcb   : > { %v320_v15 = vsel %vm319_vm11, %v250_v14, %v311_v11  ;;  %v283_v16 = vpop.trf.xlu1  ;;  %v321_v17 = vsel %vm319_vm11, %v282_v12, %v312_v13  ;;  %v251_v18 = vpop.trf.xlu0 }
  0xcc   : > { %vm326_vm12 = vcmp.lt.s32.totalorder %v283_v16, %v321_v17  ;;  %vm324_vm13 = vcmp.gt.s32.totalorder %v251_v18, %v320_v15  ;;  %vm325_vm14 = vcmp.eq.s32.totalorder %v251_v18, %v320_v15 }
  0xcd   : > { %vm327_vm15 = vmand %vm325_vm14, %vm326_vm12 }
  0xce   : > { %vm328_vm0 = vmor %vm324_vm13, %vm327_vm15 }
  0xcf   : > { %v329_v19 = vsel %vm328_vm0, %v251_v18, %v320_v15  ;;  %v284_v20 = vpop.trf.xlu1  ;;  %v330_v21 = vsel %vm328_vm0, %v283_v16, %v321_v17  ;;  %v252_v22 = vpop.trf.xlu0 }
  0xd0   : > { %vm335_vm1 = vcmp.lt.s32.totalorder %v284_v20, %v330_v21  ;;  %vm333_vm2 = vcmp.gt.s32.totalorder %v252_v22, %v329_v19  ;;  %vm334_vm3 = vcmp.eq.s32.totalorder %v252_v22, %v329_v19 }
  0xd1   : > { %vm336_vm4 = vmand %vm334_vm3, %vm335_vm1 }
  0xd2   : > { %vm337_vm5 = vmor %vm333_vm2, %vm336_vm4 }
  0xd3   : > { %v338_v23 = vsel %vm337_vm5, %v252_v22, %v329_v19  ;;  %v285_v24 = vpop.trf.xlu1  ;;  %v339_v25 = vsel %vm337_vm5, %v284_v20, %v330_v21  ;;  %v253_v26 = vpop.trf.xlu0 }
  0xd4   : > { %vm344_vm6 = vcmp.lt.s32.totalorder %v285_v24, %v339_v25  ;;  %vm342_vm7 = vcmp.gt.s32.totalorder %v253_v26, %v338_v23  ;;  %vm343_vm8 = vcmp.eq.s32.totalorder %v253_v26, %v338_v23 }
  0xd5   : > { %vm345_vm9 = vmand %vm343_vm8, %vm344_vm6 }
  0xd6   : > { %vm346_vm10 = vmor %vm342_vm7, %vm345_vm9 }
  0xd7   : > { %v347_v27 = vsel %vm346_vm10, %v253_v26, %v338_v23  ;;  %v286_v28 = vpop.trf.xlu1  ;;  %v348_v29 = vsel %vm346_vm10, %v285_v24, %v339_v25  ;;  %v254_v30 = vpop.trf.xlu0 }
  0xd8   : > { %vm353_vm11 = vcmp.lt.s32.totalorder %v286_v28, %v348_v29  ;;  %vm351_vm12 = vcmp.gt.s32.totalorder %v254_v30, %v347_v27  ;;  %vm352_vm13 = vcmp.eq.s32.totalorder %v254_v30, %v347_v27 }
  0xd9   : > { %vm354_vm14 = vmand %vm352_vm13, %vm353_vm11 }
  0xda   : > { %vm355_vm15 = vmor %vm351_vm12, %vm354_vm14 }
  0xdb   : > { %v356_v31 = vsel %vm355_vm15, %v254_v30, %v347_v27  ;;  %v287_v32 = vpop.trf.xlu1  ;;  %v357_v33 = vsel %vm355_vm15, %v286_v28, %v348_v29  ;;  %v255_v34 = vpop.trf.xlu0 }
  0xdc   : > { %vm362_vm0 = vcmp.lt.s32.totalorder %v287_v32, %v357_v33  ;;  %vm360_vm1 = vcmp.gt.s32.totalorder %v255_v34, %v356_v31  ;;  %vm361_vm2 = vcmp.eq.s32.totalorder %v255_v34, %v356_v31 }
  0xdd   : > { %vm363_vm3 = vmand %vm361_vm2, %vm362_vm0 }
  0xde   : > { %vm364_vm4 = vmor %vm360_vm1, %vm363_vm3 }
  0xdf   : > { %v365_v35 = vsel %vm364_vm4, %v255_v34, %v356_v31  ;;  %v288_v36 = vpop.trf.xlu1  ;;  %v366_v37 = vsel %vm364_vm4, %v287_v32, %v357_v33  ;;  %v256_v38 = vpop.trf.xlu0  ;;  %v1631_v34 = vmov 2147483648  }
  0xe0   : > { %vm371_vm5 = vcmp.lt.s32.totalorder %v288_v36, %v366_v37  ;;  %vm369_vm6 = vcmp.gt.s32.totalorder %v256_v38, %v365_v35  ;;  %vm370_vm7 = vcmp.eq.s32.totalorder %v256_v38, %v365_v35 }
  0xe1   : > { %vm372_vm8 = vmand %vm370_vm7, %vm371_vm5 }
  0xe2   : > { %vm373_vm9 = vmor %vm369_vm6, %vm372_vm8 }
  0xe3   : > { %v374_v39 = vsel %vm373_vm9, %v256_v38, %v365_v35  ;;  %v289_v40 = vpop.trf.xlu1  ;;  %v375_v41 = vsel %vm373_vm9, %v288_v36, %v366_v37  ;;  %v257_v42 = vpop.trf.xlu0  ;;  %v1632_v35 = vmov 2147483647  }
  0xe4   : > { %vm380_vm10 = vcmp.lt.s32.totalorder %v289_v40, %v375_v41  ;;  %vm378_vm11 = vcmp.gt.s32.totalorder %v257_v42, %v374_v39  ;;  %vm379_vm12 = vcmp.eq.s32.totalorder %v257_v42, %v374_v39 }
  0xe5   : > { %vm381_vm13 = vmand %vm379_vm12, %vm380_vm10 }
  0xe6   : > { %vm382_vm14 = vmor %vm378_vm11, %vm381_vm13 }
  0xe7   : > { %v383_v43 = vsel %vm382_vm14, %v257_v42, %v374_v39  ;;  %v290_v44 = vpop.trf.xlu1  ;;  %v384_v45 = vsel %vm382_vm14, %v289_v40, %v375_v41  ;;  %v258_v46 = vpop.trf.xlu0  ;;  %v608_v42 = vld [vmem:[#allocation12] sm:$0xff] (%p139_p2) }
  0xe8   : > { %vm389_vm15 = vcmp.lt.s32.totalorder %v290_v44, %v384_v45  ;;  %vm387_vm0 = vcmp.gt.s32.totalorder %v258_v46, %v383_v43  ;;  %vm388_vm1 = vcmp.eq.s32.totalorder %v258_v46, %v383_v43 }
  0xe9   : > { %vm390_vm2 = vmand %vm388_vm1, %vm389_vm15 }
  0xea   : > { %vm391_vm3 = vmor %vm387_vm0, %vm390_vm2 }
  0xeb   : > { %v392_v47 = vsel %vm391_vm3, %v258_v46, %v383_v43  ;;  %v291_v48 = vpop.trf.xlu1  ;;  %v393_v49 = vsel %vm391_vm3, %v290_v44, %v384_v45  ;;  %v259_v50 = vpop.trf.xlu0  ;;  %v609_v43 = vld [vmem:[#allocation14] sm:$0xff] (%p139_p2)  ;;  %v629_v44 = vld [vmem:[#allocation12 + $0x8] sm:$0xff] (%p139_p2)  ;;  %v1633_v46 = vmov (%p139_p2), 839939668  }
  0xec   : > { %vm398_vm4 = vcmp.lt.s32.totalorder %v291_v48, %v393_v49  ;;  %vm396_vm5 = vcmp.gt.s32.totalorder %v259_v50, %v392_v47  ;;  %vm397_vm6 = vcmp.eq.s32.totalorder %v259_v50, %v392_v47  ;;  %v631_v45 = vld [vmem:[#allocation14 + $0x8] sm:$0xff] (%p139_p2) }
  0xed   : > { %vm399_vm7 = vmand %vm397_vm6, %vm398_vm4 }
  0xee   : > { %vm400_vm8 = vmor %vm396_vm5, %vm399_vm7 }
  0xef   : > { %v401_v51 = vsel %vm400_vm8, %v259_v50, %v392_v47  ;;  %v292_v52 = vpop.trf.xlu1  ;;  %v402_v53 = vsel %vm400_vm8, %v291_v48, %v393_v49  ;;  %v260_v54 = vpop.trf.xlu0  ;;  %v684_v47 = vunpack.c.l.s4 (%p139_p2), %v1633_v46 }
  0xf0   : > { %vm407_vm9 = vcmp.lt.s32.totalorder %v292_v52, %v402_v53  ;;  %vm405_vm10 = vcmp.gt.s32.totalorder %v260_v54, %v401_v51  ;;  %vm406_vm11 = vcmp.eq.s32.totalorder %v260_v54, %v401_v51 }
  0xf1   : > { %vm408_vm12 = vmand %vm406_vm11, %vm407_vm9  ;;  %v685_v48 = vunpack.c.0.s8 (%p139_p2), %v684_v47 }
  0xf2   : > { %vm409_vm13 = vmor %vm405_vm10, %vm408_vm12 }
  0xf3   : > { %v410_v55 = vsel %vm409_vm13, %v260_v54, %v401_v51  ;;  %v293_v56 = vpop.trf.xlu1  ;;  %v411_v57 = vsel %vm409_vm13, %v292_v52, %v402_v53  ;;  %v261_v58 = vpop.trf.xlu0  ;;  %v1634_v52 = vmov (%p139_p2), 1417023538  }
  0xf4   : > { %vm416_vm14 = vcmp.lt.s32.totalorder %v293_v56, %v411_v57  ;;  %vm414_vm15 = vcmp.gt.s32.totalorder %v261_v58, %v410_v55  ;;  %vm415_vm0 = vcmp.eq.s32.totalorder %v261_v58, %v410_v55  ;;  %v712_v53 = vunpack.c.l.s4 (%p139_p2), %v1634_v52 }
  0xf5   : > { %vm417_vm1 = vmand %vm415_vm0, %vm416_vm14 }
  0xf6   : > { %vm418_vm2 = vmor %vm414_vm15, %vm417_vm1 }
  0xf7   : > { %v419_v59 = vsel %vm418_vm2, %v261_v58, %v410_v55  ;;  %v294_v60 = vpop.trf.xlu1  ;;  %v420_v61 = vsel %vm418_vm2, %v293_v56, %v411_v57  ;;  %v262_v62 = vpop.trf.xlu0  ;;  %v1693_v58 = vsub.s32 (%p139_p2), %v685_v48, %v1668_v10 }
  0xf8   : > { %vm425_vm3 = vcmp.lt.s32.totalorder %v294_v60, %v420_v61  ;;  %vm423_vm4 = vcmp.gt.s32.totalorder %v262_v62, %v419_v59  ;;  %vm424_vm5 = vcmp.eq.s32.totalorder %v262_v62, %v419_v59 }
  0xf9   : > { %vm426_vm6 = vmand %vm424_vm5, %vm425_vm3 }
  0xfa   : > { %vm427_vm7 = vmor %vm423_vm4, %vm426_vm6 }
  0xfb   : > { %v428_v63 = vsel %vm427_vm7, %v262_v62, %v419_v59  ;;  %v429_v0 = vsel %vm427_vm7, %v294_v60, %v420_v61  ;;  %v705_v59 = vand.u32 (%p139_p2), 4, %v1668_v10  ;;  %v713_v60 = vunpack.c.0.s8 (%p139_p2), %v712_v53 }
  0xfc   : > { %v431_v1 = vrot.slane %v428_v63, 1  ;;  %v432_v3 = vrot.slane %v429_v0, 1 }
  0xfe   : > { %vm434_vm8 = vcmp.gt.s32.totalorder %v431_v1, %v428_v63  ;;  %vm435_vm9 = vcmp.eq.s32.totalorder %v431_v1, %v428_v63  ;;  %vm436_vm10 = vcmp.lt.s32.totalorder %v432_v3, %v429_v0 }
  0xff   : > { %vm437_vm11 = vmand %vm435_vm9, %vm436_vm10 }
 0x100   : > { %vm438_vm12 = vmor %vm434_vm8, %vm437_vm11 }
 0x101   : > { %v439_v4 = vsel %vm438_vm12, %v431_v1, %v428_v63  ;;  %v440_v5 = vsel %vm438_vm12, %v432_v3, %v429_v0 }
 0x102   : > { %v442_v6 = vrot.slane %v439_v4, 1  ;;  %v443_v7 = vrot.slane %v440_v5, 1 }
 0x104   : > { %vm445_vm13 = vcmp.gt.s32.totalorder %v442_v6, %v439_v4  ;;  %vm446_vm14 = vcmp.eq.s32.totalorder %v442_v6, %v439_v4  ;;  %vm447_vm15 = vcmp.lt.s32.totalorder %v443_v7, %v440_v5 }
 0x105   : > { %vm448_vm0 = vmand %vm446_vm14, %vm447_vm15 }
 0x106   : > { %vm449_vm1 = vmor %vm445_vm13, %vm448_vm0 }
 0x107   : > { %v450_v8 = vsel %vm449_vm1, %v442_v6, %v439_v4  ;;  %v451_v9 = vsel %vm449_vm1, %v443_v7, %v440_v5  ;;  %v1922_v5 = vmov (%p139_p2), 0 }
 0x108   : > { %v453_v11 = vrot.slane %v450_v8, 1  ;;  %v454_v12 = vrot.slane %v451_v9, 1 }
 0x10a   : > { %vm458_vm2 = vcmp.lt.s32.totalorder %v454_v12, %v451_v9  ;;  %vm456_vm3 = vcmp.gt.s32.totalorder %v453_v11, %v450_v8  ;;  %vm457_vm4 = vcmp.eq.s32.totalorder %v453_v11, %v450_v8 }
 0x10b   : > { %vm459_vm5 = vmand %vm457_vm4, %vm458_vm2 }
 0x10c   : > { %vm460_vm6 = vmor %vm456_vm3, %vm459_vm5 }
 0x10d   : > { %v461_v13 = vsel %vm460_vm6, %v453_v11, %v450_v8  ;;  %v462_v14 = vsel %vm460_vm6, %v454_v12, %v451_v9  ;;  %v1635_v9 = vmov (%p139_p2), 1732584193   ;;  %v1721_v12 = vsub.s32 (%p139_p2), %v713_v60, %v1668_v10 }
 0x10e   : > { %v464_v15 = vrot.slane %v461_v13, 1  ;;  %v465_v16 = vrot.slane %v462_v14, 1  ;;  %v740_v11 = vunpack.c.l.s4 (%p139_p2), %v1635_v9 }
 0x110   : > { %vm467_vm7 = vcmp.gt.s32.totalorder %v464_v15, %v461_v13  ;;  %vm468_vm8 = vcmp.eq.s32.totalorder %v464_v15, %v461_v13  ;;  %vm469_vm9 = vcmp.lt.s32.totalorder %v465_v16, %v462_v14 }
 0x111   : > { %vm470_vm10 = vmand %vm468_vm8, %vm469_vm9 }
 0x112   : > { %vm471_vm11 = vmor %vm467_vm7, %vm470_vm10 }
 0x113   : > { %v472_v17 = vsel %vm471_vm11, %v464_v15, %v461_v13  ;;  %v473_v18 = vsel %vm471_vm11, %v465_v16, %v462_v14  ;;  %v733_v14 = vand.u32 (%p139_p2), 2, %v1668_v10 }
 0x114   : > { %v475_v19 = vrot.slane %v472_v17, 1  ;;  %v476_v20 = vrot.slane %v473_v18, 1 }
 0x116   : > { %vm478_vm12 = vcmp.gt.s32.totalorder %v475_v19, %v472_v17  ;;  %vm479_vm13 = vcmp.eq.s32.totalorder %v475_v19, %v472_v17  ;;  %vm480_vm14 = vcmp.lt.s32.totalorder %v476_v20, %v473_v18 }
 0x117   : > { %vm481_vm15 = vmand %vm479_vm13, %vm480_vm14 }
 0x118   : > { %vm482_vm0 = vmor %vm478_vm12, %vm481_vm15 }
 0x119   : > { %v483_v21 = vsel %vm482_vm0, %v475_v19, %v472_v17  ;;  %v484_v22 = vsel %vm482_vm0, %v476_v20, %v473_v18  ;;  %v741_v19 = vunpack.c.0.s8 (%p139_p2), %v740_v11 }
 0x11a   : > { %v486_v23 = vrot.slane %v483_v21, 1  ;;  %v487_v24 = vrot.slane %v484_v22, 1 }
 0x11c   : > { %vm489_vm1 = vcmp.gt.s32.totalorder %v486_v23, %v483_v21  ;;  %vm490_vm2 = vcmp.eq.s32.totalorder %v486_v23, %v483_v21  ;;  %vm491_vm3 = vcmp.lt.s32.totalorder %v487_v24, %v484_v22 }
 0x11d   : > { %vm492_vm4 = vmand %vm490_vm2, %vm491_vm3 }
 0x11e   : > { %vm493_vm5 = vmor %vm489_vm1, %vm492_vm4 }
 0x11f   : > { %v494_v25 = vsel %vm493_vm5, %v486_v23, %v483_v21  ;;  %v495_v26 = vsel %vm493_vm5, %v487_v24, %v484_v22  ;;  %v1924_v22 = vmov (%p139_p2), 0 }
 0x120   : > { %v497_v27 = vrot.slane %v494_v25, 1  ;;  %v498_v28 = vrot.slane %v495_v26, 1 }
 0x122   : > { %vm500_vm6 = vcmp.gt.s32.totalorder %v497_v27, %v494_v25  ;;  %vm501_vm7 = vcmp.eq.s32.totalorder %v497_v27, %v494_v25  ;;  %vm502_vm8 = vcmp.lt.s32.totalorder %v498_v28, %v495_v26 }
 0x123   : > { %vm503_vm9 = vmand %vm501_vm7, %vm502_vm8 }
 0x124   : > { %vm504_vm10 = vmor %vm500_vm6, %vm503_vm9 }
 0x125   : > { %v506_v29 = vsel %vm504_vm10, %v498_v28, %v495_v26  ;;  %v505_v30 = vsel %vm504_vm10, %v497_v27, %v494_v25  ;;  %v1751_v25 = vsub.s32 (%p139_p2), %v741_v19, %v1668_v10 }
 0x126   : > { %513 = vxpose.xlu0.b32.start.end [1/1] (short) (narrow) %v506_v29, 8  ;;  %509 = vst [vmem:[%s508_s19] sm:$0x1] %v505_v30  ;;  %511 = vst [vmem:[%s510_s20] sm:$0x1] %v506_v29  ;;  %v761_v29 = vand.u32 (%p139_p2), 1, %v1668_v10  ;;  %v1930_v10 = vmov (%p139_p2), 0  ;;  %s1497_s19 = sshll.u32 (%p139_p2), %s1636_s0, 4  ;;  %s1498_s19 = int_to_ptr.vmem [resolvable:$true] %s1497_s19 }
 0x127   :  { %s1595_s20 = scalar_lea.vmem (%p139_p2), %s1498_s19, 32  ;;  %p1600_p4 = scmp.lt.s32.totalorder (%p139_p2), %s1498_s19, %s1498_s19 }
 0x128   :  { %p1596_p3 = scmp.ne.s32.totalorder (%p139_p2), %s1498_s19, %s1595_s20  ;;  %p1601_p5 = scmp.lt.s32.totalorder (%p139_p2), %s1595_s20, %s1595_s20 }
 0x12a   :  { %p1602_p6 = por (%p139_p2), %p1601_p5, %p1600_p4 }
 0x12c   :  { %p1603_p7 = pnand (%p139_p2), %p1602_p6, %p1596_p3 }
 0x12d   :  { %v595_v38 = vld [vmem:[#allocation13 + $0x7] ss:$-1 sm:$0xff] (%p139_p2)  ;;  %v597_v39 = vld [vmem:[#allocation13 + $0xf] ss:$-1 sm:$0xff] (%p139_p2) }
 0x12e   :  { %v602_v40 = vld [vmem:[#allocation15 + $0x7] ss:$-1 sm:$0xff] (%p139_p2)  ;;  %v604_v41 = vld [vmem:[#allocation15 + $0xf] ss:$-1 sm:$0xff] (%p139_p2)  ;;  %vm614_vm13 = vcmp.gt.s32.totalorder (%p139_p2), %v608_v42, %v597_v39  ;;  %vm615_vm14 = vcmp.eq.s32.totalorder (%p139_p2), %v608_v42, %v597_v39  ;;  %vm638_vm1 = vcmp.gt.s32.totalorder (%p139_p2), %v629_v44, %v595_v38  ;;  %vm639_vm2 = vcmp.eq.s32.totalorder (%p139_p2), %v629_v44, %v595_v38 }
 0x12f   :  { %vm616_vm15 = vcmp.lt.s32.totalorder (%p139_p2), %v609_v43, %v604_v41  ;;  %vm640_vm3 = vcmp.lt.s32.totalorder (%p139_p2), %v631_v45, %v602_v40 }
 0x130   :  { %vm617_vm0 = vmand (%p139_p2), %vm615_vm14, %vm616_vm15 }
 0x131   :  { %vm618_vm4 = vmor (%p139_p2), %vm614_vm13, %vm617_vm0 }
 0x132   :  { %v619_v49 = vsel (%p139_p2), %vm618_vm4, %v608_v42, %v597_v39  ;;  %vm641_vm5 = vmand (%p139_p2), %vm639_vm2, %vm640_vm3  ;;  %v1684_v50 = vsel (%p139_p2), %vm618_vm4, %v597_v39, %v608_v42  ;;  %v1686_v51 = vsel (%p139_p2), %vm618_vm4, %v604_v41, %v609_v43 }
 0x133   :  { %vm642_vm6 = vmor (%p139_p2), %vm638_vm1, %vm641_vm5  ;;  %vm1708_vm1 = vcmp.ne.s32.totalorder (%p139_p2), %v705_v59, 0 }
 0x134   :  { %v644_v54 = vsel (%p139_p2), %vm642_vm6, %v629_v44, %v595_v38  ;;  %v1688_v55 = vsel (%p139_p2), %vm642_vm6, %v595_v38, %v629_v44  ;;  %v650_v56 = vsel (%p139_p2), %vm642_vm6, %v631_v45, %v602_v40  ;;  %v1690_v57 = vsel (%p139_p2), %vm642_vm6, %v602_v40, %v631_v45 }
 0x135   :  { %vm665_vm7 = vcmp.gt.s32.totalorder (%p139_p2), %v619_v49, %v644_v54  ;;  %vm666_vm8 = vcmp.eq.s32.totalorder (%p139_p2), %v619_v49, %v644_v54  ;;  %vm1052_vm14 = vcmp.lt.s32.totalorder (%p139_p2), %v1686_v51, %v1690_v57  ;;  %v1923_v5 = vsel (%p139_p2), %vm1708_vm1, 4294967295, %v1922_v5 }
 0x1a6   : > { %v529_v31 = vpop.trf.xlu0 }
 0x1a7   : > { %v568_v32 = vrot.slane %v529_v31, 1  ;;  %1572 = vpush %v529_v31 }
 0x1a9   : > { %1574 = vpush %v568_v32 }
 0x1d8   : > { %s1573_s21 = spop %1572 }
 0x1d9   : > { %s546_s22 = sshrl.u32 %s1573_s21, 9  ;;  %s548_s23 = ssub.s32 0, %s1573_s21 }
 0x1da   : > { %p547_p0 = scmp.lt.s32.totalorder %s1573_s21, 0  ;;  %s1564_s24 = smin.u32 %s1573_s21, %s548_s23 }
 0x1db   : > { %s550_s25 = sand.u32 511, %s1564_s24   ;;  %s1566_s26 = sshll.u32 %s546_s22, 3 }
 0x1dc   : > { %s551_s27 = ssub.s32 0, %s550_s25  ;;  %s1575_s28 = spop %1574 }
 0x1dd   : > { %s1941_s27 = smov (!%p547_p0, %s551_s27), %s550_s25  ;;  %s572_s4 = ssub.s32 0, %s1575_s28 }
 0x1de   : > { %s553_s29 = sshrl.u32 %s1941_s27, 7  ;;  %s555_s30 = sand.u32 127, %s1941_s27  }
 0x1df   : > { %s1565_s3 = sshll.u32 %s553_s29, 8  ;;  %s1568_s6 = smin.u32 %s1575_s28, %s572_s4 }
 0x1e0   : > { %s556_s5 = sadd.s32 %s1565_s3, %s555_s30  ;;  %p571_p1 = scmp.lt.s32.totalorder %s1575_s28, 0 }
 0x1e1   : > { %v558_v33 = vstv %s556_s5  ;;  %s574_s7 = sand.u32 511, %s1568_s6   ;;  %s562_s9 = scalar_lea.vmem [#allocation16], %s1566_s26 }
 0x1e2   : > { %vm560_vm11 = vcmp.eq.s32.totalorder %v53_v2, %v558_v33  ;;  %s575_s8 = ssub.s32 0, %s574_s7  ;;  %s565_s10 = scalar_lea.vmem [#allocation17], %s1566_s26 }
 0x1e3   : > { %563 = vst.msk [vmem:[%s562_s9] sm:$0xff] %vm560_vm11, %v1631_v34  ;;  %566 = vst.msk [vmem:[%s565_s10] sm:$0xff] %vm560_vm11, %v1632_v35  ;;  %s1943_s8 = smov (!%p571_p1, %s575_s8), %s574_s7  ;;  %s570_s11 = sshrl.u32 %s1575_s28, 9  ;;  %vm1050_vm11 = vcmp.gt.s32.totalorder (%p139_p2), %v1684_v50, %v1688_v55 }
 0x1e4   : > { %s577_s12 = sshrl.u32 %s1943_s8, 7  ;;  %s579_s13 = sand.u32 127, %s1943_s8  }
 0x1e5   : > { %s1569_s14 = sshll.u32 %s577_s12, 8  ;;  %s1570_s16 = sshll.u32 %s570_s11, 3 }
 0x1e6   : > { %s580_s15 = sadd.s32 %s1569_s14, %s579_s13  ;;  %s586_s17 = scalar_lea.vmem [#allocation16], %s1570_s16 }
 0x1e7   : > { %v582_v36 = vstv %s580_s15  ;;  %s589_s18 = scalar_lea.vmem [#allocation17], %s1570_s16 }
 0x1e8   : > { %v583_v37 = vadd.s32 128, %v582_v36  ;;  %141 = sbr.rel (!%p139_p2) target bundleno = 20 (0x14), region = 140 }
 0x1ea   : > { %vm584_vm12 = vcmp.eq.s32.totalorder %v53_v2, %v583_v37  ;;  %v623_v2 = vsel (%p139_p2), %vm618_vm4, %v609_v43, %v604_v41 }
 0x1eb   : > { %587 = vst.msk [vmem:[%s586_s17] sm:$0xff] %vm584_vm12, %v1631_v34  ;;  %590 = vst.msk [vmem:[%s589_s18] sm:$0xff] %vm584_vm12, %v1632_v35  ;;  %vm667_vm9 = vcmp.lt.s32.totalorder (%p139_p2), %v623_v2, %v650_v56  ;;  %vm1051_vm12 = vcmp.eq.s32.totalorder (%p139_p2), %v1684_v50, %v1688_v55 }
 0x1ec   :  { %vm668_vm10 = vmand (%p139_p2), %vm666_vm8, %vm667_vm9 }
 0x1ed   :  { %vm669_vm13 = vmor (%p139_p2), %vm665_vm7, %vm668_vm10 }
 0x1ee   :  { %v670_v61 = vsel (%p139_p2), %vm669_vm13, %v619_v49, %v644_v54  ;;  %v672_v62 = vsel (%p139_p2), %vm669_vm13, %v644_v54, %v619_v49  ;;  %v674_v63 = vsel (%p139_p2), %vm669_vm13, %v623_v2, %v650_v56  ;;  %v676_v0 = vsel (%p139_p2), %vm669_vm13, %v650_v56, %v623_v2  ;;  %vm1053_vm15 = vmand (%p139_p2), %vm1051_vm12, %vm1052_vm14 }
 0x1ef   :  { %v689_v1 = vrot.slane %v670_v61, %v1693_v58  ;;  %v696_v3 = vrot.slane %v674_v63, %v1693_v58  ;;  %vm1704_vm0 = vmor %vm1050_vm11, %vm1053_vm15  ;;  %v870_v6 = vrot.slane %v672_v62, %v1693_v58  ;;  %v877_v7 = vrot.slane %v676_v0, %v1693_v58 }
 0x1f0   :  { %v1718_v8 = vsel %vm1704_vm0, %v1684_v50, %v1688_v55  ;;  %v1727_v13 = vsel %vm1704_vm0, %v1686_v51, %v1690_v57  ;;  %vm1740_vm15 = vcmp.ne.s32.totalorder %v733_v14, 0  ;;  %v1795_v48 = vsel %vm1704_vm0, %v1688_v55, %v1684_v50 }
 0x1f1   :  { %vm698_vm2 = vcmp.gt.s32.totalorder %v670_v61, %v689_v1  ;;  %vm699_vm3 = vcmp.eq.s32.totalorder %v670_v61, %v689_v1  ;;  %vm700_vm4 = vcmp.lt.s32.totalorder %v674_v63, %v696_v3  ;;  %vm880_vm6 = vcmp.eq.s32.totalorder %v672_v62, %v870_v6 }
 0x1f2   :  { %vm701_vm5 = vmand %vm699_vm3, %vm700_vm4  ;;  %vm881_vm7 = vcmp.lt.s32.totalorder %v676_v0, %v877_v7  ;;  %vm879_vm9 = vcmp.gt.s32.totalorder %v672_v62, %v870_v6  ;;  %v1074_v15 = vrot.slane %v1718_v8, %v1693_v58  ;;  %v1081_v16 = vrot.slane %v1727_v13, %v1693_v58 }
 0x1f3   :  { %vm702_vm8 = vmor %vm698_vm2, %vm701_vm5  ;;  %v1925_v22 = vsel %vm1740_vm15, 4294967295, %v1924_v22  ;;  %v1801_v49 = vsel %vm1704_vm0, %v1690_v57, %v1686_v51  ;;  %v1811_v50 = vrot.slane %v1795_v48, %v1693_v58 }
 0x1f4   :  { %vm707_vm10 = vmxor %vm702_vm8, %vm1708_vm1  ;;  %vm1084_vm12 = vcmp.eq.s32.totalorder %v1718_v8, %v1074_v15  ;;  %vm1085_vm14 = vcmp.lt.s32.totalorder %v1727_v13, %v1081_v16  ;;  %vm1083_vm8 = vcmp.gt.s32.totalorder %v1718_v8, %v1074_v15  ;;  %v1815_v51 = vrot.slane %v1801_v49, %v1693_v58 }
 0x1f5   :  { %v708_v17 = vsel %vm707_vm10, %v670_v61, %v689_v1  ;;  %v709_v18 = vsel %vm707_vm10, %v674_v63, %v696_v3  ;;  %vm882_vm11 = vmand %vm880_vm6, %vm881_vm7 }
 0x1f6   :  { %v717_v20 = vrot.slane %v708_v17, %v1721_v12  ;;  %v724_v21 = vrot.slane %v709_v18, %v1721_v12  ;;  %vm883_vm13 = vmor %vm879_vm9, %vm882_vm11 }
 0x1f7   :  { %vm888_vm2 = vmxor %vm883_vm13, %vm1708_vm1 }
 0x1f8   :  { %vm726_vm3 = vcmp.gt.s32.totalorder %v708_v17, %v717_v20  ;;  %vm727_vm4 = vcmp.eq.s32.totalorder %v708_v17, %v717_v20  ;;  %vm728_vm5 = vcmp.lt.s32.totalorder %v709_v18, %v724_v21  ;;  %v889_v23 = vsel %vm888_vm2, %v672_v62, %v870_v6  ;;  %vm1746_vm6 = vmand %vm1084_vm12, %vm1085_vm14 }
 0x1f9   :  { %vm729_vm7 = vmand %vm727_vm4, %vm728_vm5  ;;  %v890_v26 = vsel %vm888_vm2, %v676_v0, %v877_v7  ;;  %v898_v27 = vrot.slane %v889_v23, %v1721_v12  ;;  %v1934_v6 = vmov 0 }
 0x1fa   :  { %vm730_vm9 = vmor %vm726_vm3, %vm729_vm7  ;;  %v905_v28 = vrot.slane %v890_v26, %v1721_v12 }
 0x1fb   :  { %vm735_vm10 = vmxor %vm730_vm9, %vm1740_vm15  ;;  %vm907_vm11 = vcmp.gt.s32.totalorder %v889_v23, %v898_v27  ;;  %vm908_vm12 = vcmp.eq.s32.totalorder %v889_v23, %v898_v27  ;;  %vm1767_vm9 = vcmp.ne.s32.totalorder %v761_v29, 0 }
 0x1fc   :  { %v736_v30 = vsel %vm735_vm10, %v708_v17, %v717_v20  ;;  %v737_v31 = vsel %vm735_vm10, %v709_v18, %v724_v21  ;;  %vm909_vm13 = vcmp.lt.s32.totalorder %v890_v26, %v905_v28  ;;  %vm1761_vm14 = vmor %vm1083_vm8, %vm1746_vm6  ;;  %v1931_v10 = vsel %vm1767_vm9, 4294967295, %v1930_v10 }
 0x1fd   :  { %v745_v33 = vrot.slane %v736_v30, %v1751_v25  ;;  %v752_v34 = vrot.slane %v737_v31, %v1751_v25  ;;  %vm910_vm2 = vmand %vm908_vm12, %vm909_vm13 }
 0x1fe   :  { %vm911_vm3 = vmor %vm907_vm11, %vm910_vm2 }
 0x1ff   :  { %vm754_vm4 = vcmp.gt.s32.totalorder %v736_v30, %v745_v33  ;;  %vm755_vm5 = vcmp.eq.s32.totalorder %v736_v30, %v745_v33  ;;  %vm756_vm7 = vcmp.lt.s32.totalorder %v737_v31, %v752_v34  ;;  %vm916_vm10 = vmxor %vm911_vm3, %vm1740_vm15 }
 0x200   :  { %vm757_vm6 = vmand %vm755_vm5, %vm756_vm7  ;;  %v917_v35 = vsel %vm916_vm10, %v889_v23, %v898_v27  ;;  %v918_v36 = vsel %vm916_vm10, %v890_v26, %v905_v28 }
 0x201   :  { %vm758_vm8 = vmor %vm754_vm4, %vm757_vm6  ;;  %v926_v37 = vrot.slane %v917_v35, %v1751_v25  ;;  %v933_v38 = vrot.slane %v918_v36, %v1751_v25 }
 0x202   :  { %vm763_vm11 = vmxor %vm758_vm8, %vm1767_vm9 }
 0x203   :  { %v764_v39 = vsel %vm763_vm11, %v736_v30, %v745_v33  ;;  %v765_v40 = vsel %vm763_vm11, %v737_v31, %v752_v34  ;;  %vm935_vm12 = vcmp.gt.s32.totalorder %v917_v35, %v926_v37  ;;  %vm936_vm13 = vcmp.eq.s32.totalorder %v917_v35, %v926_v37  ;;  %vm1092_vm2 = vmxor %vm1761_vm14, %vm1708_vm1 }
 0x204   :  { %v779_v41 = vrot.slane %v764_v39, %v1693_v58  ;;  %v786_v42 = vrot.slane %v765_v40, %v1693_v58  ;;  %vm937_vm3 = vcmp.lt.s32.totalorder %v918_v36, %v933_v38  ;;  %v1093_v43 = vsel %vm1092_vm2, %v1718_v8, %v1074_v15 }
 0x205   :  { %vm938_vm4 = vmand %vm936_vm13, %vm937_vm3  ;;  %v1094_v44 = vsel %vm1092_vm2, %v1727_v13, %v1081_v16  ;;  %v1102_v45 = vrot.slane %v1093_v43, %v1721_v12 }
 0x206   :  { %vm788_vm5 = vcmp.gt.s32.totalorder %v764_v39, %v779_v41  ;;  %vm789_vm7 = vcmp.eq.s32.totalorder %v764_v39, %v779_v41  ;;  %vm790_vm10 = vcmp.lt.s32.totalorder %v765_v40, %v786_v42  ;;  %vm1786_vm6 = vmor %vm935_vm12, %vm938_vm4  ;;  %v1109_v47 = vrot.slane %v1094_v44, %v1721_v12 }
 0x207   :  { %vm791_vm14 = vmand %vm789_vm7, %vm790_vm10  ;;  %vm1112_vm11 = vcmp.eq.s32.totalorder %v1093_v43, %v1102_v45  ;;  %vm1111_vm2 = vcmp.gt.s32.totalorder %v1093_v43, %v1102_v45 }
 0x208   :  { %vm792_vm8 = vmor %vm788_vm5, %vm791_vm14  ;;  %vm1113_vm12 = vcmp.lt.s32.totalorder %v1094_v44, %v1109_v47 }
 0x209   :  { %vm797_vm13 = vmxor %vm792_vm8, %vm1708_vm1 }
 0x20a   :  { %v798_v2 = vsel %vm797_vm13, %v764_v39, %v779_v41  ;;  %v799_v52 = vsel %vm797_vm13, %v765_v40, %v786_v42  ;;  %vm944_vm3 = vmxor %vm1786_vm6, %vm1767_vm9  ;;  %vm1265_vm9 = vcmp.eq.s32.totalorder %v1795_v48, %v1811_v50 }
 0x20b   :  { %v807_v53 = vrot.slane %v798_v2, %v1721_v12  ;;  %v814_v54 = vrot.slane %v799_v52, %v1721_v12  ;;  %v945_v55 = vsel %vm944_vm3, %v917_v35, %v926_v37  ;;  %v946_v56 = vsel %vm944_vm3, %v918_v36, %v933_v38  ;;  %vm1114_vm0 = vmand %vm1112_vm11, %vm1113_vm12 }
 0x20c   :  { %v960_v57 = vrot.slane %v945_v55, %v1693_v58  ;;  %v967_v59 = vrot.slane %v946_v56, %v1693_v58  ;;  %vm1115_vm4 = vmor %vm1111_vm2, %vm1114_vm0  ;;  %vm1266_vm12 = vcmp.lt.s32.totalorder %v1801_v49, %v1815_v51 }
 0x20d   :  { %vm816_vm5 = vcmp.gt.s32.totalorder %v798_v2, %v807_v53  ;;  %vm817_vm7 = vcmp.eq.s32.totalorder %v798_v2, %v807_v53  ;;  %vm818_vm10 = vcmp.lt.s32.totalorder %v799_v52, %v814_v54  ;;  %vm1120_vm6 = vmxor %vm1115_vm4, %vm1740_vm15 }
 0x20e   :  { %vm819_vm14 = vmand %vm817_vm7, %vm818_vm10  ;;  %vm970_vm8 = vcmp.eq.s32.totalorder %v945_v55, %v960_v57  ;;  %vm971_vm13 = vcmp.lt.s32.totalorder %v946_v56, %v967_v59  ;;  %v1121_v60 = vsel %vm1120_vm6, %v1093_v43, %v1102_v45  ;;  %vm969_vm11 = vcmp.gt.s32.totalorder %v945_v55, %v960_v57 }
 0x20f   :  { %vm820_vm3 = vmor %vm816_vm5, %vm819_vm14  ;;  %v1122_v61 = vsel %vm1120_vm6, %v1094_v44, %v1109_v47  ;;  %v1130_v62 = vrot.slane %v1121_v60, %v1751_v25 }
 0x210   :  { %vm825_vm2 = vmxor %vm820_vm3, %vm1740_vm15  ;;  %v1137_v63 = vrot.slane %v1122_v61, %v1751_v25 }
 0x211   :  { %v826_v0 = vsel %vm825_vm2, %v798_v2, %v807_v53  ;;  %v827_v1 = vsel %vm825_vm2, %v799_v52, %v814_v54  ;;  %vm972_vm0 = vmand %vm970_vm8, %vm971_vm13  ;;  %vm1140_vm4 = vcmp.eq.s32.totalorder %v1121_v60, %v1130_v62 }
 0x212   :  { %v835_v3 = vrot.slane %v826_v0, %v1751_v25  ;;  %v842_v4 = vrot.slane %v827_v1, %v1751_v25  ;;  %vm973_vm5 = vmor %vm969_vm11, %vm972_vm0  ;;  %vm1141_vm7 = vcmp.lt.s32.totalorder %v1122_v61, %v1137_v63  ;;  %vm1139_vm11 = vcmp.gt.s32.totalorder %v1121_v60, %v1130_v62 }
 0x213   :  { %vm1836_vm10 = vmand %vm1265_vm9, %vm1266_vm12  ;;  %vm1936_vm9 = vnez %v1931_v10 }
 0x214   :  { %v1935_v6 = vsel %vm1836_vm10, 4294967295, %v1934_v6  ;;  %vm978_vm6 = vmxor %vm973_vm5, %vm1708_vm1  ;;  %vm844_vm14 = vcmp.gt.s32.totalorder %v826_v0, %v835_v3  ;;  %vm845_vm3 = vcmp.eq.s32.totalorder %v826_v0, %v835_v3  ;;  %vm846_vm8 = vcmp.lt.s32.totalorder %v827_v1, %v842_v4 }
 0x215   :  { %v979_v7 = vsel %vm978_vm6, %v945_v55, %v960_v57  ;;  %vm1142_vm13 = vmand %vm1140_vm4, %vm1141_vm7  ;;  %v980_v8 = vsel %vm978_vm6, %v946_v56, %v967_v59  ;;  %vm1264_vm6 = vcmp.gt.s32.totalorder %v1795_v48, %v1811_v50 }
 0x216   :  { %vm847_vm2 = vmand %vm845_vm3, %vm846_vm8  ;;  %v988_v9 = vrot.slane %v979_v7, %v1721_v12  ;;  %v995_v11 = vrot.slane %v980_v8, %v1721_v12 }
 0x217   :  { %vm848_vm0 = vmor %vm844_vm14, %vm847_vm2  ;;  %vm1937_vm14 = vnez %v1925_v22 }
 0x218   :  { %vm853_vm12 = vmxor %vm848_vm0, %vm1936_vm9  ;;  %vm997_vm10 = vcmp.gt.s32.totalorder %v979_v7, %v988_v9  ;;  %vm998_vm15 = vcmp.eq.s32.totalorder %v979_v7, %v988_v9  ;;  %vm999_vm5 = vcmp.lt.s32.totalorder %v980_v8, %v995_v11 }
 0x219   :  { %v854_v13 = vsel %vm853_vm12, %v826_v0, %v835_v3  ;;  %v855_v14 = vsel %vm853_vm12, %v827_v1, %v842_v4  ;;  %vm1143_vm1 = vmor %vm1139_vm11, %vm1142_vm13  ;;  %vm1939_vm13 = vnez %v1923_v5 }
 0x21a   :  { %857 = vst [vmem:[#allocation12] sm:$0xff] %v854_v13  ;;  %858 = vst [vmem:[#allocation14] sm:$0xff] %v855_v14 }
 0x21b   :  { %vm1000_vm4 = vmand %vm998_vm15, %vm999_vm5  ;;  %vm1938_vm15 = vnez %v1935_v6 }
 0x21c   :  { %vm1001_vm7 = vmor %vm997_vm10, %vm1000_vm4 }
 0x21d   :  { %vm1006_vm3 = vmxor %vm1001_vm7, %vm1937_vm14 }
 0x21e   :  { %v1007_v15 = vsel %vm1006_vm3, %v979_v7, %v988_v9  ;;  %v1008_v16 = vsel %vm1006_vm3, %v980_v8, %v995_v11  ;;  %vm1148_vm8 = vmxor %vm1143_vm1, %vm1936_vm9 }
 0x21f   :  { %v1016_v17 = vrot.slane %v1007_v15, %v1751_v25  ;;  %v1023_v18 = vrot.slane %v1008_v16, %v1751_v25  ;;  %v1149_v19 = vsel %vm1148_vm8, %v1121_v60, %v1130_v62  ;;  %v1150_v20 = vsel %vm1148_vm8, %v1122_v61, %v1137_v63  ;;  %vm1268_vm10 = vmor %vm1264_vm6, %vm1938_vm15 }
 0x220   :  { %v1164_v21 = vrot.slane %v1149_v19, %v1693_v58  ;;  %v1171_v23 = vrot.slane %v1150_v20, %v1693_v58  ;;  %vm1273_vm2 = vmxor %vm1268_vm10, %vm1939_vm13 }
 0x221   :  { %vm1025_vm11 = vcmp.gt.s32.totalorder %v1007_v15, %v1016_v17  ;;  %vm1026_vm0 = vcmp.eq.s32.totalorder %v1007_v15, %v1016_v17  ;;  %vm1027_vm12 = vcmp.lt.s32.totalorder %v1008_v16, %v1023_v18  ;;  %v1274_v24 = vsel %vm1273_vm2, %v1795_v48, %v1811_v50  ;;  %v1459_v22 = vld [vmem:[#allocation14] sm:$0xff] }
 0x222   :  { %vm1028_vm1 = vmand %vm1026_vm0, %vm1027_vm12  ;;  %vm1174_vm5 = vcmp.eq.s32.totalorder %v1149_v19, %v1164_v21  ;;  %vm1175_vm4 = vcmp.lt.s32.totalorder %v1150_v20, %v1171_v23  ;;  %v1275_v26 = vsel %vm1273_vm2, %v1801_v49, %v1815_v51  ;;  %vm1173_vm6 = vcmp.gt.s32.totalorder %v1149_v19, %v1164_v21  ;;  %v1426_v55 = vld [vmem:[#allocation12] sm:$0xff]  ;;  %1462 = vxpose.xlu0.b32.start [1/2] (short) (narrow) %v1459_v22, 8 }
 0x223   :  { %vm1029_vm7 = vmor %vm1025_vm11, %vm1028_vm1  ;;  %v1283_v27 = vrot.slane %v1274_v24, %v1721_v12  ;;  %v1290_v28 = vrot.slane %v1275_v26, %v1721_v12  ;;  %v1428_v56 = vsub.s32 2147483647, %v1426_v55 }
 0x224   :  { %vm1034_vm3 = vmxor %vm1029_vm7, %vm1936_vm9 }
 0x225   :  { %v1035_v29 = vsel %vm1034_vm3, %v1007_v15, %v1016_v17  ;;  %v1036_v30 = vsel %vm1034_vm3, %v1008_v16, %v1023_v18  ;;  %vm1176_vm8 = vmand %vm1174_vm5, %vm1175_vm4  ;;  %vm1293_vm15 = vcmp.eq.s32.totalorder %v1274_v24, %v1283_v27  ;;  %vm1292_vm0 = vcmp.gt.s32.totalorder %v1274_v24, %v1283_v27 }
 0x226   :  { %1038 = vst [vmem:[#allocation12 + $0x8] sm:$0xff] %v1035_v29  ;;  %1039 = vst [vmem:[#allocation14 + $0x8] sm:$0xff] %v1036_v30  ;;  %vm1294_vm12 = vcmp.lt.s32.totalorder %v1275_v26, %v1290_v28 }
 0x227   :  { %vm1177_vm10 = vmor %vm1173_vm6, %vm1176_vm8 }
 0x228   :  { %vm1182_vm2 = vmxor %vm1177_vm10, %vm1939_vm13 }
 0x229   :  { %v1183_v31 = vsel %vm1182_vm2, %v1149_v19, %v1164_v21  ;;  %v1184_v32 = vsel %vm1182_vm2, %v1150_v20, %v1171_v23  ;;  %vm1295_vm11 = vmand %vm1293_vm15, %vm1294_vm12 }
 0x22a   :  { %v1192_v33 = vrot.slane %v1183_v31, %v1721_v12  ;;  %v1199_v34 = vrot.slane %v1184_v32, %v1721_v12  ;;  %vm1296_vm1 = vmor %vm1292_vm0, %vm1295_vm11 }
 0x22b   :  { %vm1301_vm5 = vmxor %vm1296_vm1, %vm1937_vm14 }
 0x22c   :  { %vm1201_vm4 = vcmp.gt.s32.totalorder %v1183_v31, %v1192_v33  ;;  %vm1202_vm7 = vcmp.eq.s32.totalorder %v1183_v31, %v1192_v33  ;;  %vm1203_vm3 = vcmp.lt.s32.totalorder %v1184_v32, %v1199_v34  ;;  %v1302_v35 = vsel %vm1301_vm5, %v1274_v24, %v1283_v27 }
 0x22d   :  { %vm1204_vm6 = vmand %vm1202_vm7, %vm1203_vm3  ;;  %v1303_v36 = vsel %vm1301_vm5, %v1275_v26, %v1290_v28  ;;  %v1311_v37 = vrot.slane %v1302_v35, %v1751_v25  ;;  %v1432_v57 = vld [vmem:[#allocation12 + $0x8] sm:$0xff] }
 0x22e   :  { %vm1205_vm8 = vmor %vm1201_vm4, %vm1204_vm6  ;;  %v1318_v38 = vrot.slane %v1303_v36, %v1751_v25  ;;  %v1461_v59 = vld [vmem:[#allocation14 + $0x8] sm:$0xff] }
 0x22f   :  { %vm1210_vm15 = vmxor %vm1205_vm8, %vm1937_vm14  ;;  %vm1320_vm10 = vcmp.gt.s32.totalorder %v1302_v35, %v1311_v37  ;;  %vm1321_vm12 = vcmp.eq.s32.totalorder %v1302_v35, %v1311_v37  ;;  %1463 = vxpose.xlu0.b32.end [2/2] (short) (narrow) %v1461_v59, 8 }
 0x230   :  { %v1211_v39 = vsel %vm1210_vm15, %v1183_v31, %v1192_v33  ;;  %v1212_v40 = vsel %vm1210_vm15, %v1184_v32, %v1199_v34  ;;  %vm1322_vm0 = vcmp.lt.s32.totalorder %v1303_v36, %v1318_v38 }
 0x231   :  { %v1220_v41 = vrot.slane %v1211_v39, %v1751_v25  ;;  %v1227_v42 = vrot.slane %v1212_v40, %v1751_v25  ;;  %vm1323_vm2 = vmand %vm1321_vm12, %vm1322_vm0 }
 0x232   :  { %vm1324_vm11 = vmor %vm1320_vm10, %vm1323_vm2 }
 0x233   :  { %vm1229_vm1 = vcmp.gt.s32.totalorder %v1211_v39, %v1220_v41  ;;  %vm1230_vm5 = vcmp.eq.s32.totalorder %v1211_v39, %v1220_v41  ;;  %vm1231_vm7 = vcmp.lt.s32.totalorder %v1212_v40, %v1227_v42  ;;  %vm1329_vm4 = vmxor %vm1324_vm11, %vm1936_vm9 }
 0x234   :  { %vm1232_vm3 = vmand %vm1230_vm5, %vm1231_vm7  ;;  %v1330_v43 = vsel %vm1329_vm4, %v1302_v35, %v1311_v37  ;;  %v1331_v44 = vsel %vm1329_vm4, %v1303_v36, %v1318_v38 }
 0x235   :  { %vm1233_vm6 = vmor %vm1229_vm1, %vm1232_vm3  ;;  %v1345_v45 = vrot.slane %v1330_v43, %v1693_v58  ;;  %v1352_v46 = vrot.slane %v1331_v44, %v1693_v58 }
 0x236   :  { %vm1238_vm8 = vmxor %vm1233_vm6, %vm1936_vm9 }
 0x237   :  { %v1239_v47 = vsel %vm1238_vm8, %v1211_v39, %v1220_v41  ;;  %v1240_v48 = vsel %vm1238_vm8, %v1212_v40, %v1227_v42  ;;  %vm1354_vm15 = vcmp.gt.s32.totalorder %v1330_v43, %v1345_v45  ;;  %vm1355_vm10 = vcmp.eq.s32.totalorder %v1330_v43, %v1345_v45 }
 0x238   :  { %1242 = vst [vmem:[#allocation13] sm:$0xff] %v1239_v47  ;;  %1243 = vst [vmem:[#allocation15] sm:$0xff] %v1240_v48  ;;  %vm1356_vm12 = vcmp.lt.s32.totalorder %v1331_v44, %v1352_v46 }
 0x239   :  { %vm1357_vm0 = vmand %vm1355_vm10, %vm1356_vm12 }
 0x23a   :  { %vm1358_vm2 = vmor %vm1354_vm15, %vm1357_vm0 }
 0x23b   :  { %vm1363_vm11 = vmxor %vm1358_vm2, %vm1939_vm13  ;;  %vm1433_vm2 = vcmp.lt.s32.totalorder %v1432_v57, 0 }
 0x23c   :  { %v1364_v49 = vsel %vm1363_vm11, %v1330_v43, %v1345_v45  ;;  %v1365_v2 = vsel %vm1363_vm11, %v1331_v44, %v1352_v46 }
 0x23d   :  { %v1373_v52 = vrot.slane %v1364_v49, %v1721_v12  ;;  %v1380_v58 = vrot.slane %v1365_v2, %v1721_v12 }
 0x23f   :  { %vm1382_vm1 = vcmp.gt.s32.totalorder %v1364_v49, %v1373_v52  ;;  %vm1383_vm5 = vcmp.eq.s32.totalorder %v1364_v49, %v1373_v52  ;;  %vm1384_vm7 = vcmp.lt.s32.totalorder %v1365_v2, %v1380_v58 }
 0x240   :  { %vm1385_vm4 = vmand %vm1383_vm5, %vm1384_vm7 }
 0x241   :  { %vm1386_vm3 = vmor %vm1382_vm1, %vm1385_vm4 }
 0x242   :  { %vm1391_vm6 = vmxor %vm1386_vm3, %vm1937_vm14  ;;  %vm1427_vm14 = vcmp.lt.s32.totalorder %v1426_v55, 0 }
 0x243   :  { %v1392_v50 = vsel %vm1391_vm6, %v1364_v49, %v1373_v52  ;;  %v1393_v51 = vsel %vm1391_vm6, %v1365_v2, %v1380_v58  ;;  %v1429_v60 = vsel %vm1427_vm14, %v1428_v56, %v1426_v55 }
 0x244   :  { %v1401_v53 = vrot.slane %v1392_v50, %v1751_v25  ;;  %v1408_v5 = vrot.slane %v1393_v51, %v1751_v25  ;;  %v1434_v25 = vsub.s32 2147483647, %v1432_v57  ;;  %1430 = vst [vmem:[#allocation12] sm:$0xff] %v1429_v60  ;;  %1440 = vxpose.xlu1.b32.start [1/2] (short) (narrow) %v1429_v60, 8 }
 0x246   :  { %vm1410_vm13 = vcmp.gt.s32.totalorder %v1392_v50, %v1401_v53  ;;  %vm1411_vm8 = vcmp.eq.s32.totalorder %v1392_v50, %v1401_v53  ;;  %vm1412_vm15 = vcmp.lt.s32.totalorder %v1393_v51, %v1408_v5  ;;  %v1435_v61 = vsel %vm1433_vm2, %v1434_v25, %v1432_v57 }
 0x247   :  { %vm1413_vm10 = vmand %vm1411_vm8, %vm1412_vm15  ;;  %1436 = vst [vmem:[#allocation12 + $0x8] sm:$0xff] %v1435_v61 }
 0x248   :  { %vm1414_vm12 = vmor %vm1410_vm13, %vm1413_vm10  ;;  %1441 = vxpose.xlu1.b32.end [2/2] (short) (narrow) %v1435_v61, 8 }
 0x249   :  { %vm1419_vm0 = vmxor %vm1414_vm12, %vm1936_vm9 }
 0x24a   :  { %v1420_v12 = vsel %vm1419_vm0, %v1392_v50, %v1401_v53  ;;  %v1421_v54 = vsel %vm1419_vm0, %v1393_v51, %v1408_v5 }
 0x24b   :  { %1423 = vst [vmem:[#allocation13 + $0x8] sm:$0xff] %v1420_v12  ;;  %1424 = vst [vmem:[#allocation15 + $0x8] sm:$0xff] %v1421_v54 }
 0x2ab   :  { %v1464_v10 = vpop.trf.xlu0 }
 0x2ac   :  { %1480 = vst [vmem:[#allocation10] sm:$0xff] %v1464_v10 }
 0x2b3   :  { %v1490_v63 = vld [vmem:[#allocation10] sm:$0x3] }
 0x2b4   :  { %1492 = vst [vmem:[#allocation11] sm:$0x3] %v1490_v63 }
 0x2c4   :  { %v1442_v62 = vpop.trf.xlu1 }
 0x2c5   :  { %1458 = vst [vmem:[#allocation7] sm:$0xff] %v1442_v62 }
 0x2cc   :  { %v1484_v0 = vld [vmem:[#allocation7] sm:$0x3] }
 0x2cd   :  { %1486 = vst [vmem:[#allocation8] sm:$0x3] %v1484_v0 }
 0x2ce   :  { %1606 = shalt.err (!%p1603_p7)
}
 0x2cf   :  { %s1607_s23 = scalar_lea.hbm %s1912_s1, 32 }
 0x2d0   :  { %p1608_p8 = scmp.ne.s32.totalorder %s1912_s1, %s1607_s23  ;;  %p1611_p9 = scmp.lt.u32.totalorder %s1607_s23, %s1912_s1 }
 0x2d2   :  { %p1613_p10 = pnand %p1611_p9, %p1608_p8 }
 0x2d4   :  { %1616 = shalt.err (!%p1613_p10)
}
 0x2d5   :  { %1500 = dma.vmem_to_hbm [thread:$0]  %s1498_s19, 32, %s1912_s1, [#allocation9]   ;;  %v1516_v1 = vld [vmem:[#allocation11] sm:$0x3] }
 0x2d6   :  { %1517 = vst [vmem:[%s1913_s2] sm:$0x3] %v1516_v1 }
 0x2d7   :  { %1621 = dma.done.wait [#allocation9], 32  }
 0x2d8   :  { %1622 = vsyncadd [#allocation9], 4294967264 }
 0x2d9   :  { %1533 = vsyncpa [#allocation9], 1 }

// kernel: faster_rcnn_forward.5
= control target key start
LH: loop header
LB: loop body
LE: loop exit
PB: predicated region body
PF: predicated region fallthrough
CT: control target
= control target key end

     0   :  { %s8504_s1 = inlined_call_operand.vmem [shape: bf16[6272,128], index: 1, kind: input, shape index: {}]   ;;  %s8505_s0 = inlined_call_operand.vmem [shape: bf16[32,6272], index: 0, kind: input, shape index: {}]   ;;  %s8506_s2 = inlined_call_operand.vmem [shape: f32[1,128], index: 2, kind: input, shape index: {}]   ;;  %s8507_s3 = inlined_call_operand.vmem [shape: bf16[128,128], index: 3, kind: input, shape index: {}]   ;;  %s8508_s4 = inlined_call_operand.vmem [shape: f32[1,128], index: 4, kind: input, shape index: {}]   ;;  %s8509_s5 = inlined_call_operand.vmem [shape: f32[32,128], index: 5, kind: output, shape index: {}]  }
   0x1   :  { %v6347_v0 = vld [vmem:[%s8504_s1 + $0x40] sm:$0xff]   ;;  %v6351_v4 = vld [vmem:[%s8504_s1 + $0x48] sm:$0xff]   ;;  %v6355_v8 = vld [vmem:[%s8504_s1 + $0x50] sm:$0xff]  }
   0x2   :  { %v6348_v1 = vld [vmem:[%s8504_s1] sm:$0xff]   ;;  %5615 = vmatprep.subr.bf16.mxu0 %v6347_v0  ;;  %v6352_v5 = vld [vmem:[%s8504_s1 + $0x8] sm:$0xff]   ;;  %v6356_v9 = vld [vmem:[%s8504_s1 + $0x10] sm:$0xff]  }
   0x3   :  { %v6349_v2 = vld [vmem:[%s8504_s1 + $0xc0] sm:$0xff]   ;;  %5616 = vmatpush3.bf16.msra.mxu0 %v6348_v1  ;;  %v6353_v6 = vld [vmem:[%s8504_s1 + $0xc8] sm:$0xff]   ;;  %v6357_v10 = vld [vmem:[%s8504_s1 + $0xd0] sm:$0xff]  }
   0x4   :  { %v6350_v3 = vld [vmem:[%s8504_s1 + $0x80] sm:$0xff]   ;;  %5643 = vmatprep.subr.bf16.mxu1 %v6349_v2  ;;  %5617 = vmatprep.subr.bf16.mxu0 %v6351_v4  ;;  %v6354_v7 = vld [vmem:[%s8504_s1 + $0x88] sm:$0xff]   ;;  %v6358_v11 = vld [vmem:[%s8504_s1 + $0x90] sm:$0xff]  }
   0x5   :  { %5644 = vmatpush3.bf16.msra.mxu1 %v6350_v3  ;;  %v6359_v12 = vld [vmem:[%s8504_s1 + $0x58] sm:$0xff]   ;;  %v6363_v16 = vld [vmem:[%s8504_s1 + $0x60] sm:$0xff]   ;;  %v6367_v20 = vld [vmem:[%s8504_s1 + $0x68] sm:$0xff]  }
   0x6   :  { %5645 = vmatprep.subr.bf16.mxu1 %v6353_v6  ;;  %v6360_v13 = vld [vmem:[%s8504_s1 + $0x18] sm:$0xff]   ;;  %v6364_v17 = vld [vmem:[%s8504_s1 + $0x20] sm:$0xff]   ;;  %v6368_v21 = vld [vmem:[%s8504_s1 + $0x28] sm:$0xff]  }
   0x7   :  { %5618 = vmatpush3.bf16.msra.mxu0 %v6352_v5  ;;  %v6361_v14 = vld [vmem:[%s8504_s1 + $0xd8] sm:$0xff]   ;;  %v6365_v18 = vld [vmem:[%s8504_s1 + $0xe0] sm:$0xff]   ;;  %v6369_v22 = vld [vmem:[%s8504_s1 + $0xe8] sm:$0xff]  }
   0x8   :  { %5619 = vmatprep.subr.bf16.mxu0 %v6355_v8  ;;  %v6362_v15 = vld [vmem:[%s8504_s1 + $0x98] sm:$0xff]   ;;  %v6366_v19 = vld [vmem:[%s8504_s1 + $0xa0] sm:$0xff]   ;;  %v6370_v23 = vld [vmem:[%s8504_s1 + $0xa8] sm:$0xff]  }
   0x9   :  { %5646 = vmatpush3.bf16.msra.mxu1 %v6354_v7  ;;  %v6371_v24 = vld [vmem:[%s8504_s1 + $0x70] sm:$0xff]   ;;  %v6375_v28 = vld [vmem:[%s8504_s1 + $0x78] sm:$0xff]   ;;  %v6378_v31 = vld [vmem:[%s8505_s0] ss:$196 sps:$4 sm:$0xff]  }
   0xa   :  { %5647 = vmatprep.subr.bf16.mxu1 %v6357_v10  ;;  %v6372_v25 = vld [vmem:[%s8504_s1 + $0x30] sm:$0xff]   ;;  %v6376_v29 = vld [vmem:[%s8504_s1 + $0x38] sm:$0xff]   ;;  %v6380_v32 = vld [vmem:[%s8505_s0 + $0x4] ss:$196 sps:$4 sm:$0xff]  }
   0xb   :  { %5620 = vmatpush3.bf16.msra.mxu0 %v6356_v9  ;;  %v6373_v26 = vld [vmem:[%s8504_s1 + $0xf0] sm:$0xff]   ;;  %v6377_v30 = vld [vmem:[%s8504_s1 + $0xf8] sm:$0xff]   ;;  %3788 = vmatprep.mubr.bf16.mxu0 %v6380_v32  ;;  %v6382_v34 = vld [vmem:[%s8504_s1 + $0x140] sm:$0xff]  }
   0xc   :  { %5621 = vmatprep.subr.bf16.mxu0 %v6359_v12  ;;  %v6374_v27 = vld [vmem:[%s8504_s1 + $0xb0] sm:$0xff]   ;;  %v6381_v33 = vld [vmem:[%s8504_s1 + $0xb8] sm:$0xff]   ;;  %v6383_v35 = vld [vmem:[%s8505_s0 + $0x8] ss:$196 sps:$4 sm:$0xff]  }
   0xd   :  { %5648 = vmatpush3.bf16.msra.mxu1 %v6358_v11  ;;  %v6385_v36 = vld [vmem:[%s8505_s0 + $0xc] ss:$196 sps:$4 sm:$0xff]   ;;  %v6386_v37 = vld [vmem:[%s8504_s1 + $0x100] sm:$0xff]   ;;  %v6397_v48 = vld [vmem:[%s8504_s1 + $0x158] sm:$0xff]  }
   0xe   :  { %5649 = vmatprep.subr.bf16.mxu1 %v6361_v14  ;;  %3837 = vmatprep.mubr.bf16.mxu1 %v6385_v36  ;;  %v6387_v38 = vld [vmem:[%s8504_s1 + $0x1c0] sm:$0xff]   ;;  %v6389_v40 = vld [vmem:[%s8504_s1 + $0x148] sm:$0xff]   ;;  %v6393_v44 = vld [vmem:[%s8504_s1 + $0x150] sm:$0xff]  }
   0xf   :  { %5622 = vmatpush3.bf16.msra.mxu0 %v6360_v13  ;;  %v6388_v39 = vld [vmem:[%s8504_s1 + $0x180] sm:$0xff]   ;;  %v6390_v41 = vld [vmem:[%s8504_s1 + $0x108] sm:$0xff]   ;;  %v6394_v45 = vld [vmem:[%s8504_s1 + $0x110] sm:$0xff]  }
  0x10   :  { %5623 = vmatprep.subr.bf16.mxu0 %v6363_v16  ;;  %v6391_v42 = vld [vmem:[%s8504_s1 + $0x1c8] sm:$0xff]   ;;  %v6395_v46 = vld [vmem:[%s8504_s1 + $0x1d0] sm:$0xff]   ;;  %v6398_v49 = vld [vmem:[%s8504_s1 + $0x118] sm:$0xff]  }
  0x11   :  { %5650 = vmatpush3.bf16.msra.mxu1 %v6362_v15  ;;  %v6392_v43 = vld [vmem:[%s8504_s1 + $0x188] sm:$0xff]   ;;  %v6396_v47 = vld [vmem:[%s8504_s1 + $0x190] sm:$0xff]   ;;  %v6399_v50 = vld [vmem:[%s8504_s1 + $0x1d8] sm:$0xff]  }
  0x12   :  { %5651 = vmatprep.subr.bf16.mxu1 %v6365_v18  ;;  %v6400_v51 = vld [vmem:[%s8504_s1 + $0x198] sm:$0xff]   ;;  %v6401_v52 = vld [vmem:[%s8504_s1 + $0x160] sm:$0xff]   ;;  %v6405_v56 = vld [vmem:[%s8504_s1 + $0x168] sm:$0xff]  }
  0x13   :  { %5624 = vmatpush3.bf16.msra.mxu0 %v6364_v17  ;;  %v6402_v53 = vld [vmem:[%s8504_s1 + $0x120] sm:$0xff]   ;;  %v6406_v57 = vld [vmem:[%s8505_s0 + $0x18c] ss:$196 sps:$4 sm:$0xff]   ;;  %v6411_v61 = vld [vmem:[%s8505_s0 + $0x194] ss:$196 sps:$4 sm:$0xff]  }
  0x14   :  { %5625 = vmatprep.subr.bf16.mxu0 %v6367_v20  ;;  %v6403_v54 = vld [vmem:[%s8504_s1 + $0x1e0] sm:$0xff]   ;;  %v6408_v58 = vld [vmem:[%s8504_s1 + $0x128] sm:$0xff]   ;;  %v6414_v63 = vld [vmem:[%s8505_s0 + $0x190] ss:$196 sps:$4 sm:$0xff]  }
  0x15   :  { %5652 = vmatpush3.bf16.msra.mxu1 %v6366_v19  ;;  %v6404_v55 = vld [vmem:[%s8504_s1 + $0x1a0] sm:$0xff]   ;;  %v6409_v59 = vld [vmem:[%s8505_s0 + $0x188] ss:$196 sps:$4 sm:$0xff]   ;;  %v6415_v0 = vld [vmem:[%s8504_s1 + $0x170] sm:$0xff]  }
  0x16   :  { %5653 = vmatprep.subr.bf16.mxu1 %v6369_v22  ;;  %v6410_v60 = vld [vmem:[%s8504_s1 + $0x1e8] sm:$0xff]   ;;  %v6416_v1 = vld [vmem:[%s8504_s1 + $0x130] sm:$0xff]   ;;  %v6419_v4 = vld [vmem:[%s8504_s1 + $0x178] sm:$0xff]  }
  0x17   :  { %5626 = vmatpush3.bf16.msra.mxu0 %v6368_v21  ;;  %v6413_v62 = vld [vmem:[%s8504_s1 + $0x1a8] sm:$0xff]   ;;  %v6417_v2 = vld [vmem:[%s8504_s1 + $0x1f0] sm:$0xff]   ;;  %v6420_v5 = vld [vmem:[%s8504_s1 + $0x138] sm:$0xff]  }
  0x18   :  { %5627 = vmatprep.subr.bf16.mxu0 %v6371_v24  ;;  %v6418_v3 = vld [vmem:[%s8504_s1 + $0x1b0] sm:$0xff]   ;;  %v6421_v6 = vld [vmem:[%s8504_s1 + $0x1f8] sm:$0xff]   ;;  %v6426_v10 = vld [vmem:[%s8504_s1 + $0x240] sm:$0xff]  }
  0x19   :  { %5654 = vmatpush3.bf16.msra.mxu1 %v6370_v23  ;;  %v6422_v7 = vld [vmem:[%s8505_s0 + $0x10] ss:$196 sps:$4 sm:$0xff]   ;;  %v6425_v9 = vld [vmem:[%s8504_s1 + $0x1b8] sm:$0xff]   ;;  %v6430_v13 = vld [vmem:[%s8504_s1 + $0x200] sm:$0xff]  }
  0x1a   :  { %5655 = vmatprep.subr.bf16.mxu1 %v6373_v26  ;;  %v6424_v8 = vld [vmem:[%s8505_s0 + $0x14] ss:$196 sps:$4 sm:$0xff]   ;;  %v6429_v12 = vld [vmem:[%s8505_s0 + $0x1c] ss:$196 sps:$4 sm:$0xff]   ;;  %v6433_v16 = vld [vmem:[%s8504_s1 + $0x248] sm:$0xff]  }
  0x1b   :  { %5628 = vmatpush3.bf16.msra.mxu0 %v6372_v25  ;;  %v6427_v11 = vld [vmem:[%s8505_s0 + $0x18] ss:$196 sps:$4 sm:$0xff]   ;;  %v6431_v14 = vld [vmem:[%s8504_s1 + $0x2c0] sm:$0xff]   ;;  %v6434_v17 = vld [vmem:[%s8504_s1 + $0x208] sm:$0xff]  }
  0x1c   :  { %5629 = vmatprep.subr.bf16.mxu0 %v6375_v28  ;;  %v6432_v15 = vld [vmem:[%s8504_s1 + $0x280] sm:$0xff]   ;;  %v6435_v18 = vld [vmem:[%s8504_s1 + $0x2c8] sm:$0xff]   ;;  %v6439_v21 = vld [vmem:[%s8505_s0 + $0x198] ss:$196 sps:$4 sm:$0xff]  }
  0x1d   :  { %5656 = vmatpush3.bf16.msra.mxu1 %v6374_v27  ;;  %v6436_v19 = vld [vmem:[%s8505_s0 + $0x19c] ss:$196 sps:$4 sm:$0xff]   ;;  %v6438_v20 = vld [vmem:[%s8504_s1 + $0x288] sm:$0xff]   ;;  %v6440_v22 = vld [vmem:[%s8504_s1 + $0x250] sm:$0xff]  }
  0x1e   :  { %5657 = vmatprep.subr.bf16.mxu1 %v6377_v30  ;;  %v6441_v23 = vld [vmem:[%s8505_s0 + $0x1a4] ss:$196 sps:$4 sm:$0xff]   ;;  %v6443_v24 = vld [vmem:[%s8504_s1 + $0x210] sm:$0xff]   ;;  %v6447_v28 = vld [vmem:[%s8504_s1 + $0x258] sm:$0xff]  }
  0x1f   :  { %5630 = vmatpush3.bf16.msra.mxu0 %v6376_v29  ;;  %v6444_v25 = vld [vmem:[%s8505_s0 + $0x1a0] ss:$196 sps:$4 sm:$0xff]   ;;  %v6445_v26 = vld [vmem:[%s8504_s1 + $0x2d0] sm:$0xff]   ;;  %v6448_v29 = vld [vmem:[%s8504_s1 + $0x218] sm:$0xff]  }
  0x20   :  { %5671 = vmatprep.subr.bf16.mxu0 %v6382_v34  ;;  %v6446_v27 = vld [vmem:[%s8504_s1 + $0x290] sm:$0xff]   ;;  %v6449_v30 = vld [vmem:[%s8504_s1 + $0x2d8] sm:$0xff]   ;;  %v6451_v32 = vld [vmem:[%s8504_s1 + $0x260] sm:$0xff]  }
  0x21   :  { %5658 = vmatpush3.bf16.msra.mxu1 %v6381_v33  ;;  %v6452_v33 = vld [vmem:[%s8504_s1 + $0x220] sm:$0xff]   ;;  %v6455_v36 = vld [vmem:[%s8504_s1 + $0x268] sm:$0xff]  }
  0x22   :  { %3789 = vmatmul.mubr.bf16.vlgmr.msra.gmra.mrb[0].mxu0 %v6378_v31  ;;  %5699 = vmatprep.subr.bf16.mxu1 %v6387_v38  ;;  %v6450_v31 = vld [vmem:[%s8504_s1 + $0x298] sm:$0xff]   ;;  %v6453_v34 = vld [vmem:[%s8504_s1 + $0x2e0] sm:$0xff]   ;;  %v6457_v38 = vld [vmem:[%s8504_s1 + $0x2e8] sm:$0xff]  }
  0x23   :  { %5672 = vmatpush3.bf16.msra.mxu0 %v6386_v37  ;;  %3796 = vmatprep.mubr.bf16.mxu0 %v6406_v57  ;;  %v6456_v37 = vld [vmem:[%s8504_s1 + $0x228] sm:$0xff]  }
  0x24   :  { %3838 = vmatmul.mubr.bf16.vlgmr.msra.gmra.mrb[0].mxu1 %v6383_v35  ;;  %5673 = vmatprep.subr.bf16.mxu0 %v6389_v40  ;;  %v6454_v35 = vld [vmem:[%s8504_s1 + $0x2a0] sm:$0xff]   ;;  %v6459_v40 = vld [vmem:[%s8504_s1 + $0x270] sm:$0xff]   ;;  %v6478_v57 = vld [vmem:[%s8504_s1 + $0x308] sm:$0xff]  }
  0x25   :  { %5700 = vmatpush3.bf16.msra.mxu1 %v6388_v39  ;;  %3845 = vmatprep.mubr.bf16.mxu1 %v6411_v61  ;;  %v6458_v39 = vld [vmem:[%s8504_s1 + $0x2a8] sm:$0xff]  }
  0x26   :  { %5701 = vmatprep.subr.bf16.mxu1 %v6391_v42  ;;  %v6461_v42 = vld [vmem:[%s8504_s1 + $0x2f0] sm:$0xff]   ;;  %v6483_v61 = vld [vmem:[%s8505_s0 + $0x1a8] ss:$196 sps:$4 sm:$0xff]  }
  0x27   :  { %5674 = vmatpush3.bf16.msra.mxu0 %v6390_v41  ;;  %v6460_v41 = vld [vmem:[%s8504_s1 + $0x230] sm:$0xff]  }
  0x28   :  { %5675 = vmatprep.subr.bf16.mxu0 %v6393_v44  ;;  %v6463_v44 = vld [vmem:[%s8504_s1 + $0x278] sm:$0xff]  }
  0x29   :  { %5702 = vmatpush3.bf16.msra.mxu1 %v6392_v43  ;;  %v6462_v43 = vld [vmem:[%s8504_s1 + $0x2b0] sm:$0xff]  }
  0x2a   :  { %5703 = vmatprep.subr.bf16.mxu1 %v6395_v46  ;;  %3797 = vmatmul.mubr.bf16.gmra.mrb[4].mxu0 %v6409_v59  ;;  %v6465_v46 = vld [vmem:[%s8504_s1 + $0x2f8] sm:$0xff]   ;;  %v6480_v59 = vld [vmem:[%s8505_s0 + $0x1ac] ss:$196 sps:$4 sm:$0xff]  }
  0x2b   :  { %5676 = vmatpush3.bf16.msra.mxu0 %v6394_v45  ;;  %3886 = vmatprep.mubr.bf16.mxu0 %v6424_v8  ;;  %v6464_v45 = vld [vmem:[%s8504_s1 + $0x238] sm:$0xff]   ;;  %v6495_v8 = vld [vmem:[%s8504_s1 + $0x360] sm:$0xff]  }
  0x2c   :  { %5677 = vmatprep.subr.bf16.mxu0 %v6397_v48  ;;  %3846 = vmatmul.mubr.bf16.gmra.mrb[4].mxu1 %v6414_v63  ;;  %v6468_v48 = vld [vmem:[%s8505_s0 + $0x24] ss:$196 sps:$4 sm:$0xff]   ;;  %v6485_v63 = vld [vmem:[%s8505_s0 + $0x1b4] ss:$196 sps:$4 sm:$0xff]  }
  0x2d   :  { %5704 = vmatpush3.bf16.msra.mxu1 %v6396_v47  ;;  %3935 = vmatprep.mubr.bf16.mxu1 %v6429_v12  ;;  %v6466_v47 = vld [vmem:[%s8505_s0 + $0x20] ss:$196 sps:$4 sm:$0xff]   ;;  %v6499_v12 = vld [vmem:[%s8504_s1 + $0x368] sm:$0xff]  }
  0x2e   :  { %5705 = vmatprep.subr.bf16.mxu1 %v6399_v50  ;;  %v6470_v50 = vld [vmem:[%s8504_s1 + $0x340] sm:$0xff]  }
  0x2f   :  { %5678 = vmatpush3.bf16.msra.mxu0 %v6398_v49  ;;  %v6469_v49 = vld [vmem:[%s8504_s1 + $0x2b8] sm:$0xff]  }
  0x30   :  { %5679 = vmatprep.subr.bf16.mxu0 %v6401_v52  ;;  %v6473_v52 = vld [vmem:[%s8505_s0 + $0x2c] ss:$196 sps:$4 sm:$0xff]  }
  0x31   :  { %5706 = vmatpush3.bf16.msra.mxu1 %v6400_v51  ;;  %v6471_v51 = vld [vmem:[%s8505_s0 + $0x28] ss:$196 sps:$4 sm:$0xff]  }
  0x32   :  { %5707 = vmatprep.subr.bf16.mxu1 %v6403_v54  ;;  %v6475_v54 = vld [vmem:[%s8504_s1 + $0x3c0] sm:$0xff]  }
  0x33   :  { %5680 = vmatpush3.bf16.msra.mxu0 %v6402_v53  ;;  %v6474_v53 = vld [vmem:[%s8504_s1 + $0x300] sm:$0xff]  }
  0x34   :  { %5681 = vmatprep.subr.bf16.mxu0 %v6405_v56  ;;  %v6477_v56 = vld [vmem:[%s8504_s1 + $0x348] sm:$0xff]  }
  0x35   :  { %5708 = vmatpush3.bf16.msra.mxu1 %v6404_v55  ;;  %v6476_v55 = vld [vmem:[%s8504_s1 + $0x380] sm:$0xff]  }
  0x36   :  { %5709 = vmatprep.subr.bf16.mxu1 %v6410_v60  ;;  %v6482_v60 = vld [vmem:[%s8504_s1 + $0x388] sm:$0xff]  }
  0x37   :  { %5682 = vmatpush3.bf16.msra.mxu0 %v6408_v58  ;;  %v6479_v58 = vld [vmem:[%s8504_s1 + $0x3c8] sm:$0xff]  }
  0x38   :  { %5683 = vmatprep.subr.bf16.mxu0 %v6415_v0  ;;  %v6487_v0 = vld [vmem:[%s8504_s1 + $0x310] sm:$0xff]  }
  0x39   :  { %5710 = vmatpush3.bf16.msra.mxu1 %v6413_v62  ;;  %v6484_v62 = vld [vmem:[%s8504_s1 + $0x350] sm:$0xff]  }
  0x3a   :  { %5711 = vmatprep.subr.bf16.mxu1 %v6417_v2  ;;  %v6489_v2 = vld [vmem:[%s8504_s1 + $0x3d0] sm:$0xff]  }
  0x3b   :  { %5684 = vmatpush3.bf16.msra.mxu0 %v6416_v1  ;;  %v6488_v1 = vld [vmem:[%s8505_s0 + $0x1b0] ss:$196 sps:$4 sm:$0xff]  }
  0x3c   :  { %5685 = vmatprep.subr.bf16.mxu0 %v6419_v4  ;;  %v6491_v4 = vld [vmem:[%s8504_s1 + $0x358] sm:$0xff]  }
  0x3d   :  { %5712 = vmatpush3.bf16.msra.mxu1 %v6418_v3  ;;  %v6490_v3 = vld [vmem:[%s8504_s1 + $0x390] sm:$0xff]  }
  0x3e   :  { %5713 = vmatprep.subr.bf16.mxu1 %v6421_v6  ;;  %v6493_v6 = vld [vmem:[%s8504_s1 + $0x3d8] sm:$0xff]  }
  0x3f   :  { %5686 = vmatpush3.bf16.msra.mxu0 %v6420_v5  ;;  %v6492_v5 = vld [vmem:[%s8504_s1 + $0x318] sm:$0xff]  }
  0x40   :  { %5727 = vmatprep.subr.bf16.mxu0 %v6426_v10  ;;  %v6497_v10 = vld [vmem:[%s8504_s1 + $0x3e0] sm:$0xff]  }
  0x41   :  { %5714 = vmatpush3.bf16.msra.mxu1 %v6425_v9  ;;  %v6496_v9 = vld [vmem:[%s8504_s1 + $0x320] sm:$0xff]  }
  0x42   :  { %3887 = vmatmul.mubr.bf16.vlgmr.msra.gmra.mrb[8].mxu0 %v6422_v7  ;;  %5755 = vmatprep.subr.bf16.mxu1 %v6431_v14  ;;  %v6494_v7 = vld [vmem:[%s8504_s1 + $0x398] sm:$0xff]   ;;  %v6501_v14 = vld [vmem:[%s8504_s1 + $0x3e8] sm:$0xff]  }
  0x43   :  { %5728 = vmatpush3.bf16.msra.mxu0 %v6430_v13  ;;  %3894 = vmatprep.mubr.bf16.mxu0 %v6436_v19  ;;  %v6500_v13 = vld [vmem:[%s8504_s1 + $0x328] sm:$0xff]   ;;  %v6506_v19 = vld [vmem:[%s8504_s1 + $0x3b0] sm:$0xff]  }
  0x44   :  { %3936 = vmatmul.mubr.bf16.vlgmr.msra.gmra.mrb[8].mxu1 %v6427_v11  ;;  %5729 = vmatprep.subr.bf16.mxu0 %v6433_v16  ;;  %v6498_v11 = vld [vmem:[%s8504_s1 + $0x3a0] sm:$0xff]   ;;  %v6503_v16 = vld [vmem:[%s8504_s1 + $0x370] sm:$0xff]  }
  0x45   :  { %5756 = vmatpush3.bf16.msra.mxu1 %v6432_v15  ;;  %3943 = vmatprep.mubr.bf16.mxu1 %v6441_v23  ;;  %v6502_v15 = vld [vmem:[%s8504_s1 + $0x3a8] sm:$0xff]   ;;  %v6510_v23 = vld [vmem:[%s8505_s0 + $0x30] ss:$196 sps:$4 sm:$0xff]  }
  0x46   :  { %5757 = vmatprep.subr.bf16.mxu1 %v6435_v18  ;;  %v6505_v18 = vld [vmem:[%s8504_s1 + $0x3f0] sm:$0xff]  }
  0x47   :  { %5730 = vmatpush3.bf16.msra.mxu0 %v6434_v17  ;;  %v6504_v17 = vld [vmem:[%s8504_s1 + $0x330] sm:$0xff]  }
  0x48   :  { %5731 = vmatprep.subr.bf16.mxu0 %v6440_v22  ;;  %v6509_v22 = vld [vmem:[%s8504_s1 + $0x3f8] sm:$0xff]  }
  0x49   :  { %5758 = vmatpush3.bf16.msra.mxu1 %v6438_v20  ;;  %v6507_v20 = vld [vmem:[%s8504_s1 + $0x378] sm:$0xff]  }
  0x4a   :  { %3895 = vmatmul.mubr.bf16.gmra.mrb[12].mxu0 %v6439_v21  ;;  %5759 = vmatprep.subr.bf16.mxu1 %v6445_v26  ;;  %v6508_v21 = vld [vmem:[%s8504_s1 + $0x338] sm:$0xff]   ;;  %v6514_v26 = vld [vmem:[%s8504_s1 + $0x440] sm:$0xff]  }
  0x4b   :  { %5732 = vmatpush3.bf16.msra.mxu0 %v6443_v24  ;;  %3984 = vmatprep.mubr.bf16.mxu0 %v6468_v48  ;;  %v6512_v24 = vld [vmem:[%s8505_s0 + $0x34] ss:$196 sps:$4 sm:$0xff]   ;;  %v6539_v48 = vld [vmem:[%s8504_s1 + $0x460] sm:$0xff]  }
  0x4c   :  { %3944 = vmatmul.mubr.bf16.gmra.mrb[12].mxu1 %v6444_v25  ;;  %5733 = vmatprep.subr.bf16.mxu0 %v6447_v28  ;;  %v6513_v25 = vld [vmem:[%s8504_s1 + $0x3b8] sm:$0xff]  }
  0x4d   :  { %5760 = vmatpush3.bf16.msra.mxu1 %v6446_v27  ;;  %4033 = vmatprep.mubr.bf16.mxu1 %v6473_v52  ;;  %v6515_v27 = vld [vmem:[%s8505_s0 + $0x38] ss:$196 sps:$4 sm:$0xff]   ;;  %v6543_v52 = vld [vmem:[%s8504_s1 + $0x468] sm:$0xff]  }
  0x4e   :  { %5761 = vmatprep.subr.bf16.mxu1 %v6449_v30  ;;  %v6517_v28 = vld [vmem:[%s8505_s0 + $0x3c] ss:$196 sps:$4 sm:$0xff]  }
  0x4f   :  { %5734 = vmatpush3.bf16.msra.mxu0 %v6448_v29  ;;  %v6518_v29 = vld [vmem:[%s8504_s1 + $0x400] sm:$0xff]  }
  0x50   :  { %5735 = vmatprep.subr.bf16.mxu0 %v6451_v32  ;;  %v6519_v30 = vld [vmem:[%s8504_s1 + $0x4c0] sm:$0xff]   ;;  %v6521_v32 = vld [vmem:[%s8504_s1 + $0x448] sm:$0xff]  }
  0x51   :  { %5762 = vmatpush3.bf16.msra.mxu1 %v6450_v31  ;;  %v6520_v31 = vld [vmem:[%s8504_s1 + $0x480] sm:$0xff]  }
  0x52   :  { %5763 = vmatprep.subr.bf16.mxu1 %v6453_v34  ;;  %v6523_v34 = vld [vmem:[%s8504_s1 + $0x4c8] sm:$0xff]  }
  0x53   :  { %5736 = vmatpush3.bf16.msra.mxu0 %v6452_v33  ;;  %v6522_v33 = vld [vmem:[%s8504_s1 + $0x408] sm:$0xff]  }
  0x54   :  { %5737 = vmatprep.subr.bf16.mxu0 %v6455_v36  ;;  %v6526_v36 = vld [vmem:[%s8504_s1 + $0x488] sm:$0xff]  }
  0x55   :  { %5764 = vmatpush3.bf16.msra.mxu1 %v6454_v35  ;;  %v6524_v35 = vld [vmem:[%s8505_s0 + $0x1bc] ss:$196 sps:$4 sm:$0xff]  }
  0x56   :  { %5765 = vmatprep.subr.bf16.mxu1 %v6457_v38  ;;  %v6528_v38 = vld [vmem:[%s8504_s1 + $0x450] sm:$0xff]  }
  0x57   :  { %5738 = vmatpush3.bf16.msra.mxu0 %v6456_v37  ;;  %v6527_v37 = vld [vmem:[%s8505_s0 + $0x1b8] ss:$196 sps:$4 sm:$0xff]  }
  0x58   :  { %5739 = vmatprep.subr.bf16.mxu0 %v6459_v40  ;;  %v6531_v40 = vld [vmem:[%s8504_s1 + $0x410] sm:$0xff]  }
  0x59   :  { %5766 = vmatpush3.bf16.msra.mxu1 %v6458_v39  ;;  %v6529_v39 = vld [vmem:[%s8505_s0 + $0x1c4] ss:$196 sps:$4 sm:$0xff]  }
  0x5a   :  { %5767 = vmatprep.subr.bf16.mxu1 %v6461_v42  ;;  %v6533_v42 = vld [vmem:[%s8504_s1 + $0x4d0] sm:$0xff]  }
  0x5b   :  { %5740 = vmatpush3.bf16.msra.mxu0 %v6460_v41  ;;  %v6532_v41 = vld [vmem:[%s8505_s0 + $0x1c0] ss:$196 sps:$4 sm:$0xff]  }
  0x5c   :  { %5741 = vmatprep.subr.bf16.mxu0 %v6463_v44  ;;  %v6535_v44 = vld [vmem:[%s8504_s1 + $0x458] sm:$0xff]  }
  0x5d   :  { %5768 = vmatpush3.bf16.msra.mxu1 %v6462_v43  ;;  %v6534_v43 = vld [vmem:[%s8504_s1 + $0x490] sm:$0xff]  }
  0x5e   :  { %5769 = vmatprep.subr.bf16.mxu1 %v6465_v46  ;;  %v6537_v46 = vld [vmem:[%s8504_s1 + $0x4d8] sm:$0xff]  }
  0x5f   :  { %5742 = vmatpush3.bf16.msra.mxu0 %v6464_v45  ;;  %v6536_v45 = vld [vmem:[%s8504_s1 + $0x418] sm:$0xff]  }
  0x60   :  { %5783 = vmatprep.subr.bf16.mxu0 %v6470_v50  ;;  %v6541_v50 = vld [vmem:[%s8504_s1 + $0x4e0] sm:$0xff]  }
  0x61   :  { %5770 = vmatpush3.bf16.msra.mxu1 %v6469_v49  ;;  %v6540_v49 = vld [vmem:[%s8504_s1 + $0x420] sm:$0xff]  }
  0x62   :  { %3985 = vmatmul.mubr.bf16.vlgmr.msra.gmra.mrb[16].mxu0 %v6466_v47  ;;  %5811 = vmatprep.subr.bf16.mxu1 %v6475_v54  ;;  %v6538_v47 = vld [vmem:[%s8504_s1 + $0x498] sm:$0xff]   ;;  %v6545_v54 = vld [vmem:[%s8504_s1 + $0x4e8] sm:$0xff]  }
  0x63   :  { %5784 = vmatpush3.bf16.msra.mxu0 %v6474_v53  ;;  %3992 = vmatprep.mubr.bf16.mxu0 %v6480_v59  ;;  %v6544_v53 = vld [vmem:[%s8504_s1 + $0x428] sm:$0xff]   ;;  %v6550_v59 = vld [vmem:[%s8504_s1 + $0x4b0] sm:$0xff]  }
  0x64   :  { %4034 = vmatmul.mubr.bf16.vlgmr.msra.gmra.mrb[16].mxu1 %v6471_v51  ;;  %5785 = vmatprep.subr.bf16.mxu0 %v6477_v56  ;;  %v6542_v51 = vld [vmem:[%s8504_s1 + $0x4a0] sm:$0xff]   ;;  %v6547_v56 = vld [vmem:[%s8504_s1 + $0x470] sm:$0xff]  }
  0x65   :  { %5812 = vmatpush3.bf16.msra.mxu1 %v6476_v55  ;;  %4041 = vmatprep.mubr.bf16.mxu1 %v6485_v63  ;;  %v6546_v55 = vld [vmem:[%s8504_s1 + $0x4a8] sm:$0xff]   ;;  %v6554_v63 = vld [vmem:[%s8505_s0 + $0x40] ss:$196 sps:$4 sm:$0xff]  }
  0x66   :  { %5813 = vmatprep.subr.bf16.mxu1 %v6479_v58  ;;  %v6549_v58 = vld [vmem:[%s8504_s1 + $0x4f0] sm:$0xff]  }
  0x67   :  { %5786 = vmatpush3.bf16.msra.mxu0 %v6478_v57  ;;  %v6548_v57 = vld [vmem:[%s8504_s1 + $0x430] sm:$0xff]  }
  0x68   :  { %5787 = vmatprep.subr.bf16.mxu0 %v6484_v62  ;;  %v6553_v62 = vld [vmem:[%s8504_s1 + $0x4f8] sm:$0xff]  }
  0x69   :  { %5814 = vmatpush3.bf16.msra.mxu1 %v6482_v60  ;;  %v6551_v60 = vld [vmem:[%s8504_s1 + $0x478] sm:$0xff]  }
  0x6a   :  { %3993 = vmatmul.mubr.bf16.gmra.mrb[20].mxu0 %v6483_v61  ;;  %5815 = vmatprep.subr.bf16.mxu1 %v6489_v2  ;;  %v6552_v61 = vld [vmem:[%s8504_s1 + $0x438] sm:$0xff]   ;;  %v6558_v2 = vld [vmem:[%s8504_s1 + $0x540] sm:$0xff]  }
  0x6b   :  { %5788 = vmatpush3.bf16.msra.mxu0 %v6487_v0  ;;  %4082 = vmatprep.mubr.bf16.mxu0 %v6512_v24  ;;  %v6556_v0 = vld [vmem:[%s8505_s0 + $0x44] ss:$196 sps:$4 sm:$0xff]  }
  0x6c   :  { %4042 = vmatmul.mubr.bf16.gmra.mrb[20].mxu1 %v6488_v1  ;;  %5789 = vmatprep.subr.bf16.mxu0 %v6491_v4  ;;  %v6557_v1 = vld [vmem:[%s8504_s1 + $0x4b8] sm:$0xff]   ;;  %v6561_v4 = vld [vmem:[%s8505_s0 + $0x4c] ss:$196 sps:$4 sm:$0xff]   ;;  %v6583_v24 = vld [vmem:[%s8504_s1 + $0x560] sm:$0xff]  }
  0x6d   :  { %5816 = vmatpush3.bf16.msra.mxu1 %v6490_v3  ;;  %4131 = vmatprep.mubr.bf16.mxu1 %v6517_v28  ;;  %v6559_v3 = vld [vmem:[%s8505_s0 + $0x48] ss:$196 sps:$4 sm:$0xff]  }
  0x6e   :  { %5817 = vmatprep.subr.bf16.mxu1 %v6493_v6  ;;  %v6563_v6 = vld [vmem:[%s8504_s1 + $0x5c0] sm:$0xff]   ;;  %v6587_v28 = vld [vmem:[%s8504_s1 + $0x568] sm:$0xff]  }
  0x6f   :  { %5790 = vmatpush3.bf16.msra.mxu0 %v6492_v5  ;;  %v6562_v5 = vld [vmem:[%s8504_s1 + $0x500] sm:$0xff]  }
  0x70   :  { %5791 = vmatprep.subr.bf16.mxu0 %v6495_v8  ;;  %v6565_v8 = vld [vmem:[%s8504_s1 + $0x548] sm:$0xff]  }
  0x71   :  { %5818 = vmatpush3.bf16.msra.mxu1 %v6494_v7  ;;  %v6564_v7 = vld [vmem:[%s8504_s1 + $0x580] sm:$0xff]  }
  0x72   :  { %5819 = vmatprep.subr.bf16.mxu1 %v6497_v10  ;;  %v6567_v10 = vld [vmem:[%s8504_s1 + $0x5c8] sm:$0xff]  }
  0x73   :  { %5792 = vmatpush3.bf16.msra.mxu0 %v6496_v9  ;;  %v6566_v9 = vld [vmem:[%s8504_s1 + $0x508] sm:$0xff]  }
  0x74   :  { %5793 = vmatprep.subr.bf16.mxu0 %v6499_v12  ;;  %v6570_v12 = vld [vmem:[%s8504_s1 + $0x588] sm:$0xff]  }
  0x75   :  { %5820 = vmatpush3.bf16.msra.mxu1 %v6498_v11  ;;  %v6568_v11 = vld [vmem:[%s8505_s0 + $0x1cc] ss:$196 sps:$4 sm:$0xff]  }
  0x76   :  { %5821 = vmatprep.subr.bf16.mxu1 %v6501_v14  ;;  %v6572_v14 = vld [vmem:[%s8504_s1 + $0x550] sm:$0xff]  }
  0x77   :  { %5794 = vmatpush3.bf16.msra.mxu0 %v6500_v13  ;;  %v6571_v13 = vld [vmem:[%s8505_s0 + $0x1c8] ss:$196 sps:$4 sm:$0xff]  }
  0x78   :  { %5795 = vmatprep.subr.bf16.mxu0 %v6503_v16  ;;  %v6575_v16 = vld [vmem:[%s8504_s1 + $0x510] sm:$0xff]  }
  0x79   :  { %5822 = vmatpush3.bf16.msra.mxu1 %v6502_v15  ;;  %v6573_v15 = vld [vmem:[%s8505_s0 + $0x1d4] ss:$196 sps:$4 sm:$0xff]  }
  0x7a   :  { %5823 = vmatprep.subr.bf16.mxu1 %v6505_v18  ;;  %v6577_v18 = vld [vmem:[%s8504_s1 + $0x5d0] sm:$0xff]  }
  0x7b   :  { %5796 = vmatpush3.bf16.msra.mxu0 %v6504_v17  ;;  %v6576_v17 = vld [vmem:[%s8505_s0 + $0x1d0] ss:$196 sps:$4 sm:$0xff]  }
  0x7c   :  { %5797 = vmatprep.subr.bf16.mxu0 %v6507_v20  ;;  %v6579_v20 = vld [vmem:[%s8504_s1 + $0x558] sm:$0xff]  }
  0x7d   :  { %5824 = vmatpush3.bf16.msra.mxu1 %v6506_v19  ;;  %v6578_v19 = vld [vmem:[%s8504_s1 + $0x590] sm:$0xff]  }
  0x7e   :  { %5825 = vmatprep.subr.bf16.mxu1 %v6509_v22  ;;  %v6581_v22 = vld [vmem:[%s8504_s1 + $0x5d8] sm:$0xff]  }
  0x7f   :  { %5798 = vmatpush3.bf16.msra.mxu0 %v6508_v21  ;;  %v6580_v21 = vld [vmem:[%s8504_s1 + $0x518] sm:$0xff]  }
  0x80   :  { %5839 = vmatprep.subr.bf16.mxu0 %v6514_v26  ;;  %v6585_v26 = vld [vmem:[%s8504_s1 + $0x5e0] sm:$0xff]  }
  0x81   :  { %5826 = vmatpush3.bf16.msra.mxu1 %v6513_v25  ;;  %v6584_v25 = vld [vmem:[%s8504_s1 + $0x520] sm:$0xff]  }
  0x82   :  { %4083 = vmatmul.mubr.bf16.vlgmr.msra.gmra.mrb[24].mxu0 %v6510_v23  ;;  %5867 = vmatprep.subr.bf16.mxu1 %v6519_v30  ;;  %v6582_v23 = vld [vmem:[%s8504_s1 + $0x598] sm:$0xff]   ;;  %v6589_v30 = vld [vmem:[%s8504_s1 + $0x5e8] sm:$0xff]  }
  0x83   :  { %5840 = vmatpush3.bf16.msra.mxu0 %v6518_v29  ;;  %4090 = vmatprep.mubr.bf16.mxu0 %v6524_v35  ;;  %v6588_v29 = vld [vmem:[%s8504_s1 + $0x528] sm:$0xff]   ;;  %v6594_v35 = vld [vmem:[%s8504_s1 + $0x5b0] sm:$0xff]  }
  0x84   :  { %4132 = vmatmul.mubr.bf16.vlgmr.msra.gmra.mrb[24].mxu1 %v6515_v27  ;;  %5841 = vmatprep.subr.bf16.mxu0 %v6521_v32  ;;  %v6586_v27 = vld [vmem:[%s8504_s1 + $0x5a0] sm:$0xff]   ;;  %v6591_v32 = vld [vmem:[%s8504_s1 + $0x570] sm:$0xff]  }
  0x85   :  { %5868 = vmatpush3.bf16.msra.mxu1 %v6520_v31  ;;  %4139 = vmatprep.mubr.bf16.mxu1 %v6529_v39  ;;  %v6590_v31 = vld [vmem:[%s8504_s1 + $0x5a8] sm:$0xff]   ;;  %v6598_v39 = vld [vmem:[%s8505_s0 + $0x50] ss:$196 sps:$4 sm:$0xff]  }
  0x86   :  { %5869 = vmatprep.subr.bf16.mxu1 %v6523_v34  ;;  %v6593_v34 = vld [vmem:[%s8504_s1 + $0x5f0] sm:$0xff]  }
  0x87   :  { %5842 = vmatpush3.bf16.msra.mxu0 %v6522_v33  ;;  %v6592_v33 = vld [vmem:[%s8504_s1 + $0x530] sm:$0xff]  }
  0x88   :  { %5843 = vmatprep.subr.bf16.mxu0 %v6528_v38  ;;  %v6597_v38 = vld [vmem:[%s8504_s1 + $0x5f8] sm:$0xff]  }
  0x89   :  { %5870 = vmatpush3.bf16.msra.mxu1 %v6526_v36  ;;  %v6595_v36 = vld [vmem:[%s8504_s1 + $0x578] sm:$0xff]  }
  0x8a   :  { %4091 = vmatmul.mubr.bf16.gmra.mrb[28].mxu0 %v6527_v37  ;;  %5871 = vmatprep.subr.bf16.mxu1 %v6533_v42  ;;  %v6596_v37 = vld [vmem:[%s8504_s1 + $0x538] sm:$0xff]   ;;  %v6602_v42 = vld [vmem:[%s8504_s1 + $0x640] sm:$0xff]  }
  0x8b   :  { %5844 = vmatpush3.bf16.msra.mxu0 %v6531_v40  ;;  %4180 = vmatprep.mubr.bf16.mxu0 %v6556_v0  ;;  %v6600_v40 = vld [vmem:[%s8505_s0 + $0x54] ss:$196 sps:$4 sm:$0xff]   ;;  %v6627_v0 = vld [vmem:[%s8504_s1 + $0x660] sm:$0xff]  }
  0x8c   :  { %4140 = vmatmul.mubr.bf16.gmra.mrb[28].mxu1 %v6532_v41  ;;  %5845 = vmatprep.subr.bf16.mxu0 %v6535_v44  ;;  %v6601_v41 = vld [vmem:[%s8504_s1 + $0x5b8] sm:$0xff]  }
  0x8d   :  { %5872 = vmatpush3.bf16.msra.mxu1 %v6534_v43  ;;  %4229 = vmatprep.mubr.bf16.mxu1 %v6561_v4  ;;  %v6603_v43 = vld [vmem:[%s8505_s0 + $0x58] ss:$196 sps:$4 sm:$0xff]   ;;  %v6631_v4 = vld [vmem:[%s8504_s1 + $0x668] sm:$0xff]  }
  0x8e   :  { %5873 = vmatprep.subr.bf16.mxu1 %v6537_v46  ;;  %v6605_v44 = vld [vmem:[%s8505_s0 + $0x5c] ss:$196 sps:$4 sm:$0xff]  }
  0x8f   :  { %5846 = vmatpush3.bf16.msra.mxu0 %v6536_v45  ;;  %v6606_v45 = vld [vmem:[%s8504_s1 + $0x600] sm:$0xff]  }
  0x90   :  { %5847 = vmatprep.subr.bf16.mxu0 %v6539_v48  ;;  %v6607_v46 = vld [vmem:[%s8504_s1 + $0x6c0] sm:$0xff]   ;;  %v6609_v48 = vld [vmem:[%s8504_s1 + $0x648] sm:$0xff]  }
  0x91   :  { %5874 = vmatpush3.bf16.msra.mxu1 %v6538_v47  ;;  %v6608_v47 = vld [vmem:[%s8504_s1 + $0x680] sm:$0xff]  }
  0x92   :  { %5875 = vmatprep.subr.bf16.mxu1 %v6541_v50  ;;  %v6611_v50 = vld [vmem:[%s8504_s1 + $0x6c8] sm:$0xff]  }
  0x93   :  { %5848 = vmatpush3.bf16.msra.mxu0 %v6540_v49  ;;  %v6610_v49 = vld [vmem:[%s8504_s1 + $0x608] sm:$0xff]  }
  0x94   :  { %5849 = vmatprep.subr.bf16.mxu0 %v6543_v52  ;;  %v6614_v52 = vld [vmem:[%s8504_s1 + $0x688] sm:$0xff]  }
  0x95   :  { %5876 = vmatpush3.bf16.msra.mxu1 %v6542_v51  ;;  %v6612_v51 = vld [vmem:[%s8505_s0 + $0x1dc] ss:$196 sps:$4 sm:$0xff]  }
  0x96   :  { %5877 = vmatprep.subr.bf16.mxu1 %v6545_v54  ;;  %v6616_v54 = vld [vmem:[%s8504_s1 + $0x650] sm:$0xff]  }
  0x97   :  { %5850 = vmatpush3.bf16.msra.mxu0 %v6544_v53  ;;  %v6615_v53 = vld [vmem:[%s8505_s0 + $0x1d8] ss:$196 sps:$4 sm:$0xff]  }
  0x98   :  { %5851 = vmatprep.subr.bf16.mxu0 %v6547_v56  ;;  %v6619_v56 = vld [vmem:[%s8504_s1 + $0x610] sm:$0xff]  }
  0x99   :  { %5878 = vmatpush3.bf16.msra.mxu1 %v6546_v55  ;;  %v6617_v55 = vld [vmem:[%s8505_s0 + $0x1e4] ss:$196 sps:$4 sm:$0xff]  }
  0x9a   :  { %5879 = vmatprep.subr.bf16.mxu1 %v6549_v58  ;;  %v6621_v58 = vld [vmem:[%s8504_s1 + $0x6d0] sm:$0xff]  }
  0x9b   :  { %5852 = vmatpush3.bf16.msra.mxu0 %v6548_v57  ;;  %v6620_v57 = vld [vmem:[%s8505_s0 + $0x1e0] ss:$196 sps:$4 sm:$0xff]  }
  0x9c   :  { %5853 = vmatprep.subr.bf16.mxu0 %v6551_v60  ;;  %v6623_v60 = vld [vmem:[%s8504_s1 + $0x658] sm:$0xff]  }
  0x9d   :  { %5880 = vmatpush3.bf16.msra.mxu1 %v6550_v59  ;;  %v6622_v59 = vld [vmem:[%s8504_s1 + $0x690] sm:$0xff]  }
  0x9e   :  { %5881 = vmatprep.subr.bf16.mxu1 %v6553_v62  ;;  %v6625_v62 = vld [vmem:[%s8504_s1 + $0x6d8] sm:$0xff]  }
  0x9f   :  { %5854 = vmatpush3.bf16.msra.mxu0 %v6552_v61  ;;  %v6624_v61 = vld [vmem:[%s8504_s1 + $0x618] sm:$0xff]  }
  0xa0   :  { %5895 = vmatprep.subr.bf16.mxu0 %v6558_v2  ;;  %v6629_v2 = vld [vmem:[%s8504_s1 + $0x6e0] sm:$0xff]  }
  0xa1   :  { %5882 = vmatpush3.bf16.msra.mxu1 %v6557_v1  ;;  %v6628_v1 = vld [vmem:[%s8504_s1 + $0x620] sm:$0xff]  }
  0xa2   :  { %4181 = vmatmul.mubr.bf16.vlgmr.msra.gmra.mrb[32].mxu0 %v6554_v63  ;;  %5923 = vmatprep.subr.bf16.mxu1 %v6563_v6  ;;  %v6626_v63 = vld [vmem:[%s8504_s1 + $0x698] sm:$0xff]   ;;  %v6633_v6 = vld [vmem:[%s8504_s1 + $0x6e8] sm:$0xff]  }
  0xa3   :  { %5896 = vmatpush3.bf16.msra.mxu0 %v6562_v5  ;;  %4188 = vmatprep.mubr.bf16.mxu0 %v6568_v11  ;;  %v6632_v5 = vld [vmem:[%s8504_s1 + $0x628] sm:$0xff]  }
  0xa4   :  { %4230 = vmatmul.mubr.bf16.vlgmr.msra.gmra.mrb[32].mxu1 %v6559_v3  ;;  %5897 = vmatprep.subr.bf16.mxu0 %v6565_v8  ;;  %v6630_v3 = vld [vmem:[%s8504_s1 + $0x6a0] sm:$0xff]   ;;  %v6634_v8 = vld [vmem:[%s8504_s1 + $0x6a8] sm:$0xff]  }
  0xa5   :  { %5924 = vmatpush3.bf16.msra.mxu1 %v6564_v7  ;;  %4237 = vmatprep.mubr.bf16.mxu1 %v6573_v15  ;;  %v6637_v15 = vld [vmem:[%s8504_s1 + $0x6f0] sm:$0xff]  }
  0xa6   :  { %5925 = vmatprep.subr.bf16.mxu1 %v6567_v10  ;;  %v6635_v10 = vld [vmem:[%s8504_s1 + $0x670] sm:$0xff]  }
  0xa7   :  { %5898 = vmatpush3.bf16.msra.mxu0 %v6566_v9 }
  0xa8   :  { %5899 = vmatprep.subr.bf16.mxu0 %v6572_v14 }
  0xa9   :  { %5926 = vmatpush3.bf16.msra.mxu1 %v6570_v12 }
  0xaa   :  { %4189 = vmatmul.mubr.bf16.gmra.mrb[36].mxu0 %v6571_v13  ;;  %5927 = vmatprep.subr.bf16.mxu1 %v6577_v18  ;;  %v6636_v13 = vld [vmem:[%s8504_s1 + $0x630] sm:$0xff]  }
  0xab   :  { %5900 = vmatpush3.bf16.msra.mxu0 %v6575_v16  ;;  %4278 = vmatprep.mubr.bf16.mxu0 %v6600_v40  ;;  %v6658_v40 = vld [vmem:[%s8504_s1 + $0x788] sm:$0xff]  }
  0xac   :  { %4238 = vmatmul.mubr.bf16.gmra.mrb[36].mxu1 %v6576_v17  ;;  %5901 = vmatprep.subr.bf16.mxu0 %v6579_v20  ;;  %v6638_v17 = vld [vmem:[%s8504_s1 + $0x6b0] sm:$0xff]   ;;  %v6639_v20 = vld [vmem:[%s8504_s1 + $0x678] sm:$0xff]  }
  0xad   :  { %5928 = vmatpush3.bf16.msra.mxu1 %v6578_v19  ;;  %4327 = vmatprep.mubr.bf16.mxu1 %v6605_v44  ;;  %v6663_v44 = vld [vmem:[%s8504_s1 + $0x710] sm:$0xff]  }
  0xae   :  { %5929 = vmatprep.subr.bf16.mxu1 %v6581_v22 }
  0xaf   :  { %5902 = vmatpush3.bf16.msra.mxu0 %v6580_v21 }
  0xb0   :  { %5903 = vmatprep.subr.bf16.mxu0 %v6583_v24 }
  0xb1   :  { %5930 = vmatpush3.bf16.msra.mxu1 %v6582_v23  ;;  %v6640_v23 = vld [vmem:[%s8504_s1 + $0x638] sm:$0xff]  }
  0xb2   :  { %5931 = vmatprep.subr.bf16.mxu1 %v6585_v26 }
  0xb3   :  { %5904 = vmatpush3.bf16.msra.mxu0 %v6584_v25  ;;  %v6641_v25 = vld [vmem:[%s8504_s1 + $0x6f8] sm:$0xff]  }
  0xb4   :  { %5905 = vmatprep.subr.bf16.mxu0 %v6587_v28  ;;  %v6644_v28 = vld [vmem:[%s8505_s0 + $0x64] ss:$196 sps:$4 sm:$0xff]  }
  0xb5   :  { %5932 = vmatpush3.bf16.msra.mxu1 %v6586_v27  ;;  %v6642_v27 = vld [vmem:[%s8505_s0 + $0x60] ss:$196 sps:$4 sm:$0xff]  }
  0xb6   :  { %5933 = vmatprep.subr.bf16.mxu1 %v6589_v30  ;;  %v6646_v30 = vld [vmem:[%s8504_s1 + $0x740] sm:$0xff]  }
  0xb7   :  { %5906 = vmatpush3.bf16.msra.mxu0 %v6588_v29  ;;  %v6645_v29 = vld [vmem:[%s8504_s1 + $0x6b8] sm:$0xff]  }
  0xb8   :  { %5907 = vmatprep.subr.bf16.mxu0 %v6591_v32  ;;  %v6649_v32 = vld [vmem:[%s8505_s0 + $0x6c] ss:$196 sps:$4 sm:$0xff]  }
  0xb9   :  { %5934 = vmatpush3.bf16.msra.mxu1 %v6590_v31  ;;  %v6647_v31 = vld [vmem:[%s8505_s0 + $0x68] ss:$196 sps:$4 sm:$0xff]  }
  0xba   :  { %5935 = vmatprep.subr.bf16.mxu1 %v6593_v34  ;;  %v6651_v34 = vld [vmem:[%s8504_s1 + $0x7c0] sm:$0xff]  }
  0xbb   :  { %5908 = vmatpush3.bf16.msra.mxu0 %v6592_v33  ;;  %v6650_v33 = vld [vmem:[%s8504_s1 + $0x700] sm:$0xff]  }
  0xbc   :  { %5909 = vmatprep.subr.bf16.mxu0 %v6595_v36  ;;  %v6653_v36 = vld [vmem:[%s8504_s1 + $0x748] sm:$0xff]  }
  0xbd   :  { %5936 = vmatpush3.bf16.msra.mxu1 %v6594_v35  ;;  %v6652_v35 = vld [vmem:[%s8504_s1 + $0x780] sm:$0xff]  }
  0xbe   :  { %5937 = vmatprep.subr.bf16.mxu1 %v6597_v38  ;;  %v6655_v38 = vld [vmem:[%s8504_s1 + $0x7c8] sm:$0xff]  }
  0xbf   :  { %5910 = vmatpush3.bf16.msra.mxu0 %v6596_v37  ;;  %v6654_v37 = vld [vmem:[%s8504_s1 + $0x708] sm:$0xff]  }
  0xc0   :  { %5951 = vmatprep.subr.bf16.mxu0 %v6602_v42  ;;  %v6660_v42 = vld [vmem:[%s8504_s1 + $0x750] sm:$0xff]  }
  0xc1   :  { %5938 = vmatpush3.bf16.msra.mxu1 %v6601_v41  ;;  %v6659_v41 = vld [vmem:[%s8505_s0 + $0x1e8] ss:$196 sps:$4 sm:$0xff]  }
  0xc2   :  { %4279 = vmatmul.mubr.bf16.vlgmr.msra.gmra.mrb[40].mxu0 %v6598_v39  ;;  %5979 = vmatprep.subr.bf16.mxu1 %v6607_v46  ;;  %v6656_v39 = vld [vmem:[%s8505_s0 + $0x1ec] ss:$196 sps:$4 sm:$0xff]  }
  0xc3   :  { %5952 = vmatpush3.bf16.msra.mxu0 %v6606_v45  ;;  %4286 = vmatprep.mubr.bf16.mxu0 %v6612_v51  ;;  %v6664_v45 = vld [vmem:[%s8505_s0 + $0x1f0] ss:$196 sps:$4 sm:$0xff]  }
  0xc4   :  { %4328 = vmatmul.mubr.bf16.vlgmr.msra.gmra.mrb[40].mxu1 %v6603_v43  ;;  %5953 = vmatprep.subr.bf16.mxu0 %v6609_v48  ;;  %v6661_v43 = vld [vmem:[%s8505_s0 + $0x1f4] ss:$196 sps:$4 sm:$0xff]  }
  0xc5   :  { %5980 = vmatpush3.bf16.msra.mxu1 %v6608_v47  ;;  %4335 = vmatprep.mubr.bf16.mxu1 %v6617_v55  ;;  %v6665_v46 = vld [vmem:[%s8504_s1 + $0x7d0] sm:$0xff]   ;;  %v6669_v55 = vld [vmem:[%s8504_s1 + $0x7d8] sm:$0xff]  }
  0xc6   :  { %5981 = vmatprep.subr.bf16.mxu1 %v6611_v50  ;;  %v6666_v48 = vld [vmem:[%s8504_s1 + $0x790] sm:$0xff]   ;;  %v6667_v50 = vld [vmem:[%s8504_s1 + $0x758] sm:$0xff]  }
  0xc7   :  { %5954 = vmatpush3.bf16.msra.mxu0 %v6610_v49 }
  0xc8   :  { %5955 = vmatprep.subr.bf16.mxu0 %v6616_v54 }
  0xc9   :  { %5982 = vmatpush3.bf16.msra.mxu1 %v6614_v52 }
  0xca   :  { %4287 = vmatmul.mubr.bf16.gmra.mrb[44].mxu0 %v6615_v53  ;;  %5983 = vmatprep.subr.bf16.mxu1 %v6621_v58  ;;  %v6668_v53 = vld [vmem:[%s8504_s1 + $0x718] sm:$0xff]  }
  0xcb   :  { %5956 = vmatpush3.bf16.msra.mxu0 %v6619_v56  ;;  %4376 = vmatprep.mubr.bf16.mxu0 %v6644_v28 }
  0xcc   :  { %4336 = vmatmul.mubr.bf16.gmra.mrb[44].mxu1 %v6620_v57  ;;  %5957 = vmatprep.subr.bf16.mxu0 %v6623_v60  ;;  %v6670_v57 = vld [vmem:[%s8504_s1 + $0x798] sm:$0xff]   ;;  %v6671_v60 = vld [vmem:[%s8504_s1 + $0x760] sm:$0xff]  }
  0xcd   :  { %5984 = vmatpush3.bf16.msra.mxu1 %v6622_v59  ;;  %4425 = vmatprep.mubr.bf16.mxu1 %v6649_v32  ;;  %v6683_v32 = vld [vmem:[%s8504_s1 + $0x778] sm:$0xff]  }
  0xce   :  { %5985 = vmatprep.subr.bf16.mxu1 %v6625_v62 }
  0xcf   :  { %5958 = vmatpush3.bf16.msra.mxu0 %v6624_v61 }
  0xd0   :  { %5959 = vmatprep.subr.bf16.mxu0 %v6627_v0 }
  0xd1   :  { %5986 = vmatpush3.bf16.msra.mxu1 %v6626_v63  ;;  %v6672_v63 = vld [vmem:[%s8504_s1 + $0x720] sm:$0xff]  }
  0xd2   :  { %5987 = vmatprep.subr.bf16.mxu1 %v6629_v2 }
  0xd3   :  { %5960 = vmatpush3.bf16.msra.mxu0 %v6628_v1  ;;  %v6673_v1 = vld [vmem:[%s8504_s1 + $0x7e0] sm:$0xff]  }
  0xd4   :  { %5961 = vmatprep.subr.bf16.mxu0 %v6631_v4  ;;  %v5115_v4 = vld [vmem:[%s8506_s2] ss:$0 sm:$0xff] }
  0xd5   :  { %5988 = vmatpush3.bf16.msra.mxu1 %v6630_v3  ;;  %v6674_v3 = vld [vmem:[%s8504_s1 + $0x7a0] sm:$0xff]  }
  0xd6   :  { %5989 = vmatprep.subr.bf16.mxu1 %v6633_v6  ;;  %v6675_v6 = vld [vmem:[%s8504_s1 + $0x768] sm:$0xff]  }
  0xd7   :  { %5962 = vmatpush3.bf16.msra.mxu0 %v6632_v5 }
  0xd8   :  { %5963 = vmatprep.subr.bf16.mxu0 %v6635_v10  ;;  %v6676_v10 = vld [vmem:[%s8504_s1 + $0x728] sm:$0xff]  }
  0xd9   :  { %5990 = vmatpush3.bf16.msra.mxu1 %v6634_v8 }
  0xda   :  { %5991 = vmatprep.subr.bf16.mxu1 %v6637_v15 }
  0xdb   :  { %5964 = vmatpush3.bf16.msra.mxu0 %v6636_v13 }
  0xdc   :  { %5965 = vmatprep.subr.bf16.mxu0 %v6639_v20 }
  0xdd   :  { %5992 = vmatpush3.bf16.msra.mxu1 %v6638_v17 }
  0xde   :  { %5993 = vmatprep.subr.bf16.mxu1 %v6641_v25 }
  0xdf   :  { %5966 = vmatpush3.bf16.msra.mxu0 %v6640_v23  ;;  %v6680_v23 = vld [vmem:[%s8504_s1 + $0x730] sm:$0xff]  }
  0xe0   :  { %6007 = vmatprep.subr.bf16.mxu0 %v6646_v30 }
  0xe1   :  { %5994 = vmatpush3.bf16.msra.mxu1 %v6645_v29  ;;  %v6682_v29 = vld [vmem:[%s8504_s1 + $0x7b0] sm:$0xff]  }
  0xe2   :  { %4377 = vmatmul.mubr.bf16.vlgmr.msra.gmra.mrb[48].mxu0 %v6642_v27  ;;  %6035 = vmatprep.subr.bf16.mxu1 %v6651_v34 }
  0xe3   :  { %6008 = vmatpush3.bf16.msra.mxu0 %v6650_v33  ;;  %4384 = vmatprep.mubr.bf16.mxu0 %v6656_v39  ;;  %v6686_v39 = vld [vmem:[%s8505_s0 + $0x70] ss:$196 sps:$4 sm:$0xff]  }
  0xe4   :  { %4426 = vmatmul.mubr.bf16.vlgmr.msra.gmra.mrb[48].mxu1 %v6647_v31  ;;  %6009 = vmatprep.subr.bf16.mxu0 %v6653_v36 }
  0xe5   :  { %6036 = vmatpush3.bf16.msra.mxu1 %v6652_v35  ;;  %4433 = vmatprep.mubr.bf16.mxu1 %v6661_v43  ;;  %v6684_v35 = vld [vmem:[%s8504_s1 + $0x738] sm:$0xff]  }
  0xe6   :  { %6037 = vmatprep.subr.bf16.mxu1 %v6655_v38  ;;  %v6685_v38 = vld [vmem:[%s8504_s1 + $0x7f8] sm:$0xff]  }
  0xe7   :  { %6010 = vmatpush3.bf16.msra.mxu0 %v6654_v37 }
  0xe8   :  { %6011 = vmatprep.subr.bf16.mxu0 %v6660_v42  ;;  %v6689_v42 = vld [vmem:[%s8504_s1 + $0x7b8] sm:$0xff]  }
  0xe9   :  { %6038 = vmatpush3.bf16.msra.mxu1 %v6658_v40  ;;  %v6688_v40 = vld [vmem:[%s8505_s0 + $0x74] ss:$196 sps:$4 sm:$0xff]  }
  0xea   :  { %4385 = vmatmul.mubr.bf16.gmra.mrb[52].mxu0 %v6659_v41  ;;  %6039 = vmatprep.subr.bf16.mxu1 %v6665_v46  ;;  %v6691_v46 = vld [vmem:[%s8505_s0 + $0x78] ss:$196 sps:$4 sm:$0xff]  }
  0xeb   :  { %6012 = vmatpush3.bf16.msra.mxu0 %v6663_v44  ;;  %4474 = vmatprep.mubr.bf16.mxu0 %v6688_v40  ;;  %v6690_v44 = vld [vmem:[%s8504_s1 + $0x840] sm:$0xff]  }
  0xec   :  { %4434 = vmatmul.mubr.bf16.gmra.mrb[52].mxu1 %v6664_v45  ;;  %6013 = vmatprep.subr.bf16.mxu0 %v6667_v50  ;;  %v6694_v50 = vld [vmem:[%s8504_s1 + $0x800] sm:$0xff]  }
  0xed   :  { %6040 = vmatpush3.bf16.msra.mxu1 %v6666_v48 }
  0xee   :  { %6041 = vmatprep.subr.bf16.mxu1 %v6669_v55  ;;  %v6696_v55 = vld [vmem:[%s8504_s1 + $0x880] sm:$0xff]  }
  0xef   :  { %6014 = vmatpush3.bf16.msra.mxu0 %v6668_v53  ;;  %v6695_v53 = vld [vmem:[%s8504_s1 + $0x8c0] sm:$0xff]  }
  0xf0   :  { %6015 = vmatprep.subr.bf16.mxu0 %v6671_v60 }
  0xf1   :  { %6042 = vmatpush3.bf16.msra.mxu1 %v6670_v57 }
  0xf2   :  { %6043 = vmatprep.subr.bf16.mxu1 %v6673_v1 }
  0xf3   :  { %6016 = vmatpush3.bf16.msra.mxu0 %v6672_v63 }
  0xf4   :  { %6017 = vmatprep.subr.bf16.mxu0 %v6675_v6 }
  0xf5   :  { %v5631_v7 = vpop.f32.mrb[0].mxu0  ;;  %6044 = vmatpush3.bf16.msra.mxu1 %v6674_v3  ;;  %v6700_v3 = vld [vmem:[%s8505_s0 + $0x1fc] ss:$196 sps:$4 sm:$0xff]  }
  0xf6   :  { %v5632_v9 = vpop.f32.mrb[1].mxu0 }
  0xf7   :  { %v7718_v11 = vadd.f32 %v5632_v9, %v5631_v7  ;;  %v5634_v12 = vpop.f32.mrb[2].mxu0  ;;  %v5659_v14 = vpop.f32.mrb[0].mxu1  ;;  %6018 = vmatpush3.bf16.msra.mxu0 %v6676_v10  ;;  %v6708_v10 = vld [vmem:[%s8505_s0 + $0x200] ss:$196 sps:$4 sm:$0xff]  }
  0xf8   :  { %v5635_v16 = vpop.f32.mrb[3].mxu0  ;;  %v5660_v19 = vpop.f32.mrb[1].mxu1 }
  0xf9   :  { %v7729_v18 = vadd.f32 %v5635_v16, %v5634_v12  ;;  %v7734_v21 = vadd.f32 %v5660_v19, %v5659_v14  ;;  %v5662_v22 = vpop.f32.mrb[2].mxu1  ;;  %v3791_v5 = vadd.f32 %v7718_v11, %v5115_v4  ;;  %v6677_v11 = vld [vmem:[%s8504_s1 + $0x7e8] sm:$0xff]  }
  0xfa   :  { %v5663_v24 = vpop.f32.mrb[3].mxu1  ;;  %6045 = vmatprep.subr.bf16.mxu1 %v6677_v11  ;;  %v6711_v11 = vld [vmem:[%s8504_s1 + $0x858] sm:$0xff]  }
  0xfb   :  { %v7742_v26 = vadd.f32 %v5663_v24, %v5662_v22  ;;  %v3794_v7 = vadd.f32 %v7729_v18, %v5115_v4  ;;  %v3840_v13 = vadd.f32 %v7734_v21, %v3791_v5  ;;  %v6678_v18 = vld [vmem:[%s8504_s1 + $0x7a8] sm:$0xff]   ;;  %v6679_v21 = vld [vmem:[%s8504_s1 + $0x770] sm:$0xff]   ;;  %v6703_v5 = vld [vmem:[%s8505_s0 + $0x1f8] ss:$196 sps:$4 sm:$0xff]  }
  0xfc   :  { %6046 = vmatpush3.bf16.msra.mxu1 %v6678_v18  ;;  %6019 = vmatprep.subr.bf16.mxu0 %v6679_v21  ;;  %v6716_v18 = vld [vmem:[%s8504_s1 + $0x820] sm:$0xff]   ;;  %v6719_v21 = vld [vmem:[%s8504_s1 + $0x868] sm:$0xff]  }
  0xfd   :  { %v5637_v47 = vpop.f32.mrb[4].mxu0  ;;  %v3843_v14 = vadd.f32 %v7742_v26, %v3794_v7  ;;  %v6681_v26 = vld [vmem:[%s8504_s1 + $0x7f0] sm:$0xff]   ;;  %6020 = vmatpush3.bf16.msra.mxu0 %v6680_v23 }
  0xfe   :  { %v5638_v49 = vpop.f32.mrb[5].mxu0  ;;  %6047 = vmatprep.subr.bf16.mxu1 %v6681_v26  ;;  %6021 = vmatprep.subr.bf16.mxu0 %v6683_v32  ;;  %v6704_v7 = vld [vmem:[%s8504_s1 + $0x850] sm:$0xff]   ;;  %v6722_v26 = vld [vmem:[%s8504_s1 + $0x8a8] sm:$0xff]  }
  0xff   :  { %v5639_v51 = vadd.f32 %v5638_v49, %v5637_v47  ;;  %v5640_v52 = vpop.f32.mrb[6].mxu0  ;;  %v5665_v54 = vpop.f32.mrb[4].mxu1  ;;  %v6693_v49 = vld [vmem:[%s8505_s0 + $0x7c] ss:$196 sps:$4 sm:$0xff]  }
 0x100   :  { %v5641_v56 = vpop.f32.mrb[7].mxu0  ;;  %v5666_v59 = vpop.f32.mrb[5].mxu1  ;;  %6048 = vmatpush3.bf16.msra.mxu1 %v6682_v29  ;;  %4523 = vmatprep.mubr.bf16.mxu1 %v6693_v49  ;;  %v6723_v29 = vld [vmem:[%s8504_s1 + $0x870] sm:$0xff]   ;;  %v6732_v49 = vld [vmem:[%s8505_s0 + $0x84] ss:$196 sps:$4 sm:$0xff]  }
 0x101   :  { %v5642_v58 = vadd.f32 %v5641_v56, %v5640_v52  ;;  %v5667_v61 = vadd.f32 %v5666_v59, %v5665_v54  ;;  %v5668_v62 = vpop.f32.mrb[6].mxu1  ;;  %v3799_v8 = vadd.f32 %v5639_v51, %v5115_v4  ;;  %6022 = vmatpush3.bf16.msra.mxu0 %v6684_v35  ;;  %6049 = vmatprep.subr.bf16.mxu1 %v6685_v38  ;;  %v6725_v35 = vld [vmem:[%s8504_s1 + $0x8f0] sm:$0xff]  }
 0x102   :  { %v5669_v0 = vpop.f32.mrb[7].mxu1  ;;  %6063 = vmatprep.subr.bf16.mxu0 %v6690_v44  ;;  %v6726_v38 = vld [vmem:[%s8504_s1 + $0x8b0] sm:$0xff]   ;;  %v6728_v44 = vld [vmem:[%s8504_s1 + $0x838] sm:$0xff]  }
 0x103   :  { %v5670_v2 = vadd.f32 %v5669_v0, %v5668_v62  ;;  %v3802_v9 = vadd.f32 %v5642_v58, %v5115_v4  ;;  %v3848_v15 = vadd.f32 %v5667_v61, %v3799_v8  ;;  %v6697_v58 = vld [vmem:[%s8504_s1 + $0x848] sm:$0xff]  }
 0x104   :  { %6050 = vmatpush3.bf16.msra.mxu1 %v6689_v42  ;;  %4475 = vmatmul.mubr.bf16.vlgmr.msra.gmra.mrb[56].mxu0 %v6686_v39  ;;  %v6698_v61 = vld [vmem:[%s8504_s1 + $0x808] sm:$0xff]  }
 0x105   :  { %v7847_v16 = vadd.f32 %v5670_v2, %v3802_v9  ;;  %6064 = vmatpush3.bf16.msra.mxu0 %v6694_v50  ;;  %6091 = vmatprep.subr.bf16.mxu1 %v6695_v53  ;;  %v6699_v0 = vld [vmem:[%s8504_s1 + $0x8c8] sm:$0xff]   ;;  %v6707_v9 = vld [vmem:[%s8504_s1 + $0x810] sm:$0xff]   ;;  %v6733_v50 = vld [vmem:[%s8504_s1 + $0x8b8] sm:$0xff]  }
 0x106   :  { %6065 = vmatprep.subr.bf16.mxu0 %v6697_v58  ;;  %v6702_v4 = vld [vmem:[%s8504_s1 + $0x888] sm:$0xff]   ;;  %4482 = vmatprep.mubr.bf16.mxu0 %v6700_v3 }
 0x107   :  { %4524 = vmatmul.mubr.bf16.vlgmr.msra.gmra.mrb[56].mxu1 %v6691_v46  ;;  %v6705_v8 = vld [vmem:[%s8505_s0 + $0x204] ss:$196 sps:$4 sm:$0xff]  }
 0x108   :  { %6092 = vmatpush3.bf16.msra.mxu1 %v6696_v55  ;;  %4531 = vmatprep.mubr.bf16.mxu1 %v6705_v8  ;;  %v6737_v55 = vld [vmem:[%s8505_s0 + $0x8c] ss:$196 sps:$4 sm:$0xff]  }
 0x109   :  { %6066 = vmatpush3.bf16.msra.mxu0 %v6698_v61  ;;  %6093 = vmatprep.subr.bf16.mxu1 %v6699_v0  ;;  %v6741_v0 = vld [vmem:[%s8504_s1 + $0x948] sm:$0xff]  }
 0x10a   :  { %6067 = vmatprep.subr.bf16.mxu0 %v6704_v7  ;;  %v6743_v7 = vld [vmem:[%s8504_s1 + $0x9c8] sm:$0xff]  }
 0x10c   :  { %6094 = vmatpush3.bf16.msra.mxu1 %v6702_v4  ;;  %4483 = vmatmul.mubr.bf16.gmra.mrb[60].mxu0 %v6703_v5 }
 0x10d   :  { %6068 = vmatpush3.bf16.msra.mxu0 %v6707_v9  ;;  %4572 = vmatprep.mubr.bf16.mxu0 %v6732_v49 }
 0x10e   :  { %6069 = vmatprep.subr.bf16.mxu0 %v6711_v11  ;;  %v6746_v11 = vld [vmem:[%s8504_s1 + $0x988] sm:$0xff]  }
 0x10f   :  { %4532 = vmatmul.mubr.bf16.gmra.mrb[60].mxu1 %v6708_v10  ;;  %v6744_v10 = vld [vmem:[%s8505_s0 + $0x20c] ss:$196 sps:$4 sm:$0xff]  }
 0x110   :  { %4621 = vmatprep.mubr.bf16.mxu1 %v6737_v55  ;;  %v6773_v55 = vld [vmem:[%s8504_s1 + $0x9f8] sm:$0xff]  }
 0x115   :  { %v5687_v12 = vpop.f32.mrb[8].mxu0 }
 0x116   :  { %v5688_v17 = vpop.f32.mrb[9].mxu0 }
 0x117   :  { %v5689_v19 = vadd.f32 %v5688_v17, %v5687_v12  ;;  %v5690_v20 = vpop.f32.mrb[10].mxu0  ;;  %v5715_v22 = vpop.f32.mrb[8].mxu1  ;;  %v6709_v12 = vld [vmem:[%s8504_s1 + $0x8d0] sm:$0xff]   ;;  %v6715_v17 = vld [vmem:[%s8504_s1 + $0x860] sm:$0xff]  }
 0x118   :  { %v5691_v25 = vpop.f32.mrb[11].mxu0  ;;  %v5716_v28 = vpop.f32.mrb[9].mxu1  ;;  %6095 = vmatprep.subr.bf16.mxu1 %v6709_v12 }
 0x119   :  { %v3889_v24 = vadd.f32 %v5689_v19, %v3840_v13  ;;  %v5692_v27 = vadd.f32 %v5691_v25, %v5690_v20  ;;  %v5717_v30 = vadd.f32 %v5716_v28, %v5715_v22  ;;  %v5718_v31 = vpop.f32.mrb[10].mxu1  ;;  %v6710_v13 = vld [vmem:[%s8504_s1 + $0x890] sm:$0xff]   ;;  %v6717_v19 = vld [vmem:[%s8504_s1 + $0x8e0] sm:$0xff]   ;;  %v6720_v22 = vld [vmem:[%s8504_s1 + $0x828] sm:$0xff]  }
 0x11a   :  { %v5719_v34 = vpop.f32.mrb[11].mxu1  ;;  %6096 = vmatpush3.bf16.msra.mxu1 %v6710_v13  ;;  %v6718_v20 = vld [vmem:[%s8504_s1 + $0x8a0] sm:$0xff]  }
 0x11b   :  { %v3892_v33 = vadd.f32 %v5692_v27, %v3843_v14  ;;  %v7870_v36 = vadd.f32 %v5717_v30, %v3889_v24  ;;  %v5720_v37 = vadd.f32 %v5719_v34, %v5718_v31  ;;  %v6712_v14 = vld [vmem:[%s8504_s1 + $0x818] sm:$0xff]   ;;  %v6721_v24 = vld [vmem:[%s8504_s1 + $0x8e8] sm:$0xff]   ;;  %v6724_v31 = vld [vmem:[%s8504_s1 + $0x830] sm:$0xff]  }
 0x11c   :  { %6070 = vmatpush3.bf16.msra.mxu0 %v6712_v14  ;;  %v6747_v14 = vld [vmem:[%s8505_s0 + $0x208] ss:$196 sps:$4 sm:$0xff]  }
 0x11d   :  { %v7881_v41 = vadd.f32 %v5720_v37, %v3892_v33  ;;  %v5693_v43 = vpop.f32.mrb[12].mxu0  ;;  %6071 = vmatprep.subr.bf16.mxu0 %v6715_v17  ;;  %v6751_v17 = vld [vmem:[%s8504_s1 + $0x910] sm:$0xff]  }
 0x11e   :  { %v5694_v45 = vpop.f32.mrb[13].mxu0 }
 0x11f   :  { %v5695_v47 = vadd.f32 %v5694_v45, %v5693_v43  ;;  %v5696_v48 = vpop.f32.mrb[14].mxu0  ;;  %v5721_v52 = vpop.f32.mrb[12].mxu1 }
 0x120   :  { %v5697_v54 = vpop.f32.mrb[15].mxu0  ;;  %v5722_v57 = vpop.f32.mrb[13].mxu1  ;;  %6072 = vmatpush3.bf16.msra.mxu0 %v6716_v18  ;;  %v6752_v18 = vld [vmem:[%s8505_s0 + $0x210] ss:$196 sps:$4 sm:$0xff]  }
 0x121   :  { %v3897_v51 = vadd.f32 %v5695_v47, %v3848_v15  ;;  %v5698_v56 = vadd.f32 %v5697_v54, %v5696_v48  ;;  %v5723_v59 = vadd.f32 %v5722_v57, %v5721_v52  ;;  %v5724_v60 = vpop.f32.mrb[14].mxu1  ;;  %v6713_v15 = vld [vmem:[%s8504_s1 + $0x8d8] sm:$0xff]   ;;  %6073 = vmatprep.subr.bf16.mxu0 %v6719_v21  ;;  %v6730_v47 = vld [vmem:[%s8505_s0 + $0x80] ss:$196 sps:$4 sm:$0xff]   ;;  %v6735_v54 = vld [vmem:[%s8505_s0 + $0x88] ss:$196 sps:$4 sm:$0xff]  }
 0x122   :  { %v5725_v63 = vpop.f32.mrb[15].mxu1  ;;  %6097 = vmatprep.subr.bf16.mxu1 %v6713_v15  ;;  %v6734_v52 = vld [vmem:[%s8504_s1 + $0x940] sm:$0xff]   ;;  %v6755_v21 = vld [vmem:[%s8504_s1 + $0x958] sm:$0xff]  }
 0x123   :  { %v3900_v62 = vadd.f32 %v5698_v56, %v7847_v16  ;;  %v7914_v1 = vadd.f32 %v5723_v59, %v3897_v51  ;;  %v5726_v2 = vadd.f32 %v5725_v63, %v5724_v60  ;;  %v6714_v16 = vld [vmem:[%s8504_s1 + $0x898] sm:$0xff]   ;;  %v6738_v57 = vld [vmem:[%s8504_s1 + $0x900] sm:$0xff]  }
 0x124   :  { %6098 = vmatpush3.bf16.msra.mxu1 %v6714_v16  ;;  %6074 = vmatpush3.bf16.msra.mxu0 %v6720_v22  ;;  %v6739_v59 = vld [vmem:[%s8504_s1 + $0x9c0] sm:$0xff]   ;;  %v6749_v16 = vld [vmem:[%s8505_s0 + $0x214] ss:$196 sps:$4 sm:$0xff]  }
 0x125   :  { %v7925_v6 = vadd.f32 %v5726_v2, %v3900_v62  ;;  %6099 = vmatprep.subr.bf16.mxu1 %v6717_v19  ;;  %6075 = vmatprep.subr.bf16.mxu0 %v6723_v29  ;;  %v6740_v62 = vld [vmem:[%s8504_s1 + $0x980] sm:$0xff]   ;;  %v6753_v19 = vld [vmem:[%s8504_s1 + $0x9d0] sm:$0xff]   ;;  %v6756_v22 = vld [vmem:[%s8504_s1 + $0x918] sm:$0xff]  }
 0x126   :  { %v6763_v29 = vld [vmem:[%s8504_s1 + $0x968] sm:$0xff]  }
 0x128   :  { %6100 = vmatpush3.bf16.msra.mxu1 %v6718_v20  ;;  %6076 = vmatpush3.bf16.msra.mxu0 %v6724_v31  ;;  %v6754_v20 = vld [vmem:[%s8504_s1 + $0x990] sm:$0xff]  }
 0x129   :  { %6101 = vmatprep.subr.bf16.mxu1 %v6721_v24  ;;  %v6758_v24 = vld [vmem:[%s8504_s1 + $0x998] sm:$0xff]  }
 0x12c   :  { %6102 = vmatpush3.bf16.msra.mxu1 %v6722_v26  ;;  %v6760_v26 = vld [vmem:[%s8504_s1 + $0x920] sm:$0xff]  }
 0x12d   :  { %6103 = vmatprep.subr.bf16.mxu1 %v6725_v35 }
 0x130   :  { %6104 = vmatpush3.bf16.msra.mxu1 %v6726_v38  ;;  %v6767_v38 = vld [vmem:[%s8504_s1 + $0x970] sm:$0xff]  }
 0x135   :  { %v5743_v23 = vpop.f32.mrb[16].mxu0 }
 0x136   :  { %v5744_v25 = vpop.f32.mrb[17].mxu0 }
 0x137   :  { %v5745_v27 = vadd.f32 %v5744_v25, %v5743_v23  ;;  %v5746_v28 = vpop.f32.mrb[18].mxu0  ;;  %v5771_v33 = vpop.f32.mrb[16].mxu1  ;;  %v6757_v23 = vld [vmem:[%s8504_s1 + $0x9d8] sm:$0xff]   ;;  %v6759_v25 = vld [vmem:[%s8504_s1 + $0x960] sm:$0xff]  }
 0x138   :  { %v5747_v30 = vpop.f32.mrb[19].mxu0  ;;  %v5772_v37 = vpop.f32.mrb[17].mxu1 }
 0x139   :  { %v3987_v32 = vadd.f32 %v5745_v27, %v7870_v36  ;;  %v5748_v34 = vadd.f32 %v5747_v30, %v5746_v28  ;;  %v5773_v40 = vadd.f32 %v5772_v37, %v5771_v33  ;;  %v5774_v42 = vpop.f32.mrb[18].mxu1  ;;  %v6727_v36 = vld [vmem:[%s8504_s1 + $0x878] sm:$0xff]   ;;  %v6761_v27 = vld [vmem:[%s8504_s1 + $0x9e0] sm:$0xff]   ;;  %v6764_v30 = vld [vmem:[%s8504_s1 + $0x928] sm:$0xff]  }
 0x13a   :  { %v5775_v43 = vpop.f32.mrb[19].mxu1  ;;  %6077 = vmatprep.subr.bf16.mxu0 %v6727_v36  ;;  %v6762_v28 = vld [vmem:[%s8504_s1 + $0x9a0] sm:$0xff]  }
 0x13b   :  { %v3990_v39 = vadd.f32 %v5748_v34, %v7881_v41  ;;  %v8001_v45 = vadd.f32 %v5773_v40, %v3987_v32  ;;  %v5776_v46 = vadd.f32 %v5775_v43, %v5774_v42  ;;  %v6729_v41 = vld [vmem:[%s8504_s1 + $0x8f8] sm:$0xff]   ;;  %6078 = vmatpush3.bf16.msra.mxu0 %v6728_v44  ;;  %v6765_v32 = vld [vmem:[%s8504_s1 + $0x9e8] sm:$0xff]   ;;  %v6768_v40 = vld [vmem:[%s8504_s1 + $0x930] sm:$0xff]  }
 0x13c   :  { %6105 = vmatprep.subr.bf16.mxu1 %v6729_v41  ;;  %6119 = vmatprep.subr.bf16.mxu0 %v6734_v52  ;;  %v6766_v34 = vld [vmem:[%s8504_s1 + $0x9a8] sm:$0xff]   ;;  %v6769_v43 = vld [vmem:[%s8504_s1 + $0x9f0] sm:$0xff]   ;;  %v6772_v52 = vld [vmem:[%s8504_s1 + $0x938] sm:$0xff]  }
 0x13d   :  { %v8009_v48 = vadd.f32 %v5776_v46, %v3990_v39  ;;  %v5749_v51 = vpop.f32.mrb[20].mxu0  ;;  %6106 = vmatpush3.bf16.msra.mxu1 %v6733_v50  ;;  %v6770_v41 = vld [vmem:[%s8504_s1 + $0x9b0] sm:$0xff]  }
 0x13e   :  { %v5750_v53 = vpop.f32.mrb[21].mxu0  ;;  %4573 = vmatmul.mubr.bf16.vlgmr.msra.gmra.mrb[64].mxu0 %v6730_v47  ;;  %6147 = vmatprep.subr.bf16.mxu1 %v6739_v59 }
 0x13f   :  { %v5751_v56 = vadd.f32 %v5750_v53, %v5749_v51  ;;  %v5752_v58 = vpop.f32.mrb[22].mxu0  ;;  %v5777_v61 = vpop.f32.mrb[20].mxu1  ;;  %6120 = vmatpush3.bf16.msra.mxu0 %v6738_v57  ;;  %4580 = vmatprep.mubr.bf16.mxu0 %v6744_v10 }
 0x140   :  { %4622 = vmatmul.mubr.bf16.vlgmr.msra.gmra.mrb[64].mxu1 %v6735_v54  ;;  %v5753_v63 = vpop.f32.mrb[23].mxu0  ;;  %v5778_v3 = vpop.f32.mrb[21].mxu1  ;;  %6121 = vmatprep.subr.bf16.mxu0 %v6741_v0 }
 0x141   :  { %v3995_v60 = vadd.f32 %v5751_v56, %v7914_v1  ;;  %v5754_v2 = vadd.f32 %v5753_v63, %v5752_v58  ;;  %6148 = vmatpush3.bf16.msra.mxu1 %v6740_v62  ;;  %v6742_v1 = vld [vmem:[%s8504_s1 + $0x908] sm:$0xff]   ;;  %v5779_v4 = vadd.f32 %v5778_v3, %v5777_v61  ;;  %v5780_v5 = vpop.f32.mrb[22].mxu1  ;;  %4629 = vmatprep.mubr.bf16.mxu1 %v6749_v16  ;;  %v6774_v56 = vld [vmem:[%s8505_s0 + $0x90] ss:$196 sps:$4 sm:$0xff]   ;;  %v6777_v58 = vld [vmem:[%s8504_s1 + $0x9b8] sm:$0xff]  }
 0x142   :  { %v5781_v9 = vpop.f32.mrb[23].mxu1  ;;  %6149 = vmatprep.subr.bf16.mxu1 %v6743_v7  ;;  %v6779_v62 = vld [vmem:[%s8505_s0 + $0x98] ss:$196 sps:$4 sm:$0xff]   ;;  %v6782_v3 = vld [vmem:[%s8504_s1 + $0xa00] sm:$0xff]  }
 0x143   :  { %v3998_v8 = vadd.f32 %v5754_v2, %v7925_v6  ;;  %6122 = vmatpush3.bf16.msra.mxu0 %v6742_v1  ;;  %v8049_v12 = vadd.f32 %v5779_v4, %v3995_v60  ;;  %v5782_v13 = vadd.f32 %v5781_v9, %v5780_v5  ;;  %v6748_v6 = vld [vmem:[%s8504_s1 + $0x950] sm:$0xff]   ;;  %v6778_v60 = vld [vmem:[%s8504_s1 + $0xa40] sm:$0xff]  }
 0x144   :  { %6123 = vmatprep.subr.bf16.mxu0 %v6748_v6  ;;  %v6781_v63 = vld [vmem:[%s8505_s0 + $0x9c] ss:$196 sps:$4 sm:$0xff]  }
 0x145   :  { %v8060_v15 = vadd.f32 %v5782_v13, %v3998_v8  ;;  %6150 = vmatpush3.bf16.msra.mxu1 %v6746_v11  ;;  %v6783_v4 = vld [vmem:[%s8504_s1 + $0xac0] sm:$0xff]   ;;  %v6785_v13 = vld [vmem:[%s8504_s1 + $0xa48] sm:$0xff]  }
 0x146   :  { %4581 = vmatmul.mubr.bf16.gmra.mrb[68].mxu0 %v6747_v14  ;;  %6151 = vmatprep.subr.bf16.mxu1 %v6753_v19  ;;  %v6784_v8 = vld [vmem:[%s8504_s1 + $0xa80] sm:$0xff]  }
 0x147   :  { %6124 = vmatpush3.bf16.msra.mxu0 %v6751_v17  ;;  %v6787_v17 = vld [vmem:[%s8504_s1 + $0xac8] sm:$0xff]  }
 0x148   :  { %4630 = vmatmul.mubr.bf16.gmra.mrb[68].mxu1 %v6752_v18  ;;  %6125 = vmatprep.subr.bf16.mxu0 %v6755_v21  ;;  %v6790_v21 = vld [vmem:[%s8504_s1 + $0xa88] sm:$0xff]  }
 0x149   :  { %6152 = vmatpush3.bf16.msra.mxu1 %v6754_v20  ;;  %4719 = vmatprep.mubr.bf16.mxu1 %v6781_v63  ;;  %v6788_v20 = vld [vmem:[%s8505_s0 + $0x21c] ss:$196 sps:$4 sm:$0xff]  }
 0x14a   :  { %6153 = vmatprep.subr.bf16.mxu1 %v6757_v23  ;;  %v6792_v23 = vld [vmem:[%s8504_s1 + $0xa50] sm:$0xff]   ;;  %v6817_v63 = vld [vmem:[%s8504_s1 + $0xaf8] sm:$0xff]  }
 0x14b   :  { %6126 = vmatpush3.bf16.msra.mxu0 %v6756_v22  ;;  %v6791_v22 = vld [vmem:[%s8505_s0 + $0x218] ss:$196 sps:$4 sm:$0xff]  }
 0x14c   :  { %6127 = vmatprep.subr.bf16.mxu0 %v6759_v25  ;;  %v6795_v25 = vld [vmem:[%s8504_s1 + $0xa10] sm:$0xff]  }
 0x14d   :  { %6154 = vmatpush3.bf16.msra.mxu1 %v6758_v24  ;;  %v6793_v24 = vld [vmem:[%s8505_s0 + $0x224] ss:$196 sps:$4 sm:$0xff]  }
 0x14e   :  { %6155 = vmatprep.subr.bf16.mxu1 %v6761_v27  ;;  %v6797_v27 = vld [vmem:[%s8504_s1 + $0xad0] sm:$0xff]  }
 0x14f   :  { %6128 = vmatpush3.bf16.msra.mxu0 %v6760_v26  ;;  %v6796_v26 = vld [vmem:[%s8505_s0 + $0x220] ss:$196 sps:$4 sm:$0xff]  }
 0x150   :  { %6129 = vmatprep.subr.bf16.mxu0 %v6763_v29  ;;  %v6799_v29 = vld [vmem:[%s8504_s1 + $0xa58] sm:$0xff]  }
 0x151   :  { %6156 = vmatpush3.bf16.msra.mxu1 %v6762_v28  ;;  %v6798_v28 = vld [vmem:[%s8504_s1 + $0xa90] sm:$0xff]  }
 0x152   :  { %6157 = vmatprep.subr.bf16.mxu1 %v6765_v32  ;;  %v6802_v32 = vld [vmem:[%s8504_s1 + $0xa98] sm:$0xff]  }
 0x153   :  { %6130 = vmatpush3.bf16.msra.mxu0 %v6764_v30  ;;  %v6800_v30 = vld [vmem:[%s8504_s1 + $0xa18] sm:$0xff]  }
 0x154   :  { %6131 = vmatprep.subr.bf16.mxu0 %v6767_v38  ;;  %v6807_v38 = vld [vmem:[%s8504_s1 + $0xa68] sm:$0xff]  }
 0x155   :  { %v5799_v31 = vpop.f32.mrb[24].mxu0  ;;  %6158 = vmatpush3.bf16.msra.mxu1 %v6766_v34  ;;  %v6804_v34 = vld [vmem:[%s8504_s1 + $0xa20] sm:$0xff]  }
 0x156   :  { %v5800_v33 = vpop.f32.mrb[25].mxu0  ;;  %6159 = vmatprep.subr.bf16.mxu1 %v6769_v43  ;;  %v6810_v43 = vld [vmem:[%s8504_s1 + $0xaa8] sm:$0xff]  }
 0x157   :  { %v5801_v35 = vadd.f32 %v5800_v33, %v5799_v31  ;;  %v5802_v37 = vpop.f32.mrb[26].mxu0  ;;  %v5827_v39 = vpop.f32.mrb[24].mxu1  ;;  %6132 = vmatpush3.bf16.msra.mxu0 %v6768_v40  ;;  %v6801_v31 = vld [vmem:[%s8504_s1 + $0xad8] sm:$0xff]   ;;  %v6803_v33 = vld [vmem:[%s8504_s1 + $0xa60] sm:$0xff]  }
 0x158   :  { %v5803_v36 = vpop.f32.mrb[27].mxu0  ;;  %v5828_v46 = vpop.f32.mrb[25].mxu1 }
 0x159   :  { %v4085_v42 = vadd.f32 %v5801_v35, %v8001_v45  ;;  %v5804_v44 = vadd.f32 %v5803_v36, %v5802_v37  ;;  %v5829_v47 = vadd.f32 %v5828_v46, %v5827_v39  ;;  %v5830_v49 = vpop.f32.mrb[26].mxu1  ;;  %v6771_v45 = vld [vmem:[%s8504_s1 + $0x978] sm:$0xff]   ;;  %6160 = vmatpush3.bf16.msra.mxu1 %v6770_v41  ;;  %v6805_v35 = vld [vmem:[%s8504_s1 + $0xae0] sm:$0xff]   ;;  %v6808_v39 = vld [vmem:[%s8504_s1 + $0xa28] sm:$0xff]  }
 0x15a   :  { %v5831_v51 = vpop.f32.mrb[27].mxu1  ;;  %6133 = vmatprep.subr.bf16.mxu0 %v6771_v45  ;;  %6161 = vmatprep.subr.bf16.mxu1 %v6773_v55  ;;  %v6806_v37 = vld [vmem:[%s8504_s1 + $0xaa0] sm:$0xff]   ;;  %v6811_v41 = vld [vmem:[%s8504_s1 + $0xa70] sm:$0xff]  }
 0x15b   :  { %v4088_v50 = vadd.f32 %v5804_v44, %v8009_v48  ;;  %v8133_v53 = vadd.f32 %v5829_v47, %v4085_v42  ;;  %v5832_v54 = vadd.f32 %v5831_v51, %v5830_v49  ;;  %6134 = vmatpush3.bf16.msra.mxu0 %v6772_v52  ;;  %v6776_v48 = vld [vmem:[%s8505_s0 + $0x94] ss:$196 sps:$4 sm:$0xff]   ;;  %v6809_v42 = vld [vmem:[%s8504_s1 + $0xae8] sm:$0xff]  }
 0x15c   :  { %4670 = vmatprep.mubr.bf16.mxu0 %v6776_v48  ;;  %6175 = vmatprep.subr.bf16.mxu0 %v6778_v60  ;;  %v6812_v49 = vld [vmem:[%s8504_s1 + $0xa30] sm:$0xff]   ;;  %v6816_v60 = vld [vmem:[%s8504_s1 + $0xa38] sm:$0xff]  }
 0x15d   :  { %v8144_v57 = vadd.f32 %v5832_v54, %v4088_v50  ;;  %v5805_v59 = vpop.f32.mrb[28].mxu0  ;;  %6162 = vmatpush3.bf16.msra.mxu1 %v6777_v58  ;;  %v6813_v51 = vld [vmem:[%s8504_s1 + $0xaf0] sm:$0xff]  }
 0x15e   :  { %v5806_v61 = vpop.f32.mrb[29].mxu0  ;;  %4671 = vmatmul.mubr.bf16.vlgmr.msra.gmra.mrb[72].mxu0 %v6774_v56  ;;  %6203 = vmatprep.subr.bf16.mxu1 %v6783_v4  ;;  %v6814_v55 = vld [vmem:[%s8504_s1 + $0xab0] sm:$0xff]   ;;  %v6822_v4 = vld [vmem:[%s8504_s1 + $0xb40] sm:$0xff]  }
 0x15f   :  { %v5807_v0 = vadd.f32 %v5806_v61, %v5805_v59  ;;  %v5808_v2 = vpop.f32.mrb[30].mxu0  ;;  %v5833_v1 = vpop.f32.mrb[28].mxu1  ;;  %6176 = vmatpush3.bf16.msra.mxu0 %v6782_v3  ;;  %4678 = vmatprep.mubr.bf16.mxu0 %v6788_v20  ;;  %v6821_v3 = vld [vmem:[%s8504_s1 + $0xab8] sm:$0xff]  }
 0x160   :  { %v5809_v7 = vpop.f32.mrb[31].mxu0  ;;  %4720 = vmatmul.mubr.bf16.vlgmr.msra.gmra.mrb[72].mxu1 %v6779_v62  ;;  %v5834_v10 = vpop.f32.mrb[29].mxu1  ;;  %6177 = vmatprep.subr.bf16.mxu0 %v6785_v13  ;;  %v6826_v13 = vld [vmem:[%s8504_s1 + $0xb00] sm:$0xff]  }
 0x161   :  { %v4093_v5 = vadd.f32 %v5807_v0, %v8049_v12  ;;  %v5810_v9 = vadd.f32 %v5809_v7, %v5808_v2  ;;  %v5835_v11 = vadd.f32 %v5834_v10, %v5833_v1  ;;  %v5836_v14 = vpop.f32.mrb[30].mxu1  ;;  %6204 = vmatpush3.bf16.msra.mxu1 %v6784_v8  ;;  %v6786_v12 = vld [vmem:[%s8504_s1 + $0xa08] sm:$0xff]   ;;  %4727 = vmatprep.mubr.bf16.mxu1 %v6793_v24  ;;  %v6818_v0 = vld [vmem:[%s8505_s0 + $0xa0] ss:$196 sps:$4 sm:$0xff]  }
 0x162   :  { %v5837_v16 = vpop.f32.mrb[31].mxu1  ;;  %6205 = vmatprep.subr.bf16.mxu1 %v6787_v17  ;;  %v6823_v7 = vld [vmem:[%s8505_s0 + $0xa8] ss:$196 sps:$4 sm:$0xff]  }
 0x163   :  { %v4096_v6 = vadd.f32 %v5810_v9, %v8060_v15  ;;  %v8178_v18 = vadd.f32 %v5835_v11, %v4093_v5  ;;  %v5838_v19 = vadd.f32 %v5837_v16, %v5836_v14  ;;  %6178 = vmatpush3.bf16.msra.mxu0 %v6786_v12  ;;  %v6825_v10 = vld [vmem:[%s8505_s0 + $0xac] ss:$196 sps:$4 sm:$0xff]   ;;  %v6827_v12 = vld [vmem:[%s8504_s1 + $0xbc0] sm:$0xff]  }
 0x164   :  { %6179 = vmatprep.subr.bf16.mxu0 %v6792_v23  ;;  %v6828_v16 = vld [vmem:[%s8504_s1 + $0xb80] sm:$0xff]  }
 0x165   :  { %v8186_v15 = vadd.f32 %v5838_v19, %v4096_v6  ;;  %6206 = vmatpush3.bf16.msra.mxu1 %v6790_v21 }
 0x166   :  { %4679 = vmatmul.mubr.bf16.gmra.mrb[76].mxu0 %v6791_v22  ;;  %6207 = vmatprep.subr.bf16.mxu1 %v6797_v27  ;;  %v6830_v22 = vld [vmem:[%s8504_s1 + $0xb08] sm:$0xff]  }
 0x167   :  { %6180 = vmatpush3.bf16.msra.mxu0 %v6795_v25  ;;  %v6831_v25 = vld [vmem:[%s8504_s1 + $0xbc8] sm:$0xff]  }
 0x168   :  { %4728 = vmatmul.mubr.bf16.gmra.mrb[76].mxu1 %v6796_v26  ;;  %6181 = vmatprep.subr.bf16.mxu0 %v6799_v29  ;;  %v6834_v29 = vld [vmem:[%s8504_s1 + $0xb88] sm:$0xff]  }
 0x169   :  { %6208 = vmatpush3.bf16.msra.mxu1 %v6798_v28  ;;  %4817 = vmatprep.mubr.bf16.mxu1 %v6825_v10  ;;  %v6832_v28 = vld [vmem:[%s8505_s0 + $0x22c] ss:$196 sps:$4 sm:$0xff]   ;;  %v6864_v10 = vld [vmem:[%s8505_s0 + $0xb4] ss:$196 sps:$4 sm:$0xff]  }
 0x16a   :  { %6209 = vmatprep.subr.bf16.mxu1 %v6801_v31  ;;  %v6836_v31 = vld [vmem:[%s8504_s1 + $0xb50] sm:$0xff]  }
 0x16b   :  { %6182 = vmatpush3.bf16.msra.mxu0 %v6800_v30 }
 0x16c   :  { %6183 = vmatprep.subr.bf16.mxu0 %v6803_v33  ;;  %v6839_v33 = vld [vmem:[%s8504_s1 + $0xb10] sm:$0xff]  }
 0x16d   :  { %6210 = vmatpush3.bf16.msra.mxu1 %v6802_v32  ;;  %v6837_v32 = vld [vmem:[%s8505_s0 + $0x234] ss:$196 sps:$4 sm:$0xff]  }
 0x16e   :  { %6211 = vmatprep.subr.bf16.mxu1 %v6805_v35  ;;  %v6841_v35 = vld [vmem:[%s8504_s1 + $0xbd0] sm:$0xff]  }
 0x16f   :  { %6184 = vmatpush3.bf16.msra.mxu0 %v6804_v34  ;;  %v6840_v34 = vld [vmem:[%s8505_s0 + $0x230] ss:$196 sps:$4 sm:$0xff]  }
 0x170   :  { %6185 = vmatprep.subr.bf16.mxu0 %v6807_v38  ;;  %v6843_v38 = vld [vmem:[%s8504_s1 + $0xb58] sm:$0xff]  }
 0x171   :  { %6212 = vmatpush3.bf16.msra.mxu1 %v6806_v37  ;;  %v6842_v37 = vld [vmem:[%s8504_s1 + $0xb90] sm:$0xff]  }
 0x172   :  { %6213 = vmatprep.subr.bf16.mxu1 %v6809_v42  ;;  %v6846_v42 = vld [vmem:[%s8504_s1 + $0xb98] sm:$0xff]  }
 0x173   :  { %6186 = vmatpush3.bf16.msra.mxu0 %v6808_v39  ;;  %v6844_v39 = vld [vmem:[%s8504_s1 + $0xb18] sm:$0xff]  }
 0x174   :  { %6187 = vmatprep.subr.bf16.mxu0 %v6811_v41  ;;  %v6851_v41 = vld [vmem:[%s8504_s1 + $0xb68] sm:$0xff]  }
 0x175   :  { %v5855_v40 = vpop.f32.mrb[32].mxu0  ;;  %6214 = vmatpush3.bf16.msra.mxu1 %v6810_v43  ;;  %v6848_v43 = vld [vmem:[%s8504_s1 + $0xb20] sm:$0xff]  }
 0x176   :  { %v5856_v36 = vpop.f32.mrb[33].mxu0  ;;  %6215 = vmatprep.subr.bf16.mxu1 %v6813_v51  ;;  %v6854_v51 = vld [vmem:[%s8504_s1 + $0xba8] sm:$0xff]  }
 0x177   :  { %v5857_v44 = vadd.f32 %v5856_v36, %v5855_v40  ;;  %v5858_v46 = vpop.f32.mrb[34].mxu0  ;;  %v5883_v47 = vpop.f32.mrb[32].mxu1  ;;  %6188 = vmatpush3.bf16.msra.mxu0 %v6812_v49  ;;  %v6845_v40 = vld [vmem:[%s8504_s1 + $0xbd8] sm:$0xff]   ;;  %v6847_v36 = vld [vmem:[%s8504_s1 + $0xb60] sm:$0xff]  }
 0x178   :  { %v5859_v50 = vpop.f32.mrb[35].mxu0  ;;  %v5884_v54 = vpop.f32.mrb[33].mxu1 }
 0x179   :  { %v4183_v45 = vadd.f32 %v5857_v44, %v8133_v53  ;;  %v5860_v52 = vadd.f32 %v5859_v50, %v5858_v46  ;;  %v5885_v56 = vadd.f32 %v5884_v54, %v5883_v47  ;;  %v5886_v48 = vpop.f32.mrb[34].mxu1  ;;  %v6815_v53 = vld [vmem:[%s8504_s1 + $0xa78] sm:$0xff]   ;;  %6216 = vmatpush3.bf16.msra.mxu1 %v6814_v55  ;;  %v6849_v44 = vld [vmem:[%s8504_s1 + $0xbe0] sm:$0xff]   ;;  %v6852_v47 = vld [vmem:[%s8504_s1 + $0xb28] sm:$0xff]  }
 0x17a   :  { %v5887_v59 = vpop.f32.mrb[35].mxu1  ;;  %6189 = vmatprep.subr.bf16.mxu0 %v6815_v53  ;;  %6217 = vmatprep.subr.bf16.mxu1 %v6817_v63  ;;  %v6850_v46 = vld [vmem:[%s8504_s1 + $0xba0] sm:$0xff]   ;;  %v6855_v55 = vld [vmem:[%s8504_s1 + $0xb70] sm:$0xff]  }
 0x17b   :  { %v4186_v58 = vadd.f32 %v5860_v52, %v8144_v57  ;;  %v8265_v61 = vadd.f32 %v5885_v56, %v4183_v45  ;;  %v5888_v62 = vadd.f32 %v5887_v59, %v5886_v48  ;;  %6190 = vmatpush3.bf16.msra.mxu0 %v6816_v60  ;;  %v6820_v57 = vld [vmem:[%s8505_s0 + $0xa4] ss:$196 sps:$4 sm:$0xff]   ;;  %v6856_v48 = vld [vmem:[%s8504_s1 + $0xb30] sm:$0xff]  }
 0x17c   :  { %4768 = vmatprep.mubr.bf16.mxu0 %v6820_v57  ;;  %6231 = vmatprep.subr.bf16.mxu0 %v6822_v4  ;;  %v6853_v45 = vld [vmem:[%s8504_s1 + $0xbe8] sm:$0xff]   ;;  %v6857_v60 = vld [vmem:[%s8504_s1 + $0xbf0] sm:$0xff]   ;;  %v6860_v4 = vld [vmem:[%s8504_s1 + $0xb38] sm:$0xff]  }
 0x17d   :  { %v8276_v2 = vadd.f32 %v5888_v62, %v4186_v58  ;;  %v5861_v1 = vpop.f32.mrb[36].mxu0  ;;  %6218 = vmatpush3.bf16.msra.mxu1 %v6821_v3  ;;  %v6858_v63 = vld [vmem:[%s8504_s1 + $0xbb0] sm:$0xff]  }
 0x17e   :  { %v5862_v5 = vpop.f32.mrb[37].mxu0  ;;  %4769 = vmatmul.mubr.bf16.vlgmr.msra.gmra.mrb[80].mxu0 %v6818_v0  ;;  %6259 = vmatprep.subr.bf16.mxu1 %v6827_v12 }
 0x17f   :  { %v5863_v8 = vadd.f32 %v5862_v5, %v5861_v1  ;;  %v5864_v9 = vpop.f32.mrb[38].mxu0  ;;  %v5889_v14 = vpop.f32.mrb[36].mxu1  ;;  %6232 = vmatpush3.bf16.msra.mxu0 %v6826_v13  ;;  %4776 = vmatprep.mubr.bf16.mxu0 %v6832_v28  ;;  %v6865_v13 = vld [vmem:[%s8504_s1 + $0xbb8] sm:$0xff]  }
 0x180   :  { %v5865_v6 = vpop.f32.mrb[39].mxu0  ;;  %4818 = vmatmul.mubr.bf16.vlgmr.msra.gmra.mrb[80].mxu1 %v6823_v7  ;;  %v5890_v19 = vpop.f32.mrb[37].mxu1 }
 0x181   :  { %v4191_v11 = vadd.f32 %v5863_v8, %v8178_v18  ;;  %v5866_v17 = vadd.f32 %v5865_v6, %v5864_v9  ;;  %v6829_v18 = vld [vmem:[%s8504_s1 + $0xb48] sm:$0xff]   ;;  %v5891_v20 = vadd.f32 %v5890_v19, %v5889_v14  ;;  %v5892_v21 = vpop.f32.mrb[38].mxu1  ;;  %6260 = vmatpush3.bf16.msra.mxu1 %v6828_v16  ;;  %4825 = vmatprep.mubr.bf16.mxu1 %v6837_v32  ;;  %v6862_v8 = vld [vmem:[%s8505_s0 + $0xb0] ss:$196 sps:$4 sm:$0xff]   ;;  %v6866_v14 = vld [vmem:[%s8504_s1 + $0xc00] sm:$0xff]  }
 0x182   :  { %v5893_v24 = vpop.f32.mrb[39].mxu1  ;;  %6233 = vmatprep.subr.bf16.mxu0 %v6829_v18  ;;  %6261 = vmatprep.subr.bf16.mxu1 %v6831_v25  ;;  %v6867_v6 = vld [vmem:[%s8505_s0 + $0xb8] ss:$196 sps:$4 sm:$0xff]   ;;  %v6870_v19 = vld [vmem:[%s8504_s1 + $0xc08] sm:$0xff]   ;;  %v6874_v25 = vld [vmem:[%s8504_s1 + $0xc10] sm:$0xff]  }
 0x183   :  { %v4194_v23 = vadd.f32 %v5866_v17, %v8186_v15  ;;  %v8310_v26 = vadd.f32 %v5891_v20, %v4191_v11  ;;  %v5894_v27 = vadd.f32 %v5893_v24, %v5892_v21  ;;  %6234 = vmatpush3.bf16.msra.mxu0 %v6830_v22  ;;  %v6835_v15 = vld [vmem:[%s8505_s0 + $0x228] ss:$196 sps:$4 sm:$0xff]   ;;  %v6869_v16 = vld [vmem:[%s8505_s0 + $0xbc] ss:$196 sps:$4 sm:$0xff]  }
 0x184   :  { %6235 = vmatprep.subr.bf16.mxu0 %v6836_v31  ;;  %v6871_v21 = vld [vmem:[%s8505_s0 + $0x23c] ss:$196 sps:$4 sm:$0xff]  }
 0x185   :  { %v8321_v30 = vadd.f32 %v5894_v27, %v4194_v23  ;;  %6262 = vmatpush3.bf16.msra.mxu1 %v6834_v29  ;;  %v6873_v22 = vld [vmem:[%s8505_s0 + $0x238] ss:$196 sps:$4 sm:$0xff]   ;;  %v6875_v29 = vld [vmem:[%s8505_s0 + $0x244] ss:$196 sps:$4 sm:$0xff]  }
 0x186   :  { %4777 = vmatmul.mubr.bf16.gmra.mrb[84].mxu0 %v6835_v15  ;;  %6263 = vmatprep.subr.bf16.mxu1 %v6841_v35  ;;  %v6878_v35 = vld [vmem:[%s8504_s1 + $0xc18] sm:$0xff]  }
 0x187   :  { %6236 = vmatpush3.bf16.msra.mxu0 %v6839_v33  ;;  %4866 = vmatprep.mubr.bf16.mxu0 %v6864_v10 }
 0x188   :  { %4826 = vmatmul.mubr.bf16.gmra.mrb[84].mxu1 %v6840_v34  ;;  %6237 = vmatprep.subr.bf16.mxu0 %v6843_v38 }
 0x189   :  { %6264 = vmatpush3.bf16.msra.mxu1 %v6842_v37  ;;  %4915 = vmatprep.mubr.bf16.mxu1 %v6869_v16 }
 0x18a   :  { %6265 = vmatprep.subr.bf16.mxu1 %v6845_v40  ;;  %v6880_v40 = vld [vmem:[%s8504_s1 + $0xc28] sm:$0xff]  }
 0x18b   :  { %6238 = vmatpush3.bf16.msra.mxu0 %v6844_v39  ;;  %v6879_v39 = vld [vmem:[%s8504_s1 + $0xc20] sm:$0xff]  }
 0x18c   :  { %6239 = vmatprep.subr.bf16.mxu0 %v6847_v36  ;;  %v6882_v36 = vld [vmem:[%s8504_s1 + $0xc38] sm:$0xff]  }
 0x18d   :  { %6266 = vmatpush3.bf16.msra.mxu1 %v6846_v42  ;;  %v6881_v42 = vld [vmem:[%s8504_s1 + $0xc30] sm:$0xff]  }
 0x18e   :  { %6267 = vmatprep.subr.bf16.mxu1 %v6849_v44 }
 0x18f   :  { %6240 = vmatpush3.bf16.msra.mxu0 %v6848_v43 }
 0x190   :  { %6241 = vmatprep.subr.bf16.mxu0 %v6851_v41 }
 0x191   :  { %6268 = vmatpush3.bf16.msra.mxu1 %v6850_v46 }
 0x192   :  { %6269 = vmatprep.subr.bf16.mxu1 %v6853_v45 }
 0x193   :  { %6242 = vmatpush3.bf16.msra.mxu0 %v6852_v47 }
 0x194   :  { %6243 = vmatprep.subr.bf16.mxu0 %v6855_v55 }
 0x195   :  { %v5911_v49 = vpop.f32.mrb[40].mxu0  ;;  %6270 = vmatpush3.bf16.msra.mxu1 %v6854_v51 }
 0x196   :  { %v5912_v50 = vpop.f32.mrb[41].mxu0  ;;  %6271 = vmatprep.subr.bf16.mxu1 %v6857_v60 }
 0x197   :  { %v5913_v52 = vadd.f32 %v5912_v50, %v5911_v49  ;;  %v5914_v54 = vpop.f32.mrb[42].mxu0  ;;  %v5939_v58 = vpop.f32.mrb[40].mxu1  ;;  %6244 = vmatpush3.bf16.msra.mxu0 %v6856_v48 }
 0x198   :  { %v5915_v56 = vpop.f32.mrb[43].mxu0  ;;  %v5940_v62 = vpop.f32.mrb[41].mxu1 }
 0x199   :  { %v4281_v53 = vadd.f32 %v5913_v52, %v8265_v61  ;;  %v5916_v59 = vadd.f32 %v5915_v56, %v5914_v54  ;;  %v5941_v57 = vadd.f32 %v5940_v62, %v5939_v58  ;;  %v5942_v3 = vpop.f32.mrb[42].mxu1  ;;  %v6859_v61 = vld [vmem:[%s8504_s1 + $0xb78] sm:$0xff]   ;;  %6272 = vmatpush3.bf16.msra.mxu1 %v6858_v63  ;;  %v6884_v52 = vld [vmem:[%s8505_s0 + $0x248] ss:$196 sps:$4 sm:$0xff]  }
 0x19a   :  { %v5943_v1 = vpop.f32.mrb[43].mxu1  ;;  %6245 = vmatprep.subr.bf16.mxu0 %v6859_v61 }
 0x19b   :  { %v4284_v0 = vadd.f32 %v5916_v59, %v8276_v2  ;;  %v8397_v5 = vadd.f32 %v5941_v57, %v4281_v53  ;;  %v5944_v7 = vadd.f32 %v5943_v1, %v5942_v3  ;;  %v6861_v2 = vld [vmem:[%s8504_s1 + $0xbf8] sm:$0xff]   ;;  %6246 = vmatpush3.bf16.msra.mxu0 %v6860_v4 }
 0x19c   :  { %6273 = vmatprep.subr.bf16.mxu1 %v6861_v2  ;;  %6307 = vmatprep.subr.bf16.mxu0 %v6866_v14 }
 0x19d   :  { %v8405_v9 = vadd.f32 %v5944_v7, %v4284_v0  ;;  %v5917_v11 = vpop.f32.mrb[44].mxu0  ;;  %6274 = vmatpush3.bf16.msra.mxu1 %v6865_v13 }
 0x19e   :  { %v5918_v12 = vpop.f32.mrb[45].mxu0  ;;  %4867 = vmatmul.mubr.bf16.vlgmr.msra.gmra.mrb[88].mxu0 %v6862_v8 }
 0x19f   :  { %v5919_v17 = vadd.f32 %v5918_v12, %v5917_v11  ;;  %v5920_v18 = vpop.f32.mrb[46].mxu0  ;;  %v5945_v20 = vpop.f32.mrb[44].mxu1  ;;  %6308 = vmatpush3.bf16.msra.mxu0 %v6866_v14  ;;  %4874 = vmatprep.mubr.bf16.mxu0 %v6871_v21 }
 0x1a0   :  { %v5921_v24 = vpop.f32.mrb[47].mxu0  ;;  %4916 = vmatmul.mubr.bf16.vlgmr.msra.gmra.mrb[88].mxu1 %v6867_v6  ;;  %6309 = vmatprep.subr.bf16.mxu0 %v6870_v19  ;;  %v5946_v28 = vpop.f32.mrb[45].mxu1 }
 0x1a1   :  { %v4289_v23 = vadd.f32 %v5919_v17, %v8310_v26  ;;  %v5922_v27 = vadd.f32 %v5921_v24, %v5920_v18  ;;  %v5947_v15 = vadd.f32 %v5946_v28, %v5945_v20  ;;  %v5948_v31 = vpop.f32.mrb[46].mxu1  ;;  %v6877_v26 = vld [vmem:[%s8505_s0 + $0x240] ss:$196 sps:$4 sm:$0xff]   ;;  %4923 = vmatprep.mubr.bf16.mxu1 %v6875_v29 }
 0x1a2   :  { %v5949_v34 = vpop.f32.mrb[47].mxu1 }
 0x1a3   :  { %v4292_v32 = vadd.f32 %v5922_v27, %v8321_v30  ;;  %6310 = vmatpush3.bf16.msra.mxu0 %v6870_v19  ;;  %v4338_v33 = vadd.f32 %v5947_v15, %v4289_v23  ;;  %v5950_v37 = vadd.f32 %v5949_v34, %v5948_v31  ;;  %v6883_v30 = vld [vmem:[%s8505_s0 + $0xc0] ss:$196 sps:$4 sm:$0xff]  }
 0x1a4   :  { %6311 = vmatprep.subr.bf16.mxu0 %v6874_v25 }
 0x1a5   :  { %v4341_v38 = vadd.f32 %v5950_v37, %v4292_v32 }
 0x1a6   :  { %4875 = vmatmul.mubr.bf16.gmra.mrb[92].mxu0 %v6873_v22 }
 0x1a7   :  { %6312 = vmatpush3.bf16.msra.mxu0 %v6874_v25  ;;  %6323 = vmatprep.mubr.bf16.mxu0 %v6883_v30 }
 0x1a8   :  { %4924 = vmatmul.mubr.bf16.gmra.mrb[92].mxu1 %v6877_v26  ;;  %6313 = vmatprep.subr.bf16.mxu0 %v6878_v35 }
 0x1ab   :  { %6314 = vmatpush3.bf16.msra.mxu0 %v6878_v35 }
 0x1ac   :  { %6315 = vmatprep.subr.bf16.mxu0 %v6879_v39 }
 0x1af   :  { %6316 = vmatpush3.bf16.msra.mxu0 %v6879_v39 }
 0x1b0   :  { %6317 = vmatprep.subr.bf16.mxu0 %v6880_v40 }
 0x1b3   :  { %6318 = vmatpush3.bf16.msra.mxu0 %v6880_v40 }
 0x1b4   :  { %6319 = vmatprep.subr.bf16.mxu0 %v6881_v42 }
 0x1b5   :  { %v5967_v43 = vpop.f32.mrb[48].mxu0 }
 0x1b6   :  { %v5968_v44 = vpop.f32.mrb[49].mxu0 }
 0x1b7   :  { %6320 = vmatpush3.bf16.msra.mxu0 %v6881_v42  ;;  %v5969_v46 = vadd.f32 %v5968_v44, %v5967_v43  ;;  %v5970_v41 = vpop.f32.mrb[50].mxu0  ;;  %v5995_v47 = vpop.f32.mrb[48].mxu1  ;;  %v6885_v44 = vld [vmem:[%s8507_s3] sm:$0xff]  }
 0x1b8   :  { %6321 = vmatprep.subr.bf16.mxu0 %v6882_v36  ;;  %v5971_v49 = vpop.f32.mrb[51].mxu0  ;;  %v5996_v51 = vpop.f32.mrb[49].mxu1  ;;  %6327 = vmatprep.subr.bf16.mxu1 %v6885_v44 }
 0x1b9   :  { %v4379_v45 = vadd.f32 %v5969_v46, %v8397_v5  ;;  %v5972_v50 = vadd.f32 %v5971_v49, %v5970_v41  ;;  %v5997_v54 = vadd.f32 %v5996_v51, %v5995_v47  ;;  %v5998_v55 = vpop.f32.mrb[50].mxu1  ;;  %6328 = vmatpush3.bf16.msra.mxu1 %v6885_v44  ;;  %v6886_v46 = vld [vmem:[%s8507_s3 + $0x8] sm:$0xff]   ;;  %v6887_v41 = vld [vmem:[%s8507_s3 + $0x10] sm:$0xff]   ;;  %v6888_v51 = vld [vmem:[%s8507_s3 + $0x18] sm:$0xff]  }
 0x1ba   :  { %v5999_v48 = vpop.f32.mrb[51].mxu1  ;;  %6329 = vmatprep.subr.bf16.mxu1 %v6886_v46 }
 0x1bb   :  { %6322 = vmatpush3.bf16.msra.mxu0 %v6882_v36  ;;  %v4382_v56 = vadd.f32 %v5972_v50, %v8405_v9  ;;  %v4428_v53 = vadd.f32 %v5997_v54, %v4379_v45  ;;  %v6000_v58 = vadd.f32 %v5999_v48, %v5998_v55 }
 0x1bd   :  { %v4431_v59 = vadd.f32 %v6000_v58, %v4382_v56  ;;  %v5973_v60 = vpop.f32.mrb[52].mxu0  ;;  %6330 = vmatpush3.bf16.msra.mxu1 %v6886_v46 }
 0x1be   :  { %6324 = vmatmul.mubr.bf16.vlgmr.msra.gmra.mrb[96].mxu0 %v6884_v52  ;;  %v5974_v62 = vpop.f32.mrb[53].mxu0  ;;  %6331 = vmatprep.subr.bf16.mxu1 %v6887_v41 }
 0x1bf   :  { %v5975_v63 = vadd.f32 %v5974_v62, %v5973_v60  ;;  %v5976_v0 = vpop.f32.mrb[54].mxu0  ;;  %v6001_v61 = vpop.f32.mrb[52].mxu1  ;;  %v6889_v62 = vld [vmem:[%s8507_s3 + $0x20] sm:$0xff]  }
 0x1c0   :  { %v5977_v57 = vpop.f32.mrb[55].mxu0  ;;  %v6002_v4 = vpop.f32.mrb[53].mxu1 }
 0x1c1   :  { %v4387_v3 = vadd.f32 %v5975_v63, %v4338_v33  ;;  %v5978_v1 = vadd.f32 %v5977_v57, %v5976_v0  ;;  %v6003_v7 = vadd.f32 %v6002_v4, %v6001_v61  ;;  %v6004_v2 = vpop.f32.mrb[54].mxu1  ;;  %6332 = vmatpush3.bf16.msra.mxu1 %v6887_v41  ;;  %v6890_v61 = vld [vmem:[%s8507_s3 + $0x28] sm:$0xff]  }
 0x1c2   :  { %v6005_v8 = vpop.f32.mrb[55].mxu1  ;;  %6333 = vmatprep.subr.bf16.mxu1 %v6888_v51 }
 0x1c3   :  { %v4390_v5 = vadd.f32 %v5978_v1, %v4341_v38  ;;  %v4436_v10 = vadd.f32 %v6003_v7, %v4387_v3  ;;  %v6006_v9 = vadd.f32 %v6005_v8, %v6004_v2 }
 0x1c5   :  { %v4439_v13 = vadd.f32 %v6006_v9, %v4390_v5  ;;  %6334 = vmatpush3.bf16.msra.mxu1 %v6888_v51 }
 0x1c6   :  { %6335 = vmatprep.subr.bf16.mxu1 %v6889_v62 }
 0x1c9   :  { %6336 = vmatpush3.bf16.msra.mxu1 %v6889_v62 }
 0x1ca   :  { %6337 = vmatprep.subr.bf16.mxu1 %v6890_v61 }
 0x1cd   :  { %6338 = vmatpush3.bf16.msra.mxu1 %v6890_v61 }
 0x1d7   :  { %v6023_v11 = vpop.f32.mrb[56].mxu0 }
 0x1d8   :  { %v6024_v14 = vpop.f32.mrb[57].mxu0 }
 0x1d9   :  { %v6025_v12 = vadd.f32 %v6024_v14, %v6023_v11  ;;  %v6026_v6 = vpop.f32.mrb[58].mxu0 }
 0x1da   :  { %v6027_v16 = vpop.f32.mrb[59].mxu0  ;;  %v6051_v19 = vpop.f32.mrb[56].mxu1 }
 0x1db   :  { %v4477_v17 = vadd.f32 %v6025_v12, %v4428_v53  ;;  %v6028_v18 = vadd.f32 %v6027_v16, %v6026_v6  ;;  %v6052_v20 = vpop.f32.mrb[57].mxu1 }
 0x1dc   :  { %v6053_v22 = vadd.f32 %v6052_v20, %v6051_v19  ;;  %v6054_v23 = vpop.f32.mrb[58].mxu1 }
 0x1dd   :  { %v4480_v21 = vadd.f32 %v6028_v18, %v4431_v59  ;;  %v6055_v24 = vpop.f32.mrb[59].mxu1  ;;  %v6892_v18 = vld [vmem:[%s8507_s3 + $0x38] sm:$0xff]  }
 0x1de   :  { %v4526_v25 = vadd.f32 %v6053_v22, %v4477_v17  ;;  %v6056_v27 = vadd.f32 %v6055_v24, %v6054_v23  ;;  %v6891_v17 = vld [vmem:[%s8507_s3 + $0x30] sm:$0xff]  }
 0x1df   :  { %v6029_v29 = vpop.f32.mrb[60].mxu0  ;;  %6339 = vmatprep.subr.bf16.mxu1 %v6891_v17 }
 0x1e0   :  { %v4529_v28 = vadd.f32 %v6056_v27, %v4480_v21  ;;  %v6030_v15 = vpop.f32.mrb[61].mxu0  ;;  %6340 = vmatpush3.bf16.msra.mxu1 %v6891_v17 }
 0x1e1   :  { %v6031_v31 = vadd.f32 %v6030_v15, %v6029_v29  ;;  %v6032_v26 = vpop.f32.mrb[62].mxu0  ;;  %6341 = vmatprep.subr.bf16.mxu1 %v6892_v18 }
 0x1e2   :  { %v6057_v32 = vpop.f32.mrb[60].mxu1  ;;  %v6033_v33 = vpop.f32.mrb[63].mxu0 }
 0x1e3   :  { %v4485_v34 = vadd.f32 %v6031_v31, %v4436_v10  ;;  %v6034_v35 = vadd.f32 %v6033_v33, %v6032_v26  ;;  %v6058_v37 = vpop.f32.mrb[61].mxu1 }
 0x1e4   :  { %v6059_v38 = vadd.f32 %v6058_v37, %v6057_v32  ;;  %v6060_v39 = vpop.f32.mrb[62].mxu1  ;;  %6342 = vmatpush3.bf16.msra.mxu1 %v6892_v18 }
 0x1e5   :  { %v4488_v30 = vadd.f32 %v6034_v35, %v4439_v13  ;;  %v6061_v40 = vpop.f32.mrb[63].mxu1 }
 0x1e6   :  { %v4534_v42 = vadd.f32 %v6059_v38, %v4485_v34  ;;  %v6062_v36 = vadd.f32 %v6061_v40, %v6060_v39 }
 0x1e8   :  { %v4537_v43 = vadd.f32 %v6062_v36, %v4488_v30 }
 0x211   :  { %v6079_v47 = vpop.f32.mrb[64].mxu0 }
 0x212   :  { %v6080_v49 = vpop.f32.mrb[65].mxu0 }
 0x213   :  { %v6081_v45 = vadd.f32 %v6080_v49, %v6079_v47  ;;  %v6082_v50 = vpop.f32.mrb[66].mxu0  ;;  %v6107_v52 = vpop.f32.mrb[64].mxu1 }
 0x214   :  { %v6083_v54 = vpop.f32.mrb[67].mxu0  ;;  %v6108_v48 = vpop.f32.mrb[65].mxu1 }
 0x215   :  { %v4575_v55 = vadd.f32 %v6081_v45, %v4526_v25  ;;  %v6084_v56 = vadd.f32 %v6083_v54, %v6082_v50  ;;  %v6109_v53 = vadd.f32 %v6108_v48, %v6107_v52  ;;  %v6110_v58 = vpop.f32.mrb[66].mxu1 }
 0x216   :  { %v6111_v60 = vpop.f32.mrb[67].mxu1 }
 0x217   :  { %v4578_v59 = vadd.f32 %v6084_v56, %v4529_v28  ;;  %v4624_v63 = vadd.f32 %v6109_v53, %v4575_v55  ;;  %v6112_v0 = vadd.f32 %v6111_v60, %v6110_v58 }
 0x219   :  { %v4627_v57 = vadd.f32 %v6112_v0, %v4578_v59  ;;  %v6085_v3 = vpop.f32.mrb[68].mxu0 }
 0x21a   :  { %v6086_v1 = vpop.f32.mrb[69].mxu0 }
 0x21b   :  { %v6087_v4 = vadd.f32 %v6086_v1, %v6085_v3  ;;  %v6088_v5 = vpop.f32.mrb[70].mxu0  ;;  %v6113_v8 = vpop.f32.mrb[68].mxu1 }
 0x21c   :  { %v6089_v7 = vpop.f32.mrb[71].mxu0  ;;  %v6114_v9 = vpop.f32.mrb[69].mxu1 }
 0x21d   :  { %v4583_v2 = vadd.f32 %v6087_v4, %v4534_v42  ;;  %v6090_v10 = vadd.f32 %v6089_v7, %v6088_v5  ;;  %v6115_v11 = vadd.f32 %v6114_v9, %v6113_v8  ;;  %v6116_v14 = vpop.f32.mrb[70].mxu1 }
 0x21e   :  { %v6117_v12 = vpop.f32.mrb[71].mxu1 }
 0x21f   :  { %v4586_v13 = vadd.f32 %v6090_v10, %v4537_v43  ;;  %v4632_v6 = vadd.f32 %v6115_v11, %v4583_v2  ;;  %v6118_v16 = vadd.f32 %v6117_v12, %v6116_v14 }
 0x221   :  { %v4635_v19 = vadd.f32 %v6118_v16, %v4586_v13 }
 0x231   :  { %v6135_v20 = vpop.f32.mrb[72].mxu0 }
 0x232   :  { %v6136_v21 = vpop.f32.mrb[73].mxu0 }
 0x233   :  { %v6137_v22 = vadd.f32 %v6136_v21, %v6135_v20  ;;  %v6138_v23 = vpop.f32.mrb[74].mxu0  ;;  %v6163_v24 = vpop.f32.mrb[72].mxu1 }
 0x234   :  { %v6139_v25 = vpop.f32.mrb[75].mxu0  ;;  %v6164_v29 = vpop.f32.mrb[73].mxu1 }
 0x235   :  { %v4673_v27 = vadd.f32 %v6137_v22, %v4624_v63  ;;  %v6140_v28 = vadd.f32 %v6139_v25, %v6138_v23  ;;  %v6165_v15 = vadd.f32 %v6164_v29, %v6163_v24  ;;  %v6166_v31 = vpop.f32.mrb[74].mxu1 }
 0x236   :  { %v6167_v32 = vpop.f32.mrb[75].mxu1 }
 0x237   :  { %v4676_v26 = vadd.f32 %v6140_v28, %v4627_v57  ;;  %v4722_v33 = vadd.f32 %v6165_v15, %v4673_v27  ;;  %v6168_v34 = vadd.f32 %v6167_v32, %v6166_v31 }
 0x239   :  { %v4725_v35 = vadd.f32 %v6168_v34, %v4676_v26  ;;  %v6141_v37 = vpop.f32.mrb[76].mxu0 }
 0x23a   :  { %v6142_v38 = vpop.f32.mrb[77].mxu0 }
 0x23b   :  { %v6143_v39 = vadd.f32 %v6142_v38, %v6141_v37  ;;  %v6144_v30 = vpop.f32.mrb[78].mxu0  ;;  %v6169_v40 = vpop.f32.mrb[76].mxu1 }
 0x23c   :  { %v6145_v42 = vpop.f32.mrb[79].mxu0  ;;  %v6170_v44 = vpop.f32.mrb[77].mxu1 }
 0x23d   :  { %v4681_v36 = vadd.f32 %v6143_v39, %v4632_v6  ;;  %v6146_v43 = vadd.f32 %v6145_v42, %v6144_v30  ;;  %v6171_v46 = vadd.f32 %v6170_v44, %v6169_v40  ;;  %v6172_v41 = vpop.f32.mrb[78].mxu1 }
 0x23e   :  { %v6173_v49 = vpop.f32.mrb[79].mxu1 }
 0x23f   :  { %v4684_v47 = vadd.f32 %v6146_v43, %v4635_v19  ;;  %v4730_v45 = vadd.f32 %v6171_v46, %v4681_v36  ;;  %v6174_v50 = vadd.f32 %v6173_v49, %v6172_v41 }
 0x241   :  { %v4733_v51 = vadd.f32 %v6174_v50, %v4684_v47 }
 0x251   :  { %v6191_v52 = vpop.f32.mrb[80].mxu0 }
 0x252   :  { %v6192_v54 = vpop.f32.mrb[81].mxu0 }
 0x253   :  { %v6193_v55 = vadd.f32 %v6192_v54, %v6191_v52  ;;  %v6194_v56 = vpop.f32.mrb[82].mxu0  ;;  %v6219_v58 = vpop.f32.mrb[80].mxu1 }
 0x254   :  { %v6195_v48 = vpop.f32.mrb[83].mxu0  ;;  %v6220_v60 = vpop.f32.mrb[81].mxu1 }
 0x255   :  { %v4771_v53 = vadd.f32 %v6193_v55, %v4722_v33  ;;  %v6196_v59 = vadd.f32 %v6195_v48, %v6194_v56  ;;  %v6221_v63 = vadd.f32 %v6220_v60, %v6219_v58  ;;  %v6222_v0 = vpop.f32.mrb[82].mxu1 }
 0x256   :  { %v6223_v57 = vpop.f32.mrb[83].mxu1 }
 0x257   :  { %v4774_v62 = vadd.f32 %v6196_v59, %v4725_v35  ;;  %v4820_v3 = vadd.f32 %v6221_v63, %v4771_v53  ;;  %v6224_v61 = vadd.f32 %v6223_v57, %v6222_v0 }
 0x259   :  { %v4823_v1 = vadd.f32 %v6224_v61, %v4774_v62  ;;  %v6197_v4 = vpop.f32.mrb[84].mxu0  ;;  %v5606_v61 = vld [vmem:[%s8508_s4] ss:$0 sm:$0xff] }
 0x25a   :  { %v6198_v5 = vpop.f32.mrb[85].mxu0 }
 0x25b   :  { %v6199_v7 = vadd.f32 %v6198_v5, %v6197_v4  ;;  %v6200_v2 = vpop.f32.mrb[86].mxu0  ;;  %v6225_v8 = vpop.f32.mrb[84].mxu1 }
 0x25c   :  { %v6201_v10 = vpop.f32.mrb[87].mxu0  ;;  %v6226_v11 = vpop.f32.mrb[85].mxu1 }
 0x25d   :  { %v4779_v9 = vadd.f32 %v6199_v7, %v4730_v45  ;;  %v6202_v13 = vadd.f32 %v6201_v10, %v6200_v2  ;;  %v6227_v14 = vadd.f32 %v6226_v11, %v6225_v8  ;;  %v6228_v12 = vpop.f32.mrb[86].mxu1 }
 0x25e   :  { %v6229_v16 = vpop.f32.mrb[87].mxu1 }
 0x25f   :  { %v4782_v6 = vadd.f32 %v6202_v13, %v4733_v51  ;;  %v4828_v17 = vadd.f32 %v6227_v14, %v4779_v9  ;;  %v6230_v19 = vadd.f32 %v6229_v16, %v6228_v12 }
 0x261   :  { %v4831_v18 = vadd.f32 %v6230_v19, %v4782_v6 }
 0x271   :  { %v6247_v20 = vpop.f32.mrb[88].mxu0 }
 0x272   :  { %v6248_v21 = vpop.f32.mrb[89].mxu0 }
 0x273   :  { %v6249_v22 = vadd.f32 %v6248_v21, %v6247_v20  ;;  %v6250_v23 = vpop.f32.mrb[90].mxu0  ;;  %v6275_v24 = vpop.f32.mrb[88].mxu1 }
 0x274   :  { %v6251_v25 = vpop.f32.mrb[91].mxu0  ;;  %v6276_v29 = vpop.f32.mrb[89].mxu1 }
 0x275   :  { %v4869_v27 = vadd.f32 %v6249_v22, %v4820_v3  ;;  %v6252_v28 = vadd.f32 %v6251_v25, %v6250_v23  ;;  %v6277_v15 = vadd.f32 %v6276_v29, %v6275_v24  ;;  %v6278_v31 = vpop.f32.mrb[90].mxu1 }
 0x276   :  { %v6279_v32 = vpop.f32.mrb[91].mxu1 }
 0x277   :  { %v4872_v26 = vadd.f32 %v6252_v28, %v4823_v1  ;;  %v6280_v33 = vadd.f32 %v6279_v32, %v6278_v31  ;;  %v4918_v34 = vadd.f32 %v6277_v15, %v4869_v27 }
 0x279   :  { %v6253_v35 = vpop.f32.mrb[92].mxu0  ;;  %v4921_v38 = vadd.f32 %v6280_v33, %v4872_v26 }
 0x27a   :  { %v6254_v37 = vpop.f32.mrb[93].mxu0 }
 0x27b   :  { %v6255_v39 = vadd.f32 %v6254_v37, %v6253_v35  ;;  %v6256_v30 = vpop.f32.mrb[94].mxu0  ;;  %v6281_v40 = vpop.f32.mrb[92].mxu1 }
 0x27c   :  { %v6257_v42 = vpop.f32.mrb[95].mxu0  ;;  %v6282_v44 = vpop.f32.mrb[93].mxu1 }
 0x27d   :  { %v4877_v36 = vadd.f32 %v6255_v39, %v4828_v17  ;;  %v6258_v43 = vadd.f32 %v6257_v42, %v6256_v30  ;;  %v6283_v46 = vadd.f32 %v6282_v44, %v6281_v40  ;;  %v6284_v41 = vpop.f32.mrb[94].mxu1 }
 0x27e   :  { %v6285_v49 = vpop.f32.mrb[95].mxu1 }
 0x27f   :  { %v4880_v47 = vadd.f32 %v6258_v43, %v4831_v18  ;;  %v6286_v45 = vadd.f32 %v6285_v49, %v6284_v41  ;;  %v4926_v50 = vadd.f32 %v6283_v46, %v4877_v36 }
 0x281   :  { %v4929_v51 = vadd.f32 %v6286_v45, %v4880_v47 }
 0x291   :  { %v6325_v52 = vpop.f32.mrb[96].mxu0 }
 0x292   :  { %v4975_v54 = vadd.f32 %v6325_v52, %v4926_v50  ;;  %v4966_v55 = vpop.f32.mrb[97].mxu0 }
 0x293   :  { %v4967_v56 = vadd.f32 %v4966_v55, %v4918_v34  ;;  %v6326_v48 = vpop.f32.mrb[98].mxu0 }
 0x294   :  { %v4978_v53 = vadd.f32 %v6326_v48, %v4929_v51  ;;  %v4969_v58 = vpop.f32.mrb[99].mxu0  ;;  %v4983_v60 = vmax.f32 %v4975_v54, 0.0 }
 0x295   :  { %v4970_v59 = vadd.f32 %v4969_v58, %v4921_v38  ;;  %v4981_v63 = vmax.f32 %v4967_v56, 0.0 }
 0x296   :  { %v4984_v62 = vmax.f32 %v4978_v53, 0.0 }
 0x297   :  { %v4982_v0 = vmax.f32 %v4970_v59, 0.0 }
 0x298   :  { %v4986_v57 = vpack.c.bf16 %v4984_v62, %v4983_v60 }
 0x299   :  { %v4985_v3 = vpack.c.bf16 %v4982_v0, %v4981_v63 }
 0x29b   :  { %6343 = vmatprep.mubr.bf16.mxu1 %v4985_v3 }
 0x29c   :  { %6344 = vmatmul.mubr.bf16.vlgmr.msra.gmra.mrb[96].mxu1 %v4986_v57 }
 0x36f   :  { %v6345_v1 = vpop.f32.mrb[96].mxu1 }
 0x370   :  { %v5101_v4 = vadd.f32 %v6345_v1, %v5606_v61  ;;  %v5092_v5 = vpop.f32.mrb[97].mxu1 }
 0x371   :  { %v5093_v7 = vadd.f32 %v5606_v61, %v5092_v5  ;;  %v6346_v2 = vpop.f32.mrb[98].mxu1 }
 0x372   :  { %5109 = vst [vmem:[%s8509_s5 + $0x10] sm:$0xff] %v5101_v4  ;;  %v5104_v8 = vadd.f32 %v6346_v2, %v5606_v61  ;;  %v5095_v10 = vpop.f32.mrb[99].mxu1 }
 0x373   :  { %5107 = vst [vmem:[%s8509_s5] sm:$0xff] %v5093_v7  ;;  %v5096_v9 = vadd.f32 %v5606_v61, %v5095_v10 }
 0x374   :  { %5110 = vst [vmem:[%s8509_s5 + $0x18] sm:$0xff] %v5104_v8 }
 0x375   :  { %5108 = vst [vmem:[%s8509_s5 + $0x8] sm:$0xff] %v5096_v9 }

</bundles_post_ra>
